<compile_context>
chip_gen: v6e
topology: v6e:2x2x1
jax: 0.10.0
libtpu: 0.0.40
codegen_flags: <defaults>
</compile_context>

<pallas_src>
import functools

import jax
import jax.numpy as jnp
import numpy as np
from jax.experimental import pallas as pl
from jax.experimental.pallas import tpu as pltpu

VMEM_LIMIT_BYTES = 48 * 1024 * 1024   # above the 16/32 MiB default scoped limit, below v7x's 64 MiB


def _round_up(n, m):
    return ((n + m - 1) // m) * m


def _largest_divisor_leq(n, cap):
    cap = max(1, min(n, cap))
    for d in range(cap, 0, -1):
        if n % d == 0:
            return d
    return 1


# --------------------------------------------------------------------------- kernels

def conv3x3_kernel(*refs, TH, W, H, fuse_bn_relu):
    """3x3 'same' conv of one halo'd row tile as 9 shifted MXU matmuls.

    refs (fuse_bn_relu=True ):  x, w, scale, shift | y, stats | xa, acc
    refs (fuse_bn_relu=False):  x, w               | y, stats | xa, acc

      x_ref    : (TH+2, W+2, Cin)  spatially zero-padded halo'd row tile
      w_ref    : (9, Cin, Cout)    flattened HWIO 3x3 weights (Cout lane-padded)
      scale/shift : (1, Cout)      previous layer's folded BN affine (fused path)
      y_ref    : (TH, W, Cout)     pre-BN conv output tile
      stats_ref: (2, Cout)         per-tile partial [sum, sum_sq] (reduced outside)
      xa_ref   : VMEM scratch      activation tile in the matmul compute dtype
      acc_ref  : VMEM scratch      (TH*W, Cout) f32 accumulator
    """
    if fuse_bn_relu:
        x_ref, w_ref, scale_ref, shift_ref, y_ref, stats_ref, xa_ref, acc_ref = refs
    else:
        x_ref, w_ref, y_ref, stats_ref, xa_ref, acc_ref = refs

    cdtype = xa_ref.dtype

    if fuse_bn_relu:
        # BN(batch-stats affine) + ReLU of the *previous* conv, fused into this kernel's
        # input path so the activated tensor never round-trips HBM.
        a = jnp.maximum(x_ref[...] * scale_ref[0] + shift_ref[0], 0.0)
        # The spatial zero-padding ring must stay exactly 0 (relu(0*s+b) != 0 in general).
        j = pl.program_id(1)
        row = jax.lax.broadcasted_iota(jnp.int32, (TH + 2, W + 2, 1), 0) + j * TH
        col = jax.lax.broadcasted_iota(jnp.int32, (TH + 2, W + 2, 1), 1)
        valid = (row >= 1) & (row <= H) & (col >= 1) & (col <= W)
        xa_ref[...] = jnp.where(valid, a, 0.0).astype(cdtype)
    else:
        xa_ref[...] = x_ref[...].astype(cdtype)

    cin = xa_ref.shape[-1]
    cout = acc_ref.shape[-1]

    acc_ref[...] = jnp.zeros_like(acc_ref)
    for dy in range(3):
        for dx in range(3):
            win = xa_ref[dy:dy + TH, dx:dx + W, :].reshape(TH * W, cin)
            acc_ref[...] += jnp.dot(win, w_ref[dy * 3 + dx],
                                    preferred_element_type=jnp.float32)

    acc = acc_ref[...]
    y_ref[...] = acc.reshape(TH, W, cout)
    # Per-tile partial BatchNorm statistics (no shared accumulator -> grid stays parallel).
    stats_ref[0:1, :] = jnp.sum(acc, axis=0, keepdims=True)
    stats_ref[1:2, :] = jnp.sum(acc * acc, axis=0, keepdims=True)


def bn_relu_pool_kernel(y_ref, scale_ref, shift_ref, x_ref, p_ref):
    """Fused BN-affine + ReLU + 2x2 maxpool on one row-pair tile.

    y_ref/x_ref: (TPH, 2, W/2, 2*C)  conv2 output viewed as (row-pair, 2, col-pair, 2*C)
                 where the W-pair factor is merged into the lane dim (free reshape).
    scale/shift: (1, 2*C)  BN affine tiled twice to match the merged lane dim.
    p_ref      : (TPH, W/2, C) pooled output.
    """
    a = jnp.maximum(y_ref[...] * scale_ref[0] + shift_ref[0], 0.0)
    x_ref[...] = a                                          # x_out, written once
    m = jnp.maximum(a[:, 0], a[:, 1])                       # H-pair max (pure VPU)
    c = p_ref.shape[-1]
    p_ref[...] = jnp.maximum(m[..., :c], m[..., c:])        # W-pair max (lane-aligned halves)


# --------------------------------------------------------------------------- wrappers

def conv3x3_bn_stats(x, w9, *, scale=None, shift=None, use_bf16=False):
    """3x3 conv, pad=1. If scale/shift are given, relu(x*scale+shift) (previous layer's
    training-mode BN + ReLU) is applied in-kernel first. Returns the pre-BN conv output
    (N, H, W, Cout) and per-tile partial stats (N, HT, 2, Cout)."""
    N, H, W, Cin = x.shape
    Cout = w9.shape[-1]

    TH = _largest_divisor_leq(H, max(1, 512 // max(W, 1)))   # ~512 matmul rows per tile
    HT = H // TH

    # Spatial zero-pad, then restage into non-overlapping halo'd row tiles:
    # ~(TH+2)/TH activation traffic vs. 9x for an HBM im2col.
    xp = jnp.pad(x, ((0, 0), (1, 1), (1, 1), (0, 0)))
    if HT == 1:
        xt = xp[:, None]                                     # free: no restage needed
    else:
        xt = jnp.stack([xp[:, j * TH:j * TH + TH + 2] for j in range(HT)], axis=1)

    fuse = scale is not None
    kernel = functools.partial(conv3x3_kernel, TH=TH, W=W, H=H, fuse_bn_relu=fuse)

    in_specs = [pl.BlockSpec((None, None, TH + 2, W + 2, Cin), lambda n, j: (n, j, 0, 0, 0)),
                pl.BlockSpec((9, Cin, Cout), lambda n, j: (0, 0, 0))]
    args = [xt, w9]
    if fuse:
        in_specs += [pl.BlockSpec((1, Cout), lambda n, j: (0, 0)),
                     pl.BlockSpec((1, Cout), lambda n, j: (0, 0))]
        args += [scale, shift]

    cdtype = jnp.bfloat16 if use_bf16 else jnp.float32
    y, stats = pl.pallas_call(
        kernel,
        out_shape=(jax.ShapeDtypeStruct((N, H, W, Cout), jnp.float32),
                   jax.ShapeDtypeStruct((N, HT, 2, Cout), jnp.float32)),
        grid=(N, HT),
        in_specs=in_specs,
        out_specs=(pl.BlockSpec((None, TH, W, Cout), lambda n, j: (n, j, 0, 0)),
                   pl.BlockSpec((None, None, 2, Cout), lambda n, j: (n, j, 0, 0))),
        scratch_shapes=[pltpu.VMEM((TH + 2, W + 2, Cin), cdtype),
                        pltpu.VMEM((TH * W, Cout), jnp.float32)],
        compiler_params=pltpu.CompilerParams(
            dimension_semantics=("parallel", "parallel"),
            vmem_limit_bytes=VMEM_LIMIT_BYTES),
    )(*args)
    return y, stats


def _bn_scale_shift(stats, count, gamma, beta, eps=1e-5):
    """Fold training-mode BatchNorm (biased batch variance) into per-channel scale/shift."""
    s = jnp.sum(stats, axis=(0, 1))                 # reduce per-tile partials -> (2, C)
    mean = s[0] / count
    var = s[1] / count - mean * mean
    scale = gamma * jax.lax.rsqrt(var + eps)
    shift = beta - mean * scale
    return scale[None, :], shift[None, :]


def bn_relu_maxpool(y, scale, shift):
    """Fused BN-affine + ReLU + 2x2 maxpool; returns (x_out, pooled)."""
    N, H, W, C = y.shape
    H2, W2, C2 = H // 2, W // 2, 2 * C
    yr = y.reshape(N, H2, 2, W2, C2)                # free row-major reshape; lanes stay 128-dense
    scale_t = jnp.tile(scale, (1, 2))               # match the merged (w-pair, C) lane dim
    shift_t = jnp.tile(shift, (1, 2))

    TPH = _largest_divisor_leq(H2, max(1, 1024 // max(2 * W2, 1)))
    HP = H2 // TPH

    x_r, p = pl.pallas_call(
        bn_relu_pool_kernel,
        out_shape=(jax.ShapeDtypeStruct((N, H2, 2, W2, C2), jnp.float32),
                   jax.ShapeDtypeStruct((N, H2, W2, C), jnp.float32)),
        grid=(N, HP),
        in_specs=[pl.BlockSpec((None, TPH, 2, W2, C2), lambda n, t: (n, t, 0, 0, 0)),
                  pl.BlockSpec((1, C2), lambda n, t: (0, 0)),
                  pl.BlockSpec((1, C2), lambda n, t: (0, 0))],
        out_specs=(pl.BlockSpec((None, TPH, 2, W2, C2), lambda n, t: (n, t, 0, 0, 0)),
                   pl.BlockSpec((None, TPH, W2, C), lambda n, t: (n, t, 0, 0))),
        compiler_params=pltpu.CompilerParams(
            dimension_semantics=("parallel", "parallel"),
            vmem_limit_bytes=VMEM_LIMIT_BYTES),
    )(yr, scale_t, shift_t)
    return x_r.reshape(N, H, W, C), p


def encoder_block_forward(x, params, *, use_bf16=False):
    """NHWC forward of encoder_block: (conv3x3 -> BN(train) -> ReLU) x2, then 2x2 maxpool.
    Returns (x, p) exactly like the PyTorch module (in NHWC layout). H and W must be even
    (as in UNet, where every encoder stage halves the spatial dims)."""
    N, H, W, Cin = x.shape
    w1, w2 = params["w1"], params["w2"]             # HWIO
    Cout = w1.shape[-1]
    Cp = _round_up(Cout, 128)                       # lane-dense channel padding
    pad_c = Cp - Cout

    w1p = jnp.pad(w1, ((0, 0), (0, 0), (0, 0), (0, pad_c))).reshape(9, Cin, Cp)
    w2p = jnp.pad(w2, ((0, 0), (0, 0), (0, pad_c), (0, pad_c))).reshape(9, Cp, Cp)
    if use_bf16:
        w1p = w1p.astype(jnp.bfloat16)
        w2p = w2p.astype(jnp.bfloat16)
    g1 = jnp.pad(params["gamma1"], (0, pad_c))
    b1 = jnp.pad(params["beta1"], (0, pad_c))
    g2 = jnp.pad(params["gamma2"], (0, pad_c))
    b2 = jnp.pad(params["beta2"], (0, pad_c))

    count = jnp.float32(N * H * W)

    # NOTE: the conv biases (params["b1"], params["b2"]) are not applied: in training-mode
    # BatchNorm a per-channel bias is exactly cancelled by the batch-mean subtraction, so the
    # final outputs are mathematically identical (verified vs. the reference in __main__).

    # conv1 -> per-tile BN stats
    y1, s1 = conv3x3_bn_stats(x, w1p, use_bf16=use_bf16)
    sc1, sh1 = _bn_scale_shift(s1, count, g1, b1)

    # conv2 with bn1+ReLU fused into its input path (a1 never exists in HBM)
    y2, s2 = conv3x3_bn_stats(y1, w2p, scale=sc1, shift=sh1, use_bf16=use_bf16)
    sc2, sh2 = _bn_scale_shift(s2, count, g2, b2)

    # bn2 + ReLU + 2x2 maxpool fused in one pass
    x_full, p_full = bn_relu_maxpool(y2, sc2, sh2)
    return x_full[..., :Cout], p_full[..., :Cout]


# --------------------------------------------------------------------------- test harness

def init_params(key, in_c, out_c):
    k1, k2, k3, k4 = jax.random.split(key, 4)
    return {
        "w1": 0.1 * jax.random.normal(k1, (3, 3, in_c, out_c), jnp.float32),   # HWIO
        "b1": 0.1 * jax.random.normal(k2, (out_c,), jnp.float32),
        "w2": 0.1 * jax.random.normal(k3, (3, 3, out_c, out_c), jnp.float32),
        "b2": 0.1 * jax.random.normal(k4, (out_c,), jnp.float32),
        # BatchNorm affine params at PyTorch defaults (weight=1, bias=0)
        "gamma1": jnp.ones((out_c,), jnp.float32),
        "beta1": jnp.zeros((out_c,), jnp.float32),
        "gamma2": jnp.ones((out_c,), jnp.float32),
        "beta2": jnp.zeros((out_c,), jnp.float32),
    }


def reference_forward(x, params, eps=1e-5):
    """Pure-JAX (XLA) reference of the PyTorch module in training mode (includes conv bias)."""
    def conv(v, w, b):
        y = jax.lax.conv_general_dilated(v, w, (1, 1), ((1, 1), (1, 1)),
                                         dimension_numbers=("NHWC", "HWIO", "NHWC"))
        return y + b.reshape(1, 1, 1, -1)

    def bn_relu(y, gamma, beta):
        mean = jnp.mean(y, axis=(0, 1, 2))
        var = jnp.mean((y - mean) ** 2, axis=(0, 1, 2))     # biased, as PyTorch training BN
        return jnp.maximum((y - mean) * jax.lax.rsqrt(var + eps) * gamma + beta, 0.0)

    a1 = bn_relu(conv(x, params["w1"], params["b1"]), params["gamma1"], params["beta1"])
    xo = bn_relu(conv(a1, params["w2"], params["b2"]), params["gamma2"], params["beta2"])
    N, H, W, C = xo.shape
    p = jnp.max(xo.reshape(N, H // 2, 2, W // 2, 2, C), axis=(2, 4))
    return xo, p


if __name__ == "__main__":
    key = jax.random.PRNGKey(0)
    kx, kp = jax.random.split(key)

    # NHWC input; equivalent to a PyTorch NCHW input of shape (2, 4, 16, 16).
    N, H, W, in_c, out_c = 2, 16, 16, 4, 8
    x = jax.random.normal(kx, (N, H, W, in_c), jnp.float32)
    params = init_params(kp, in_c, out_c)

    x_out, p_out = jax.jit(encoder_block_forward)(x, params)
    jax.block_until_ready((x_out, p_out))

    assert x_out.shape == (N, H, W, out_c)
    assert p_out.shape == (N, H // 2, W // 2, out_c)

    x_ref, p_ref = jax.jit(reference_forward)(x, params)
    np.testing.assert_allclose(np.asarray(x_out), np.asarray(x_ref), rtol=5e-3, atol=5e-3)
    np.testing.assert_allclose(np.asarray(p_out), np.asarray(p_ref), rtol=5e-3, atol=5e-3)

    print("KERNEL_OK")
</pallas_src>

<mosaic_0001>
module attributes {stable_mosaic.version = 11 : i64} {
  func.func @conv3x3_kernel(%arg0: i32, %arg1: i32, %arg2: memref<1x1x18x18x4xf32, #tpu.memory_space<vmem>>, %arg3: memref<9x4x128xf32, #tpu.memory_space<vmem>>, %arg4: memref<1x16x16x128xf32, #tpu.memory_space<vmem>>, %arg5: memref<1x1x2x128xf32, #tpu.memory_space<vmem>>, %arg6: memref<18x18x4xf32, #tpu.memory_space<vmem>>, %arg7: memref<256x128xf32, #tpu.memory_space<vmem>>) attributes {dimension_semantics = [#tpu.dimension_semantics<parallel>, #tpu.dimension_semantics<parallel>], iteration_bounds = array<i64: 2, 1>, scalar_prefetch = 0 : i64, scratch_operands = 2 : i64, tpu.core_type = #tpu.core_type<tc>, window_params = [{transform_indices = @transform_0, window_bounds = array<i64: 1, 1, 18, 18, 4>}, {pipeline_mode = #tpu.pipeline_mode<synchronous>, transform_indices = @transform_1, window_bounds = array<i64: 9, 4, 128>}, {transform_indices = @transform_2, window_bounds = array<i64: 1, 16, 16, 128>}, {transform_indices = @transform_3, window_bounds = array<i64: 1, 1, 2, 128>}]} {
    %c0 = arith.constant 0 : index
    %c0_0 = arith.constant 0 : index
    %c0_1 = arith.constant 0 : index
    %c0_2 = arith.constant 0 : index
    %c0_3 = arith.constant 0 : index
    %0 = vector.load %arg2[%c0, %c0_0, %c0_1, %c0_2, %c0_3] : memref<1x1x18x18x4xf32, #tpu.memory_space<vmem>>, vector<1x1x18x18x4xf32>
    %1 = vector.shape_cast %0 : vector<1x1x18x18x4xf32> to vector<18x18x4xf32>
    %c0_4 = arith.constant 0 : index
    %c0_5 = arith.constant 0 : index
    %c0_6 = arith.constant 0 : index
    %2 = vector.load %arg6[%c0_4, %c0_5, %c0_6] : memref<18x18x4xf32, #tpu.memory_space<vmem>>, vector<18x18x4xf32>
    tpu.vector_store %arg6[%c0_4, %c0_5, %c0_6], %1 {strides = array<i32>} : memref<18x18x4xf32, #tpu.memory_space<vmem>>, vector<18x18x4xf32>,
    %cst = arith.constant 0.000000e+00 : f32
    %3 = vector.broadcast %cst : f32 to vector<256x128xf32>
    %c0_7 = arith.constant 0 : index
    %c0_8 = arith.constant 0 : index
    %4 = vector.load %arg7[%c0_7, %c0_8] : memref<256x128xf32, #tpu.memory_space<vmem>>, vector<256x128xf32>
    tpu.vector_store %arg7[%c0_7, %c0_8], %3 {strides = array<i32>} : memref<256x128xf32, #tpu.memory_space<vmem>>, vector<256x128xf32>,
    %c0_9 = arith.constant 0 : index
    %c0_10 = arith.constant 0 : index
    %c0_11 = arith.constant 0 : index
    %5 = vector.load %arg6[%c0_9, %c0_10, %c0_11] : memref<18x18x4xf32, #tpu.memory_space<vmem>>, vector<16x16x4xf32>
    %6 = vector.shape_cast %5 : vector<16x16x4xf32> to vector<256x4xf32>
    %c0_12 = arith.constant 0 : index
    %c0_13 = arith.constant 0 : index
    %7 = vector.load %arg7[%c0_12, %c0_13] : memref<256x128xf32, #tpu.memory_space<vmem>>, vector<256x128xf32>
    %c0_14 = arith.constant 0 : index
    %c0_15 = arith.constant 0 : index
    %c0_16 = arith.constant 0 : index
    %8 = vector.load %arg3[%c0_14, %c0_15, %c0_16] : memref<9x4x128xf32, #tpu.memory_space<vmem>>, vector<1x4x128xf32>
    %9 = vector.shape_cast %8 : vector<1x4x128xf32> to vector<4x128xf32>
    %cst_17 = arith.constant dense<0.000000e+00> : vector<256x128xf32>
    %10 = tpu.matmul %6, %9, %cst_17 {dimension_numbers = #tpu.dot_dimension_numbers<[1], [0], [0], [1], [0, 0, 1, 1], [], []>} : vector<256x4xf32>, vector<4x128xf32>, vector<256x128xf32> -> vector<256x128xf32>
    %11 = arith.addf %7, %10 : vector<256x128xf32>
    %c0_18 = arith.constant 0 : index
    %c0_19 = arith.constant 0 : index
    %12 = vector.load %arg7[%c0_18, %c0_19] : memref<256x128xf32, #tpu.memory_space<vmem>>, vector<256x128xf32>
    tpu.vector_store %arg7[%c0_18, %c0_19], %11 {strides = array<i32>} : memref<256x128xf32, #tpu.memory_space<vmem>>, vector<256x128xf32>,
    %c0_20 = arith.constant 0 : index
    %c1 = arith.constant 1 : index
    %c0_21 = arith.constant 0 : index
    %13 = vector.load %arg6[%c0_20, %c1, %c0_21] : memref<18x18x4xf32, #tpu.memory_space<vmem>>, vector<16x16x4xf32>
    %14 = vector.shape_cast %13 : vector<16x16x4xf32> to vector<256x4xf32>
    %c0_22 = arith.constant 0 : index
    %c0_23 = arith.constant 0 : index
    %15 = vector.load %arg7[%c0_22, %c0_23] : memref<256x128xf32, #tpu.memory_space<vmem>>, vector<256x128xf32>
    %c1_24 = arith.constant 1 : index
    %c0_25 = arith.constant 0 : index
    %c0_26 = arith.constant 0 : index
    %16 = vector.load %arg3[%c1_24, %c0_25, %c0_26] : memref<9x4x128xf32, #tpu.memory_space<vmem>>, vector<1x4x128xf32>
    %17 = vector.shape_cast %16 : vector<1x4x128xf32> to vector<4x128xf32>
    %cst_27 = arith.constant dense<0.000000e+00> : vector<256x128xf32>
    %18 = tpu.matmul %14, %17, %cst_27 {dimension_numbers = #tpu.dot_dimension_numbers<[1], [0], [0], [1], [0, 0, 1, 1], [], []>} : vector<256x4xf32>, vector<4x128xf32>, vector<256x128xf32> -> vector<256x128xf32>
    %19 = arith.addf %15, %18 : vector<256x128xf32>
    %c0_28 = arith.constant 0 : index
    %c0_29 = arith.constant 0 : index
    %20 = vector.load %arg7[%c0_28, %c0_29] : memref<256x128xf32, #tpu.memory_space<vmem>>, vector<256x128xf32>
    tpu.vector_store %arg7[%c0_28, %c0_29], %19 {strides = array<i32>} : memref<256x128xf32, #tpu.memory_space<vmem>>, vector<256x128xf32>,
    %c0_30 = arith.constant 0 : index
    %c2 = arith.constant 2 : index
    %c0_31 = arith.constant 0 : index
    %21 = vector.load %arg6[%c0_30, %c2, %c0_31] : memref<18x18x4xf32, #tpu.memory_space<vmem>>, vector<16x16x4xf32>
    %22 = vector.shape_cast %21 : vector<16x16x4xf32> to vector<256x4xf32>
    %c0_32 = arith.constant 0 : index
    %c0_33 = arith.constant 0 : index
    %23 = vector.load %arg7[%c0_32, %c0_33] : memref<256x128xf32, #tpu.memory_space<vmem>>, vector<256x128xf32>
    %c2_34 = arith.constant 2 : index
    %c0_35 = arith.constant 0 : index
    %c0_36 = arith.constant 0 : index
    %24 = vector.load %arg3[%c2_34, %c0_35, %c0_36] : memref<9x4x128xf32, #tpu.memory_space<vmem>>, vector<1x4x128xf32>
    %25 = vector.shape_cast %24 : vector<1x4x128xf32> to vector<4x128xf32>
    %cst_37 = arith.constant dense<0.000000e+00> : vector<256x128xf32>
    %26 = tpu.matmul %22, %25, %cst_37 {dimension_numbers = #tpu.dot_dimension_numbers<[1], [0], [0], [1], [0, 0, 1, 1], [], []>} : vector<256x4xf32>, vector<4x128xf32>, vector<256x128xf32> -> vector<256x128xf32>
    %27 = arith.addf %23, %26 : vector<256x128xf32>
    %c0_38 = arith.constant 0 : index
    %c0_39 = arith.constant 0 : index
    %28 = vector.load %arg7[%c0_38, %c0_39] : memref<256x128xf32, #tpu.memory_space<vmem>>, vector<256x128xf32>
    tpu.vector_store %arg7[%c0_38, %c0_39], %27 {strides = array<i32>} : memref<256x128xf32, #tpu.memory_space<vmem>>, vector<256x128xf32>,
    %c1_40 = arith.constant 1 : index
    %c0_41 = arith.constant 0 : index
    %c0_42 = arith.constant 0 : index
    %29 = vector.load %arg6[%c1_40, %c0_41, %c0_42] : memref<18x18x4xf32, #tpu.memory_space<vmem>>, vector<16x16x4xf32>
    %30 = vector.shape_cast %29 : vector<16x16x4xf32> to vector<256x4xf32>
    %c0_43 = arith.constant 0 : index
    %c0_44 = arith.constant 0 : index
    %31 = vector.load %arg7[%c0_43, %c0_44] : memref<256x128xf32, #tpu.memory_space<vmem>>, vector<256x128xf32>
    %c3 = arith.constant 3 : index
    %c0_45 = arith.constant 0 : index
    %c0_46 = arith.constant 0 : index
    %32 = vector.load %arg3[%c3, %c0_45, %c0_46] : memref<9x4x128xf32, #tpu.memory_space<vmem>>, vector<1x4x128xf32>
    %33 = vector.shape_cast %32 : vector<1x4x128xf32> to vector<4x128xf32>
    %cst_47 = arith.constant dense<0.000000e+00> : vector<256x128xf32>
    %34 = tpu.matmul %30, %33, %cst_47 {dimension_numbers = #tpu.dot_dimension_numbers<[1], [0], [0], [1], [0, 0, 1, 1], [], []>} : vector<256x4xf32>, vector<4x128xf32>, vector<256x128xf32> -> vector<256x128xf32>
    %35 = arith.addf %31, %34 : vector<256x128xf32>
    %c0_48 = arith.constant 0 : index
    %c0_49 = arith.constant 0 : index
    %36 = vector.load %arg7[%c0_48, %c0_49] : memref<256x128xf32, #tpu.memory_space<vmem>>, vector<256x128xf32>
    tpu.vector_store %arg7[%c0_48, %c0_49], %35 {strides = array<i32>} : memref<256x128xf32, #tpu.memory_space<vmem>>, vector<256x128xf32>,
    %c1_50 = arith.constant 1 : index
    %c1_51 = arith.constant 1 : index
    %c0_52 = arith.constant 0 : index
    %37 = vector.load %arg6[%c1_50, %c1_51, %c0_52] : memref<18x18x4xf32, #tpu.memory_space<vmem>>, vector<16x16x4xf32>
    %38 = vector.shape_cast %37 : vector<16x16x4xf32> to vector<256x4xf32>
    %c0_53 = arith.constant 0 : index
    %c0_54 = arith.constant 0 : index
    %39 = vector.load %arg7[%c0_53, %c0_54] : memref<256x128xf32, #tpu.memory_space<vmem>>, vector<256x128xf32>
    %c4 = arith.constant 4 : index
    %c0_55 = arith.constant 0 : index
    %c0_56 = arith.constant 0 : index
    %40 = vector.load %arg3[%c4, %c0_55, %c0_56] : memref<9x4x128xf32, #tpu.memory_space<vmem>>, vector<1x4x128xf32>
    %41 = vector.shape_cast %40 : vector<1x4x128xf32> to vector<4x128xf32>
    %cst_57 = arith.constant dense<0.000000e+00> : vector<256x128xf32>
    %42 = tpu.matmul %38, %41, %cst_57 {dimension_numbers = #tpu.dot_dimension_numbers<[1], [0], [0], [1], [0, 0, 1, 1], [], []>} : vector<256x4xf32>, vector<4x128xf32>, vector<256x128xf32> -> vector<256x128xf32>
    %43 = arith.addf %39, %42 : vector<256x128xf32>
    %c0_58 = arith.constant 0 : index
    %c0_59 = arith.constant 0 : index
    %44 = vector.load %arg7[%c0_58, %c0_59] : memref<256x128xf32, #tpu.memory_space<vmem>>, vector<256x128xf32>
    tpu.vector_store %arg7[%c0_58, %c0_59], %43 {strides = array<i32>} : memref<256x128xf32, #tpu.memory_space<vmem>>, vector<256x128xf32>,
    %c1_60 = arith.constant 1 : index
    %c2_61 = arith.constant 2 : index
    %c0_62 = arith.constant 0 : index
    %45 = vector.load %arg6[%c1_60, %c2_61, %c0_62] : memref<18x18x4xf32, #tpu.memory_space<vmem>>, vector<16x16x4xf32>
    %46 = vector.shape_cast %45 : vector<16x16x4xf32> to vector<256x4xf32>
    %c0_63 = arith.constant 0 : index
    %c0_64 = arith.constant 0 : index
    %47 = vector.load %arg7[%c0_63, %c0_64] : memref<256x128xf32, #tpu.memory_space<vmem>>, vector<256x128xf32>
    %c5 = arith.constant 5 : index
    %c0_65 = arith.constant 0 : index
    %c0_66 = arith.constant 0 : index
    %48 = vector.load %arg3[%c5, %c0_65, %c0_66] : memref<9x4x128xf32, #tpu.memory_space<vmem>>, vector<1x4x128xf32>
    %49 = vector.shape_cast %48 : vector<1x4x128xf32> to vector<4x128xf32>
    %cst_67 = arith.constant dense<0.000000e+00> : vector<256x128xf32>
    %50 = tpu.matmul %46, %49, %cst_67 {dimension_numbers = #tpu.dot_dimension_numbers<[1], [0], [0], [1], [0, 0, 1, 1], [], []>} : vector<256x4xf32>, vector<4x128xf32>, vector<256x128xf32> -> vector<256x128xf32>
    %51 = arith.addf %47, %50 : vector<256x128xf32>
    %c0_68 = arith.constant 0 : index
    %c0_69 = arith.constant 0 : index
    %52 = vector.load %arg7[%c0_68, %c0_69] : memref<256x128xf32, #tpu.memory_space<vmem>>, vector<256x128xf32>
    tpu.vector_store %arg7[%c0_68, %c0_69], %51 {strides = array<i32>} : memref<256x128xf32, #tpu.memory_space<vmem>>, vector<256x128xf32>,
    %c2_70 = arith.constant 2 : index
    %c0_71 = arith.constant 0 : index
    %c0_72 = arith.constant 0 : index
    %53 = vector.load %arg6[%c2_70, %c0_71, %c0_72] : memref<18x18x4xf32, #tpu.memory_space<vmem>>, vector<16x16x4xf32>
    %54 = vector.shape_cast %53 : vector<16x16x4xf32> to vector<256x4xf32>
    %c0_73 = arith.constant 0 : index
    %c0_74 = arith.constant 0 : index
    %55 = vector.load %arg7[%c0_73, %c0_74] : memref<256x128xf32, #tpu.memory_space<vmem>>, vector<256x128xf32>
    %c6 = arith.constant 6 : index
    %c0_75 = arith.constant 0 : index
    %c0_76 = arith.constant 0 : index
    %56 = vector.load %arg3[%c6, %c0_75, %c0_76] : memref<9x4x128xf32, #tpu.memory_space<vmem>>, vector<1x4x128xf32>
    %57 = vector.shape_cast %56 : vector<1x4x128xf32> to vector<4x128xf32>
    %cst_77 = arith.constant dense<0.000000e+00> : vector<256x128xf32>
    %58 = tpu.matmul %54, %57, %cst_77 {dimension_numbers = #tpu.dot_dimension_numbers<[1], [0], [0], [1], [0, 0, 1, 1], [], []>} : vector<256x4xf32>, vector<4x128xf32>, vector<256x128xf32> -> vector<256x128xf32>
    %59 = arith.addf %55, %58 : vector<256x128xf32>
    %c0_78 = arith.constant 0 : index
    %c0_79 = arith.constant 0 : index
    %60 = vector.load %arg7[%c0_78, %c0_79] : memref<256x128xf32, #tpu.memory_space<vmem>>, vector<256x128xf32>
    tpu.vector_store %arg7[%c0_78, %c0_79], %59 {strides = array<i32>} : memref<256x128xf32, #tpu.memory_space<vmem>>, vector<256x128xf32>,
    %c2_80 = arith.constant 2 : index
    %c1_81 = arith.constant 1 : index
    %c0_82 = arith.constant 0 : index
    %61 = vector.load %arg6[%c2_80, %c1_81, %c0_82] : memref<18x18x4xf32, #tpu.memory_space<vmem>>, vector<16x16x4xf32>
    %62 = vector.shape_cast %61 : vector<16x16x4xf32> to vector<256x4xf32>
    %c0_83 = arith.constant 0 : index
    %c0_84 = arith.constant 0 : index
    %63 = vector.load %arg7[%c0_83, %c0_84] : memref<256x128xf32, #tpu.memory_space<vmem>>, vector<256x128xf32>
    %c7 = arith.constant 7 : index
    %c0_85 = arith.constant 0 : index
    %c0_86 = arith.constant 0 : index
    %64 = vector.load %arg3[%c7, %c0_85, %c0_86] : memref<9x4x128xf32, #tpu.memory_space<vmem>>, vector<1x4x128xf32>
    %65 = vector.shape_cast %64 : vector<1x4x128xf32> to vector<4x128xf32>
    %cst_87 = arith.constant dense<0.000000e+00> : vector<256x128xf32>
    %66 = tpu.matmul %62, %65, %cst_87 {dimension_numbers = #tpu.dot_dimension_numbers<[1], [0], [0], [1], [0, 0, 1, 1], [], []>} : vector<256x4xf32>, vector<4x128xf32>, vector<256x128xf32> -> vector<256x128xf32>
    %67 = arith.addf %63, %66 : vector<256x128xf32>
    %c0_88 = arith.constant 0 : index
    %c0_89 = arith.constant 0 : index
    %68 = vector.load %arg7[%c0_88, %c0_89] : memref<256x128xf32, #tpu.memory_space<vmem>>, vector<256x128xf32>
    tpu.vector_store %arg7[%c0_88, %c0_89], %67 {strides = array<i32>} : memref<256x128xf32, #tpu.memory_space<vmem>>, vector<256x128xf32>,
    %c2_90 = arith.constant 2 : index
    %c2_91 = arith.constant 2 : index
    %c0_92 = arith.constant 0 : index
    %69 = vector.load %arg6[%c2_90, %c2_91, %c0_92] : memref<18x18x4xf32, #tpu.memory_space<vmem>>, vector<16x16x4xf32>
    %70 = vector.shape_cast %69 : vector<16x16x4xf32> to vector<256x4xf32>
    %c0_93 = arith.constant 0 : index
    %c0_94 = arith.constant 0 : index
    %71 = vector.load %arg7[%c0_93, %c0_94] : memref<256x128xf32, #tpu.memory_space<vmem>>, vector<256x128xf32>
    %c8 = arith.constant 8 : index
    %c0_95 = arith.constant 0 : index
    %c0_96 = arith.constant 0 : index
    %72 = vector.load %arg3[%c8, %c0_95, %c0_96] : memref<9x4x128xf32, #tpu.memory_space<vmem>>, vector<1x4x128xf32>
    %73 = vector.shape_cast %72 : vector<1x4x128xf32> to vector<4x128xf32>
    %cst_97 = arith.constant dense<0.000000e+00> : vector<256x128xf32>
    %74 = tpu.matmul %70, %73, %cst_97 {dimension_numbers = #tpu.dot_dimension_numbers<[1], [0], [0], [1], [0, 0, 1, 1], [], []>} : vector<256x4xf32>, vector<4x128xf32>, vector<256x128xf32> -> vector<256x128xf32>
    %75 = arith.addf %71, %74 : vector<256x128xf32>
    %c0_98 = arith.constant 0 : index
    %c0_99 = arith.constant 0 : index
    %76 = vector.load %arg7[%c0_98, %c0_99] : memref<256x128xf32, #tpu.memory_space<vmem>>, vector<256x128xf32>
    tpu.vector_store %arg7[%c0_98, %c0_99], %75 {strides = array<i32>} : memref<256x128xf32, #tpu.memory_space<vmem>>, vector<256x128xf32>,
    %c0_100 = arith.constant 0 : index
    %c0_101 = arith.constant 0 : index
    %77 = vector.load %arg7[%c0_100, %c0_101] : memref<256x128xf32, #tpu.memory_space<vmem>>, vector<256x128xf32>
    %78 = vector.shape_cast %77 : vector<256x128xf32> to vector<16x16x128xf32>
    %c0_102 = arith.constant 0 : index
    %c0_103 = arith.constant 0 : index
    %c0_104 = arith.constant 0 : index
    %c0_105 = arith.constant 0 : index
    %79 = vector.load %arg4[%c0_102, %c0_103, %c0_104, %c0_105] : memref<1x16x16x128xf32, #tpu.memory_space<vmem>>, vector<1x16x16x128xf32>
    %80 = vector.shape_cast %79 : vector<1x16x16x128xf32> to vector<16x16x128xf32>
    %81 = vector.shape_cast %78 : vector<16x16x128xf32> to vector<1x16x16x128xf32>
    tpu.vector_store %arg4[%c0_102, %c0_103, %c0_104, %c0_105], %81 {strides = array<i32>} : memref<1x16x16x128xf32, #tpu.memory_space<vmem>>, vector<1x16x16x128xf32>,
    %cst_106 = arith.constant dense<0.000000e+00> : vector<128xf32>
    %82 = vector.multi_reduction <add>, %77, %cst_106 [0] : vector<256x128xf32> to vector<128xf32>
    %83 = vector.shape_cast %82 : vector<128xf32> to vector<1x128xf32>
    %c0_107 = arith.constant 0 : index
    %c0_108 = arith.constant 0 : index
    %c0_109 = arith.constant 0 : index
    %c0_110 = arith.constant 0 : index
    %84 = vector.load %arg5[%c0_107, %c0_108, %c0_109, %c0_110] : memref<1x1x2x128xf32, #tpu.memory_space<vmem>>, vector<1x1x1x128xf32>
    %85 = vector.shape_cast %84 : vector<1x1x1x128xf32> to vector<1x128xf32>
    %86 = vector.shape_cast %83 : vector<1x128xf32> to vector<1x1x1x128xf32>
    tpu.vector_store %arg5[%c0_107, %c0_108, %c0_109, %c0_110], %86 {strides = array<i32>} : memref<1x1x2x128xf32, #tpu.memory_space<vmem>>, vector<1x1x1x128xf32>,
    %87 = arith.mulf %77, %77 : vector<256x128xf32>
    %cst_111 = arith.constant dense<0.000000e+00> : vector<128xf32>
    %88 = vector.multi_reduction <add>, %87, %cst_111 [0] : vector<256x128xf32> to vector<128xf32>
    %89 = vector.shape_cast %88 : vector<128xf32> to vector<1x128xf32>
    %c0_112 = arith.constant 0 : index
    %c0_113 = arith.constant 0 : index
    %c1_114 = arith.constant 1 : index
    %c0_115 = arith.constant 0 : index
    %90 = vector.load %arg5[%c0_112, %c0_113, %c1_114, %c0_115] : memref<1x1x2x128xf32, #tpu.memory_space<vmem>>, vector<1x1x1x128xf32>
    %91 = vector.shape_cast %90 : vector<1x1x1x128xf32> to vector<1x128xf32>
    %92 = vector.shape_cast %89 : vector<1x128xf32> to vector<1x1x1x128xf32>
    tpu.vector_store %arg5[%c0_112, %c0_113, %c1_114, %c0_115], %92 {strides = array<i32>} : memref<1x1x2x128xf32, #tpu.memory_space<vmem>>, vector<1x1x1x128xf32>,
    return
  }
  func.func @transform_0(%arg0: i32, %arg1: i32) -> (i32, i32, i32, i32, i32) {
    %c0_i32 = arith.constant 0 : i32
    %c0_i32_0 = arith.constant 0 : i32
    %c0_i32_1 = arith.constant 0 : i32
    %c0_i32_2 = arith.constant 0 : i32
    return %arg0, %arg1, %c0_i32, %c0_i32_0, %c0_i32_1 : i32, i32, i32, i32, i32
  }
  func.func @transform_1(%arg0: i32, %arg1: i32) -> (i32, i32, i32) {
    %c0_i32 = arith.constant 0 : i32
    %c0_i32_0 = arith.constant 0 : i32
    %c0_i32_1 = arith.constant 0 : i32
    %c0_i32_2 = arith.constant 0 : i32
    return %c0_i32, %c0_i32_0, %c0_i32_1 : i32, i32, i32
  }
  func.func @transform_2(%arg0: i32, %arg1: i32) -> (i32, i32, i32, i32) {
    %c0_i32 = arith.constant 0 : i32
    %c0_i32_0 = arith.constant 0 : i32
    %c0_i32_1 = arith.constant 0 : i32
    return %arg0, %arg1, %c0_i32, %c0_i32_0 : i32, i32, i32, i32
  }
  func.func @transform_3(%arg0: i32, %arg1: i32) -> (i32, i32, i32, i32) {
    %c0_i32 = arith.constant 0 : i32
    %c0_i32_0 = arith.constant 0 : i32
    %c0_i32_1 = arith.constant 0 : i32
    return %arg0, %arg1, %c0_i32, %c0_i32_0 : i32, i32, i32, i32
  }
}

module attributes {stable_mosaic.version = 11 : i64} {
  func.func @conv3x3_kernel(%arg0: i32, %arg1: i32, %arg2: memref<1x1x18x18x128xf32, #tpu.memory_space<vmem>>, %arg3: memref<9x128x128xf32, #tpu.memory_space<vmem>>, %arg4: memref<1x128xf32, #tpu.memory_space<vmem>>, %arg5: memref<1x128xf32, #tpu.memory_space<vmem>>, %arg6: memref<1x16x16x128xf32, #tpu.memory_space<vmem>>, %arg7: memref<1x1x2x128xf32, #tpu.memory_space<vmem>>, %arg8: memref<18x18x128xf32, #tpu.memory_space<vmem>>, %arg9: memref<256x128xf32, #tpu.memory_space<vmem>>) attributes {dimension_semantics = [#tpu.dimension_semantics<parallel>, #tpu.dimension_semantics<parallel>], iteration_bounds = array<i64: 2, 1>, scalar_prefetch = 0 : i64, scratch_operands = 2 : i64, tpu.core_type = #tpu.core_type<tc>, window_params = [{transform_indices = @transform_0, window_bounds = array<i64: 1, 1, 18, 18, 128>}, {pipeline_mode = #tpu.pipeline_mode<synchronous>, transform_indices = @transform_1, window_bounds = array<i64: 9, 128, 128>}, {pipeline_mode = #tpu.pipeline_mode<synchronous>, transform_indices = @transform_2, window_bounds = array<i64: 1, 128>}, {pipeline_mode = #tpu.pipeline_mode<synchronous>, transform_indices = @transform_3, window_bounds = array<i64: 1, 128>}, {transform_indices = @transform_4, window_bounds = array<i64: 1, 16, 16, 128>}, {transform_indices = @transform_5, window_bounds = array<i64: 1, 1, 2, 128>}]} {
    %c0 = arith.constant 0 : index
    %c0_0 = arith.constant 0 : index
    %c0_1 = arith.constant 0 : index
    %c0_2 = arith.constant 0 : index
    %c0_3 = arith.constant 0 : index
    %0 = vector.load %arg2[%c0, %c0_0, %c0_1, %c0_2, %c0_3] : memref<1x1x18x18x128xf32, #tpu.memory_space<vmem>>, vector<1x1x18x18x128xf32>
    %1 = vector.shape_cast %0 : vector<1x1x18x18x128xf32> to vector<18x18x128xf32>
    %c0_4 = arith.constant 0 : index
    %c0_5 = arith.constant 0 : index
    %2 = vector.load %arg4[%c0_4, %c0_5] : memref<1x128xf32, #tpu.memory_space<vmem>>, vector<1x128xf32>
    %3 = vector.shape_cast %2 : vector<1x128xf32> to vector<128xf32>
    %4 = vector.shape_cast %3 : vector<128xf32> to vector<1x1x128xf32>
    %5 = vector.broadcast %4 : vector<1x1x128xf32> to vector<18x18x128xf32>
    %6 = arith.mulf %1, %5 : vector<18x18x128xf32>
    %c0_6 = arith.constant 0 : index
    %c0_7 = arith.constant 0 : index
    %7 = vector.load %arg5[%c0_6, %c0_7] : memref<1x128xf32, #tpu.memory_space<vmem>>, vector<1x128xf32>
    %8 = vector.shape_cast %7 : vector<1x128xf32> to vector<128xf32>
    %9 = vector.shape_cast %8 : vector<128xf32> to vector<1x1x128xf32>
    %10 = vector.broadcast %9 : vector<1x1x128xf32> to vector<18x18x128xf32>
    %11 = arith.addf %6, %10 : vector<18x18x128xf32>
    %cst = arith.constant 0.000000e+00 : f32
    %12 = vector.broadcast %cst : f32 to vector<18x18x128xf32>
    %13 = arith.maximumf %11, %12 : vector<18x18x128xf32>
    %14 = tpu.iota {dimensions = array<i32: 0>} : vector<18x18x1xi32>
    %c16_i32 = arith.constant 16 : i32
    %15 = arith.muli %arg1, %c16_i32 : i32
    %16 = vector.broadcast %15 : i32 to vector<18x18x1xi32>
    %17 = arith.addi %14, %16 : vector<18x18x1xi32>
    %18 = tpu.iota {dimensions = array<i32: 1>} : vector<18x18x1xi32>
    %c1_i32 = arith.constant 1 : i32
    %19 = vector.broadcast %c1_i32 : i32 to vector<18x18x1xi32>
    %20 = arith.cmpi sge, %17, %19 : vector<18x18x1xi32>
    %c16_i32_8 = arith.constant 16 : i32
    %21 = vector.broadcast %c16_i32_8 : i32 to vector<18x18x1xi32>
    %22 = arith.cmpi sle, %17, %21 : vector<18x18x1xi32>
    %23 = arith.andi %20, %22 : vector<18x18x1xi1>
    %c1_i32_9 = arith.constant 1 : i32
    %24 = vector.broadcast %c1_i32_9 : i32 to vector<18x18x1xi32>
    %25 = arith.cmpi sge, %18, %24 : vector<18x18x1xi32>
    %26 = arith.andi %23, %25 : vector<18x18x1xi1>
    %c16_i32_10 = arith.constant 16 : i32
    %27 = vector.broadcast %c16_i32_10 : i32 to vector<18x18x1xi32>
    %28 = arith.cmpi sle, %18, %27 : vector<18x18x1xi32>
    %29 = arith.andi %26, %28 : vector<18x18x1xi1>
    %cst_11 = arith.constant 0.000000e+00 : f32
    %30 = vector.shape_cast %29 : vector<18x18x1xi1> to vector<18x18x1xi1>
    %31 = vector.broadcast %30 : vector<18x18x1xi1> to vector<18x18x128xi1>
    %32 = vector.broadcast %cst_11 : f32 to vector<18x18x128xf32>
    %33 = arith.select %31, %13, %32 : vector<18x18x128xi1>, vector<18x18x128xf32>
    %c0_12 = arith.constant 0 : index
    %c0_13 = arith.constant 0 : index
    %c0_14 = arith.constant 0 : index
    %34 = vector.load %arg8[%c0_12, %c0_13, %c0_14] : memref<18x18x128xf32, #tpu.memory_space<vmem>>, vector<18x18x128xf32>
    tpu.vector_store %arg8[%c0_12, %c0_13, %c0_14], %33 {strides = array<i32>} : memref<18x18x128xf32, #tpu.memory_space<vmem>>, vector<18x18x128xf32>,
    %cst_15 = arith.constant 0.000000e+00 : f32
    %35 = vector.broadcast %cst_15 : f32 to vector<256x128xf32>
    %c0_16 = arith.constant 0 : index
    %c0_17 = arith.constant 0 : index
    %36 = vector.load %arg9[%c0_16, %c0_17] : memref<256x128xf32, #tpu.memory_space<vmem>>, vector<256x128xf32>
    tpu.vector_store %arg9[%c0_16, %c0_17], %35 {strides = array<i32>} : memref<256x128xf32, #tpu.memory_space<vmem>>, vector<256x128xf32>,
    %c0_18 = arith.constant 0 : index
    %c0_19 = arith.constant 0 : index
    %c0_20 = arith.constant 0 : index
    %37 = vector.load %arg8[%c0_18, %c0_19, %c0_20] : memref<18x18x128xf32, #tpu.memory_space<vmem>>, vector<16x16x128xf32>
    %38 = vector.shape_cast %37 : vector<16x16x128xf32> to vector<256x128xf32>
    %c0_21 = arith.constant 0 : index
    %c0_22 = arith.constant 0 : index
    %39 = vector.load %arg9[%c0_21, %c0_22] : memref<256x128xf32, #tpu.memory_space<vmem>>, vector<256x128xf32>
    %c0_23 = arith.constant 0 : index
    %c0_24 = arith.constant 0 : index
    %c0_25 = arith.constant 0 : index
    %40 = vector.load %arg3[%c0_23, %c0_24, %c0_25] : memref<9x128x128xf32, #tpu.memory_space<vmem>>, vector<1x128x128xf32>
    %41 = vector.shape_cast %40 : vector<1x128x128xf32> to vector<128x128xf32>
    %cst_26 = arith.constant dense<0.000000e+00> : vector<256x128xf32>
    %42 = tpu.matmul %38, %41, %cst_26 {dimension_numbers = #tpu.dot_dimension_numbers<[1], [0], [0], [1], [0, 0, 1, 1], [], []>} : vector<256x128xf32>, vector<128x128xf32>, vector<256x128xf32> -> vector<256x128xf32>
    %43 = arith.addf %39, %42 : vector<256x128xf32>
    %c0_27 = arith.constant 0 : index
    %c0_28 = arith.constant 0 : index
    %44 = vector.load %arg9[%c0_27, %c0_28] : memref<256x128xf32, #tpu.memory_space<vmem>>, vector<256x128xf32>
    tpu.vector_store %arg9[%c0_27, %c0_28], %43 {strides = array<i32>} : memref<256x128xf32, #tpu.memory_space<vmem>>, vector<256x128xf32>,
    %c0_29 = arith.constant 0 : index
    %c1 = arith.constant 1 : index
    %c0_30 = arith.constant 0 : index
    %45 = vector.load %arg8[%c0_29, %c1, %c0_30] : memref<18x18x128xf32, #tpu.memory_space<vmem>>, vector<16x16x128xf32>
    %46 = vector.shape_cast %45 : vector<16x16x128xf32> to vector<256x128xf32>
    %c0_31 = arith.constant 0 : index
    %c0_32 = arith.constant 0 : index
    %47 = vector.load %arg9[%c0_31, %c0_32] : memref<256x128xf32, #tpu.memory_space<vmem>>, vector<256x128xf32>
    %c1_33 = arith.constant 1 : index
    %c0_34 = arith.constant 0 : index
    %c0_35 = arith.constant 0 : index
    %48 = vector.load %arg3[%c1_33, %c0_34, %c0_35] : memref<9x128x128xf32, #tpu.memory_space<vmem>>, vector<1x128x128xf32>
    %49 = vector.shape_cast %48 : vector<1x128x128xf32> to vector<128x128xf32>
    %cst_36 = arith.constant dense<0.000000e+00> : vector<256x128xf32>
    %50 = tpu.matmul %46, %49, %cst_36 {dimension_numbers = #tpu.dot_dimension_numbers<[1], [0], [0], [1], [0, 0, 1, 1], [], []>} : vector<256x128xf32>, vector<128x128xf32>, vector<256x128xf32> -> vector<256x128xf32>
    %51 = arith.addf %47, %50 : vector<256x128xf32>
    %c0_37 = arith.constant 0 : index
    %c0_38 = arith.constant 0 : index
    %52 = vector.load %arg9[%c0_37, %c0_38] : memref<256x128xf32, #tpu.memory_space<vmem>>, vector<256x128xf32>
    tpu.vector_store %arg9[%c0_37, %c0_38], %51 {strides = array<i32>} : memref<256x128xf32, #tpu.memory_space<vmem>>, vector<256x128xf32>,
    %c0_39 = arith.constant 0 : index
    %c2 = arith.constant 2 : index
    %c0_40 = arith.constant 0 : index
    %53 = vector.load %arg8[%c0_39, %c2, %c0_40] : memref<18x18x128xf32, #tpu.memory_space<vmem>>, vector<16x16x128xf32>
    %54 = vector.shape_cast %53 : vector<16x16x128xf32> to vector<256x128xf32>
    %c0_41 = arith.constant 0 : index
    %c0_42 = arith.constant 0 : index
    %55 = vector.load %arg9[%c0_41, %c0_42] : memref<256x128xf32, #tpu.memory_space<vmem>>, vector<256x128xf32>
    %c2_43 = arith.constant 2 : index
    %c0_44 = arith.constant 0 : index
    %c0_45 = arith.constant 0 : index
    %56 = vector.load %arg3[%c2_43, %c0_44, %c0_45] : memref<9x128x128xf32, #tpu.memory_space<vmem>>, vector<1x128x128xf32>
    %57 = vector.shape_cast %56 : vector<1x128x128xf32> to vector<128x128xf32>
    %cst_46 = arith.constant dense<0.000000e+00> : vector<256x128xf32>
    %58 = tpu.matmul %54, %57, %cst_46 {dimension_numbers = #tpu.dot_dimension_numbers<[1], [0], [0], [1], [0, 0, 1, 1], [], []>} : vector<256x128xf32>, vector<128x128xf32>, vector<256x128xf32> -> vector<256x128xf32>
    %59 = arith.addf %55, %58 : vector<256x128xf32>
    %c0_47 = arith.constant 0 : index
    %c0_48 = arith.constant 0 : index
    %60 = vector.load %arg9[%c0_47, %c0_48] : memref<256x128xf32, #tpu.memory_space<vmem>>, vector<256x128xf32>
    tpu.vector_store %arg9[%c0_47, %c0_48], %59 {strides = array<i32>} : memref<256x128xf32, #tpu.memory_space<vmem>>, vector<256x128xf32>,
    %c1_49 = arith.constant 1 : index
    %c0_50 = arith.constant 0 : index
    %c0_51 = arith.constant 0 : index
    %61 = vector.load %arg8[%c1_49, %c0_50, %c0_51] : memref<18x18x128xf32, #tpu.memory_space<vmem>>, vector<16x16x128xf32>
    %62 = vector.shape_cast %61 : vector<16x16x128xf32> to vector<256x128xf32>
    %c0_52 = arith.constant 0 : index
    %c0_53 = arith.constant 0 : index
    %63 = vector.load %arg9[%c0_52, %c0_53] : memref<256x128xf32, #tpu.memory_space<vmem>>, vector<256x128xf32>
    %c3 = arith.constant 3 : index
    %c0_54 = arith.constant 0 : index
    %c0_55 = arith.constant 0 : index
    %64 = vector.load %arg3[%c3, %c0_54, %c0_55] : memref<9x128x128xf32, #tpu.memory_space<vmem>>, vector<1x128x128xf32>
    %65 = vector.shape_cast %64 : vector<1x128x128xf32> to vector<128x128xf32>
    %cst_56 = arith.constant dense<0.000000e+00> : vector<256x128xf32>
    %66 = tpu.matmul %62, %65, %cst_56 {dimension_numbers = #tpu.dot_dimension_numbers<[1], [0], [0], [1], [0, 0, 1, 1], [], []>} : vector<256x128xf32>, vector<128x128xf32>, vector<256x128xf32> -> vector<256x128xf32>
    %67 = arith.addf %63, %66 : vector<256x128xf32>
    %c0_57 = arith.constant 0 : index
    %c0_58 = arith.constant 0 : index
    %68 = vector.load %arg9[%c0_57, %c0_58] : memref<256x128xf32, #tpu.memory_space<vmem>>, vector<256x128xf32>
    tpu.vector_store %arg9[%c0_57, %c0_58], %67 {strides = array<i32>} : memref<256x128xf32, #tpu.memory_space<vmem>>, vector<256x128xf32>,
    %c1_59 = arith.constant 1 : index
    %c1_60 = arith.constant 1 : index
    %c0_61 = arith.constant 0 : index
    %69 = vector.load %arg8[%c1_59, %c1_60, %c0_61] : memref<18x18x128xf32, #tpu.memory_space<vmem>>, vector<16x16x128xf32>
    %70 = vector.shape_cast %69 : vector<16x16x128xf32> to vector<256x128xf32>
    %c0_62 = arith.constant 0 : index
    %c0_63 = arith.constant 0 : index
    %71 = vector.load %arg9[%c0_62, %c0_63] : memref<256x128xf32, #tpu.memory_space<vmem>>, vector<256x128xf32>
    %c4 = arith.constant 4 : index
    %c0_64 = arith.constant 0 : index
    %c0_65 = arith.constant 0 : index
    %72 = vector.load %arg3[%c4, %c0_64, %c0_65] : memref<9x128x128xf32, #tpu.memory_space<vmem>>, vector<1x128x128xf32>
    %73 = vector.shape_cast %72 : vector<1x128x128xf32> to vector<128x128xf32>
    %cst_66 = arith.constant dense<0.000000e+00> : vector<256x128xf32>
    %74 = tpu.matmul %70, %73, %cst_66 {dimension_numbers = #tpu.dot_dimension_numbers<[1], [0], [0], [1], [0, 0, 1, 1], [], []>} : vector<256x128xf32>, vector<128x128xf32>, vector<256x128xf32> -> vector<256x128xf32>
    %75 = arith.addf %71, %74 : vector<256x128xf32>
    %c0_67 = arith.constant 0 : index
    %c0_68 = arith.constant 0 : index
    %76 = vector.load %arg9[%c0_67, %c0_68] : memref<256x128xf32, #tpu.memory_space<vmem>>, vector<256x128xf32>
    tpu.vector_store %arg9[%c0_67, %c0_68], %75 {strides = array<i32>} : memref<256x128xf32, #tpu.memory_space<vmem>>, vector<256x128xf32>,
    %c1_69 = arith.constant 1 : index
    %c2_70 = arith.constant 2 : index
    %c0_71 = arith.constant 0 : index
    %77 = vector.load %arg8[%c1_69, %c2_70, %c0_71] : memref<18x18x128xf32, #tpu.memory_space<vmem>>, vector<16x16x128xf32>
    %78 = vector.shape_cast %77 : vector<16x16x128xf32> to vector<256x128xf32>
    %c0_72 = arith.constant 0 : index
    %c0_73 = arith.constant 0 : index
    %79 = vector.load %arg9[%c0_72, %c0_73] : memref<256x128xf32, #tpu.memory_space<vmem>>, vector<256x128xf32>
    %c5 = arith.constant 5 : index
    %c0_74 = arith.constant 0 : index
    %c0_75 = arith.constant 0 : index
    %80 = vector.load %arg3[%c5, %c0_74, %c0_75] : memref<9x128x128xf32, #tpu.memory_space<vmem>>, vector<1x128x128xf32>
    %81 = vector.shape_cast %80 : vector<1x128x128xf32> to vector<128x128xf32>
    %cst_76 = arith.constant dense<0.000000e+00> : vector<256x128xf32>
    %82 = tpu.matmul %78, %81, %cst_76 {dimension_numbers = #tpu.dot_dimension_numbers<[1], [0], [0], [1], [0, 0, 1, 1], [], []>} : vector<256x128xf32>, vector<128x128xf32>, vector<256x128xf32> -> vector<256x128xf32>
    %83 = arith.addf %79, %82 : vector<256x128xf32>
    %c0_77 = arith.constant 0 : index
    %c0_78 = arith.constant 0 : index
    %84 = vector.load %arg9[%c0_77, %c0_78] : memref<256x128xf32, #tpu.memory_space<vmem>>, vector<256x128xf32>
    tpu.vector_store %arg9[%c0_77, %c0_78], %83 {strides = array<i32>} : memref<256x128xf32, #tpu.memory_space<vmem>>, vector<256x128xf32>,
    %c2_79 = arith.constant 2 : index
    %c0_80 = arith.constant 0 : index
    %c0_81 = arith.constant 0 : index
    %85 = vector.load %arg8[%c2_79, %c0_80, %c0_81] : memref<18x18x128xf32, #tpu.memory_space<vmem>>, vector<16x16x128xf32>
    %86 = vector.shape_cast %85 : vector<16x16x128xf32> to vector<256x128xf32>
    %c0_82 = arith.constant 0 : index
    %c0_83 = arith.constant 0 : index
    %87 = vector.load %arg9[%c0_82, %c0_83] : memref<256x128xf32, #tpu.memory_space<vmem>>, vector<256x128xf32>
    %c6 = arith.constant 6 : index
    %c0_84 = arith.constant 0 : index
    %c0_85 = arith.constant 0 : index
    %88 = vector.load %arg3[%c6, %c0_84, %c0_85] : memref<9x128x128xf32, #tpu.memory_space<vmem>>, vector<1x128x128xf32>
    %89 = vector.shape_cast %88 : vector<1x128x128xf32> to vector<128x128xf32>
    %cst_86 = arith.constant dense<0.000000e+00> : vector<256x128xf32>
    %90 = tpu.matmul %86, %89, %cst_86 {dimension_numbers = #tpu.dot_dimension_numbers<[1], [0], [0], [1], [0, 0, 1, 1], [], []>} : vector<256x128xf32>, vector<128x128xf32>, vector<256x128xf32> -> vector<256x128xf32>
    %91 = arith.addf %87, %90 : vector<256x128xf32>
    %c0_87 = arith.constant 0 : index
    %c0_88 = arith.constant 0 : index
    %92 = vector.load %arg9[%c0_87, %c0_88] : memref<256x128xf32, #tpu.memory_space<vmem>>, vector<256x128xf32>
    tpu.vector_store %arg9[%c0_87, %c0_88], %91 {strides = array<i32>} : memref<256x128xf32, #tpu.memory_space<vmem>>, vector<256x128xf32>,
    %c2_89 = arith.constant 2 : index
    %c1_90 = arith.constant 1 : index
    %c0_91 = arith.constant 0 : index
    %93 = vector.load %arg8[%c2_89, %c1_90, %c0_91] : memref<18x18x128xf32, #tpu.memory_space<vmem>>, vector<16x16x128xf32>
    %94 = vector.shape_cast %93 : vector<16x16x128xf32> to vector<256x128xf32>
    %c0_92 = arith.constant 0 : index
    %c0_93 = arith.constant 0 : index
    %95 = vector.load %arg9[%c0_92, %c0_93] : memref<256x128xf32, #tpu.memory_space<vmem>>, vector<256x128xf32>
    %c7 = arith.constant 7 : index
    %c0_94 = arith.constant 0 : index
    %c0_95 = arith.constant 0 : index
    %96 = vector.load %arg3[%c7, %c0_94, %c0_95] : memref<9x128x128xf32, #tpu.memory_space<vmem>>, vector<1x128x128xf32>
    %97 = vector.shape_cast %96 : vector<1x128x128xf32> to vector<128x128xf32>
    %cst_96 = arith.constant dense<0.000000e+00> : vector<256x128xf32>
    %98 = tpu.matmul %94, %97, %cst_96 {dimension_numbers = #tpu.dot_dimension_numbers<[1], [0], [0], [1], [0, 0, 1, 1], [], []>} : vector<256x128xf32>, vector<128x128xf32>, vector<256x128xf32> -> vector<256x128xf32>
    %99 = arith.addf %95, %98 : vector<256x128xf32>
    %c0_97 = arith.constant 0 : index
    %c0_98 = arith.constant 0 : index
    %100 = vector.load %arg9[%c0_97, %c0_98] : memref<256x128xf32, #tpu.memory_space<vmem>>, vector<256x128xf32>
    tpu.vector_store %arg9[%c0_97, %c0_98], %99 {strides = array<i32>} : memref<256x128xf32, #tpu.memory_space<vmem>>, vector<256x128xf32>,
    %c2_99 = arith.constant 2 : index
    %c2_100 = arith.constant 2 : index
    %c0_101 = arith.constant 0 : index
    %101 = vector.load %arg8[%c2_99, %c2_100, %c0_101] : memref<18x18x128xf32, #tpu.memory_space<vmem>>, vector<16x16x128xf32>
    %102 = vector.shape_cast %101 : vector<16x16x128xf32> to vector<256x128xf32>
    %c0_102 = arith.constant 0 : index
    %c0_103 = arith.constant 0 : index
    %103 = vector.load %arg9[%c0_102, %c0_103] : memref<256x128xf32, #tpu.memory_space<vmem>>, vector<256x128xf32>
    %c8 = arith.constant 8 : index
    %c0_104 = arith.constant 0 : index
    %c0_105 = arith.constant 0 : index
    %104 = vector.load %arg3[%c8, %c0_104, %c0_105] : memref<9x128x128xf32, #tpu.memory_space<vmem>>, vector<1x128x128xf32>
    %105 = vector.shape_cast %104 : vector<1x128x128xf32> to vector<128x128xf32>
    %cst_106 = arith.constant dense<0.000000e+00> : vector<256x128xf32>
    %106 = tpu.matmul %102, %105, %cst_106 {dimension_numbers = #tpu.dot_dimension_numbers<[1], [0], [0], [1], [0, 0, 1, 1], [], []>} : vector<256x128xf32>, vector<128x128xf32>, vector<256x128xf32> -> vector<256x128xf32>
    %107 = arith.addf %103, %106 : vector<256x128xf32>
    %c0_107 = arith.constant 0 : index
    %c0_108 = arith.constant 0 : index
    %108 = vector.load %arg9[%c0_107, %c0_108] : memref<256x128xf32, #tpu.memory_space<vmem>>, vector<256x128xf32>
    tpu.vector_store %arg9[%c0_107, %c0_108], %107 {strides = array<i32>} : memref<256x128xf32, #tpu.memory_space<vmem>>, vector<256x128xf32>,
    %c0_109 = arith.constant 0 : index
    %c0_110 = arith.constant 0 : index
    %109 = vector.load %arg9[%c0_109, %c0_110] : memref<256x128xf32, #tpu.memory_space<vmem>>, vector<256x128xf32>
    %110 = vector.shape_cast %109 : vector<256x128xf32> to vector<16x16x128xf32>
    %c0_111 = arith.constant 0 : index
    %c0_112 = arith.constant 0 : index
    %c0_113 = arith.constant 0 : index
    %c0_114 = arith.constant 0 : index
    %111 = vector.load %arg6[%c0_111, %c0_112, %c0_113, %c0_114] : memref<1x16x16x128xf32, #tpu.memory_space<vmem>>, vector<1x16x16x128xf32>
    %112 = vector.shape_cast %111 : vector<1x16x16x128xf32> to vector<16x16x128xf32>
    %113 = vector.shape_cast %110 : vector<16x16x128xf32> to vector<1x16x16x128xf32>
    tpu.vector_store %arg6[%c0_111, %c0_112, %c0_113, %c0_114], %113 {strides = array<i32>} : memref<1x16x16x128xf32, #tpu.memory_space<vmem>>, vector<1x16x16x128xf32>,
    %cst_115 = arith.constant dense<0.000000e+00> : vector<128xf32>
    %114 = vector.multi_reduction <add>, %109, %cst_115 [0] : vector<256x128xf32> to vector<128xf32>
    %115 = vector.shape_cast %114 : vector<128xf32> to vector<1x128xf32>
    %c0_116 = arith.constant 0 : index
    %c0_117 = arith.constant 0 : index
    %c0_118 = arith.constant 0 : index
    %c0_119 = arith.constant 0 : index
    %116 = vector.load %arg7[%c0_116, %c0_117, %c0_118, %c0_119] : memref<1x1x2x128xf32, #tpu.memory_space<vmem>>, vector<1x1x1x128xf32>
    %117 = vector.shape_cast %116 : vector<1x1x1x128xf32> to vector<1x128xf32>
    %118 = vector.shape_cast %115 : vector<1x128xf32> to vector<1x1x1x128xf32>
    tpu.vector_store %arg7[%c0_116, %c0_117, %c0_118, %c0_119], %118 {strides = array<i32>} : memref<1x1x2x128xf32, #tpu.memory_space<vmem>>, vector<1x1x1x128xf32>,
    %119 = arith.mulf %109, %109 : vector<256x128xf32>
    %cst_120 = arith.constant dense<0.000000e+00> : vector<128xf32>
    %120 = vector.multi_reduction <add>, %119, %cst_120 [0] : vector<256x128xf32> to vector<128xf32>
    %121 = vector.shape_cast %120 : vector<128xf32> to vector<1x128xf32>
    %c0_121 = arith.constant 0 : index
    %c0_122 = arith.constant 0 : index
    %c1_123 = arith.constant 1 : index
    %c0_124 = arith.constant 0 : index
    %122 = vector.load %arg7[%c0_121, %c0_122, %c1_123, %c0_124] : memref<1x1x2x128xf32, #tpu.memory_space<vmem>>, vector<1x1x1x128xf32>
    %123 = vector.shape_cast %122 : vector<1x1x1x128xf32> to vector<1x128xf32>
    %124 = vector.shape_cast %121 : vector<1x128xf32> to vector<1x1x1x128xf32>
    tpu.vector_store %arg7[%c0_121, %c0_122, %c1_123, %c0_124], %124 {strides = array<i32>} : memref<1x1x2x128xf32, #tpu.memory_space<vmem>>, vector<1x1x1x128xf32>,
    return
  }
  func.func @transform_0(%arg0: i32, %arg1: i32) -> (i32, i32, i32, i32, i32) {
    %c0_i32 = arith.constant 0 : i32
    %c0_i32_0 = arith.constant 0 : i32
    %c0_i32_1 = arith.constant 0 : i32
    %c0_i32_2 = arith.constant 0 : i32
    return %arg0, %arg1, %c0_i32, %c0_i32_0, %c0_i32_1 : i32, i32, i32, i32, i32
  }
  func.func @transform_1(%arg0: i32, %arg1: i32) -> (i32, i32, i32) {
    %c0_i32 = arith.constant 0 : i32
    %c0_i32_0 = arith.constant 0 : i32
    %c0_i32_1 = arith.constant 0 : i32
    %c0_i32_2 = arith.constant 0 : i32
    return %c0_i32, %c0_i32_0, %c0_i32_1 : i32, i32, i32
  }
  func.func @transform_2(%arg0: i32, %arg1: i32) -> (i32, i32) {
    %c0_i32 = arith.constant 0 : i32
    %c0_i32_0 = arith.constant 0 : i32
    %c0_i32_1 = arith.constant 0 : i32
    return %c0_i32, %c0_i32_0 : i32, i32
  }
  func.func @transform_3(%arg0: i32, %arg1: i32) -> (i32, i32) {
    %c0_i32 = arith.constant 0 : i32
    %c0_i32_0 = arith.constant 0 : i32
    %c0_i32_1 = arith.constant 0 : i32
    return %c0_i32, %c0_i32_0 : i32, i32
  }
  func.func @transform_4(%arg0: i32, %arg1: i32) -> (i32, i32, i32, i32) {
    %c0_i32 = arith.constant 0 : i32
    %c0_i32_0 = arith.constant 0 : i32
    %c0_i32_1 = arith.constant 0 : i32
    return %arg0, %arg1, %c0_i32, %c0_i32_0 : i32, i32, i32, i32
  }
  func.func @transform_5(%arg0: i32, %arg1: i32) -> (i32, i32, i32, i32) {
    %c0_i32 = arith.constant 0 : i32
    %c0_i32_0 = arith.constant 0 : i32
    %c0_i32_1 = arith.constant 0 : i32
    return %arg0, %arg1, %c0_i32, %c0_i32_0 : i32, i32, i32, i32
  }
}

module attributes {stable_mosaic.version = 11 : i64} {
  func.func @bn_relu_pool_kernel(%arg0: i32, %arg1: i32, %arg2: memref<1x8x2x8x256xf32, #tpu.memory_space<vmem>>, %arg3: memref<1x256xf32, #tpu.memory_space<vmem>>, %arg4: memref<1x256xf32, #tpu.memory_space<vmem>>, %arg5: memref<1x8x2x8x256xf32, #tpu.memory_space<vmem>>, %arg6: memref<1x8x8x128xf32, #tpu.memory_space<vmem>>) attributes {dimension_semantics = [#tpu.dimension_semantics<parallel>, #tpu.dimension_semantics<parallel>], iteration_bounds = array<i64: 2, 1>, scalar_prefetch = 0 : i64, scratch_operands = 0 : i64, tpu.core_type = #tpu.core_type<tc>, window_params = [{transform_indices = @transform_0, window_bounds = array<i64: 1, 8, 2, 8, 256>}, {pipeline_mode = #tpu.pipeline_mode<synchronous>, transform_indices = @transform_1, window_bounds = array<i64: 1, 256>}, {pipeline_mode = #tpu.pipeline_mode<synchronous>, transform_indices = @transform_2, window_bounds = array<i64: 1, 256>}, {transform_indices = @transform_3, window_bounds = array<i64: 1, 8, 2, 8, 256>}, {transform_indices = @transform_4, window_bounds = array<i64: 1, 8, 8, 128>}]} {
    %c0 = arith.constant 0 : index
    %c0_0 = arith.constant 0 : index
    %c0_1 = arith.constant 0 : index
    %c0_2 = arith.constant 0 : index
    %c0_3 = arith.constant 0 : index
    %0 = vector.load %arg2[%c0, %c0_0, %c0_1, %c0_2, %c0_3] : memref<1x8x2x8x256xf32, #tpu.memory_space<vmem>>, vector<1x8x2x8x256xf32>
    %1 = vector.shape_cast %0 : vector<1x8x2x8x256xf32> to vector<8x2x8x256xf32>
    %c0_4 = arith.constant 0 : index
    %c0_5 = arith.constant 0 : index
    %2 = vector.load %arg3[%c0_4, %c0_5] : memref<1x256xf32, #tpu.memory_space<vmem>>, vector<1x256xf32>
    %3 = vector.shape_cast %2 : vector<1x256xf32> to vector<256xf32>
    %4 = vector.shape_cast %3 : vector<256xf32> to vector<1x1x1x256xf32>
    %5 = vector.broadcast %4 : vector<1x1x1x256xf32> to vector<8x2x8x256xf32>
    %6 = arith.mulf %1, %5 : vector<8x2x8x256xf32>
    %c0_6 = arith.constant 0 : index
    %c0_7 = arith.constant 0 : index
    %7 = vector.load %arg4[%c0_6, %c0_7] : memref<1x256xf32, #tpu.memory_space<vmem>>, vector<1x256xf32>
    %8 = vector.shape_cast %7 : vector<1x256xf32> to vector<256xf32>
    %9 = vector.shape_cast %8 : vector<256xf32> to vector<1x1x1x256xf32>
    %10 = vector.broadcast %9 : vector<1x1x1x256xf32> to vector<8x2x8x256xf32>
    %11 = arith.addf %6, %10 : vector<8x2x8x256xf32>
    %cst = arith.constant 0.000000e+00 : f32
    %12 = vector.broadcast %cst : f32 to vector<8x2x8x256xf32>
    %13 = arith.maximumf %11, %12 : vector<8x2x8x256xf32>
    %c0_8 = arith.constant 0 : index
    %c0_9 = arith.constant 0 : index
    %c0_10 = arith.constant 0 : index
    %c0_11 = arith.constant 0 : index
    %c0_12 = arith.constant 0 : index
    %14 = vector.load %arg5[%c0_8, %c0_9, %c0_10, %c0_11, %c0_12] : memref<1x8x2x8x256xf32, #tpu.memory_space<vmem>>, vector<1x8x2x8x256xf32>
    %15 = vector.shape_cast %14 : vector<1x8x2x8x256xf32> to vector<8x2x8x256xf32>
    %16 = vector.shape_cast %13 : vector<8x2x8x256xf32> to vector<1x8x2x8x256xf32>
    tpu.vector_store %arg5[%c0_8, %c0_9, %c0_10, %c0_11, %c0_12], %16 {strides = array<i32>} : memref<1x8x2x8x256xf32, #tpu.memory_space<vmem>>, vector<1x8x2x8x256xf32>,
    %17 = vector.extract_strided_slice %13 {offsets = [0, 0, 0, 0], sizes = [8, 1, 8, 256], strides = [1, 1, 1, 1]} : vector<8x2x8x256xf32> to vector<8x1x8x256xf32>
    %18 = vector.shape_cast %17 : vector<8x1x8x256xf32> to vector<8x8x256xf32>
    %19 = vector.extract_strided_slice %13 {offsets = [0, 1, 0, 0], sizes = [8, 1, 8, 256], strides = [1, 1, 1, 1]} : vector<8x2x8x256xf32> to vector<8x1x8x256xf32>
    %20 = vector.shape_cast %19 : vector<8x1x8x256xf32> to vector<8x8x256xf32>
    %21 = arith.maximumf %18, %20 : vector<8x8x256xf32>
    %22 = vector.extract_strided_slice %21 {offsets = [0, 0, 0], sizes = [8, 8, 128], strides = [1, 1, 1]} : vector<8x8x256xf32> to vector<8x8x128xf32>
    %23 = vector.extract_strided_slice %21 {offsets = [0, 0, 128], sizes = [8, 8, 128], strides = [1, 1, 1]} : vector<8x8x256xf32> to vector<8x8x128xf32>
    %24 = arith.maximumf %22, %23 : vector<8x8x128xf32>
    %c0_13 = arith.constant 0 : index
    %c0_14 = arith.constant 0 : index
    %c0_15 = arith.constant 0 : index
    %c0_16 = arith.constant 0 : index
    %25 = vector.load %arg6[%c0_13, %c0_14, %c0_15, %c0_16] : memref<1x8x8x128xf32, #tpu.memory_space<vmem>>, vector<1x8x8x128xf32>
    %26 = vector.shape_cast %25 : vector<1x8x8x128xf32> to vector<8x8x128xf32>
    %27 = vector.shape_cast %24 : vector<8x8x128xf32> to vector<1x8x8x128xf32>
    tpu.vector_store %arg6[%c0_13, %c0_14, %c0_15, %c0_16], %27 {strides = array<i32>} : memref<1x8x8x128xf32, #tpu.memory_space<vmem>>, vector<1x8x8x128xf32>,
    return
  }
  func.func @transform_0(%arg0: i32, %arg1: i32) -> (i32, i32, i32, i32, i32) {
    %c0_i32 = arith.constant 0 : i32
    %c0_i32_0 = arith.constant 0 : i32
    %c0_i32_1 = arith.constant 0 : i32
    %c0_i32_2 = arith.constant 0 : i32
    return %arg0, %arg1, %c0_i32, %c0_i32_0, %c0_i32_1 : i32, i32, i32, i32, i32
  }
  func.func @transform_1(%arg0: i32, %arg1: i32) -> (i32, i32) {
    %c0_i32 = arith.constant 0 : i32
    %c0_i32_0 = arith.constant 0 : i32
    %c0_i32_1 = arith.constant 0 : i32
    return %c0_i32, %c0_i32_0 : i32, i32
  }
  func.func @transform_2(%arg0: i32, %arg1: i32) -> (i32, i32) {
    %c0_i32 = arith.constant 0 : i32
    %c0_i32_0 = arith.constant 0 : i32
    %c0_i32_1 = arith.constant 0 : i32
    return %c0_i32, %c0_i32_0 : i32, i32
  }
  func.func @transform_3(%arg0: i32, %arg1: i32) -> (i32, i32, i32, i32, i32) {
    %c0_i32 = arith.constant 0 : i32
    %c0_i32_0 = arith.constant 0 : i32
    %c0_i32_1 = arith.constant 0 : i32
    %c0_i32_2 = arith.constant 0 : i32
    return %arg0, %arg1, %c0_i32, %c0_i32_0, %c0_i32_1 : i32, i32, i32, i32, i32
  }
  func.func @transform_4(%arg0: i32, %arg1: i32) -> (i32, i32, i32, i32) {
    %c0_i32 = arith.constant 0 : i32
    %c0_i32_0 = arith.constant 0 : i32
    %c0_i32_1 = arith.constant 0 : i32
    return %arg0, %arg1, %c0_i32, %c0_i32_0 : i32, i32, i32, i32
  }
}

</mosaic_0001>

<bundles_post_ra>
// kernel: encoder_block_forward.5
= control target key start
LH: loop header
LB: loop body
LE: loop exit
PB: predicated region body
PF: predicated region fallthrough
CT: control target
= control target key end

     0   :  { %10 = vsyncpa [#allocation3], 0  ;;  %s1095_s0 = inlined_call_operand.vmem [shape: f32[2,8,2,8,256], index: 0, kind: input, shape index: {}]   ;;  %s1096_s1 = inlined_call_operand.vmem [shape: f32[1,256], index: 1, kind: input, shape index: {}]   ;;  %s1097_s2 = inlined_call_operand.vmem [shape: f32[1,256], index: 2, kind: input, shape index: {}]   ;;  %s1098_s3 = inlined_call_operand.vmem [shape: f32[2,8,2,8,256], index: 3, kind: output, shape index: {0}]   ;;  %s1099_s4 = inlined_call_operand.hbm [shape: f32[2,8,8,128], index: 4, kind: output, shape index: {1}]  }
   0x1   :  { %12 = vsyncpa [#allocation3 + $0x1], 0  ;;  %s807_s15 = smov 0   ;;  %s809_s16 = smov 0  }
   0x2   :  { %s811_s17 = smov 0   ;;  %s813_s18 = smov 0  }
   0x3   :  { %s815_s19 = smov 0   ;;  %s817_s20 = smov 0  }
   0x4 LB: > { %s626_s21 = sadd.s32 4294967295, %s777_s20   ;;  %s627_s22 = sadd.s32 4294967294, %s777_s20   ;;  %s777_s20 = sphi %s817_s20, %s18_s20   ;;  %s773_s19 = sphi %s815_s19, %s1106_s19   ;;  %s769_s18 = sphi %s813_s18, %s1105_s18   ;;  %s765_s17 = sphi %s811_s17, %s1104_s17   ;;  %s761_s16 = sphi %s809_s16, %s1103_s16   ;;  %s757_s15 = sphi %s807_s15, %s1102_s15  }
   0x5   : > { %s30_s23 = sadd.s32 1, %s773_s19  ;;  %s137_s24 = sadd.s32 1, %s765_s17 }
   0x6   : > { %p32_p0 = scmp.ge.s32.totalorder %s30_s23, 2  ;;  %p147_p1 = scmp.ne.s32.totalorder %s765_s17, %s761_s16 }
   0x7   : > { %p148_p2 = scmp.eq.s32.totalorder %s626_s21, 1  ;;  %p153_p3 = scmp.ne.s32.totalorder %s761_s16, %s757_s15 }
   0x8   : > { %s1108_s23 = smov (%p32_p0, %s30_s23), 0  ;;  %p154_p5 = scmp.eq.s32.totalorder %s627_s22, 1 }
   0x9   : > { %p847_p4 = por %p148_p2, %p147_p1  ;;  %s132_s26 = ssub.s32 %s773_s19, %s1108_s23 }
   0xa   : > { %p630_p6 = scmp.ge.s32.totalorder %s777_s20, 1  ;;  %p135_p7 = scmp.eq.s32.totalorder %s132_s26, 0 }
   0xb   : > { %p854_p8 = por %p154_p5, %p153_p3  ;;  %p192_p9 = scmp.lt.s32.totalorder %s777_s20, 3 }
   0xc   : > { %s860_s28 = scalar_select %p135_p7, %s765_s17, %s137_s24  }
   0xd   : > { %p193_p10 = pnand %p630_p6, %p192_p9 }
   0xe   : > { %p234_p11 = scmp.lt.s32.totalorder (!%p193_p10), %s769_s18, 1  ;;  %s230_s12 = sand.u32 (!%p193_p10), 1, %s761_s16  }
   0xf   : > { %196 = sbr.rel (%p193_p10) target bundleno = 79 (0x4f), region = 32  ;;  %s925_s22 = sshll.u32 (!%p193_p10), %s230_s12, 6 }
  0x10   : > { %s954_s24 = scalar_lea.vmem (!%p193_p10), [#allocation2], %s925_s22 }
  0x11   : > { %s502_s26 = sshll.u32 (!%p193_p10), %s954_s24, 4  ;;  %s1040_s26 = int_to_ptr.vmem [resolvable:$true] %s502_s26 }
  0x12   : > { %s701_s7 = scalar_lea.vmem (!%p193_p10), %s1040_s26, 1024 }
  0x13   : > { %p702_p12 = scmp.ne.s32.totalorder (!%p193_p10), %s1040_s26, %s701_s7 }
  0x14   : > { %v290_v0 = vlaneseq  ;;  %s864_s29 = scalar_select %p234_p11, %s769_s18, 1  ;;  %v288_v2 = vld [vmem:[%s1096_s1] sm:$0x3] }
  0x15   : > { %v332_v3 = vld [vmem:[%s1097_s2] sm:$0x3]  ;;  %p703_p13 = pnand %p702_p12, %p847_p4 }
  0x16   : > { %v291_v1 = vshrl.u32 %v290_v0, 7  ;;  %s641_s8 = sshll.u32 %s864_s29, 8  ;;  %s643_s29 = sshll.u32 %s769_s18, 10 }
  0x17   : > { %s878_s11 = scalar_lea.vmem %s1095_s0, %s641_s8  ;;  %s918_s21 = scalar_lea.vmem %s1098_s3, %s641_s8 }
  0x18   : > { %v292_v4 = vsub.s32 0, %v291_v1  ;;  %v296_v5 = vsub.s32 1, %v291_v1  ;;  %v256_v10 = vld [vmem:[%s878_s11] sm:$0xff]  ;;  %v257_v11 = vld [vmem:[%s878_s11 + $0x8] sm:$0xff]  ;;  %v258_v12 = vld [vmem:[%s878_s11 + $0x10] sm:$0xff]  ;;  %s1045_s6 = scalar_lea.hbm %s1099_s4, %s643_s29  ;;  %s1050_s18 = scalar_lea.sflag [#allocation3], %s230_s12 }
  0x19   : > { %v259_v13 = vld [vmem:[%s878_s11 + $0x18] sm:$0xff]  ;;  %v260_v17 = vld [vmem:[%s878_s11 + $0x20] sm:$0xff]  ;;  %v261_v18 = vld [vmem:[%s878_s11 + $0x28] sm:$0xff]  ;;  %p704_p0 = pneg %p703_p13  ;;  %s779_s8 = smov [#allocation2]  }
  0x1a   : > { %v880_v6 = vrot.slane %v288_v2, %v292_v4  ;;  %v882_v7 = vrot.slane %v288_v2, %v296_v5  ;;  %v884_v8 = vrot.slane %v332_v3, %v292_v4  ;;  %v886_v9 = vrot.slane %v332_v3, %v296_v5  ;;  %v262_v20 = vld [vmem:[%s878_s11 + $0x30] sm:$0xff]  ;;  %v263_v21 = vld [vmem:[%s878_s11 + $0x38] sm:$0xff]  ;;  %v264_v32 = vld [vmem:[%s878_s11 + $0x40] sm:$0xff]  ;;  %s705_s9 = sshll.u32 %s779_s8, 4  ;;  %s706_s9 = int_to_ptr.vmem [resolvable:$false] %s705_s9 }
  0x1b   : > { %v265_v33 = vld [vmem:[%s878_s11 + $0x48] sm:$0xff]  ;;  %v266_v38 = vld [vmem:[%s878_s11 + $0x50] sm:$0xff]  ;;  %v267_v39 = vld [vmem:[%s878_s11 + $0x58] sm:$0xff]  ;;  %s707_s10 = scalar_lea.vmem %s706_s9, 2048  ;;  %p708_p1 = scmp.lt.s32.totalorder %s1040_s26, %s706_s9 }
  0x1c   : > { %v300_v14 = vmul.f32 %v880_v6, %v256_v10  ;;  %v301_v15 = vmul.f32 %v882_v7, %v257_v11  ;;  %v302_v16 = vmul.f32 %v880_v6, %v258_v12  ;;  %v303_v19 = vmul.f32 %v882_v7, %v259_v13  ;;  %v268_v44 = vld [vmem:[%s878_s11 + $0x60] sm:$0xff]  ;;  %v269_v53 = vld [vmem:[%s878_s11 + $0x68] sm:$0xff]  ;;  %v270_v54 = vld [vmem:[%s878_s11 + $0x70] sm:$0xff]  ;;  %p709_p2 = scmp.lt.s32.totalorder %s707_s10, %s701_s7 }
  0x1d   : > { %v304_v22 = vmul.f32 %v880_v6, %v260_v17  ;;  %v305_v23 = vmul.f32 %v882_v7, %v261_v18  ;;  %v306_v27 = vmul.f32 %v880_v6, %v262_v20  ;;  %v307_v29 = vmul.f32 %v882_v7, %v263_v21  ;;  %v271_v58 = vld [vmem:[%s878_s11 + $0x78] sm:$0xff]  ;;  %v272_v0 = vld [vmem:[%s878_s11 + $0x80] sm:$0xff]  ;;  %v273_v5 = vld [vmem:[%s878_s11 + $0x88] sm:$0xff] }
  0x1e   : > { %v344_v24 = vadd.f32 %v884_v8, %v300_v14  ;;  %v345_v25 = vadd.f32 %v886_v9, %v301_v15  ;;  %v346_v26 = vadd.f32 %v884_v8, %v302_v16  ;;  %v347_v28 = vadd.f32 %v886_v9, %v303_v19  ;;  %v274_v14 = vld [vmem:[%s878_s11 + $0x90] sm:$0xff]  ;;  %v275_v18 = vld [vmem:[%s878_s11 + $0x98] sm:$0xff]  ;;  %p710_p3 = por %p709_p2, %p708_p1 }
  0x1f   : > { %v348_v30 = vadd.f32 %v884_v8, %v304_v22  ;;  %v349_v31 = vadd.f32 %v886_v9, %v305_v23  ;;  %v350_v37 = vadd.f32 %v884_v8, %v306_v27  ;;  %v351_v41 = vadd.f32 %v886_v9, %v307_v29  ;;  %v277_v29 = vld [vmem:[%s878_s11 + $0xa8] sm:$0xff] }
  0x20   : > { %v376_v34 = vmax.f32 %v344_v24, 0.0  ;;  %v377_v35 = vmax.f32 %v345_v25, 0.0  ;;  %v378_v36 = vmax.f32 %v346_v26, 0.0  ;;  %v379_v40 = vmax.f32 %v347_v28, 0.0  ;;  %v276_v24 = vld [vmem:[%s878_s11 + $0xa0] sm:$0xff]  ;;  %p711_p5 = pnand %p710_p3, %p704_p0 }
  0x21   : > { %v380_v42 = vmax.f32 %v348_v30, 0.0  ;;  %v381_v43 = vmax.f32 %v349_v31, 0.0  ;;  %v382_v46 = vmax.f32 %v350_v37, 0.0  ;;  %v308_v47 = vmul.f32 %v880_v6, %v264_v32 }
  0x22   : > { %v440_v45 = vmax.f32 %v376_v34, %v378_v36  ;;  %v309_v48 = vmul.f32 %v882_v7, %v265_v33  ;;  %408 = vst [vmem:[%s918_s21] sm:$0xff] %v376_v34  ;;  %409 = vst [vmem:[%s918_s21 + $0x8] sm:$0xff] %v377_v35  ;;  %v441_v49 = vmax.f32 %v377_v35, %v379_v40  ;;  %v383_v50 = vmax.f32 %v351_v41, 0.0  ;;  %v278_v34 = vld [vmem:[%s878_s11 + $0xb0] sm:$0xff]  ;;  %v279_v35 = vld [vmem:[%s878_s11 + $0xb8] sm:$0xff] }
  0x23   : > { %410 = vst [vmem:[%s918_s21 + $0x10] sm:$0xff] %v378_v36  ;;  %v310_v51 = vmul.f32 %v880_v6, %v266_v38  ;;  %v311_v52 = vmul.f32 %v882_v7, %v267_v39  ;;  %411 = vst [vmem:[%s918_s21 + $0x18] sm:$0xff] %v379_v40  ;;  %v442_v55 = vmax.f32 %v380_v42, %v382_v46 }
  0x24   : > { %412 = vst [vmem:[%s918_s21 + $0x20] sm:$0xff] %v380_v42  ;;  %413 = vst [vmem:[%s918_s21 + $0x28] sm:$0xff] %v381_v43  ;;  %v352_v56 = vadd.f32 %v884_v8, %v308_v47  ;;  %v353_v57 = vadd.f32 %v886_v9, %v309_v48  ;;  %v312_v59 = vmul.f32 %v880_v6, %v268_v44  ;;  %v280_v44 = vld [vmem:[%s878_s11 + $0xc0] sm:$0xff] }
  0x25   : > { %414 = vst [vmem:[%s918_s21 + $0x30] sm:$0xff] %v382_v46  ;;  %v456_v60 = vmax.f32 %v440_v45, %v441_v49  ;;  %v443_v61 = vmax.f32 %v381_v43, %v383_v50  ;;  %v354_v62 = vadd.f32 %v884_v8, %v310_v51  ;;  %v355_v63 = vadd.f32 %v886_v9, %v311_v52  ;;  %v281_v49 = vld [vmem:[%s878_s11 + $0xc8] sm:$0xff] }
  0x26   : > { %415 = vst [vmem:[%s918_s21 + $0x38] sm:$0xff] %v383_v50  ;;  %v384_v1 = vmax.f32 %v352_v56, 0.0  ;;  %v385_v2 = vmax.f32 %v353_v57, 0.0  ;;  %v313_v3 = vmul.f32 %v882_v7, %v269_v53  ;;  %v314_v4 = vmul.f32 %v880_v6, %v270_v54  ;;  %v282_v54 = vld [vmem:[%s878_s11 + $0xd0] sm:$0xff] }
  0x27   : > { %464 = vst [vmem:[%s954_s24] sm:$0xff] %v456_v60  ;;  %v457_v10 = vmax.f32 %v442_v55, %v443_v61  ;;  %v386_v11 = vmax.f32 %v354_v62, 0.0  ;;  %v387_v12 = vmax.f32 %v355_v63, 0.0  ;;  %v315_v13 = vmul.f32 %v882_v7, %v271_v58  ;;  %v283_v55 = vld [vmem:[%s878_s11 + $0xd8] sm:$0xff]  ;;  %v284_v60 = vld [vmem:[%s878_s11 + $0xe0] sm:$0xff] }
  0x28   : > { %v356_v15 = vadd.f32 %v884_v8, %v312_v59  ;;  %v357_v16 = vadd.f32 %v886_v9, %v313_v3  ;;  %v358_v17 = vadd.f32 %v884_v8, %v314_v4  ;;  %v316_v19 = vmul.f32 %v880_v6, %v272_v0  ;;  %416 = vst [vmem:[%s918_s21 + $0x40] sm:$0xff] %v384_v1 }
  0x29   : > { %417 = vst [vmem:[%s918_s21 + $0x48] sm:$0xff] %v385_v2  ;;  %465 = vst [vmem:[%s954_s24 + $0x8] sm:$0xff] %v457_v10  ;;  %v444_v20 = vmax.f32 %v384_v1, %v386_v11  ;;  %v445_v21 = vmax.f32 %v385_v2, %v387_v12  ;;  %v359_v22 = vadd.f32 %v886_v9, %v315_v13  ;;  %v286_v10 = vld [vmem:[%s878_s11 + $0xf0] sm:$0xff] }
  0x2a   : > { %v317_v23 = vmul.f32 %v882_v7, %v273_v5  ;;  %418 = vst [vmem:[%s918_s21 + $0x50] sm:$0xff] %v386_v11  ;;  %419 = vst [vmem:[%s918_s21 + $0x58] sm:$0xff] %v387_v12  ;;  %v388_v25 = vmax.f32 %v356_v15, 0.0  ;;  %v389_v26 = vmax.f32 %v357_v16, 0.0  ;;  %v390_v27 = vmax.f32 %v358_v17, 0.0  ;;  %v285_v5 = vld [vmem:[%s878_s11 + $0xe8] sm:$0xff] }
  0x2b   : > { %v318_v28 = vmul.f32 %v880_v6, %v274_v14  ;;  %v458_v30 = vmax.f32 %v444_v20, %v445_v21  ;;  %v391_v31 = vmax.f32 %v359_v22, 0.0  ;;  %v319_v32 = vmul.f32 %v882_v7, %v275_v18  ;;  %v287_v14 = vld [vmem:[%s878_s11 + $0xf8] sm:$0xff] }
  0x2c   : > { %v360_v33 = vadd.f32 %v884_v8, %v316_v19  ;;  %v446_v36 = vmax.f32 %v388_v25, %v390_v27  ;;  %v361_v37 = vadd.f32 %v886_v9, %v317_v23  ;;  %v320_v39 = vmul.f32 %v880_v6, %v276_v24  ;;  %420 = vst [vmem:[%s918_s21 + $0x60] sm:$0xff] %v388_v25 }
  0x2d   : > { %v362_v38 = vadd.f32 %v884_v8, %v318_v28  ;;  %421 = vst [vmem:[%s918_s21 + $0x68] sm:$0xff] %v389_v26  ;;  %422 = vst [vmem:[%s918_s21 + $0x70] sm:$0xff] %v390_v27  ;;  %v447_v40 = vmax.f32 %v389_v26, %v391_v31  ;;  %v363_v41 = vadd.f32 %v886_v9, %v319_v32 }
  0x2e   : > { %466 = vst [vmem:[%s954_s24 + $0x10] sm:$0xff] %v458_v30  ;;  %v392_v42 = vmax.f32 %v360_v33, 0.0  ;;  %v321_v43 = vmul.f32 %v882_v7, %v277_v29  ;;  %423 = vst [vmem:[%s918_s21 + $0x78] sm:$0xff] %v391_v31  ;;  %v393_v45 = vmax.f32 %v361_v37, 0.0  ;;  %v322_v47 = vmul.f32 %v880_v6, %v278_v34 }
  0x2f   : > { %v394_v46 = vmax.f32 %v362_v38, 0.0  ;;  %v323_v48 = vmul.f32 %v882_v7, %v279_v35  ;;  %v459_v50 = vmax.f32 %v446_v36, %v447_v40  ;;  %v395_v51 = vmax.f32 %v363_v41, 0.0 }
  0x30   : > { %v364_v52 = vadd.f32 %v884_v8, %v320_v39  ;;  %v365_v53 = vadd.f32 %v886_v9, %v321_v43  ;;  %424 = vst [vmem:[%s918_s21 + $0x80] sm:$0xff] %v392_v42  ;;  %v366_v57 = vadd.f32 %v884_v8, %v322_v47  ;;  %v324_v59 = vmul.f32 %v880_v6, %v280_v44 }
  0x31   : > { %v448_v56 = vmax.f32 %v392_v42, %v394_v46  ;;  %v367_v58 = vadd.f32 %v886_v9, %v323_v48  ;;  %425 = vst [vmem:[%s918_s21 + $0x88] sm:$0xff] %v393_v45  ;;  %426 = vst [vmem:[%s918_s21 + $0x90] sm:$0xff] %v394_v46  ;;  %v449_v61 = vmax.f32 %v393_v45, %v395_v51 }
  0x32   : > { %467 = vst [vmem:[%s954_s24 + $0x18] sm:$0xff] %v459_v50  ;;  %v396_v62 = vmax.f32 %v364_v52, 0.0  ;;  %v397_v63 = vmax.f32 %v365_v53, 0.0  ;;  %v325_v0 = vmul.f32 %v882_v7, %v281_v49  ;;  %427 = vst [vmem:[%s918_s21 + $0x98] sm:$0xff] %v395_v51  ;;  %v398_v1 = vmax.f32 %v366_v57, 0.0 }
  0x33   : > { %v399_v2 = vmax.f32 %v367_v58, 0.0  ;;  %v326_v3 = vmul.f32 %v880_v6, %v282_v54  ;;  %v327_v4 = vmul.f32 %v882_v7, %v283_v55  ;;  %v460_v11 = vmax.f32 %v448_v56, %v449_v61 }
  0x34   : > { %v368_v12 = vadd.f32 %v884_v8, %v324_v59  ;;  %v369_v13 = vadd.f32 %v886_v9, %v325_v0  ;;  %v328_v15 = vmul.f32 %v880_v6, %v284_v60  ;;  %428 = vst [vmem:[%s918_s21 + $0xa0] sm:$0xff] %v396_v62  ;;  %429 = vst [vmem:[%s918_s21 + $0xa8] sm:$0xff] %v397_v63 }
  0x35   : > { %v450_v16 = vmax.f32 %v396_v62, %v398_v1  ;;  %v451_v17 = vmax.f32 %v397_v63, %v399_v2  ;;  %v370_v18 = vadd.f32 %v884_v8, %v326_v3  ;;  %v371_v19 = vadd.f32 %v886_v9, %v327_v4  ;;  %430 = vst [vmem:[%s918_s21 + $0xb0] sm:$0xff] %v398_v1 }
  0x36   : > { %431 = vst [vmem:[%s918_s21 + $0xb8] sm:$0xff] %v399_v2  ;;  %468 = vst [vmem:[%s954_s24 + $0x20] sm:$0xff] %v460_v11  ;;  %v400_v20 = vmax.f32 %v368_v12, 0.0  ;;  %v401_v21 = vmax.f32 %v369_v13, 0.0  ;;  %v329_v22 = vmul.f32 %v882_v7, %v285_v5  ;;  %v330_v23 = vmul.f32 %v880_v6, %v286_v10 }
  0x37   : > { %v461_v24 = vmax.f32 %v450_v16, %v451_v17  ;;  %v402_v25 = vmax.f32 %v370_v18, 0.0  ;;  %v403_v26 = vmax.f32 %v371_v19, 0.0  ;;  %v331_v27 = vmul.f32 %v882_v7, %v287_v14 }
  0x38   : > { %v372_v28 = vadd.f32 %v884_v8, %v328_v15  ;;  %v373_v29 = vadd.f32 %v886_v9, %v329_v22  ;;  %v374_v30 = vadd.f32 %v884_v8, %v330_v23  ;;  %432 = vst [vmem:[%s918_s21 + $0xc0] sm:$0xff] %v400_v20  ;;  %433 = vst [vmem:[%s918_s21 + $0xc8] sm:$0xff] %v401_v21 }
  0x39   : > { %469 = vst [vmem:[%s954_s24 + $0x28] sm:$0xff] %v461_v24  ;;  %v452_v6 = vmax.f32 %v400_v20, %v402_v25  ;;  %v453_v31 = vmax.f32 %v401_v21, %v403_v26  ;;  %v375_v32 = vadd.f32 %v886_v9, %v331_v27  ;;  %434 = vst [vmem:[%s918_s21 + $0xd0] sm:$0xff] %v402_v25 }
  0x3a   : > { %435 = vst [vmem:[%s918_s21 + $0xd8] sm:$0xff] %v403_v26  ;;  %v404_v7 = vmax.f32 %v372_v28, 0.0  ;;  %v405_v33 = vmax.f32 %v373_v29, 0.0  ;;  %v406_v34 = vmax.f32 %v374_v30, 0.0 }
  0x3b   : > { %v462_v8 = vmax.f32 %v452_v6, %v453_v31  ;;  %v407_v35 = vmax.f32 %v375_v32, 0.0 }
  0x3c   : > { %v454_v36 = vmax.f32 %v404_v7, %v406_v34  ;;  %436 = vst [vmem:[%s918_s21 + $0xe0] sm:$0xff] %v404_v7  ;;  %437 = vst [vmem:[%s918_s21 + $0xe8] sm:$0xff] %v405_v33 }
  0x3d   : > { %438 = vst [vmem:[%s918_s21 + $0xf0] sm:$0xff] %v406_v34  ;;  %470 = vst [vmem:[%s954_s24 + $0x30] sm:$0xff] %v462_v8  ;;  %v455_v37 = vmax.f32 %v405_v33, %v407_v35 }
  0x3e   : > { %439 = vst [vmem:[%s918_s21 + $0xf8] sm:$0xff] %v407_v35 }
  0x3f   : > { %v463_v9 = vmax.f32 %v454_v36, %v455_v37 }
  0x41   : > { %471 = vst [vmem:[%s954_s24 + $0x38] sm:$0xff] %v463_v9 }
  0x42   : > { %714 = shalt.err (!%p711_p5)
}
  0x43   : > { %s715_s11 = scalar_lea.hbm %s1045_s6, 1024  ;;  %s719_s14 = scalar_lea.hbm %s1099_s4, 2048 }
  0x44   : > { %p716_p6 = scmp.ne.s32.totalorder %s1045_s6, %s715_s11  ;;  %p720_p10 = scmp.lt.s32.totalorder %s1045_s6, %s1099_s4 }
  0x45   : > { %p721_p11 = scmp.lt.s32.totalorder %s719_s14, %s715_s11 }
  0x46   : > { %p717_p7 = pnand %p716_p6, %p847_p4 }
  0x47   : > { %p722_p12 = por %p721_p11, %p720_p10 }
  0x48   : > { %p718_p9 = pneg %p717_p7 }
  0x4a   : > { %p723_p13 = pnand %p722_p12, %p718_p9 }
  0x4c   : > { %726 = shalt.err (!%p723_p13)
}
  0x4d   : > { %s780_s24 = smov 128   ;;  %s781_s29 = smov 8  }
  0x4e   : > { %644 = dma.vmem_to_hbm [thread:$0]  (%p847_p4), %s1040_s26, 1024, %s1045_s6, %s1050_s18, %s780_s24, %s780_s24, %s781_s29  }
  0x4f PF: > { %p650_p0 = scmp.ge.s32.totalorder %s777_s20, 2  ;;  %s530_s30 = sand.u32 1, %s757_s15  }
  0x50   : > { %s531_s5 = scalar_lea.sflag [#allocation3], %s530_s30 }
  0x51   : > { %p647_p1 = pnand %p650_p0, %p854_p8 }
  0x53   : > { %p648_p2 = pneg %p647_p1 }
  0x55   : > { %752 = dma.done.wait (%p648_p2), %s531_s5, 1024  }
  0x56   : > { %754 = vsyncadd (%p648_p2), %s531_s5, 4294966272  ;;  %s18_s20 = sadd.s32 1, %s777_s20   ;;  %s1102_s15 = smov %s761_s16 }
  0x57   : > { %p15_p3 = scmp.ge.s32.totalorder %s18_s20, 4   ;;  %s1103_s16 = smov %s765_s17 }
  0x58   : > { %s1104_s17 = smov %s860_s28  ;;  %s1105_s18 = smov %s773_s19 }
  0x59   : > { %s1106_s19 = smov %s1108_s23  ;;  %17 = sbr.rel (!%p15_p3) target bundleno = 4 (0x4), region = 79 }
  0x5e   :  { %536 = vsyncpa [#allocation3], 1 }
  0x5f   :  { %538 = vsyncpa [#allocation3 + $0x1], 1 }

// kernel: encoder_block_forward.3
= control target key start
LH: loop header
LB: loop body
LE: loop exit
PB: predicated region body
PF: predicated region fallthrough
CT: control target
= control target key end

     0   :  { %s5903_s12 = smov 0   ;;  %s5905_s13 = smov 0   ;;  %s7385_s0 = inlined_call_operand.vmem [shape: f32[2,1,18,18,4], index: 0, kind: input, shape index: {}]   ;;  %s7386_s1 = inlined_call_operand.vmem [shape: f32[9,4,128], index: 1, kind: input, shape index: {}]   ;;  %s7387_s2 = inlined_call_operand.vmem [shape: f32[2,16,16,128], index: 2, kind: output, shape index: {0}]   ;;  %s7388_s3 = inlined_call_operand.vmem [shape: f32[2,1,2,128], index: 3, kind: output, shape index: {1}]  }
   0x1   :  { %s5907_s14 = smov 0  }
   0x2 LB: > { %s26_s15 = sadd.s32 1, %s5877_s13  ;;  %p4772_p0 = scmp.ge.s32.totalorder %s5881_s14, 1  ;;  %s5881_s14 = sphi %s5907_s14, %s14_s14   ;;  %s5877_s13 = sphi %s5905_s13, %s7635_s13   ;;  %s5873_s12 = sphi %s5903_s12, %s7634_s12  }
   0x3   : > { %p28_p1 = scmp.ge.s32.totalorder %s26_s15, 2  ;;  %p162_p2 = scmp.lt.s32.totalorder %s5881_s14, 3 }
   0x5   : > { %s7637_s15 = smov (%p28_p1, %s26_s15), 0  ;;  %p163_p3 = pnand %p4772_p0, %p162_p2 }
   0x7   : > { %166 = sbr.rel (%p163_p3) target bundleno = 536 (0x218), region = 28 }
   0xc   : > { %v435_v0 = vld [vmem:[%s7386_s1] sm:$0xf]  ;;  %vm532_vm0 = vcmask 1043456   ;;  %p202_p4 = scmp.lt.s32.totalorder %s5873_s12, 1  ;;  %v5929_v1 = vld [vmem:[%s7386_s1 + $0x4] sm:$0xf] }
   0xd   : > { %5832 = vmatprep.subr.msk.mxu1 %vm532_vm0, %v435_v0  ;;  %5382 = vmatprep.subr.msk.mxu0 %vm532_vm0, %v435_v0  ;;  %v5934_v2 = vld [vmem:[%s7386_s1 + $0x8] sm:$0xf]  ;;  %vm283_vm1 = vcmask 31744   ;;  %v6015_v33 = vld [vmem:[%s7386_s1 + $0xc] sm:$0xf]  ;;  %vm286_vm2 = vcmask 25600  }
   0xe   : > { %5833 = vmatpush3.msk.msra.mxu1 %vm532_vm0, %v435_v0  ;;  %5383 = vmatpush3.msk.msra.mxu0 %vm532_vm0, %v435_v0  ;;  %s7639_s12 = smov (!%p202_p4, %s5873_s12), 1  ;;  %v6020_v34 = vld [vmem:[%s7386_s1 + $0x10] sm:$0xf] }
   0xf   : > { %5432 = vmatprep.subr.msk.mxu1 %vm532_vm0, %v5929_v1  ;;  %5482 = vmatprep.subr.msk.mxu0 %vm532_vm0, %v5934_v2  ;;  %s5834_s22 = smul.u32 432, %s7639_s12  ;;  %s5084_s11 = sshll.u32 %s7639_s12, 8 }
  0x10   : > { %s7254_s18 = scalar_lea.vmem %s7387_s2, %s5084_s11  ;;  %s4776_s19 = sshll.u32 %s7639_s12, 1 }
  0x11   : > { %s5948_s25 = scalar_lea.vmem %s7385_s0, %s5834_s22  ;;  %s228_s22 = scalar_lea.vmem %s7388_s3, %s4776_s19 }
  0x12   : > { %v229_v3 = vld [vmem:[%s5948_s25] sm:$0xff]  ;;  %v230_v5 = vld [vmem:[%s5948_s25 + $0x8] sm:$0xff]  ;;  %v232_v7 = vld [vmem:[%s5948_s25 + $0x18] sm:$0xff] }
  0x13   : > { %v253_v4 = vld [vmem:[%s5948_s25 + $0xc0] sm:$0xff]  ;;  %284 = vst.msk [vmem:[#allocation2] sm:$0xff] %vm283_vm1, %v229_v3  ;;  %285 = vst.msk [vmem:[#allocation2 + $0x8] sm:$0xff] %vm283_vm1, %v230_v5  ;;  %v254_v6 = vld [vmem:[%s5948_s25 + $0xc8] sm:$0xff] }
  0x14   : > { %309 = vst.msk [vmem:[#allocation2 + $0xc0] sm:$0xff] %vm283_vm1, %v253_v4  ;;  %v256_v8 = vld [vmem:[%s5948_s25 + $0xd8] sm:$0xff]  ;;  %310 = vst.msk [vmem:[#allocation2 + $0xc8] sm:$0xff] %vm283_vm1, %v254_v6  ;;  %v233_v9 = vld [vmem:[%s5948_s25 + $0x20] sm:$0xff] }
  0x15   : > { %288 = vst.msk [vmem:[#allocation2 + $0x18] sm:$0xff] %vm283_vm1, %v232_v7  ;;  %312 = vst.msk [vmem:[#allocation2 + $0xd8] sm:$0xff] %vm283_vm1, %v256_v8  ;;  %v257_v10 = vld [vmem:[%s5948_s25 + $0xe0] sm:$0xff]  ;;  %v235_v11 = vld [vmem:[%s5948_s25 + $0x30] sm:$0xff] }
  0x16   : > { %289 = vst.msk [vmem:[#allocation2 + $0x20] sm:$0xff] %vm283_vm1, %v233_v9  ;;  %313 = vst.msk [vmem:[#allocation2 + $0xe0] sm:$0xff] %vm283_vm1, %v257_v10  ;;  %v259_v12 = vld [vmem:[%s5948_s25 + $0xf0] sm:$0xff]  ;;  %v236_v13 = vld [vmem:[%s5948_s25 + $0x38] sm:$0xff] }
  0x17   : > { %291 = vst.msk [vmem:[#allocation2 + $0x30] sm:$0xff] %vm283_vm1, %v235_v11  ;;  %v260_v14 = vld [vmem:[%s5948_s25 + $0xf8] sm:$0xff]  ;;  %315 = vst.msk [vmem:[#allocation2 + $0xf0] sm:$0xff] %vm283_vm1, %v259_v12  ;;  %v238_v15 = vld [vmem:[%s5948_s25 + $0x48] sm:$0xff] }
  0x18   : > { %292 = vst.msk [vmem:[#allocation2 + $0x38] sm:$0xff] %vm283_vm1, %v236_v13  ;;  %316 = vst.msk [vmem:[#allocation2 + $0xf8] sm:$0xff] %vm283_vm1, %v260_v14  ;;  %v262_v16 = vld [vmem:[%s5948_s25 + $0x108] sm:$0xff]  ;;  %v239_v17 = vld [vmem:[%s5948_s25 + $0x50] sm:$0xff] }
  0x19   : > { %294 = vst.msk [vmem:[#allocation2 + $0x48] sm:$0xff] %vm283_vm1, %v238_v15  ;;  %318 = vst.msk [vmem:[#allocation2 + $0x108] sm:$0xff] %vm283_vm1, %v262_v16  ;;  %v263_v18 = vld [vmem:[%s5948_s25 + $0x110] sm:$0xff]  ;;  %v241_v19 = vld [vmem:[%s5948_s25 + $0x60] sm:$0xff] }
  0x1a   : > { %295 = vst.msk [vmem:[#allocation2 + $0x50] sm:$0xff] %vm283_vm1, %v239_v17  ;;  %v265_v20 = vld [vmem:[%s5948_s25 + $0x120] sm:$0xff]  ;;  %319 = vst.msk [vmem:[#allocation2 + $0x110] sm:$0xff] %vm283_vm1, %v263_v18  ;;  %v242_v21 = vld [vmem:[%s5948_s25 + $0x68] sm:$0xff] }
  0x1b   : > { %297 = vst.msk [vmem:[#allocation2 + $0x60] sm:$0xff] %vm283_vm1, %v241_v19  ;;  %321 = vst.msk [vmem:[#allocation2 + $0x120] sm:$0xff] %vm283_vm1, %v265_v20  ;;  %v266_v22 = vld [vmem:[%s5948_s25 + $0x128] sm:$0xff]  ;;  %v244_v23 = vld [vmem:[%s5948_s25 + $0x78] sm:$0xff] }
  0x1c   : > { %298 = vst.msk [vmem:[#allocation2 + $0x68] sm:$0xff] %vm283_vm1, %v242_v21  ;;  %322 = vst.msk [vmem:[#allocation2 + $0x128] sm:$0xff] %vm283_vm1, %v266_v22  ;;  %v268_v24 = vld [vmem:[%s5948_s25 + $0x138] sm:$0xff]  ;;  %v245_v25 = vld [vmem:[%s5948_s25 + $0x80] sm:$0xff] }
  0x1d   : > { %300 = vst.msk [vmem:[#allocation2 + $0x78] sm:$0xff] %vm283_vm1, %v244_v23  ;;  %v269_v26 = vld [vmem:[%s5948_s25 + $0x140] sm:$0xff]  ;;  %v372_v29 = vld [vmem:[#allocation2 + $0x8] sm:$0xff]  ;;  %324 = vst.msk [vmem:[#allocation2 + $0x138] sm:$0xff] %vm283_vm1, %v268_v24 }
  0x1e   : > { %v371_v27 = vld [vmem:[#allocation2] sm:$0xff]  ;;  %301 = vst.msk [vmem:[#allocation2 + $0x80] sm:$0xff] %vm283_vm1, %v245_v25  ;;  %325 = vst.msk [vmem:[#allocation2 + $0x140] sm:$0xff] %vm283_vm1, %v269_v26  ;;  %v6003_v30 = vld [vmem:[#allocation2 + $0xc8] sm:$0xff] }
  0x1f   : > { %v5995_v28 = vld [vmem:[#allocation2 + $0xc0] sm:$0xff]  ;;  %5384 = vmatprep.mubr.msk.f32.mxu0 %vm283_vm1, %v371_v27  ;;  %v6005_v31 = vld [vmem:[#allocation2 + $0x18] sm:$0xff]  ;;  %v6034_v37 = vld [vmem:[#allocation2 + $0x30] sm:$0xff] }
  0x20   : > { %5408 = vmatprep.mubr.msk.f32.mxu1 %vm283_vm1, %v5995_v28  ;;  %v6007_v32 = vld [vmem:[#allocation2 + $0xd8] sm:$0xff]  ;;  %5385 = vmatmul.mubr.msk.f32.vlgmr.msra.gmra.mxu0 %vm283_vm1, %v372_v29  ;;  %v6026_v35 = vld [vmem:[#allocation2 + $0x20] sm:$0xff]  ;;  %v6036_v38 = vld [vmem:[#allocation2 + $0xf0] sm:$0xff] }
  0x21   : > { %5409 = vmatmul.mubr.msk.f32.vlgmr.msra.gmra.mxu1 %vm283_vm1, %v6003_v30  ;;  %5483 = vmatpush3.msk.msra.mxu0 %vm532_vm0, %v5934_v2  ;;  %v6028_v36 = vld [vmem:[#allocation2 + $0xe0] sm:$0xff]  ;;  %v6046_v39 = vld [vmem:[#allocation2 + $0x38] sm:$0xff]  ;;  %v6054_v41 = vld [vmem:[#allocation2 + $0x48] sm:$0xff] }
  0x22   : > { %5433 = vmatpush3.msk.msra.mxu1 %vm532_vm0, %v5929_v1  ;;  %5387 = vmatprep.mubr.msk.f32.mxu0 %vm283_vm1, %v6005_v31  ;;  %v6052_v40 = vld [vmem:[#allocation2 + $0xf8] sm:$0xff]  ;;  %v6056_v42 = vld [vmem:[#allocation2 + $0x108] sm:$0xff]  ;;  %v247_v43 = vld [vmem:[%s5948_s25 + $0x90] sm:$0xff] }
  0x23   : > { %5411 = vmatprep.mubr.msk.f32.mxu1 %vm283_vm1, %v6007_v32  ;;  %5532 = vmatprep.subr.msk.mxu1 %vm532_vm0, %v6015_v33  ;;  %v271_v44 = vld [vmem:[%s5948_s25 + $0x150] sm:$0xff]  ;;  %v248_v45 = vld [vmem:[%s5948_s25 + $0x98] sm:$0xff]  ;;  %303 = vst.msk [vmem:[#allocation2 + $0x90] sm:$0xff] %vm283_vm1, %v247_v43  ;;  %v250_v47 = vld [vmem:[%s5948_s25 + $0xa8] sm:$0xff] }
  0x24   : > { %5582 = vmatprep.subr.msk.mxu0 %vm532_vm0, %v6020_v34  ;;  %5388 = vmatmul.mubr.msk.f32.gmra.mxu0 %vm283_vm1, %v6026_v35  ;;  %327 = vst.msk [vmem:[#allocation2 + $0x150] sm:$0xff] %vm283_vm1, %v271_v44  ;;  %304 = vst.msk [vmem:[#allocation2 + $0x98] sm:$0xff] %vm283_vm1, %v248_v45  ;;  %v272_v46 = vld [vmem:[%s5948_s25 + $0x158] sm:$0xff]  ;;  %v274_v48 = vld [vmem:[%s5948_s25 + $0x168] sm:$0xff] }
  0x25   : > { %5412 = vmatmul.mubr.msk.f32.gmra.mxu1 %vm283_vm1, %v6028_v36  ;;  %5390 = vmatprep.mubr.msk.f32.mxu0 %vm283_vm1, %v6034_v37  ;;  %328 = vst.msk [vmem:[#allocation2 + $0x158] sm:$0xff] %vm283_vm1, %v272_v46  ;;  %306 = vst.msk [vmem:[#allocation2 + $0xa8] sm:$0xff] %vm283_vm1, %v250_v47  ;;  %v251_v49 = vld [vmem:[%s5948_s25 + $0xb0] sm:$0xff]  ;;  %v6087_v54 = vld [vmem:[#allocation2 + $0x60] sm:$0xff] }
  0x26   : > { %5414 = vmatprep.mubr.msk.f32.mxu1 %vm283_vm1, %v6036_v38  ;;  %330 = vst.msk [vmem:[#allocation2 + $0x168] sm:$0xff] %vm283_vm1, %v274_v48  ;;  %v275_v50 = vld [vmem:[%s5948_s25 + $0x170] sm:$0xff]  ;;  %307 = vst.msk [vmem:[#allocation2 + $0xb0] sm:$0xff] %vm283_vm1, %v251_v49  ;;  %v6089_v55 = vld [vmem:[#allocation2 + $0x120] sm:$0xff] }
  0x27   : > { %v6080_v51 = vld [vmem:[#allocation2 + $0x50] sm:$0xff]  ;;  %331 = vst.msk [vmem:[#allocation2 + $0x170] sm:$0xff] %vm283_vm1, %v275_v50  ;;  %v234_v56 = vld [vmem:[%s5948_s25 + $0x28] sm:$0x3]  ;;  %v237_v57 = vld [vmem:[%s5948_s25 + $0x40] sm:$0x3] }
  0x28   : > { %5391 = vmatmul.mubr.msk.f32.gmra.mxu0 %vm283_vm1, %v6046_v39  ;;  %v6082_v52 = vld [vmem:[#allocation2 + $0x110] sm:$0xff]  ;;  %290 = vst.msk [vmem:[#allocation2 + $0x28] sm:$0x3] %vm286_vm2, %v234_v56  ;;  %293 = vst.msk [vmem:[#allocation2 + $0x40] sm:$0x3] %vm286_vm2, %v237_v57  ;;  %v6105_v59 = vld [vmem:[#allocation2 + $0x68] sm:$0xff] }
  0x29   : > { %5415 = vmatmul.mubr.msk.f32.gmra.mxu1 %vm283_vm1, %v6052_v40  ;;  %5393 = vmatprep.mubr.msk.f32.mxu0 %vm283_vm1, %v6054_v41  ;;  %v231_v53 = vld [vmem:[%s5948_s25 + $0x10] sm:$0x3]  ;;  %v240_v58 = vld [vmem:[%s5948_s25 + $0x58] sm:$0x3]  ;;  %v6107_v60 = vld [vmem:[#allocation2 + $0x128] sm:$0xff] }
  0x2a   : > { %5417 = vmatprep.mubr.msk.f32.mxu1 %vm283_vm1, %v6056_v42  ;;  %287 = vst.msk [vmem:[#allocation2 + $0x10] sm:$0x3] %vm286_vm2, %v231_v53  ;;  %296 = vst.msk [vmem:[#allocation2 + $0x58] sm:$0x3] %vm286_vm2, %v240_v58  ;;  %v243_v61 = vld [vmem:[%s5948_s25 + $0x70] sm:$0x3] }
  0x2b   : > { %v6111_v62 = vld [vmem:[#allocation2 + $0x78] sm:$0xff]  ;;  %299 = vst.msk [vmem:[#allocation2 + $0x70] sm:$0x3] %vm286_vm2, %v243_v61  ;;  %v6124_v0 = vld [vmem:[#allocation2 + $0x80] sm:$0xff]  ;;  %v246_v2 = vld [vmem:[%s5948_s25 + $0x88] sm:$0x3] }
  0x2c   : > { %5394 = vmatmul.mubr.msk.f32.gmra.mxu0 %vm283_vm1, %v6080_v51  ;;  %v6113_v63 = vld [vmem:[#allocation2 + $0x138] sm:$0xff]  ;;  %v6126_v1 = vld [vmem:[#allocation2 + $0x140] sm:$0xff]  ;;  %v6129_v3 = vld [vmem:[#allocation2 + $0x90] sm:$0xff]  ;;  %302 = vst.msk [vmem:[#allocation2 + $0x88] sm:$0x3] %vm286_vm2, %v246_v2 }
  0x2d   : > { %5418 = vmatmul.mubr.msk.f32.gmra.mxu1 %vm283_vm1, %v6082_v52  ;;  %5396 = vmatprep.mubr.msk.f32.mxu0 %vm283_vm1, %v6087_v54  ;;  %v6131_v4 = vld [vmem:[#allocation2 + $0x150] sm:$0xff]  ;;  %v249_v5 = vld [vmem:[%s5948_s25 + $0xa0] sm:$0x3]  ;;  %v6143_v6 = vld [vmem:[#allocation2 + $0x98] sm:$0xff] }
  0x2e   : > { %5420 = vmatprep.mubr.msk.f32.mxu1 %vm283_vm1, %v6089_v55  ;;  %v6145_v7 = vld [vmem:[#allocation2 + $0x158] sm:$0xff]  ;;  %305 = vst.msk [vmem:[#allocation2 + $0xa0] sm:$0x3] %vm286_vm2, %v249_v5  ;;  %v6148_v8 = vld [vmem:[#allocation2 + $0xa8] sm:$0xff]  ;;  %v255_v11 = vld [vmem:[%s5948_s25 + $0xd0] sm:$0x3] }
  0x2f   : > { %v6150_v9 = vld [vmem:[#allocation2 + $0x168] sm:$0xff]  ;;  %v252_v10 = vld [vmem:[%s5948_s25 + $0xb8] sm:$0x3]  ;;  %311 = vst.msk [vmem:[#allocation2 + $0xd0] sm:$0x3] %vm286_vm2, %v255_v11  ;;  %v6165_v13 = vld [vmem:[#allocation2 + $0xb0] sm:$0xff] }
  0x30   : > { %5397 = vmatmul.mubr.msk.f32.gmra.mxu0 %vm283_vm1, %v6105_v59  ;;  %7449 = vst [vmem:[#allocation4_spill] sm:$0xff] %v6150_v9  ;;  %308 = vst.msk [vmem:[#allocation2 + $0xb8] sm:$0x3] %vm286_vm2, %v252_v10  ;;  %v258_v12 = vld [vmem:[%s5948_s25 + $0xe8] sm:$0x3]  ;;  %v6167_v14 = vld [vmem:[#allocation2 + $0x170] sm:$0xff] }
  0x31   : > { %5421 = vmatmul.mubr.msk.f32.gmra.mxu1 %vm283_vm1, %v6107_v60  ;;  %5399 = vmatprep.mubr.msk.f32.mxu0 %vm283_vm1, %v6111_v62  ;;  %7450 = vst [vmem:[#allocation5_spill] sm:$0xff] %v6167_v14  ;;  %314 = vst.msk [vmem:[#allocation2 + $0xe8] sm:$0x3] %vm286_vm2, %v258_v12  ;;  %v825_v15 = vld [vmem:[#allocation2 + $0x1] sm:$0xff]  ;;  %v264_v18 = vld [vmem:[%s5948_s25 + $0x118] sm:$0x3] }
  0x32   : > { %5423 = vmatprep.mubr.msk.f32.mxu1 %vm283_vm1, %v6113_v63  ;;  %v1279_v16 = vld [vmem:[#allocation2 + $0x2] sm:$0xff]  ;;  %v261_v17 = vld [vmem:[%s5948_s25 + $0x100] sm:$0x3]  ;;  %320 = vst.msk [vmem:[#allocation2 + $0x118] sm:$0x3] %vm286_vm2, %v264_v18  ;;  %v1280_v21 = vld [vmem:[#allocation2 + $0xa] sm:$0xff] }
  0x33   : > { %317 = vst.msk [vmem:[#allocation2 + $0x100] sm:$0x3] %vm286_vm2, %v261_v17  ;;  %v267_v19 = vld [vmem:[%s5948_s25 + $0x130] sm:$0x3]  ;;  %v270_v22 = vld [vmem:[%s5948_s25 + $0x148] sm:$0x3] }
  0x34   : > { %5400 = vmatmul.mubr.msk.f32.gmra.mxu0 %vm283_vm1, %v6124_v0  ;;  %v826_v20 = vld [vmem:[#allocation2 + $0x9] sm:$0xff]  ;;  %323 = vst.msk [vmem:[#allocation2 + $0x130] sm:$0x3] %vm286_vm2, %v267_v19  ;;  %326 = vst.msk [vmem:[#allocation2 + $0x148] sm:$0x3] %vm286_vm2, %v270_v22  ;;  %v6184_v23 = vld [vmem:[#allocation2 + $0x19] sm:$0xff] }
  0x35   : > { %5424 = vmatmul.mubr.msk.f32.gmra.mxu1 %vm283_vm1, %v6126_v1  ;;  %5402 = vmatprep.mubr.msk.f32.mxu0 %vm283_vm1, %v6129_v3  ;;  %v6186_v24 = vld [vmem:[#allocation2 + $0x1a] sm:$0xff]  ;;  %v6194_v26 = vld [vmem:[%s7386_s1 + $0x14] sm:$0xf]  ;;  %v6207_v43 = vld [vmem:[#allocation2 + $0x22] sm:$0xff] }
  0x36   : > { %5426 = vmatprep.mubr.msk.f32.mxu1 %vm283_vm1, %v6131_v4  ;;  %7451 = vst [vmem:[#allocation6_spill] sm:$0xff] %v6186_v24  ;;  %v273_v25 = vld [vmem:[%s5948_s25 + $0x160] sm:$0x3]  ;;  %v6199_v27 = vld [vmem:[%s7386_s1 + $0x18] sm:$0xf]  ;;  %7452 = vst [vmem:[#allocation7_spill] sm:$0xff] %v6207_v43 }
  0x37   : > { %v6205_v29 = vld [vmem:[#allocation2 + $0x21] sm:$0xff]  ;;  %329 = vst.msk [vmem:[#allocation2 + $0x160] sm:$0x3] %vm286_vm2, %v273_v25  ;;  %v276_v44 = vld [vmem:[%s5948_s25 + $0x178] sm:$0x3]  ;;  %v6242_v50 = vld [vmem:[#allocation2 + $0x49] sm:$0xff] }
  0x38   : > { %5403 = vmatmul.mubr.msk.f32.gmra.mxu0 %vm283_vm1, %v6143_v6  ;;  %v6215_v45 = vld [vmem:[#allocation2 + $0x31] sm:$0xff]  ;;  %332 = vst.msk [vmem:[#allocation2 + $0x178] sm:$0x3] %vm286_vm2, %v276_v44  ;;  %v278_v46 = vld [vmem:[%s5948_s25 + $0x188] sm:$0xff]  ;;  %v6237_v48 = vld [vmem:[#allocation2 + $0x39] sm:$0xff] }
  0x39   : > { %5427 = vmatmul.mubr.msk.f32.gmra.mxu1 %vm283_vm1, %v6145_v7  ;;  %5405 = vmatprep.mubr.msk.f32.mxu0 %vm283_vm1, %v6148_v8  ;;  %334 = vst.msk [vmem:[#allocation2 + $0x188] sm:$0xff] %vm283_vm1, %v278_v46  ;;  %v279_v47 = vld [vmem:[%s5948_s25 + $0x190] sm:$0x3]  ;;  %v6239_v49 = vld [vmem:[#allocation2 + $0x3a] sm:$0xff]  ;;  %v6256_v57 = vld [vmem:[#allocation2 + $0x52] sm:$0xff] }
  0x3a   : > { %5429 = vmatprep.mubr.msk.f32.mxu1 %vm283_vm1, %v6150_v9  ;;  %7454 = vst [vmem:[#allocation9_spill] sm:$0xff] %v6239_v49  ;;  %335 = vst.msk [vmem:[#allocation2 + $0x190] sm:$0x3] %vm286_vm2, %v279_v47  ;;  %v6244_v53 = vld [vmem:[#allocation2 + $0x4a] sm:$0xff]  ;;  %v6258_v58 = vld [vmem:[#allocation2 + $0x61] sm:$0xff] }
  0x3b   : > { %7455 = vst [vmem:[#allocation10_spill] sm:$0xff] %v6244_v53  ;;  %v6254_v56 = vld [vmem:[#allocation2 + $0x51] sm:$0xff]  ;;  %7456 = vst [vmem:[#allocation11_spill] sm:$0xff] %v6256_v57  ;;  %v6260_v61 = vld [vmem:[#allocation2 + $0x62] sm:$0xff] }
  0x3c   : > { %5406 = vmatmul.mubr.msk.f32.gmra.mxu0 %vm283_vm1, %v6165_v13  ;;  %7457 = vst [vmem:[#allocation12_spill] sm:$0xff] %v6260_v61  ;;  %v6270_v2 = vld [vmem:[#allocation2 + $0x69] sm:$0xff]  ;;  %v6274_v10 = vld [vmem:[#allocation2 + $0x79] sm:$0xff]  ;;  %v6286_v12 = vld [vmem:[#allocation2 + $0x81] sm:$0xff] }
  0x3d   : > { %5430 = vmatmul.mubr.msk.f32.gmra.mxu1 %vm283_vm1, %v6167_v14  ;;  %5484 = vmatprep.mubr.msk.f32.mxu0 %vm283_vm1, %v1279_v16  ;;  %v6272_v5 = vld [vmem:[#allocation2 + $0x6a] sm:$0xff]  ;;  %v6276_v11 = vld [vmem:[#allocation2 + $0x7a] sm:$0xff]  ;;  %v6292_v17 = vld [vmem:[#allocation2 + $0x92] sm:$0xff] }
  0x3e   : > { %5434 = vmatprep.mubr.msk.f32.mxu1 %vm283_vm1, %v825_v15  ;;  %7458 = vst [vmem:[#allocation13_spill] sm:$0xff] %v6272_v5  ;;  %7459 = vst [vmem:[#allocation14_spill] sm:$0xff] %v6276_v11  ;;  %v6288_v15 = vld [vmem:[#allocation2 + $0x82] sm:$0xff]  ;;  %v6290_v16 = vld [vmem:[#allocation2 + $0x91] sm:$0xff] }
  0x3f   : > { %7460 = vst [vmem:[#allocation15_spill] sm:$0xff] %v6288_v15  ;;  %7461 = vst [vmem:[#allocation16_spill] sm:$0xff] %v6292_v17  ;;  %v6302_v18 = vld [vmem:[#allocation2 + $0x99] sm:$0xff]  ;;  %v6318_v22 = vld [vmem:[#allocation2 + $0xb1] sm:$0xff] }
  0x40   : > { %5485 = vmatmul.mubr.msk.f32.vlgmr.msra.gmra.mxu0 %vm283_vm1, %v1280_v21  ;;  %v6304_v19 = vld [vmem:[#allocation2 + $0x9a] sm:$0xff]  ;;  %v6308_v21 = vld [vmem:[#allocation2 + $0xaa] sm:$0xff]  ;;  %v6320_v25 = vld [vmem:[#allocation2 + $0xb2] sm:$0xff] }
  0x41   : > { %5435 = vmatmul.mubr.msk.f32.vlgmr.msra.gmra.mxu1 %vm283_vm1, %v826_v20  ;;  %5583 = vmatpush3.msk.msra.mxu0 %vm532_vm0, %v6020_v34  ;;  %v277_v34 = vld [vmem:[%s5948_s25 + $0x180] sm:$0xff]  ;;  %7462 = vst [vmem:[#allocation17_spill] sm:$0xff] %v6304_v19  ;;  %v6306_v20 = vld [vmem:[#allocation2 + $0xa9] sm:$0xff]  ;;  %7463 = vst [vmem:[#allocation18_spill] sm:$0xff] %v6308_v21 }
  0x42   : > { %5533 = vmatpush3.msk.msra.mxu1 %vm532_vm0, %v6015_v33  ;;  %5437 = vmatprep.mubr.msk.f32.mxu1 %vm283_vm1, %v6184_v23  ;;  %v6217_v33 = vld [vmem:[#allocation2 + $0x32] sm:$0xff]  ;;  %333 = vst.msk [vmem:[#allocation2 + $0x180] sm:$0xff] %vm283_vm1, %v277_v34  ;;  %7464 = vst [vmem:[#allocation19_spill] sm:$0xff] %v6320_v25  ;;  %v6322_v44 = vld [vmem:[#allocation2 + $0xc1] sm:$0xff] }
  0x43   : > { %5487 = vmatprep.mubr.msk.f32.mxu0 %vm283_vm1, %v6186_v24  ;;  %7453 = vst [vmem:[#allocation8_spill] sm:$0xff] %v6217_v33  ;;  %5632 = vmatprep.subr.msk.mxu1 %vm532_vm0, %v6194_v26  ;;  %v6324_v34 = vld [vmem:[#allocation2 + $0xc2] sm:$0xff]  ;;  %v6336_v47 = vld [vmem:[#allocation2 + $0xca] sm:$0xff]  ;;  %v280_v24 = vld [vmem:[%s5948_s25 + $0x198] sm:$0xff] }
  0x44   : > { %5682 = vmatprep.subr.msk.mxu0 %vm532_vm0, %v6199_v27  ;;  %5488 = vmatmul.mubr.msk.f32.gmra.mxu0 %vm283_vm1, %v6207_v43  ;;  %7465 = vst [vmem:[#allocation20_spill] sm:$0xff] %v6324_v34  ;;  %v6334_v46 = vld [vmem:[#allocation2 + $0xc9] sm:$0xff]  ;;  %7466 = vst [vmem:[#allocation21_spill] sm:$0xff] %v6336_v47  ;;  %v6420_v43 = vld [vmem:[#allocation2 + $0x152] sm:$0xff] }
  0x45   : > { %5438 = vmatmul.mubr.msk.f32.gmra.mxu1 %vm283_vm1, %v6205_v29  ;;  %5490 = vmatprep.mubr.msk.f32.mxu0 %vm283_vm1, %v6217_v33  ;;  %v6418_v33 = vld [vmem:[#allocation2 + $0x151] sm:$0xff]  ;;  %7478 = vst [vmem:[#allocation33_spill] sm:$0xff] %v6420_v43  ;;  %336 = vst.msk [vmem:[#allocation2 + $0x198] sm:$0xff] %vm283_vm1, %v280_v24  ;;  %v281_v14 = vld [vmem:[%s5948_s25 + $0x1a0] sm:$0xff] }
  0x46   : > { %5440 = vmatprep.mubr.msk.f32.mxu1 %vm283_vm1, %v6215_v45  ;;  %337 = vst.msk [vmem:[#allocation2 + $0x1a0] sm:$0xff] %vm283_vm1, %v281_v14  ;;  %v6438_v24 = vld [vmem:[#allocation2 + $0x169] sm:$0xff]  ;;  %v6450_v14 = vld [vmem:[#allocation2 + $0x171] sm:$0xff] }
  0x47   : > { %v6440_v9 = vld [vmem:[#allocation2 + $0x16a] sm:$0xff] }
  0x48   : > { %5491 = vmatmul.mubr.msk.f32.gmra.mxu0 %vm283_vm1, %v6239_v49  ;;  %v6404_v49 = vld [vmem:[#allocation2 + $0x13a] sm:$0xff]  ;;  %7479 = vst [vmem:[#allocation34_spill] sm:$0xff] %v6440_v9 }
  0x49   : > { %5441 = vmatmul.mubr.msk.f32.gmra.mxu1 %vm283_vm1, %v6237_v48  ;;  %5493 = vmatprep.mubr.msk.f32.mxu0 %vm283_vm1, %v6244_v53  ;;  %v6402_v53 = vld [vmem:[#allocation2 + $0x139] sm:$0xff]  ;;  %7477 = vst [vmem:[#allocation32_spill] sm:$0xff] %v6404_v49 }
  0x4a   : > { %5443 = vmatprep.mubr.msk.f32.mxu1 %vm283_vm1, %v6242_v50 }
  0x4c   : > { %5494 = vmatmul.mubr.msk.f32.gmra.mxu0 %vm283_vm1, %v6256_v57  ;;  %v6388_v57 = vld [vmem:[#allocation2 + $0x122] sm:$0xff] }
  0x4d   : > { %5444 = vmatmul.mubr.msk.f32.gmra.mxu1 %vm283_vm1, %v6254_v56  ;;  %5496 = vmatprep.mubr.msk.f32.mxu0 %vm283_vm1, %v6260_v61  ;;  %v6386_v61 = vld [vmem:[#allocation2 + $0x121] sm:$0xff]  ;;  %7474 = vst [vmem:[#allocation29_spill] sm:$0xff] %v6388_v57 }
  0x4e   : > { %5446 = vmatprep.mubr.msk.f32.mxu1 %vm283_vm1, %v6258_v58  ;;  %7473 = vst [vmem:[#allocation28_spill] sm:$0xff] %v6386_v61 }
  0x50   : > { %5497 = vmatmul.mubr.msk.f32.gmra.mxu0 %vm283_vm1, %v6272_v5  ;;  %v6372_v5 = vld [vmem:[#allocation2 + $0x10a] sm:$0xff] }
  0x51   : > { %5447 = vmatmul.mubr.msk.f32.gmra.mxu1 %vm283_vm1, %v6270_v2  ;;  %5499 = vmatprep.mubr.msk.f32.mxu0 %vm283_vm1, %v6276_v11  ;;  %v6370_v11 = vld [vmem:[#allocation2 + $0x109] sm:$0xff]  ;;  %7471 = vst [vmem:[#allocation26_spill] sm:$0xff] %v6372_v5 }
  0x52   : > { %5449 = vmatprep.mubr.msk.f32.mxu1 %vm283_vm1, %v6274_v10 }
  0x54   : > { %5500 = vmatmul.mubr.msk.f32.gmra.mxu0 %vm283_vm1, %v6288_v15  ;;  %v6356_v15 = vld [vmem:[#allocation2 + $0xf2] sm:$0xff] }
  0x55   : > { %5450 = vmatmul.mubr.msk.f32.gmra.mxu1 %vm283_vm1, %v6286_v12  ;;  %5502 = vmatprep.mubr.msk.f32.mxu0 %vm283_vm1, %v6292_v17  ;;  %v6354_v17 = vld [vmem:[#allocation2 + $0xf1] sm:$0xff]  ;;  %7469 = vst [vmem:[#allocation24_spill] sm:$0xff] %v6356_v15 }
  0x56   : > { %5452 = vmatprep.mubr.msk.f32.mxu1 %vm283_vm1, %v6290_v16 }
  0x58   : > { %5503 = vmatmul.mubr.msk.f32.gmra.mxu0 %vm283_vm1, %v6304_v19  ;;  %v6340_v19 = vld [vmem:[#allocation2 + $0xda] sm:$0xff] }
  0x59   : > { %5453 = vmatmul.mubr.msk.f32.gmra.mxu1 %vm283_vm1, %v6302_v18  ;;  %5505 = vmatprep.mubr.msk.f32.mxu0 %vm283_vm1, %v6308_v21  ;;  %v6338_v21 = vld [vmem:[#allocation2 + $0xd9] sm:$0xff]  ;;  %7467 = vst [vmem:[#allocation22_spill] sm:$0xff] %v6340_v19 }
  0x5a   : > { %5455 = vmatprep.mubr.msk.f32.mxu1 %vm283_vm1, %v6306_v20 }
  0x5c   : > { %5506 = vmatmul.mubr.msk.f32.gmra.mxu0 %vm283_vm1, %v6320_v25  ;;  %v6352_v25 = vld [vmem:[#allocation2 + $0xe2] sm:$0xff] }
  0x5d   : > { %5456 = vmatmul.mubr.msk.f32.gmra.mxu1 %vm283_vm1, %v6318_v22  ;;  %5508 = vmatprep.mubr.msk.f32.mxu0 %vm283_vm1, %v6324_v34  ;;  %v6350_v34 = vld [vmem:[#allocation2 + $0xe1] sm:$0xff]  ;;  %7468 = vst [vmem:[#allocation23_spill] sm:$0xff] %v6352_v25 }
  0x5e   : > { %5458 = vmatprep.mubr.msk.f32.mxu1 %vm283_vm1, %v6322_v44 }
  0x60   : > { %5509 = vmatmul.mubr.msk.f32.gmra.mxu0 %vm283_vm1, %v6336_v47  ;;  %v6368_v47 = vld [vmem:[#allocation2 + $0xfa] sm:$0xff] }
  0x61   : > { %5459 = vmatmul.mubr.msk.f32.gmra.mxu1 %vm283_vm1, %v6334_v46  ;;  %5511 = vmatprep.mubr.msk.f32.mxu0 %vm283_vm1, %v6340_v19  ;;  %v6366_v19 = vld [vmem:[#allocation2 + $0xf9] sm:$0xff]  ;;  %7470 = vst [vmem:[#allocation25_spill] sm:$0xff] %v6368_v47 }
  0x62   : > { %5461 = vmatprep.mubr.msk.f32.mxu1 %vm283_vm1, %v6338_v21 }
  0x64   : > { %5512 = vmatmul.mubr.msk.f32.gmra.mxu0 %vm283_vm1, %v6352_v25  ;;  %v6384_v25 = vld [vmem:[#allocation2 + $0x112] sm:$0xff] }
  0x65   : > { %5462 = vmatmul.mubr.msk.f32.gmra.mxu1 %vm283_vm1, %v6350_v34  ;;  %5514 = vmatprep.mubr.msk.f32.mxu0 %vm283_vm1, %v6356_v15  ;;  %v6382_v15 = vld [vmem:[#allocation2 + $0x111] sm:$0xff]  ;;  %7472 = vst [vmem:[#allocation27_spill] sm:$0xff] %v6384_v25 }
  0x66   : > { %5464 = vmatprep.mubr.msk.f32.mxu1 %vm283_vm1, %v6354_v17 }
  0x68   : > { %5515 = vmatmul.mubr.msk.f32.gmra.mxu0 %vm283_vm1, %v6368_v47  ;;  %v6400_v47 = vld [vmem:[#allocation2 + $0x12a] sm:$0xff] }
  0x69   : > { %5465 = vmatmul.mubr.msk.f32.gmra.mxu1 %vm283_vm1, %v6366_v19  ;;  %5517 = vmatprep.mubr.msk.f32.mxu0 %vm283_vm1, %v6372_v5  ;;  %v6398_v5 = vld [vmem:[#allocation2 + $0x129] sm:$0xff]  ;;  %7476 = vst [vmem:[#allocation31_spill] sm:$0xff] %v6400_v47 }
  0x6a   : > { %5467 = vmatprep.mubr.msk.f32.mxu1 %vm283_vm1, %v6370_v11  ;;  %7475 = vst [vmem:[#allocation30_spill] sm:$0xff] %v6398_v5 }
  0x6c   : > { %5518 = vmatmul.mubr.msk.f32.gmra.mxu0 %vm283_vm1, %v6384_v25  ;;  %v6416_v25 = vld [vmem:[#allocation2 + $0x142] sm:$0xff] }
  0x6d   : > { %5468 = vmatmul.mubr.msk.f32.gmra.mxu1 %vm283_vm1, %v6382_v15  ;;  %5520 = vmatprep.mubr.msk.f32.mxu0 %vm283_vm1, %v6388_v57  ;;  %v6414_v57 = vld [vmem:[#allocation2 + $0x141] sm:$0xff] }
  0x6e   : > { %5470 = vmatprep.mubr.msk.f32.mxu1 %vm283_vm1, %v6386_v61 }
  0x70   : > { %5521 = vmatmul.mubr.msk.f32.gmra.mxu0 %vm283_vm1, %v6400_v47  ;;  %v6436_v47 = vld [vmem:[#allocation2 + $0x15a] sm:$0xff] }
  0x71   : > { %5471 = vmatmul.mubr.msk.f32.gmra.mxu1 %vm283_vm1, %v6398_v5  ;;  %5523 = vmatprep.mubr.msk.f32.mxu0 %vm283_vm1, %v6404_v49  ;;  %v6434_v49 = vld [vmem:[#allocation2 + $0x159] sm:$0xff] }
  0x72   : > { %5473 = vmatprep.mubr.msk.f32.mxu1 %vm283_vm1, %v6402_v53 }
  0x74   : > { %5524 = vmatmul.mubr.msk.f32.gmra.mxu0 %vm283_vm1, %v6416_v25 }
  0x75   : > { %5474 = vmatmul.mubr.msk.f32.gmra.mxu1 %vm283_vm1, %v6414_v57  ;;  %5526 = vmatprep.mubr.msk.f32.mxu0 %vm283_vm1, %v6420_v43  ;;  %v6452_v43 = vld [vmem:[#allocation2 + $0x172] sm:$0xff] }
  0x76   : > { %5476 = vmatprep.mubr.msk.f32.mxu1 %vm283_vm1, %v6418_v33  ;;  %7480 = vst [vmem:[#allocation35_spill] sm:$0xff] %v6452_v43 }
  0x78   : > { %5527 = vmatmul.mubr.msk.f32.gmra.mxu0 %vm283_vm1, %v6436_v47 }
  0x79   : > { %5477 = vmatmul.mubr.msk.f32.gmra.mxu1 %vm283_vm1, %v6434_v49  ;;  %5529 = vmatprep.mubr.msk.f32.mxu0 %vm283_vm1, %v6440_v9  ;;  %v6469_v9 = vld [vmem:[%s7386_s1 + $0x1c] sm:$0xf] }
  0x7a   : > { %5479 = vmatprep.mubr.msk.f32.mxu1 %vm283_vm1, %v6438_v24 }
  0x7c   : > { %5530 = vmatmul.mubr.msk.f32.gmra.mxu0 %vm283_vm1, %v6452_v43  ;;  %v6474_v43 = vld [vmem:[%s7386_s1 + $0x20] sm:$0xf] }
  0x7d   : > { %5480 = vmatmul.mubr.msk.f32.gmra.mxu1 %vm283_vm1, %v6450_v14  ;;  %5584 = vmatprep.mubr.msk.f32.mxu0 %vm283_vm1, %v6184_v23  ;;  %v6594_v23 = vld [vmem:[#allocation2 + $0x180] sm:$0xff] }
  0x7e   : > { %5534 = vmatprep.mubr.msk.f32.mxu1 %vm283_vm1, %v6005_v31  ;;  %v282_v31 = vld [vmem:[%s5948_s25 + $0x1a8] sm:$0x3] }
  0x7f   : > { %338 = vst.msk [vmem:[#allocation2 + $0x1a8] sm:$0x3] %vm286_vm2, %v282_v31 }
  0x80   : > { %5585 = vmatmul.mubr.msk.f32.vlgmr.msra.gmra.mxu0 %vm283_vm1, %v6205_v29  ;;  %v6606_v29 = vld [vmem:[#allocation2 + $0x188] sm:$0xff] }
  0x81   : > { %5535 = vmatmul.mubr.msk.f32.vlgmr.msra.gmra.mxu1 %vm283_vm1, %v6026_v35  ;;  %5683 = vmatpush3.msk.msra.mxu0 %vm532_vm0, %v6199_v27  ;;  %v7481_v35 = vld [vmem:[#allocation4_spill] sm:$0xff]  ;;  %v7483_v27 = vld [vmem:[#allocation5_spill] sm:$0xff] }
  0x82   : > { %5633 = vmatpush3.msk.msra.mxu1 %vm532_vm0, %v6194_v26  ;;  %5537 = vmatprep.mubr.msk.f32.mxu1 %vm283_vm1, %v6034_v37  ;;  %v6596_v26 = vld [vmem:[#allocation2 + $0x181] sm:$0xff] }
  0x83   : > { %5587 = vmatprep.mubr.msk.f32.mxu0 %vm283_vm1, %v6215_v45  ;;  %5732 = vmatprep.subr.msk.mxu1 %vm532_vm0, %v6469_v9  ;;  %7482 = vst [vmem:[#allocation4_spill] sm:$0xff] %v6596_v26 }
  0x84   : > { %5782 = vmatprep.subr.msk.mxu0 %vm532_vm0, %v6474_v43  ;;  %5588 = vmatmul.mubr.msk.f32.gmra.mxu0 %vm283_vm1, %v6237_v48 }
  0x85   : > { %5538 = vmatmul.mubr.msk.f32.gmra.mxu1 %vm283_vm1, %v6046_v39  ;;  %5590 = vmatprep.mubr.msk.f32.mxu0 %vm283_vm1, %v6242_v50 }
  0x86   : > { %5540 = vmatprep.mubr.msk.f32.mxu1 %vm283_vm1, %v6054_v41 }
  0x88   : > { %5591 = vmatmul.mubr.msk.f32.gmra.mxu0 %vm283_vm1, %v6254_v56 }
  0x89   : > { %5541 = vmatmul.mubr.msk.f32.gmra.mxu1 %vm283_vm1, %v6080_v51  ;;  %5593 = vmatprep.mubr.msk.f32.mxu0 %vm283_vm1, %v6258_v58 }
  0x8a   : > { %5543 = vmatprep.mubr.msk.f32.mxu1 %vm283_vm1, %v6087_v54 }
  0x8c   : > { %5594 = vmatmul.mubr.msk.f32.gmra.mxu0 %vm283_vm1, %v6270_v2 }
  0x8d   : > { %5544 = vmatmul.mubr.msk.f32.gmra.mxu1 %vm283_vm1, %v6105_v59  ;;  %5596 = vmatprep.mubr.msk.f32.mxu0 %vm283_vm1, %v6274_v10 }
  0x8e   : > { %5546 = vmatprep.mubr.msk.f32.mxu1 %vm283_vm1, %v6111_v62 }
  0x90   : > { %5597 = vmatmul.mubr.msk.f32.gmra.mxu0 %vm283_vm1, %v6286_v12 }
  0x91   : > { %5547 = vmatmul.mubr.msk.f32.gmra.mxu1 %vm283_vm1, %v6124_v0  ;;  %5599 = vmatprep.mubr.msk.f32.mxu0 %vm283_vm1, %v6290_v16 }
  0x92   : > { %5549 = vmatprep.mubr.msk.f32.mxu1 %vm283_vm1, %v6129_v3 }
  0x94   : > { %5600 = vmatmul.mubr.msk.f32.gmra.mxu0 %vm283_vm1, %v6302_v18 }
  0x95   : > { %5550 = vmatmul.mubr.msk.f32.gmra.mxu1 %vm283_vm1, %v6143_v6  ;;  %5602 = vmatprep.mubr.msk.f32.mxu0 %vm283_vm1, %v6306_v20 }
  0x96   : > { %5552 = vmatprep.mubr.msk.f32.mxu1 %vm283_vm1, %v6148_v8 }
  0x98   : > { %5603 = vmatmul.mubr.msk.f32.gmra.mxu0 %vm283_vm1, %v6318_v22 }
  0x99   : > { %5553 = vmatmul.mubr.msk.f32.gmra.mxu1 %vm283_vm1, %v6165_v13  ;;  %5605 = vmatprep.mubr.msk.f32.mxu0 %vm283_vm1, %v6322_v44 }
  0x9a   : > { %5555 = vmatprep.mubr.msk.f32.mxu1 %vm283_vm1, %v5995_v28 }
  0x9c   : > { %5606 = vmatmul.mubr.msk.f32.gmra.mxu0 %vm283_vm1, %v6334_v46 }
  0x9d   : > { %5556 = vmatmul.mubr.msk.f32.gmra.mxu1 %vm283_vm1, %v6003_v30  ;;  %5608 = vmatprep.mubr.msk.f32.mxu0 %vm283_vm1, %v6338_v21 }
  0x9e   : > { %5558 = vmatprep.mubr.msk.f32.mxu1 %vm283_vm1, %v6007_v32 }
  0xa0   : > { %5609 = vmatmul.mubr.msk.f32.gmra.mxu0 %vm283_vm1, %v6350_v34 }
  0xa1   : > { %5559 = vmatmul.mubr.msk.f32.gmra.mxu1 %vm283_vm1, %v6028_v36  ;;  %5611 = vmatprep.mubr.msk.f32.mxu0 %vm283_vm1, %v6354_v17 }
  0xa2   : > { %5561 = vmatprep.mubr.msk.f32.mxu1 %vm283_vm1, %v6036_v38 }
  0xa4   : > { %5612 = vmatmul.mubr.msk.f32.gmra.mxu0 %vm283_vm1, %v6366_v19 }
  0xa5   : > { %5562 = vmatmul.mubr.msk.f32.gmra.mxu1 %vm283_vm1, %v6052_v40  ;;  %5614 = vmatprep.mubr.msk.f32.mxu0 %vm283_vm1, %v6370_v11 }
  0xa6   : > { %5564 = vmatprep.mubr.msk.f32.mxu1 %vm283_vm1, %v6056_v42 }
  0xa8   : > { %5615 = vmatmul.mubr.msk.f32.gmra.mxu0 %vm283_vm1, %v6382_v15 }
  0xa9   : > { %5565 = vmatmul.mubr.msk.f32.gmra.mxu1 %vm283_vm1, %v6082_v52  ;;  %5617 = vmatprep.mubr.msk.f32.mxu0 %vm283_vm1, %v6386_v61 }
  0xaa   : > { %5567 = vmatprep.mubr.msk.f32.mxu1 %vm283_vm1, %v6089_v55 }
  0xac   : > { %5618 = vmatmul.mubr.msk.f32.gmra.mxu0 %vm283_vm1, %v6398_v5  ;;  %v7509_v5 = vld [vmem:[#allocation27_spill] sm:$0xff] }
  0xad   : > { %5568 = vmatmul.mubr.msk.f32.gmra.mxu1 %vm283_vm1, %v6107_v60  ;;  %5620 = vmatprep.mubr.msk.f32.mxu0 %vm283_vm1, %v6402_v53  ;;  %v7486_v53 = vld [vmem:[#allocation7_spill] sm:$0xff] }
  0xae   : > { %5570 = vmatprep.mubr.msk.f32.mxu1 %vm283_vm1, %v6113_v63 }
  0xb0   : > { %5621 = vmatmul.mubr.msk.f32.gmra.mxu0 %vm283_vm1, %v6414_v57  ;;  %v7487_v57 = vld [vmem:[#allocation8_spill] sm:$0xff] }
  0xb1   : > { %5571 = vmatmul.mubr.msk.f32.gmra.mxu1 %vm283_vm1, %v6126_v1  ;;  %5623 = vmatprep.mubr.msk.f32.mxu0 %vm283_vm1, %v6418_v33  ;;  %v6608_v33 = vld [vmem:[#allocation2 + $0x189] sm:$0xff] }
  0xb2   : > { %5573 = vmatprep.mubr.msk.f32.mxu1 %vm283_vm1, %v6131_v4  ;;  %7484 = vst [vmem:[#allocation5_spill] sm:$0xff] %v6608_v33 }
  0xb4   : > { %5624 = vmatmul.mubr.msk.f32.gmra.mxu0 %vm283_vm1, %v6434_v49  ;;  %v7485_v49 = vld [vmem:[#allocation6_spill] sm:$0xff] }
  0xb5   : > { %5574 = vmatmul.mubr.msk.f32.gmra.mxu1 %vm283_vm1, %v6145_v7  ;;  %5626 = vmatprep.mubr.msk.f32.mxu0 %vm283_vm1, %v6438_v24  ;;  %v7488_v24 = vld [vmem:[#allocation9_spill] sm:$0xff] }
  0xb6   : > { %5576 = vmatprep.mubr.msk.f32.mxu1 %vm283_vm1, %v7481_v35 }
  0xb8   : > { %5627 = vmatmul.mubr.msk.f32.gmra.mxu0 %vm283_vm1, %v6450_v14 }
  0xb9   : > { %5577 = vmatmul.mubr.msk.f32.gmra.mxu1 %vm283_vm1, %v7483_v27  ;;  %5629 = vmatprep.mubr.msk.f32.mxu0 %vm283_vm1, %v6596_v26 }
  0xba   : > { %5579 = vmatprep.mubr.msk.f32.mxu1 %vm283_vm1, %v6594_v23 }
  0xbc   : > { %5630 = vmatmul.mubr.msk.f32.gmra.mxu0 %vm283_vm1, %v6608_v33 }
  0xbd   : > { %5580 = vmatmul.mubr.msk.f32.gmra.mxu1 %vm283_vm1, %v6606_v29  ;;  %5684 = vmatprep.mubr.msk.f32.mxu0 %vm283_vm1, %v6034_v37  ;;  %v7489_v37 = vld [vmem:[#allocation10_spill] sm:$0xff] }
  0xbe   : > { %5634 = vmatprep.mubr.msk.f32.mxu1 %vm283_vm1, %v7485_v49  ;;  %v7505_v49 = vld [vmem:[#allocation25_spill] sm:$0xff] }
  0xc0   : > { %5685 = vmatmul.mubr.msk.f32.vlgmr.msra.gmra.mxu0 %vm283_vm1, %v6046_v39  ;;  %v7490_v39 = vld [vmem:[#allocation11_spill] sm:$0xff] }
  0xc1   : > { %5635 = vmatmul.mubr.msk.f32.vlgmr.msra.gmra.mxu1 %vm283_vm1, %v7486_v53  ;;  %5783 = vmatpush3.msk.msra.mxu0 %vm532_vm0, %v6474_v43  ;;  %v7502_v43 = vld [vmem:[#allocation23_spill] sm:$0xff] }
  0xc2   : > { %5733 = vmatpush3.msk.msra.mxu1 %vm532_vm0, %v6469_v9  ;;  %5637 = vmatprep.mubr.msk.f32.mxu1 %vm283_vm1, %v7487_v57  ;;  %v7491_v9 = vld [vmem:[#allocation12_spill] sm:$0xff] }
  0xc3   : > { %5687 = vmatprep.mubr.msk.f32.mxu0 %vm283_vm1, %v6054_v41  ;;  %v7492_v41 = vld [vmem:[#allocation13_spill] sm:$0xff] }
  0xc4   : > { %5688 = vmatmul.mubr.msk.f32.gmra.mxu0 %vm283_vm1, %v6080_v51  ;;  %v7493_v51 = vld [vmem:[#allocation14_spill] sm:$0xff] }
  0xc5   : > { %5638 = vmatmul.mubr.msk.f32.gmra.mxu1 %vm283_vm1, %v7488_v24  ;;  %5690 = vmatprep.mubr.msk.f32.mxu0 %vm283_vm1, %v6087_v54  ;;  %v7494_v54 = vld [vmem:[#allocation15_spill] sm:$0xff] }
  0xc6   : > { %5640 = vmatprep.mubr.msk.f32.mxu1 %vm283_vm1, %v7489_v37 }
  0xc8   : > { %5691 = vmatmul.mubr.msk.f32.gmra.mxu0 %vm283_vm1, %v6105_v59  ;;  %v7495_v59 = vld [vmem:[#allocation16_spill] sm:$0xff] }
  0xc9   : > { %5641 = vmatmul.mubr.msk.f32.gmra.mxu1 %vm283_vm1, %v7490_v39  ;;  %5693 = vmatprep.mubr.msk.f32.mxu0 %vm283_vm1, %v6111_v62  ;;  %v7496_v62 = vld [vmem:[#allocation17_spill] sm:$0xff] }
  0xca   : > { %5643 = vmatprep.mubr.msk.f32.mxu1 %vm283_vm1, %v7491_v9 }
  0xcc   : > { %5694 = vmatmul.mubr.msk.f32.gmra.mxu0 %vm283_vm1, %v6124_v0  ;;  %v7497_v0 = vld [vmem:[#allocation18_spill] sm:$0xff] }
  0xcd   : > { %5644 = vmatmul.mubr.msk.f32.gmra.mxu1 %vm283_vm1, %v7492_v41  ;;  %5696 = vmatprep.mubr.msk.f32.mxu0 %vm283_vm1, %v6129_v3  ;;  %v7498_v3 = vld [vmem:[#allocation19_spill] sm:$0xff] }
  0xce   : > { %5646 = vmatprep.mubr.msk.f32.mxu1 %vm283_vm1, %v7493_v51 }
  0xd0   : > { %5697 = vmatmul.mubr.msk.f32.gmra.mxu0 %vm283_vm1, %v6143_v6  ;;  %v7499_v6 = vld [vmem:[#allocation20_spill] sm:$0xff] }
  0xd1   : > { %5647 = vmatmul.mubr.msk.f32.gmra.mxu1 %vm283_vm1, %v7494_v54  ;;  %5699 = vmatprep.mubr.msk.f32.mxu0 %vm283_vm1, %v6148_v8  ;;  %v7500_v8 = vld [vmem:[#allocation21_spill] sm:$0xff] }
  0xd2   : > { %5649 = vmatprep.mubr.msk.f32.mxu1 %vm283_vm1, %v7495_v59 }
  0xd4   : > { %5700 = vmatmul.mubr.msk.f32.gmra.mxu0 %vm283_vm1, %v6165_v13  ;;  %v7501_v13 = vld [vmem:[#allocation22_spill] sm:$0xff] }
  0xd5   : > { %5650 = vmatmul.mubr.msk.f32.gmra.mxu1 %vm283_vm1, %v7496_v62  ;;  %5702 = vmatprep.mubr.msk.f32.mxu0 %vm283_vm1, %v5995_v28 }
  0xd6   : > { %5652 = vmatprep.mubr.msk.f32.mxu1 %vm283_vm1, %v7497_v0 }
  0xd8   : > { %5703 = vmatmul.mubr.msk.f32.gmra.mxu0 %vm283_vm1, %v6003_v30 }
  0xd9   : > { %5653 = vmatmul.mubr.msk.f32.gmra.mxu1 %vm283_vm1, %v7498_v3  ;;  %5705 = vmatprep.mubr.msk.f32.mxu0 %vm283_vm1, %v6007_v32  ;;  %v7503_v32 = vld [vmem:[#allocation24_spill] sm:$0xff] }
  0xda   : > { %5655 = vmatprep.mubr.msk.f32.mxu1 %vm283_vm1, %v7499_v6 }
  0xdc   : > { %5706 = vmatmul.mubr.msk.f32.gmra.mxu0 %vm283_vm1, %v6028_v36 }
  0xdd   : > { %5656 = vmatmul.mubr.msk.f32.gmra.mxu1 %vm283_vm1, %v7500_v8  ;;  %5708 = vmatprep.mubr.msk.f32.mxu0 %vm283_vm1, %v6036_v38 }
  0xde   : > { %5658 = vmatprep.mubr.msk.f32.mxu1 %vm283_vm1, %v7501_v13 }
  0xe0   : > { %v6686_v28 = vpop.f32.mrf.mxu0  ;;  %5709 = vmatmul.mubr.msk.f32.gmra.mxu0 %vm283_vm1, %v6052_v40  ;;  %v7506_v40 = vld [vmem:[#allocation26_spill] sm:$0xff] }
  0xe1   : > { %v6688_v30 = vpop.f32.mrf.mxu1  ;;  %5659 = vmatmul.mubr.msk.f32.gmra.mxu1 %vm283_vm1, %v7502_v43  ;;  %5711 = vmatprep.mubr.msk.f32.mxu0 %vm283_vm1, %v6056_v42 }
  0xe2   : > { %5661 = vmatprep.mubr.msk.f32.mxu1 %vm283_vm1, %v7503_v32  ;;  %v6698_v36 = vpop.f32.mrf.mxu0 }
  0xe3   : > { %v6700_v14 = vpop.f32.mrf.mxu1 }
  0xe4   : > { %v6702_v38 = vpop.f32.mrf.mxu0  ;;  %5712 = vmatmul.mubr.msk.f32.gmra.mxu0 %vm283_vm1, %v6082_v52  ;;  %v7510_v52 = vld [vmem:[#allocation29_spill] sm:$0xff] }
  0xe5   : > { %v6704_v31 = vpop.f32.mrf.mxu1  ;;  %5662 = vmatmul.mubr.msk.f32.gmra.mxu1 %vm283_vm1, %v7505_v49  ;;  %5714 = vmatprep.mubr.msk.f32.mxu0 %vm283_vm1, %v6089_v55 }
  0xe6   : > { %7504 = vst [vmem:[#allocation6_spill] sm:$0xff] %v6704_v31  ;;  %5664 = vmatprep.mubr.msk.f32.mxu1 %vm283_vm1, %v7506_v40  ;;  %v6714_v42 = vpop.f32.mrf.mxu0 }
  0xe7   : > { %v6716_v53 = vpop.f32.mrf.mxu1 }
  0xe8   : > { %7507 = vst [vmem:[#allocation7_spill] sm:$0xff] %v6716_v53  ;;  %v6718_v33 = vpop.f32.mrf.mxu0  ;;  %5715 = vmatmul.mubr.msk.f32.gmra.mxu0 %vm283_vm1, %v6107_v60  ;;  %v7514_v60 = vld [vmem:[#allocation32_spill] sm:$0xff] }
  0xe9   : > { %v6720_v26 = vpop.f32.mrf.mxu1  ;;  %5665 = vmatmul.mubr.msk.f32.gmra.mxu1 %vm283_vm1, %v7509_v5  ;;  %5717 = vmatprep.mubr.msk.f32.mxu0 %vm283_vm1, %v6113_v63 }
  0xea   : > { %7508 = vst [vmem:[#allocation8_spill] sm:$0xff] %v6720_v26  ;;  %5667 = vmatprep.mubr.msk.f32.mxu1 %vm283_vm1, %v7510_v52  ;;  %v6730_v55 = vpop.f32.mrf.mxu0  ;;  %v7513_v26 = vld [vmem:[#allocation31_spill] sm:$0xff] }
  0xeb   : > { %v6732_v61 = vpop.f32.mrf.mxu1 }
  0xec   : > { %7511 = vst [vmem:[#allocation9_spill] sm:$0xff] %v6732_v61  ;;  %v6734_v53 = vpop.f32.mrf.mxu0  ;;  %5718 = vmatmul.mubr.msk.f32.gmra.mxu0 %vm283_vm1, %v6126_v1  ;;  %v7517_v1 = vld [vmem:[#allocation33_spill] sm:$0xff] }
  0xed   : > { %v6736_v31 = vpop.f32.mrf.mxu1  ;;  %5668 = vmatmul.mubr.msk.f32.gmra.mxu1 %vm283_vm1, %v7513_v26  ;;  %5720 = vmatprep.mubr.msk.f32.mxu0 %vm283_vm1, %v6131_v4 }
  0xee   : > { %7512 = vst [vmem:[#allocation10_spill] sm:$0xff] %v6736_v31  ;;  %5670 = vmatprep.mubr.msk.f32.mxu1 %vm283_vm1, %v7514_v60  ;;  %v6746_v63 = vpop.f32.mrf.mxu0 }
  0xef   : > { %v6748_v52 = vpop.f32.mrf.mxu1 }
  0xf0   : > { %7515 = vst [vmem:[#allocation11_spill] sm:$0xff] %v6748_v52  ;;  %v6750_v61 = vpop.f32.mrf.mxu0  ;;  %5721 = vmatmul.mubr.msk.f32.gmra.mxu0 %vm283_vm1, %v6145_v7  ;;  %v7520_v7 = vld [vmem:[#allocation34_spill] sm:$0xff] }
  0xf1   : > { %v6752_v5 = vpop.f32.mrf.mxu1  ;;  %5671 = vmatmul.mubr.msk.f32.gmra.mxu1 %vm283_vm1, %v6416_v25  ;;  %5723 = vmatprep.mubr.msk.f32.mxu0 %vm283_vm1, %v7481_v35 }
  0xf2   : > { %7516 = vst [vmem:[#allocation12_spill] sm:$0xff] %v6752_v5  ;;  %5673 = vmatprep.mubr.msk.f32.mxu1 %vm283_vm1, %v7517_v1  ;;  %v6762_v4 = vpop.f32.mrf.mxu0  ;;  %v6782_v1 = vld [vmem:[#allocation2 + $0x182] sm:$0xff] }
  0xf3   : > { %v6764_v60 = vpop.f32.mrf.mxu1  ;;  %7522 = vst [vmem:[#allocation16_spill] sm:$0xff] %v6782_v1 }
  0xf4   : > { %7518 = vst [vmem:[#allocation13_spill] sm:$0xff] %v6764_v60  ;;  %v6766_v52 = vpop.f32.mrf.mxu0  ;;  %5724 = vmatmul.mubr.msk.f32.gmra.mxu0 %vm283_vm1, %v7483_v27  ;;  %v3127_v60 = vld [vmem:[#allocation2 + $0x198] sm:$0xff]  ;;  %v3128_v27 = vld [vmem:[#allocation2 + $0x1a0] sm:$0xff] }
  0xf5   : > { %v6768_v31 = vpop.f32.mrf.mxu1  ;;  %5674 = vmatmul.mubr.msk.f32.gmra.mxu1 %vm283_vm1, %v6436_v47  ;;  %5726 = vmatprep.mubr.msk.f32.mxu0 %vm283_vm1, %v6594_v23  ;;  %v7524_v47 = vld [vmem:[#allocation35_spill] sm:$0xff] }
  0xf6   : > { %7519 = vst [vmem:[#allocation14_spill] sm:$0xff] %v6768_v31  ;;  %5676 = vmatprep.mubr.msk.f32.mxu1 %vm283_vm1, %v7520_v7  ;;  %v6778_v25 = vpop.f32.mrf.mxu0  ;;  %v6795_v23 = vld [vmem:[#allocation2 + $0x18a] sm:$0xff] }
  0xf7   : > { %v6780_v35 = vpop.f32.mrf.mxu1  ;;  %7525 = vst [vmem:[#allocation18_spill] sm:$0xff] %v6795_v23 }
  0xf8   : > { %7521 = vst [vmem:[#allocation15_spill] sm:$0xff] %v6780_v35  ;;  %v6784_v31 = vpop.f32.mrf.mxu0  ;;  %5727 = vmatmul.mubr.msk.f32.gmra.mxu0 %vm283_vm1, %v6606_v29 }
  0xf9   : > { %v6786_v5 = vpop.f32.mrf.mxu1  ;;  %5677 = vmatmul.mubr.msk.f32.gmra.mxu1 %vm283_vm1, %v7524_v47  ;;  %5729 = vmatprep.mubr.msk.f32.mxu0 %vm283_vm1, %v3127_v60 }
  0xfa   : > { %7523 = vst [vmem:[#allocation17_spill] sm:$0xff] %v6786_v5  ;;  %5679 = vmatprep.mubr.msk.f32.mxu1 %vm283_vm1, %v6782_v1  ;;  %v6797_v7 = vpop.f32.mrf.mxu0 }
  0xfb   : > { %v6799_v35 = vpop.f32.mrf.mxu1 }
  0xfc   : > { %7526 = vst [vmem:[#allocation19_spill] sm:$0xff] %v6799_v35  ;;  %v6801_v26 = vpop.f32.mrf.mxu0  ;;  %5730 = vmatmul.mubr.msk.f32.gmra.mxu0 %vm283_vm1, %v3128_v27 }
  0xfd   : > { %v6803_v5 = vpop.f32.mrf.mxu1  ;;  %5680 = vmatmul.mubr.msk.f32.gmra.mxu1 %vm283_vm1, %v6795_v23  ;;  %5784 = vmatprep.mubr.msk.f32.mxu0 %vm283_vm1, %v7487_v57 }
  0xfe   : > { %7527 = vst [vmem:[#allocation20_spill] sm:$0xff] %v6803_v5  ;;  %5734 = vmatprep.mubr.msk.f32.mxu1 %vm283_vm1, %v6215_v45  ;;  %v6812_v29 = vpop.f32.mrf.mxu0 }
  0xff   : > { %v6814_v60 = vpop.f32.mrf.mxu1 }
 0x100   : > { %7528 = vst [vmem:[#allocation21_spill] sm:$0xff] %v6814_v60  ;;  %v5486_v35 = vpop.f32.mrf.mxu0  ;;  %5785 = vmatmul.mubr.msk.f32.vlgmr.msra.gmra.mxu0 %vm283_vm1, %v7488_v24 }
 0x101   : > { %v5436_v47 = vpop.f32.mrf.mxu1  ;;  %5735 = vmatmul.mubr.msk.f32.vlgmr.msra.gmra.mxu1 %vm283_vm1, %v6237_v48  ;;  %5787 = vmatprep.mubr.msk.f32.mxu0 %vm283_vm1, %v7489_v37 }
 0x102   : > { %v1216_v27 = vadd.f32 %v5436_v47, %v6686_v28  ;;  %5737 = vmatprep.mubr.msk.f32.mxu1 %vm283_vm1, %v6242_v50  ;;  %v1510_v57 = vpop.f32.mrf.mxu0 }
 0x103   : > { %v1056_v45 = vpop.f32.mrf.mxu1 }
 0x104   : > { %v6825_v5 = vadd.f32 %v5486_v35, %v1216_v27  ;;  %v1215_v60 = vadd.f32 %v1056_v45, %v6698_v36  ;;  %v5489_v1 = vpop.f32.mrf.mxu0  ;;  %5788 = vmatmul.mubr.msk.f32.gmra.mxu0 %vm283_vm1, %v7490_v39 }
 0x105   : > { %v5439_v23 = vpop.f32.mrf.mxu1  ;;  %5738 = vmatmul.mubr.msk.f32.gmra.mxu1 %vm283_vm1, %v6254_v56  ;;  %5790 = vmatprep.mubr.msk.f32.mxu0 %vm283_vm1, %v7491_v9 }
 0x106   : > { %v6832_v48 = vadd.f32 %v1510_v57, %v1215_v60  ;;  %v1218_v50 = vadd.f32 %v5439_v23, %v6702_v38  ;;  %5740 = vmatprep.mubr.msk.f32.mxu1 %vm283_vm1, %v6258_v58  ;;  %v1520_v37 = vpop.f32.mrf.mxu0 }
 0x107   : > { %v1066_v24 = vpop.f32.mrf.mxu1 }
 0x108   : > { %v6839_v28 = vadd.f32 %v5489_v1, %v1218_v50  ;;  %v1217_v36 = vadd.f32 %v1066_v24, %v6714_v42  ;;  %v5492_v35 = vpop.f32.mrf.mxu0  ;;  %5791 = vmatmul.mubr.msk.f32.gmra.mxu0 %vm283_vm1, %v7492_v41 }
 0x109   : > { %v5442_v56 = vpop.f32.mrf.mxu1  ;;  %5741 = vmatmul.mubr.msk.f32.gmra.mxu1 %vm283_vm1, %v6270_v2  ;;  %5793 = vmatprep.mubr.msk.f32.mxu0 %vm283_vm1, %v7493_v51 }
 0x10a   : > { %v6846_v39 = vadd.f32 %v1520_v37, %v1217_v36  ;;  %v1220_v58 = vadd.f32 %v5442_v56, %v6718_v33  ;;  %5743 = vmatprep.mubr.msk.f32.mxu1 %vm283_vm1, %v6274_v10  ;;  %v1530_v38 = vpop.f32.mrf.mxu0 }
 0x10b   : > { %v1076_v9 = vpop.f32.mrf.mxu1 }
 0x10c   : > { %v6853_v42 = vadd.f32 %v5492_v35, %v1220_v58  ;;  %v1219_v1 = vadd.f32 %v1076_v9, %v6730_v55  ;;  %v5495_v23 = vpop.f32.mrf.mxu0  ;;  %5794 = vmatmul.mubr.msk.f32.gmra.mxu0 %vm283_vm1, %v7494_v54 }
 0x10d   : > { %v5445_v2 = vpop.f32.mrf.mxu1  ;;  %5744 = vmatmul.mubr.msk.f32.gmra.mxu1 %vm283_vm1, %v6286_v12  ;;  %5796 = vmatprep.mubr.msk.f32.mxu0 %vm283_vm1, %v7495_v59 }
 0x10e   : > { %v6860_v33 = vadd.f32 %v1530_v38, %v1219_v1  ;;  %v1222_v10 = vadd.f32 %v5445_v2, %v6734_v53  ;;  %5746 = vmatprep.mubr.msk.f32.mxu1 %vm283_vm1, %v6290_v16  ;;  %v1540_v51 = vpop.f32.mrf.mxu0  ;;  %v7531_v38 = vld [vmem:[#allocation28_spill] sm:$0xff]  ;;  %v3573_v2 = vld [vmem:[#allocation2 + $0x139] sm:$0xff] }
 0x10f   : > { %v1086_v41 = vpop.f32.mrf.mxu1 }
 0x110   : > { %v6867_v55 = vadd.f32 %v5495_v23, %v1222_v10  ;;  %v1221_v60 = vadd.f32 %v1086_v41, %v6746_v63  ;;  %v5498_v47 = vpop.f32.mrf.mxu0  ;;  %5797 = vmatmul.mubr.msk.f32.gmra.mxu0 %vm283_vm1, %v7496_v62  ;;  %v4027_v23 = vld [vmem:[#allocation2 + $0x13a] sm:$0xff] }
 0x111   : > { %v5448_v12 = vpop.f32.mrf.mxu1  ;;  %5747 = vmatmul.mubr.msk.f32.gmra.mxu1 %vm283_vm1, %v6302_v18  ;;  %5799 = vmatprep.mubr.msk.f32.mxu0 %vm283_vm1, %v7497_v0 }
 0x112   : > { %v6874_v54 = vadd.f32 %v1540_v51, %v1221_v60  ;;  %v1224_v16 = vadd.f32 %v5448_v12, %v6750_v61  ;;  %5749 = vmatprep.mubr.msk.f32.mxu1 %vm283_vm1, %v6306_v20  ;;  %v1550_v53 = vpop.f32.mrf.mxu0  ;;  %v7534_v12 = vld [vmem:[#allocation30_spill] sm:$0xff] }
 0x113   : > { %v1096_v59 = vpop.f32.mrf.mxu1 }
 0x114   : > { %v6881_v63 = vadd.f32 %v5498_v47, %v1224_v16  ;;  %v1223_v27 = vadd.f32 %v1096_v59, %v6762_v4  ;;  %v5501_v45 = vpop.f32.mrf.mxu0  ;;  %5800 = vmatmul.mubr.msk.f32.gmra.mxu0 %vm283_vm1, %v7498_v3  ;;  %v7535_v47 = vld [vmem:[#allocation31_spill] sm:$0xff]  ;;  %v7536_v59 = vld [vmem:[#allocation8_spill] sm:$0xff] }
 0x115   : > { %v5451_v18 = vpop.f32.mrf.mxu1  ;;  %5750 = vmatmul.mubr.msk.f32.gmra.mxu1 %vm283_vm1, %v6318_v22  ;;  %5802 = vmatprep.mubr.msk.f32.mxu0 %vm283_vm1, %v7499_v6 }
 0x116   : > { %v6888_v61 = vadd.f32 %v1550_v53, %v1223_v27  ;;  %v1226_v20 = vadd.f32 %v5451_v18, %v6766_v52  ;;  %5752 = vmatprep.mubr.msk.f32.mxu1 %vm283_vm1, %v6322_v44  ;;  %v1560_v0 = vpop.f32.mrf.mxu0  ;;  %v3574_v27 = vld [vmem:[#allocation2 + $0x141] sm:$0xff] }
 0x117   : > { %v1106_v62 = vpop.f32.mrf.mxu1  ;;  %v4028_v18 = vld [vmem:[#allocation2 + $0x142] sm:$0xff] }
 0x118   : > { %v6895_v4 = vadd.f32 %v5501_v45, %v1226_v20  ;;  %v1225_v57 = vadd.f32 %v1106_v62, %v6778_v25  ;;  %v5504_v50 = vpop.f32.mrf.mxu0  ;;  %5803 = vmatmul.mubr.msk.f32.gmra.mxu0 %vm283_vm1, %v7500_v8  ;;  %v3575_v62 = vld [vmem:[#allocation2 + $0x151] sm:$0xff] }
 0x119   : > { %v5454_v22 = vpop.f32.mrf.mxu1  ;;  %5753 = vmatmul.mubr.msk.f32.gmra.mxu1 %vm283_vm1, %v6334_v46  ;;  %5805 = vmatprep.mubr.msk.f32.mxu0 %vm283_vm1, %v7501_v13 }
 0x11a   : > { %v6902_v3 = vadd.f32 %v1560_v0, %v1225_v57  ;;  %v1228_v44 = vadd.f32 %v5454_v22, %v6784_v31  ;;  %5755 = vmatprep.mubr.msk.f32.mxu1 %vm283_vm1, %v6338_v21  ;;  %v1570_v52 = vpop.f32.mrf.mxu0  ;;  %v4029_v0 = vld [vmem:[#allocation2 + $0x152] sm:$0xff] }
 0x11b   : > { %v1116_v6 = vpop.f32.mrf.mxu1  ;;  %v7537_v22 = vld [vmem:[#allocation9_spill] sm:$0xff] }
 0x11c   : > { %v6909_v25 = vadd.f32 %v5504_v50, %v1228_v44  ;;  %v1227_v24 = vadd.f32 %v1116_v6, %v6797_v7  ;;  %v5507_v37 = vpop.f32.mrf.mxu0  ;;  %5806 = vmatmul.mubr.msk.f32.gmra.mxu0 %vm283_vm1, %v7502_v43 }
 0x11d   : > { %v5457_v46 = vpop.f32.mrf.mxu1  ;;  %5756 = vmatmul.mubr.msk.f32.gmra.mxu1 %vm283_vm1, %v6350_v34  ;;  %5808 = vmatprep.mubr.msk.f32.mxu0 %vm283_vm1, %v7503_v32 }
 0x11e   : > { %v6916_v8 = vadd.f32 %v1570_v52, %v1227_v24  ;;  %v1230_v21 = vadd.f32 %v5457_v46, %v6801_v26  ;;  %5758 = vmatprep.mubr.msk.f32.mxu1 %vm283_vm1, %v6354_v17  ;;  %v1580_v31 = vpop.f32.mrf.mxu0  ;;  %v7538_v24 = vld [vmem:[#allocation10_spill] sm:$0xff] }
 0x11f   : > { %v1126_v13 = vpop.f32.mrf.mxu1 }
 0x120   : > { %v6923_v7 = vadd.f32 %v5507_v37, %v1230_v21  ;;  %v1229_v36 = vadd.f32 %v1126_v13, %v6812_v29  ;;  %v5510_v56 = vpop.f32.mrf.mxu0  ;;  %5809 = vmatmul.mubr.msk.f32.gmra.mxu0 %vm283_vm1, %v7505_v49  ;;  %v7529_v49 = vld [vmem:[#allocation27_spill] sm:$0xff]  ;;  %v3576_v37 = vld [vmem:[#allocation2 + $0x159] sm:$0xff] }
 0x121   : > { %v5460_v34 = vpop.f32.mrf.mxu1  ;;  %5759 = vmatmul.mubr.msk.f32.gmra.mxu1 %vm283_vm1, %v6366_v19  ;;  %5811 = vmatprep.mubr.msk.f32.mxu0 %vm283_vm1, %v7506_v40  ;;  %v7532_v40 = vld [vmem:[#allocation29_spill] sm:$0xff] }
 0x122   : > { %v6930_v26 = vadd.f32 %v1580_v31, %v1229_v36  ;;  %v1232_v17 = vadd.f32 %v5460_v34, %v6688_v30  ;;  %5761 = vmatprep.mubr.msk.f32.mxu1 %vm283_vm1, %v6370_v11  ;;  %v1590_v32 = vpop.f32.mrf.mxu0  ;;  %v7530_v11 = vld [vmem:[#allocation6_spill] sm:$0xff]  ;;  %v3577_v36 = vld [vmem:[#allocation2 + $0x169] sm:$0xff] }
 0x123   : > { %v1136_v43 = vpop.f32.mrf.mxu1  ;;  %v4030_v21 = vld [vmem:[#allocation2 + $0x15a] sm:$0xff]  ;;  %v4031_v34 = vld [vmem:[#allocation2 + $0x16a] sm:$0xff] }
 0x124   : > { %v6937_v29 = vadd.f32 %v5510_v56, %v1232_v17  ;;  %v1231_v35 = vadd.f32 %v1136_v43, %v6700_v14  ;;  %v5513_v58 = vpop.f32.mrf.mxu0  ;;  %5812 = vmatmul.mubr.msk.f32.gmra.mxu0 %vm283_vm1, %v7529_v49  ;;  %v7539_v17 = vld [vmem:[#allocation11_spill] sm:$0xff] }
 0x125   : > { %v5463_v19 = vpop.f32.mrf.mxu1  ;;  %5762 = vmatmul.mubr.msk.f32.gmra.mxu1 %vm283_vm1, %v6382_v15  ;;  %5814 = vmatprep.mubr.msk.f32.mxu0 %vm283_vm1, %v7532_v40  ;;  %v7533_v15 = vld [vmem:[#allocation7_spill] sm:$0xff] }
 0x126   : > { %v6944_v30 = vadd.f32 %v1590_v32, %v1231_v35  ;;  %v1234_v9 = vadd.f32 %v5463_v19, %v7530_v11  ;;  %5764 = vmatprep.mubr.msk.f32.mxu1 %vm283_vm1, %v7531_v38  ;;  %v1600_v14 = vpop.f32.mrf.mxu0  ;;  %v3578_v11 = vld [vmem:[#allocation2 + $0x171] sm:$0xff] }
 0x127   : > { %v1146_v1 = vpop.f32.mrf.mxu1 }
 0x128   : > { %v6951_v10 = vadd.f32 %v5513_v58, %v1234_v9  ;;  %v1233_v41 = vadd.f32 %v1146_v1, %v7533_v15  ;;  %v5516_v60 = vpop.f32.mrf.mxu0  ;;  %5815 = vmatmul.mubr.msk.f32.gmra.mxu0 %vm283_vm1, %v7535_v47  ;;  %v7540_v58 = vld [vmem:[#allocation12_spill] sm:$0xff] }
 0x129   : > { %v5466_v51 = vpop.f32.mrf.mxu1  ;;  %5765 = vmatmul.mubr.msk.f32.gmra.mxu1 %vm283_vm1, %v7534_v12  ;;  %5817 = vmatprep.mubr.msk.f32.mxu0 %vm283_vm1, %v4027_v23  ;;  %v4032_v9 = vld [vmem:[#allocation2 + $0x172] sm:$0xff] }
 0x12a   : > { %v6958_v16 = vadd.f32 %v1600_v14, %v1233_v41  ;;  %v1236_v53 = vadd.f32 %v5466_v51, %v7536_v59  ;;  %5767 = vmatprep.mubr.msk.f32.mxu1 %vm283_vm1, %v3573_v2  ;;  %v1610_v20 = vpop.f32.mrf.mxu0  ;;  %v7541_v14 = vld [vmem:[#allocation13_spill] sm:$0xff]  ;;  %v7542_v51 = vld [vmem:[#allocation14_spill] sm:$0xff]  ;;  %v7543_v12 = vld [vmem:[#allocation4_spill] sm:$0xff] }
 0x12b   : > { %v1156_v45 = vpop.f32.mrf.mxu1  ;;  %v7544_v47 = vld [vmem:[#allocation16_spill] sm:$0xff] }
 0x12c   : > { %v6963_v57 = vadd.f32 %v5516_v60, %v1236_v53  ;;  %v1235_v50 = vadd.f32 %v1156_v45, %v7537_v22  ;;  %v5519_v6 = vpop.f32.mrf.mxu0  ;;  %5818 = vmatmul.mubr.msk.f32.gmra.mxu0 %vm283_vm1, %v4028_v18  ;;  %v4035_v18 = vld [vmem:[#allocation2 + $0x19a] sm:$0xff] }
 0x12d   : > { %v5469_v44 = vpop.f32.mrf.mxu1  ;;  %5768 = vmatmul.mubr.msk.f32.gmra.mxu1 %vm283_vm1, %v3574_v27  ;;  %5820 = vmatprep.mubr.msk.f32.mxu0 %vm283_vm1, %v4029_v0  ;;  %v3581_v27 = vld [vmem:[#allocation2 + $0x199] sm:$0xff] }
 0x12e   : > { %v6968_v52 = vadd.f32 %v1610_v20, %v1235_v50  ;;  %v1238_v46 = vadd.f32 %v5469_v44, %v7538_v24  ;;  %5770 = vmatprep.mubr.msk.f32.mxu1 %vm283_vm1, %v3575_v62  ;;  %v1620_v31 = vpop.f32.mrf.mxu0  ;;  %v7545_v20 = vld [vmem:[#allocation15_spill] sm:$0xff]  ;;  %v7546_v50 = vld [vmem:[#allocation5_spill] sm:$0xff]  ;;  %v7547_v44 = vld [vmem:[#allocation18_spill] sm:$0xff] }
 0x12f   : > { %v1166_v13 = vpop.f32.mrf.mxu1  ;;  %v7548_v24 = vld [vmem:[#allocation17_spill] sm:$0xff] }
 0x130   : > { %v6973_v56 = vadd.f32 %v5519_v6, %v1238_v46  ;;  %v1237_v43 = vadd.f32 %v1166_v13, %v7539_v17  ;;  %v5522_v35 = vpop.f32.mrf.mxu0  ;;  %5821 = vmatmul.mubr.msk.f32.gmra.mxu0 %vm283_vm1, %v4030_v21  ;;  %v4036_v21 = vld [vmem:[#allocation2 + $0x1a2] sm:$0xff] }
 0x131   : > { %v5472_v32 = vpop.f32.mrf.mxu1  ;;  %5771 = vmatmul.mubr.msk.f32.gmra.mxu1 %vm283_vm1, %v3576_v37  ;;  %5823 = vmatprep.mubr.msk.f32.mxu0 %vm283_vm1, %v4031_v34  ;;  %v3582_v37 = vld [vmem:[#allocation2 + $0x1a1] sm:$0xff] }
 0x132   : > { %v6978_v19 = vadd.f32 %v1620_v31, %v1237_v43  ;;  %v1240_v49 = vadd.f32 %v5472_v32, %v7540_v58  ;;  %5773 = vmatprep.mubr.msk.f32.mxu1 %vm283_vm1, %v3577_v36  ;;  %v1630_v40 = vpop.f32.mrf.mxu0  ;;  %v7549_v34 = vld [vmem:[#allocation19_spill] sm:$0xff]  ;;  %v7550_v58 = vld [vmem:[#allocation20_spill] sm:$0xff] }
 0x133   : > { %v1176_v38 = vpop.f32.mrf.mxu1 }
 0x134   : > { %v6983_v1 = vadd.f32 %v5522_v35, %v1240_v49  ;;  %v1239_v2 = vadd.f32 %v1176_v38, %v7541_v14  ;;  %v5525_v15 = vpop.f32.mrf.mxu0  ;;  %5824 = vmatmul.mubr.msk.f32.gmra.mxu0 %vm283_vm1, %v4032_v9 }
 0x135   : > { %v5475_v23 = vpop.f32.mrf.mxu1  ;;  %5774 = vmatmul.mubr.msk.f32.gmra.mxu1 %vm283_vm1, %v3578_v11  ;;  %5826 = vmatprep.mubr.msk.f32.mxu0 %vm283_vm1, %v7544_v47 }
 0x136   : > { %v6988_v41 = vadd.f32 %v1630_v40, %v1239_v2  ;;  %v1242_v60 = vadd.f32 %v5475_v23, %v7542_v51  ;;  %5776 = vmatprep.mubr.msk.f32.mxu1 %vm283_vm1, %v7543_v12  ;;  %v1640_v53 = vpop.f32.mrf.mxu0  ;;  %v7551_v40 = vld [vmem:[#allocation21_spill] sm:$0xff] }
 0x137   : > { %v1186_v59 = vpop.f32.mrf.mxu1 }
 0x138   : > { %v6995_v45 = vadd.f32 %v5525_v15, %v1242_v60  ;;  %v1241_v62 = vadd.f32 %v1186_v59, %v7545_v20  ;;  %v5528_v22 = vpop.f32.mrf.mxu0  ;;  %5827 = vmatmul.mubr.msk.f32.gmra.mxu0 %vm283_vm1, %v7547_v44 }
 0x139   : > { %v5478_v0 = vpop.f32.mrf.mxu1  ;;  %5777 = vmatmul.mubr.msk.f32.gmra.mxu1 %vm283_vm1, %v7546_v50  ;;  %5829 = vmatprep.mubr.msk.f32.mxu0 %vm283_vm1, %v4035_v18 }
 0x13a   : > { %v7002_v6 = vadd.f32 %v1640_v53, %v1241_v62  ;;  %v1244_v46 = vadd.f32 %v5478_v0, %v7548_v24  ;;  %5779 = vmatprep.mubr.msk.f32.mxu1 %vm283_vm1, %v3581_v27  ;;  %v1650_v31 = vpop.f32.mrf.mxu0 }
 0x13b   : > { %v1196_v13 = vpop.f32.mrf.mxu1 }
 0x13c   : > { %v7007_v36 = vadd.f32 %v5528_v22, %v1244_v46  ;;  %v1243_v17 = vadd.f32 %v1196_v13, %v7549_v34  ;;  %v5531_v32 = vpop.f32.mrf.mxu0  ;;  %5830 = vmatmul.mubr.msk.f32.gmra.mxu0 %vm283_vm1, %v4036_v21 }
 0x13d   : > { %v5481_v43 = vpop.f32.mrf.mxu1  ;;  %5780 = vmatmul.mubr.msk.f32.gmra.mxu1 %vm283_vm1, %v3582_v37 }
 0x13e   : > { %v7012_v35 = vadd.f32 %v1650_v31, %v1243_v17  ;;  %v1246_v49 = vadd.f32 %v5481_v43, %v7550_v58  ;;  %v1660_v9 = vpop.f32.mrf.mxu0 }
 0x13f   : > { %v1206_v11 = vpop.f32.mrf.mxu1 }
 0x140   : > { %v7015_v38 = vadd.f32 %v5531_v32, %v1246_v49  ;;  %v1245_v14 = vadd.f32 %v1206_v11, %v7551_v40  ;;  %v5586_v23 = vpop.f32.mrf.mxu0 }
 0x141   : > { %v5536_v2 = vpop.f32.mrf.mxu1 }
 0x142   : > { %v7018_v15 = vadd.f32 %v1660_v9, %v1245_v14  ;;  %v2125_v51 = vadd.f32 %v5536_v2, %v6825_v5  ;;  %v2419_v12 = vpop.f32.mrf.mxu0 }
 0x143   : > { %v1965_v60 = vpop.f32.mrf.mxu1 }
 0x144   : > { %v7021_v47 = vadd.f32 %v5586_v23, %v2125_v51  ;;  %v2124_v59 = vadd.f32 %v1965_v60, %v6832_v48  ;;  %v5589_v27 = vpop.f32.mrf.mxu0 }
 0x145   : > { %v5539_v53 = vpop.f32.mrf.mxu1 }
 0x146   : > { %v7024_v18 = vadd.f32 %v2419_v12, %v2124_v59  ;;  %v2127_v20 = vadd.f32 %v5539_v53, %v6839_v28  ;;  %v2429_v0 = vpop.f32.mrf.mxu0 }
 0x147   : > { %v1975_v62 = vpop.f32.mrf.mxu1 }
 0x148   : > { %v7027_v22 = vadd.f32 %v5589_v27, %v2127_v20  ;;  %v2126_v50 = vadd.f32 %v1975_v62, %v6846_v39  ;;  %v5592_v5 = vpop.f32.mrf.mxu0 }
 0x149   : > { %v5542_v44 = vpop.f32.mrf.mxu1 }
 0x14a   : > { %v7030_v24 = vadd.f32 %v2429_v0, %v2126_v50  ;;  %v2129_v46 = vadd.f32 %v5542_v44, %v6853_v42  ;;  %v2439_v48 = vpop.f32.mrf.mxu0 }
 0x14b   : > { %v1985_v37 = vpop.f32.mrf.mxu1 }
 0x14c   : > { %v7033_v21 = vadd.f32 %v5592_v5, %v2129_v46  ;;  %v2128_v13 = vadd.f32 %v1985_v37, %v6860_v33  ;;  %v5595_v28 = vpop.f32.mrf.mxu0 }
 0x14d   : > { %v5545_v31 = vpop.f32.mrf.mxu1 }
 0x14e   : > { %v7036_v34 = vadd.f32 %v2439_v48, %v2128_v13  ;;  %v2131_v17 = vadd.f32 %v5545_v31, %v6867_v55  ;;  %v2449_v39 = vpop.f32.mrf.mxu0 }
 0x14f   : > { %v1995_v43 = vpop.f32.mrf.mxu1 }
 0x150   : > { %v7039_v32 = vadd.f32 %v5595_v28, %v2131_v17  ;;  %v2130_v58 = vadd.f32 %v1995_v43, %v6874_v54  ;;  %v5598_v42 = vpop.f32.mrf.mxu0 }
 0x151   : > { %v5548_v49 = vpop.f32.mrf.mxu1 }
 0x152   : > { %v7042_v11 = vadd.f32 %v2449_v39, %v2130_v58  ;;  %v2133_v9 = vadd.f32 %v5548_v49, %v6881_v63  ;;  %v2459_v33 = vpop.f32.mrf.mxu0 }
 0x153   : > { %v2005_v40 = vpop.f32.mrf.mxu1 }
 0x154   : > { %v7045_v14 = vadd.f32 %v5598_v42, %v2133_v9  ;;  %v2132_v2 = vadd.f32 %v2005_v40, %v6888_v61  ;;  %v5601_v55 = vpop.f32.mrf.mxu0 }
 0x155   : > { %v5551_v23 = vpop.f32.mrf.mxu1 }
 0x156   : > { %v7048_v51 = vadd.f32 %v2459_v33, %v2132_v2  ;;  %v2135_v60 = vadd.f32 %v5551_v23, %v6895_v4  ;;  %v2469_v54 = vpop.f32.mrf.mxu0 }
 0x157   : > { %v2015_v12 = vpop.f32.mrf.mxu1 }
 0x158   : > { %v7051_v59 = vadd.f32 %v5601_v55, %v2135_v60  ;;  %v2134_v53 = vadd.f32 %v2015_v12, %v6902_v3  ;;  %v5604_v63 = vpop.f32.mrf.mxu0 }
 0x159   : > { %v5554_v27 = vpop.f32.mrf.mxu1 }
 0x15a   : > { %v7054_v20 = vadd.f32 %v2469_v54, %v2134_v53  ;;  %v2137_v62 = vadd.f32 %v5554_v27, %v6909_v25  ;;  %v2479_v61 = vpop.f32.mrf.mxu0 }
 0x15b   : > { %v2025_v0 = vpop.f32.mrf.mxu1 }
 0x15c   : > { %v7057_v50 = vadd.f32 %v5604_v63, %v2137_v62  ;;  %v2136_v44 = vadd.f32 %v2025_v0, %v6916_v8  ;;  %v5607_v4 = vpop.f32.mrf.mxu0 }
 0x15d   : > { %v5557_v5 = vpop.f32.mrf.mxu1 }
 0x15e   : > { %v7060_v46 = vadd.f32 %v2479_v61, %v2136_v44  ;;  %v2139_v37 = vadd.f32 %v5557_v5, %v6923_v7  ;;  %v2489_v3 = vpop.f32.mrf.mxu0 }
 0x15f   : > { %v2035_v48 = vpop.f32.mrf.mxu1 }
 0x160   : > { %v7063_v13 = vadd.f32 %v5607_v4, %v2139_v37  ;;  %v2138_v31 = vadd.f32 %v2035_v48, %v6930_v26  ;;  %v5610_v25 = vpop.f32.mrf.mxu0 }
 0x161   : > { %v5560_v28 = vpop.f32.mrf.mxu1 }
 0x162   : > { %v7066_v17 = vadd.f32 %v2489_v3, %v2138_v31  ;;  %v2141_v43 = vadd.f32 %v5560_v28, %v6937_v29  ;;  %v2499_v8 = vpop.f32.mrf.mxu0 }
 0x163   : > { %v2045_v39 = vpop.f32.mrf.mxu1 }
 0x164   : > { %v7069_v58 = vadd.f32 %v5610_v25, %v2141_v43  ;;  %v2140_v49 = vadd.f32 %v2045_v39, %v6944_v30  ;;  %v5613_v7 = vpop.f32.mrf.mxu0 }
 0x165   : > { %v5563_v42 = vpop.f32.mrf.mxu1 }
 0x166   : > { %v7072_v9 = vadd.f32 %v2499_v8, %v2140_v49  ;;  %v2143_v40 = vadd.f32 %v5563_v42, %v6951_v10  ;;  %v2509_v26 = vpop.f32.mrf.mxu0 }
 0x167   : > { %v2055_v33 = vpop.f32.mrf.mxu1 }
 0x168   : > { %v7075_v2 = vadd.f32 %v5613_v7, %v2143_v40  ;;  %v2142_v23 = vadd.f32 %v2055_v33, %v6958_v16  ;;  %v5616_v29 = vpop.f32.mrf.mxu0 }
 0x169   : > { %v5566_v55 = vpop.f32.mrf.mxu1 }
 0x16a   : > { %7552 = vst [vmem:[#allocation22_spill] sm:$0xff] %v7075_v2  ;;  %v7078_v60 = vadd.f32 %v2509_v26, %v2142_v23  ;;  %v2145_v12 = vadd.f32 %v5566_v55, %v6963_v57  ;;  %v2519_v30 = vpop.f32.mrf.mxu0 }
 0x16b   : > { %v2065_v54 = vpop.f32.mrf.mxu1 }
 0x16c   : > { %7553 = vst [vmem:[#allocation23_spill] sm:$0xff] %v7078_v60  ;;  %v7081_v53 = vadd.f32 %v5616_v29, %v2145_v12  ;;  %v2144_v27 = vadd.f32 %v2065_v54, %v6968_v52  ;;  %v5619_v10 = vpop.f32.mrf.mxu0 }
 0x16d   : > { %v5569_v63 = vpop.f32.mrf.mxu1 }
 0x16e   : > { %7554 = vst [vmem:[#allocation24_spill] sm:$0xff] %v7081_v53  ;;  %v7084_v62 = vadd.f32 %v2519_v30, %v2144_v27  ;;  %v2147_v0 = vadd.f32 %v5569_v63, %v6973_v56  ;;  %v2529_v16 = vpop.f32.mrf.mxu0 }
 0x16f   : > { %v2075_v61 = vpop.f32.mrf.mxu1 }
 0x170   : > { %7555 = vst [vmem:[#allocation25_spill] sm:$0xff] %v7084_v62  ;;  %v7087_v44 = vadd.f32 %v5619_v10, %v2147_v0  ;;  %v2146_v5 = vadd.f32 %v2075_v61, %v6978_v19  ;;  %v5622_v57 = vpop.f32.mrf.mxu0 }
 0x171   : > { %v5572_v4 = vpop.f32.mrf.mxu1 }
 0x172   : > { %7556 = vst [vmem:[#allocation26_spill] sm:$0xff] %v7087_v44  ;;  %v7090_v37 = vadd.f32 %v2529_v16, %v2146_v5  ;;  %v2149_v48 = vadd.f32 %v5572_v4, %v6983_v1  ;;  %v2539_v52 = vpop.f32.mrf.mxu0 }
 0x173   : > { %v2085_v3 = vpop.f32.mrf.mxu1 }
 0x174   : > { %7557 = vst [vmem:[#allocation32_spill] sm:$0xff] %v7090_v37  ;;  %v7093_v31 = vadd.f32 %v5622_v57, %v2149_v48  ;;  %v2148_v28 = vadd.f32 %v2085_v3, %v6988_v41  ;;  %v5625_v56 = vpop.f32.mrf.mxu0 }
 0x175   : > { %v5575_v25 = vpop.f32.mrf.mxu1 }
 0x176   : > { %7558 = vst [vmem:[#allocation33_spill] sm:$0xff] %v7093_v31  ;;  %v7096_v43 = vadd.f32 %v2539_v52, %v2148_v28  ;;  %v2151_v39 = vadd.f32 %v5575_v25, %v6995_v45  ;;  %v2549_v19 = vpop.f32.mrf.mxu0 }
 0x177   : > { %v2095_v8 = vpop.f32.mrf.mxu1 }
 0x178   : > { %7559 = vst [vmem:[#allocation34_spill] sm:$0xff] %v7096_v43  ;;  %v7099_v49 = vadd.f32 %v5625_v56, %v2151_v39  ;;  %v2150_v42 = vadd.f32 %v2095_v8, %v7002_v6  ;;  %v5628_v1 = vpop.f32.mrf.mxu0 }
 0x179   : > { %v5578_v7 = vpop.f32.mrf.mxu1 }
 0x17a   : > { %7560 = vst [vmem:[#allocation35_spill] sm:$0xff] %v7099_v49  ;;  %v7102_v40 = vadd.f32 %v2549_v19, %v2150_v42  ;;  %v2153_v33 = vadd.f32 %v5578_v7, %v7007_v36  ;;  %v2559_v41 = vpop.f32.mrf.mxu0 }
 0x17b   : > { %v2105_v26 = vpop.f32.mrf.mxu1 }
 0x17c   : > { %7561 = vst [vmem:[#allocation27_spill] sm:$0xff] %v7102_v40  ;;  %v7105_v23 = vadd.f32 %v5628_v1, %v2153_v33  ;;  %v2152_v55 = vadd.f32 %v2105_v26, %v7012_v35  ;;  %v5631_v45 = vpop.f32.mrf.mxu0 }
 0x17d   : > { %v5581_v29 = vpop.f32.mrf.mxu1 }
 0x17e   : > { %7562 = vst [vmem:[#allocation6_spill] sm:$0xff] %v7105_v23  ;;  %v7108_v12 = vadd.f32 %v2559_v41, %v2152_v55  ;;  %v2155_v54 = vadd.f32 %v5581_v29, %v7015_v38  ;;  %v2569_v6 = vpop.f32.mrf.mxu0 }
 0x17f   : > { %v2115_v30 = vpop.f32.mrf.mxu1 }
 0x180   : > { %7563 = vst [vmem:[#allocation28_spill] sm:$0xff] %v7108_v12  ;;  %v7111_v27 = vadd.f32 %v5631_v45, %v2155_v54  ;;  %v2154_v63 = vadd.f32 %v2115_v30, %v7018_v15  ;;  %v7114_v36 = vpop.f32.mrf.mxu0 }
 0x181   : > { %v5636_v10 = vpop.f32.mrf.mxu1 }
 0x182   : > { %7564 = vst [vmem:[#allocation29_spill] sm:$0xff] %v7111_v27  ;;  %v7116_v0 = vadd.f32 %v2569_v6, %v2154_v63  ;;  %v7118_v16 = vpop.f32.mrf.mxu0 }
 0x183   : > { %v2873_v61 = vpop.f32.mrf.mxu1 }
 0x184   : > { %7565 = vst [vmem:[#allocation7_spill] sm:$0xff] %v7116_v0  ;;  %v7122_v5 = vpop.f32.mrf.mxu0 }
 0x185   : > { %v7120_v35 = vpop.f32.mrf.mxu1 }
 0x186   : > { %v7126_v38 = vpop.f32.mrf.mxu0 }
 0x187   : > { %v7124_v4 = vpop.f32.mrf.mxu1 }
 0x188   : > { %v7130_v48 = vpop.f32.mrf.mxu0 }
 0x189   : > { %v7128_v57 = vpop.f32.mrf.mxu1 }
 0x18a   : > { %v7134_v3 = vpop.f32.mrf.mxu0 }
 0x18b   : > { %v7132_v15 = vpop.f32.mrf.mxu1 }
 0x18c   : > { %v7138_v28 = vpop.f32.mrf.mxu0 }
 0x18d   : > { %v7136_v52 = vpop.f32.mrf.mxu1 }
 0x18e   : > { %v7142_v56 = vpop.f32.mrf.mxu0 }
 0x18f   : > { %v7140_v25 = vpop.f32.mrf.mxu1 }
 0x190   : > { %v7146_v8 = vpop.f32.mrf.mxu0 }
 0x191   : > { %v7144_v39 = vpop.f32.mrf.mxu1 }
 0x192   : > { %v7150_v42 = vpop.f32.mrf.mxu0 }
 0x193   : > { %v7148_v19 = vpop.f32.mrf.mxu1 }
 0x194   : > { %v7154_v1 = vpop.f32.mrf.mxu0 }
 0x195   : > { %v7152_v7 = vpop.f32.mrf.mxu1 }
 0x196   : > { %v7158_v26 = vpop.f32.mrf.mxu0 }
 0x197   : > { %v7156_v33 = vpop.f32.mrf.mxu1 }
 0x198   : > { %v7162_v55 = vpop.f32.mrf.mxu0 }
 0x199   : > { %v7160_v41 = vpop.f32.mrf.mxu1 }
 0x19a   : > { %v7166_v45 = vpop.f32.mrf.mxu0 }
 0x19b   : > { %v7164_v29 = vpop.f32.mrf.mxu1 }
 0x19c   : > { %v7170_v30 = vpop.f32.mrf.mxu0 }
 0x19d   : > { %v7168_v54 = vpop.f32.mrf.mxu1 }
 0x19e   : > { %v7174_v63 = vpop.f32.mrf.mxu0 }
 0x19f   : > { %v7172_v6 = vpop.f32.mrf.mxu1 }
 0x1a0   : > { %v7178_v27 = vpop.f32.mrf.mxu0 }
 0x1a1   : > { %v7176_v0 = vpop.f32.mrf.mxu1 }
 0x1a2   : > { %v7182_v23 = vpop.f32.mrf.mxu0 }
 0x1a3   : > { %v7180_v12 = vpop.f32.mrf.mxu1  ;;  %7566 = vst [vmem:[#allocation30_spill] sm:$0xff] %v7182_v23 }
 0x1a4   : > { %v7186_v49 = vpop.f32.mrf.mxu0 }
 0x1a5   : > { %v7184_v40 = vpop.f32.mrf.mxu1  ;;  %7568 = vst [vmem:[#allocation8_spill] sm:$0xff] %v7186_v49 }
 0x1a6   : > { %7567 = vst [vmem:[#allocation31_spill] sm:$0xff] %v7184_v40  ;;  %v7190_v31 = vpop.f32.mrf.mxu0 }
 0x1a7   : > { %v7188_v43 = vpop.f32.mrf.mxu1  ;;  %7570 = vst [vmem:[#allocation10_spill] sm:$0xff] %v7190_v31 }
 0x1a8   : > { %7569 = vst [vmem:[#allocation9_spill] sm:$0xff] %v7188_v43  ;;  %v7194_v44 = vpop.f32.mrf.mxu0 }
 0x1a9   : > { %v7192_v37 = vpop.f32.mrf.mxu1  ;;  %7572 = vst [vmem:[#allocation12_spill] sm:$0xff] %v7194_v44 }
 0x1aa   : > { %7571 = vst [vmem:[#allocation11_spill] sm:$0xff] %v7192_v37  ;;  %v7198_v53 = vpop.f32.mrf.mxu0 }
 0x1ab   : > { %v7196_v62 = vpop.f32.mrf.mxu1  ;;  %7574 = vst [vmem:[#allocation14_spill] sm:$0xff] %v7198_v53 }
 0x1ac   : > { %7573 = vst [vmem:[#allocation13_spill] sm:$0xff] %v7196_v62  ;;  %v7202_v2 = vpop.f32.mrf.mxu0 }
 0x1ad   : > { %v7200_v60 = vpop.f32.mrf.mxu1  ;;  %7576 = vst [vmem:[#allocation16_spill] sm:$0xff] %v7202_v2 }
 0x1ae   : > { %7575 = vst [vmem:[#allocation4_spill] sm:$0xff] %v7200_v60  ;;  %v7206_v40 = vpop.f32.mrf.mxu0 }
 0x1af   : > { %v7204_v23 = vpop.f32.mrf.mxu1  ;;  %7578 = vst [vmem:[#allocation5_spill] sm:$0xff] %v7206_v40 }
 0x1b0   : > { %7577 = vst [vmem:[#allocation15_spill] sm:$0xff] %v7204_v23  ;;  %v7210_v43 = vpop.f32.mrf.mxu0 }
 0x1b1   : > { %v7208_v49 = vpop.f32.mrf.mxu1  ;;  %7580 = vst [vmem:[#allocation17_spill] sm:$0xff] %v7210_v43 }
 0x1b2   : > { %7579 = vst [vmem:[#allocation18_spill] sm:$0xff] %v7208_v49  ;;  %v7214_v37 = vpop.f32.mrf.mxu0 }
 0x1b3   : > { %v7212_v31 = vpop.f32.mrf.mxu1  ;;  %7582 = vst [vmem:[#allocation20_spill] sm:$0xff] %v7214_v37 }
 0x1b4   : > { %7581 = vst [vmem:[#allocation19_spill] sm:$0xff] %v7212_v31  ;;  %v7218_v53 = vpop.f32.mrf.mxu0  ;;  %v3033_v31 = vadd.f32 %v5636_v10, %v7021_v47  ;;  %v3034_v10 = vadd.f32 %v7124_v4, %v7030_v24 }
 0x1b5   : > { %v7216_v44 = vpop.f32.mrf.mxu1  ;;  %7584 = vst [vmem:[#allocation36_spill] sm:$0xff] %v7218_v53  ;;  %v3032_v53 = vadd.f32 %v2873_v61, %v7024_v18  ;;  %v3037_v18 = vadd.f32 %v7128_v57, %v7033_v21  ;;  %v3036_v21 = vadd.f32 %v7132_v15, %v7036_v34  ;;  %v3038_v34 = vadd.f32 %v7140_v25, %v7042_v11 }
 0x1b6   : > { %7583 = vst [vmem:[#allocation21_spill] sm:$0xff] %v7216_v44  ;;  %v7222_v2 = vpop.f32.mrf.mxu0  ;;  %v3489_v24 = vadd.f32 %v7126_v38, %v3034_v10  ;;  %v3039_v38 = vadd.f32 %v7136_v52, %v7039_v32 }
 0x1b7   : > { %v7220_v60 = vpop.f32.mrf.mxu1  ;;  %7586 = vst [vmem:[#allocation38_spill] sm:$0xff] %v7222_v2  ;;  %v3488_v2 = vadd.f32 %v7114_v36, %v3033_v31  ;;  %v3487_v47 = vadd.f32 %v7118_v16, %v3032_v53  ;;  %v3492_v4 = vadd.f32 %v7130_v48, %v3037_v18  ;;  %v3491_v10 = vadd.f32 %v7134_v3, %v3036_v21 }
 0x1b8   : > { %7585 = vst [vmem:[#allocation37_spill] sm:$0xff] %v7220_v60  ;;  %v7226_v40 = vpop.f32.mrf.mxu0  ;;  %v3494_v11 = vadd.f32 %v7138_v28, %v3039_v38  ;;  %v3493_v3 = vadd.f32 %v7142_v56, %v3038_v34 }
 0x1b9   : > { %v7224_v23 = vpop.f32.mrf.mxu1  ;;  %7587 = vst [vmem:[#allocation39_spill] sm:$0xff] %v7226_v40  ;;  %v3035_v40 = vadd.f32 %v7120_v35, %v7027_v22 }
 0x1ba   : > { %v7230_v43 = vpop.f32.mrf.mxu0 }
 0x1bb   : > { %v7228_v49 = vpop.f32.mrf.mxu1  ;;  %7589 = vst [vmem:[#allocation41_spill] sm:$0xff] %v7230_v43  ;;  %v3490_v36 = vadd.f32 %v7122_v5, %v3035_v40 }
 0x1bc   : > { %7588 = vst [vmem:[#allocation40_spill] sm:$0xff] %v7228_v49  ;;  %v7235_v44 = vpop.f32.mrf.mxu0 }
 0x1bd   : > { %v7233_v37 = vpop.f32.mrf.mxu1  ;;  %7590 = vst [vmem:[#allocation42_spill] sm:$0xff] %v7235_v44 }
 0x1be   : > { %v7240_v60 = vpop.f32.mrf.mxu0 }
 0x1bf   : > { %v7238_v62 = vpop.f32.mrf.mxu1  ;;  %7592 = vst [vmem:[#allocation44_spill] sm:$0xff] %v7240_v60 }
 0x1c0   : > { %7591 = vst [vmem:[#allocation43_spill] sm:$0xff] %v7238_v62  ;;  %v5786_v43 = vpop.f32.mrf.mxu0 }
 0x1c1   : > { %v5736_v49 = vpop.f32.mrf.mxu1 }
 0x1c2   : > { %v3942_v44 = vadd.f32 %v5736_v49, %v3488_v2  ;;  %v4236_v22 = vpop.f32.mrf.mxu0 }
 0x1c3   : > { %v3782_v31 = vpop.f32.mrf.mxu1 }
 0x1c4   : > { %v4396_v61 = vadd.f32 %v5786_v43, %v3942_v44  ;;  %v3941_v53 = vadd.f32 %v3782_v31, %v3487_v47  ;;  %v5789_v35 = vpop.f32.mrf.mxu0 }
 0x1c5   : > { %v5739_v16 = vpop.f32.mrf.mxu1 }
 0x1c6   : > { %4492 = vst [vmem:[%s7254_s18 + $0x8] sm:$0xff] %v4396_v61  ;;  %v4395_v2 = vadd.f32 %v4236_v22, %v3941_v53  ;;  %v3944_v49 = vadd.f32 %v5739_v16, %v3490_v36  ;;  %v4562_v57 = vmul.f32 %v4396_v61, %v4396_v61  ;;  %v4246_v62 = vpop.f32.mrf.mxu0  ;;  %v3041_v22 = vadd.f32 %v7144_v39, %v7045_v14 }
 0x1c7   : > { %v3792_v60 = vpop.f32.mrf.mxu1  ;;  %v3040_v39 = vadd.f32 %v7148_v19, %v7048_v51 }
 0x1c8   : > { %4491 = vst [vmem:[%s7254_s18] sm:$0xff] %v4395_v2  ;;  %v4523_v40 = vadd.f32 %v4396_v61, %v4395_v2  ;;  %v4561_v44 = vmul.f32 %v4395_v2, %v4395_v2  ;;  %v4398_v43 = vadd.f32 %v5789_v35, %v3944_v49  ;;  %v3943_v5 = vadd.f32 %v3792_v60, %v3489_v24  ;;  %v5792_v47 = vpop.f32.mrf.mxu0 }
 0x1c9   : > { %v5742_v15 = vpop.f32.mrf.mxu1  ;;  %v3496_v14 = vadd.f32 %v7146_v8, %v3041_v22  ;;  %v3043_v2 = vadd.f32 %v7152_v7, %v7051_v59 }
 0x1ca   : > { %v4593_v48 = vadd.f32 %v4562_v57, %v4561_v44  ;;  %4494 = vst [vmem:[%s7254_s18 + $0x18] sm:$0xff] %v4398_v43  ;;  %v4397_v18 = vadd.f32 %v4246_v62, %v3943_v5  ;;  %v3946_v31 = vadd.f32 %v5742_v15, %v3492_v4  ;;  %v4256_v60 = vpop.f32.mrf.mxu0  ;;  %v4564_v62 = vmul.f32 %v4398_v43, %v4398_v43 }
 0x1cb   : > { %v3802_v36 = vpop.f32.mrf.mxu1  ;;  %v3495_v15 = vadd.f32 %v7150_v42, %v3040_v39 }
 0x1cc   : > { %4493 = vst [vmem:[%s7254_s18 + $0x10] sm:$0xff] %v4397_v18  ;;  %v4524_v61 = vadd.f32 %v4523_v40, %v4397_v18  ;;  %v4563_v32 = vmul.f32 %v4397_v18, %v4397_v18  ;;  %v4400_v52 = vadd.f32 %v5792_v47, %v3946_v31  ;;  %v3945_v53 = vadd.f32 %v3802_v36, %v3491_v10  ;;  %v5795_v16 = vpop.f32.mrf.mxu0 }
 0x1cd   : > { %v5745_v25 = vpop.f32.mrf.mxu1  ;;  %v3498_v47 = vadd.f32 %v7154_v1, %v3043_v2  ;;  %v3045_v10 = vadd.f32 %v7160_v41, %v7057_v50 }
 0x1ce   : > { %v4594_v35 = vadd.f32 %v4593_v48, %v4563_v32  ;;  %4496 = vst [vmem:[%s7254_s18 + $0x28] sm:$0xff] %v4400_v52  ;;  %v4399_v24 = vadd.f32 %v4256_v60, %v3945_v53  ;;  %v4525_v21 = vadd.f32 %v4524_v61, %v4398_v43  ;;  %v3948_v49 = vadd.f32 %v5745_v25, %v3494_v11  ;;  %v4266_v28 = vpop.f32.mrf.mxu0 }
 0x1cf   : > { %v3812_v4 = vpop.f32.mrf.mxu1  ;;  %v3042_v43 = vadd.f32 %v7156_v33, %v7054_v20  ;;  %v4566_v8 = vmul.f32 %v4400_v52, %v4400_v52  ;;  %v3044_v60 = vadd.f32 %v7164_v29, %v7060_v46  ;;  %v3500_v53 = vadd.f32 %v7162_v55, %v3045_v10 }
 0x1d0   : > { %4495 = vst [vmem:[%s7254_s18 + $0x20] sm:$0xff] %v4399_v24  ;;  %v4526_v56 = vadd.f32 %v4525_v21, %v4399_v24  ;;  %v4565_v57 = vmul.f32 %v4399_v24, %v4399_v24  ;;  %v4595_v40 = vadd.f32 %v4594_v35, %v4564_v62  ;;  %v3947_v44 = vadd.f32 %v3812_v4, %v3493_v3  ;;  %v5798_v51 = vpop.f32.mrf.mxu0 }
 0x1d1   : > { %v4402_v5 = vadd.f32 %v5795_v16, %v3948_v49  ;;  %v5748_v38 = vpop.f32.mrf.mxu1  ;;  %v3497_v36 = vadd.f32 %v7158_v26, %v3042_v43  ;;  %v3047_v26 = vadd.f32 %v7168_v54, %v7063_v13  ;;  %v3046_v55 = vadd.f32 %v7172_v6, %v7066_v17 }
 0x1d2   : > { %v4596_v19 = vadd.f32 %v4595_v40, %v4565_v57  ;;  %v4401_v34 = vadd.f32 %v4266_v28, %v3947_v44  ;;  %v4527_v59 = vadd.f32 %v4526_v56, %v4400_v52  ;;  %v3950_v7 = vadd.f32 %v5748_v38, %v3496_v14  ;;  %v4276_v18 = vpop.f32.mrf.mxu0 }
 0x1d3   : > { %4498 = vst [vmem:[%s7254_s18 + $0x38] sm:$0xff] %v4402_v5  ;;  %v3822_v48 = vpop.f32.mrf.mxu1  ;;  %v4568_v32 = vmul.f32 %v4402_v5, %v4402_v5  ;;  %v3499_v14 = vadd.f32 %v7166_v45, %v3044_v60  ;;  %v3049_v13 = vadd.f32 %v7176_v0, %v7069_v58  ;;  %v3502_v57 = vadd.f32 %v7170_v30, %v3047_v26 }
 0x1d4   : > { %4497 = vst [vmem:[%s7254_s18 + $0x30] sm:$0xff] %v4401_v34  ;;  %v4528_v20 = vadd.f32 %v4527_v59, %v4401_v34  ;;  %v4567_v33 = vmul.f32 %v4401_v34, %v4401_v34  ;;  %v4597_v31 = vadd.f32 %v4596_v19, %v4566_v8  ;;  %v4404_v22 = vadd.f32 %v5798_v51, %v3950_v7  ;;  %v5801_v61 = vpop.f32.mrf.mxu0 }
 0x1d5   : > { %v3949_v42 = vadd.f32 %v3822_v48, %v3495_v15  ;;  %v5751_v1 = vpop.f32.mrf.mxu1  ;;  %v3048_v58 = vadd.f32 %v7180_v12, %v7072_v9  ;;  %v3504_v51 = vadd.f32 %v7178_v27, %v3049_v13  ;;  %v7593_v15 = vld [vmem:[#allocation22_spill] sm:$0xff] }
 0x1d6   : > { %v4598_v50 = vadd.f32 %v4597_v31, %v4567_v33  ;;  %4500 = vst [vmem:[%s7254_s18 + $0x48] sm:$0xff] %v4404_v22  ;;  %v4529_v41 = vadd.f32 %v4528_v20, %v4402_v5  ;;  %v3952_v52 = vadd.f32 %v5751_v1, %v3498_v47  ;;  %v4286_v25 = vpop.f32.mrf.mxu0  ;;  %v4570_v54 = vmul.f32 %v4404_v22, %v4404_v22  ;;  %v7594_v47 = vld [vmem:[#allocation31_spill] sm:$0xff]  ;;  %v7595_v31 = vld [vmem:[#allocation30_spill] sm:$0xff] }
 0x1d7   : > { %v4403_v11 = vadd.f32 %v4276_v18, %v3949_v42  ;;  %v3832_v3 = vpop.f32.mrf.mxu1  ;;  %v3501_v5 = vadd.f32 %v7174_v63, %v3046_v55  ;;  %v3051_v10 = vadd.f32 %v7594_v47, %v7593_v15  ;;  %v3503_v27 = vadd.f32 %v7595_v31, %v3048_v58 }
 0x1d8   : > { %v4599_v16 = vadd.f32 %v4598_v50, %v4568_v32  ;;  %v4406_v46 = vadd.f32 %v5801_v61, %v3952_v52  ;;  %v3951_v29 = vadd.f32 %v3832_v3, %v3497_v36  ;;  %v5804_v21 = vpop.f32.mrf.mxu0  ;;  %v7597_v36 = vld [vmem:[#allocation9_spill] sm:$0xff]  ;;  %v7598_v61 = vld [vmem:[#allocation24_spill] sm:$0xff]  ;;  %v7599_v32 = vld [vmem:[#allocation11_spill] sm:$0xff] }
 0x1d9   : > { %4499 = vst [vmem:[%s7254_s18 + $0x40] sm:$0xff] %v4403_v11  ;;  %v4530_v62 = vadd.f32 %v4529_v41, %v4403_v11  ;;  %v4569_v35 = vmul.f32 %v4403_v11, %v4403_v11  ;;  %v5754_v24 = vpop.f32.mrf.mxu1  ;;  %v3053_v50 = vadd.f32 %v7599_v32, %v7598_v61 }
 0x1da   : > { %4502 = vst [vmem:[%s7254_s18 + $0x58] sm:$0xff] %v4406_v46  ;;  %v4405_v39 = vadd.f32 %v4286_v25, %v3951_v29  ;;  %v3954_v2 = vadd.f32 %v5754_v24, %v3500_v53  ;;  %v4296_v56 = vpop.f32.mrf.mxu0  ;;  %v4572_v30 = vmul.f32 %v4406_v46, %v4406_v46  ;;  %v7600_v25 = vld [vmem:[#allocation8_spill] sm:$0xff] }
 0x1db   : > { %v4600_v49 = vadd.f32 %v4599_v16, %v4569_v35  ;;  %v4531_v4 = vadd.f32 %v4530_v62, %v4404_v22  ;;  %v3842_v28 = vpop.f32.mrf.mxu1  ;;  %v7596_v22 = vld [vmem:[#allocation23_spill] sm:$0xff]  ;;  %v3506_v26 = vadd.f32 %v7600_v25, %v3051_v10 }
 0x1dc   : > { %4501 = vst [vmem:[%s7254_s18 + $0x50] sm:$0xff] %v4405_v39  ;;  %v4571_v40 = vmul.f32 %v4405_v39, %v4405_v39  ;;  %v4408_v45 = vadd.f32 %v5804_v21, %v3954_v2  ;;  %v3953_v44 = vadd.f32 %v3842_v28, %v3499_v14  ;;  %v5807_v8 = vpop.f32.mrf.mxu0  ;;  %v3050_v60 = vadd.f32 %v7597_v36, %v7596_v22  ;;  %v7601_v14 = vld [vmem:[#allocation10_spill] sm:$0xff]  ;;  %v7603_v2 = vld [vmem:[#allocation13_spill] sm:$0xff] }
 0x1dd   : > { %v4532_v43 = vadd.f32 %v4531_v4, %v4405_v39  ;;  %v4601_v17 = vadd.f32 %v4600_v49, %v4570_v54  ;;  %v5757_v6 = vpop.f32.mrf.mxu1  ;;  %v7602_v39 = vld [vmem:[#allocation25_spill] sm:$0xff]  ;;  %v7604_v4 = vld [vmem:[#allocation12_spill] sm:$0xff] }
 0x1de   : > { %4504 = vst [vmem:[%s7254_s18 + $0x68] sm:$0xff] %v4408_v45  ;;  %v4407_v0 = vadd.f32 %v4296_v56, %v3953_v44  ;;  %v3956_v38 = vadd.f32 %v5757_v6, %v3502_v57  ;;  %v4306_v7 = vpop.f32.mrf.mxu0  ;;  %v4574_v41 = vmul.f32 %v4408_v45, %v4408_v45  ;;  %v3505_v55 = vadd.f32 %v7601_v14, %v3050_v60  ;;  %v7617_v14 = vld [vmem:[#allocation35_spill] sm:$0xff] }
 0x1df   : > { %v4602_v19 = vadd.f32 %v4601_v17, %v4571_v40  ;;  %v4533_v34 = vadd.f32 %v4532_v43, %v4406_v46  ;;  %v3852_v59 = vpop.f32.mrf.mxu1  ;;  %v3052_v13 = vadd.f32 %v7603_v2, %v7602_v39  ;;  %v3508_v28 = vadd.f32 %v7604_v4, %v3053_v50  ;;  %v7605_v43 = vld [vmem:[#allocation26_spill] sm:$0xff]  ;;  %v7606_v17 = vld [vmem:[#allocation4_spill] sm:$0xff] }
 0x1e0   : > { %4503 = vst [vmem:[%s7254_s18 + $0x60] sm:$0xff] %v4407_v0  ;;  %v4573_v48 = vmul.f32 %v4407_v0, %v4407_v0  ;;  %v4410_v63 = vadd.f32 %v5807_v8, %v3956_v38  ;;  %v3955_v18 = vadd.f32 %v3852_v59, %v3501_v5  ;;  %v5810_v33 = vpop.f32.mrf.mxu0  ;;  %v3055_v6 = vadd.f32 %v7606_v17, %v7605_v43  ;;  %v7608_v59 = vld [vmem:[#allocation32_spill] sm:$0xff] }
 0x1e1   : > { %v4534_v20 = vadd.f32 %v4533_v34, %v4407_v0  ;;  %v4603_v9 = vadd.f32 %v4602_v19, %v4572_v30  ;;  %v5760_v12 = vpop.f32.mrf.mxu1  ;;  %v7607_v19 = vld [vmem:[#allocation14_spill] sm:$0xff] }
 0x1e2   : > { %4506 = vst [vmem:[%s7254_s18 + $0x78] sm:$0xff] %v4410_v63  ;;  %v4409_v42 = vadd.f32 %v4306_v7, %v3955_v18  ;;  %v3958_v1 = vadd.f32 %v5760_v12, %v3504_v51  ;;  %v4316_v3 = vpop.f32.mrf.mxu0  ;;  %v4576_v56 = vmul.f32 %v4410_v63, %v4410_v63  ;;  %v3507_v34 = vadd.f32 %v7607_v19, %v3052_v13  ;;  %v7609_v7 = vld [vmem:[#allocation15_spill] sm:$0xff]  ;;  %v7623_v19 = vld [vmem:[#allocation36_spill] sm:$0xff] }
 0x1e3   : > { %v4604_v52 = vadd.f32 %v4603_v9, %v4573_v48  ;;  %v4535_v53 = vadd.f32 %v4534_v20, %v4408_v45  ;;  %v3862_v11 = vpop.f32.mrf.mxu1  ;;  %v3054_v15 = vadd.f32 %v7609_v7, %v7608_v59  ;;  %v7610_v48 = vld [vmem:[#allocation33_spill] sm:$0xff] }
 0x1e4   : > { %4505 = vst [vmem:[%s7254_s18 + $0x70] sm:$0xff] %v4409_v42  ;;  %v4575_v16 = vmul.f32 %v4409_v42, %v4409_v42  ;;  %v4412_v46 = vadd.f32 %v5810_v33, %v3958_v1  ;;  %v3957_v29 = vadd.f32 %v3862_v11, %v3503_v27  ;;  %v5813_v21 = vpop.f32.mrf.mxu0  ;;  %v7612_v27 = vld [vmem:[#allocation16_spill] sm:$0xff]  ;;  %v7615_v11 = vld [vmem:[#allocation19_spill] sm:$0xff] }
 0x1e5   : > { %v4536_v62 = vadd.f32 %v4535_v53, %v4409_v42  ;;  %v4605_v35 = vadd.f32 %v4604_v52, %v4574_v41  ;;  %v5763_v24 = vpop.f32.mrf.mxu1  ;;  %v3510_v22 = vadd.f32 %v7612_v27, %v3055_v6  ;;  %v7613_v41 = vld [vmem:[#allocation5_spill] sm:$0xff]  ;;  %v7614_v53 = vld [vmem:[#allocation34_spill] sm:$0xff]  ;;  %v7627_v27 = vld [vmem:[#allocation39_spill] sm:$0xff] }
 0x1e6   : > { %4508 = vst [vmem:[%s7254_s18 + $0x88] sm:$0xff] %v4412_v46  ;;  %v4411_v54 = vadd.f32 %v4316_v3, %v3957_v29  ;;  %v3960_v49 = vadd.f32 %v5763_v24, %v3506_v26  ;;  %v4326_v44 = vpop.f32.mrf.mxu0  ;;  %v4578_v20 = vmul.f32 %v4412_v46, %v4412_v46  ;;  %v3509_v52 = vadd.f32 %v7613_v41, %v3054_v15 }
 0x1e7   : > { %v4606_v57 = vadd.f32 %v4605_v35, %v4575_v16  ;;  %v4537_v40 = vadd.f32 %v4536_v62, %v4410_v63  ;;  %v3872_v45 = vpop.f32.mrf.mxu1  ;;  %v7611_v63 = vld [vmem:[#allocation18_spill] sm:$0xff]  ;;  %v3056_v3 = vadd.f32 %v7615_v11, %v7614_v53  ;;  %v7616_v16 = vld [vmem:[#allocation17_spill] sm:$0xff] }
 0x1e8   : > { %4507 = vst [vmem:[%s7254_s18 + $0x80] sm:$0xff] %v4411_v54  ;;  %v4577_v8 = vmul.f32 %v4411_v54, %v4411_v54  ;;  %v4414_v5 = vadd.f32 %v5813_v21, %v3960_v49  ;;  %v3959_v58 = vadd.f32 %v3872_v45, %v3505_v55  ;;  %v5816_v30 = vpop.f32.mrf.mxu0  ;;  %v3057_v18 = vadd.f32 %v7611_v63, %v7610_v48  ;;  %v7618_v55 = vld [vmem:[#allocation21_spill] sm:$0xff]  ;;  %v7620_v45 = vld [vmem:[#allocation27_spill] sm:$0xff] }
 0x1e9   : > { %v4538_v0 = vadd.f32 %v4537_v40, %v4411_v54  ;;  %v4607_v38 = vadd.f32 %v4606_v57, %v4576_v56  ;;  %v5766_v51 = vpop.f32.mrf.mxu1  ;;  %v3059_v39 = vadd.f32 %v7618_v55, %v7617_v14  ;;  %v7619_v57 = vld [vmem:[#allocation20_spill] sm:$0xff] }
 0x1ea   : > { %4510 = vst [vmem:[%s7254_s18 + $0x98] sm:$0xff] %v4414_v5  ;;  %v4413_v47 = vadd.f32 %v4326_v44, %v3959_v58  ;;  %v3962_v10 = vadd.f32 %v5766_v51, %v3508_v28  ;;  %v4336_v31 = vpop.f32.mrf.mxu0  ;;  %v4580_v29 = vmul.f32 %v4414_v5, %v4414_v5  ;;  %v3511_v40 = vadd.f32 %v7619_v57, %v3056_v3  ;;  %v7621_v44 = vld [vmem:[#allocation37_spill] sm:$0xff] }
 0x1eb   : > { %v4608_v9 = vadd.f32 %v4607_v38, %v4577_v8  ;;  %v4539_v12 = vadd.f32 %v4538_v0, %v4412_v46  ;;  %v3882_v33 = vpop.f32.mrf.mxu1  ;;  %v3512_v46 = vadd.f32 %v7616_v16, %v3057_v18  ;;  %v3058_v43 = vadd.f32 %v7621_v44, %v7620_v45  ;;  %v7622_v8 = vld [vmem:[#allocation6_spill] sm:$0xff]  ;;  %v7629_v16 = vld [vmem:[#allocation41_spill] sm:$0xff]  ;;  %v7633_v44 = vld [vmem:[#allocation44_spill] sm:$0xff] }
 0x1ec   : > { %4509 = vst [vmem:[%s7254_s18 + $0x90] sm:$0xff] %v4413_v47  ;;  %v4579_v36 = vmul.f32 %v4413_v47, %v4413_v47  ;;  %v4416_v60 = vadd.f32 %v5816_v30, %v3962_v10  ;;  %v3961_v42 = vadd.f32 %v3882_v33, %v3507_v34  ;;  %v5819_v50 = vpop.f32.mrf.mxu0  ;;  %v3514_v34 = vadd.f32 %v7623_v19, %v3059_v39  ;;  %v7624_v18 = vld [vmem:[#allocation38_spill] sm:$0xff] }
 0x1ed   : > { %v4540_v1 = vadd.f32 %v4539_v12, %v4413_v47  ;;  %v4609_v61 = vadd.f32 %v4608_v9, %v4578_v20  ;;  %v5769_v32 = vpop.f32.mrf.mxu1  ;;  %v3513_v20 = vadd.f32 %v7624_v18, %v3058_v43  ;;  %v7626_v9 = vld [vmem:[#allocation40_spill] sm:$0xff] }
 0x1ee   : > { %4512 = vst [vmem:[%s7254_s18 + $0xa8] sm:$0xff] %v4416_v60  ;;  %v4415_v25 = vadd.f32 %v4336_v31, %v3961_v42  ;;  %v3964_v26 = vadd.f32 %v5769_v32, %v3510_v22  ;;  %v4346_v21 = vpop.f32.mrf.mxu0  ;;  %v4582_v58 = vmul.f32 %v4416_v60, %v4416_v60  ;;  %v7628_v32 = vld [vmem:[#allocation29_spill] sm:$0xff] }
 0x1ef   : > { %v4610_v62 = vadd.f32 %v4609_v61, %v4579_v36  ;;  %v4541_v35 = vadd.f32 %v4540_v1, %v4414_v5  ;;  %v3892_v24 = vpop.f32.mrf.mxu1  ;;  %v3061_v5 = vadd.f32 %v7224_v23, %v7622_v8  ;;  %v7625_v23 = vld [vmem:[#allocation28_spill] sm:$0xff] }
 0x1f0   : > { %4511 = vst [vmem:[%s7254_s18 + $0xa0] sm:$0xff] %v4415_v25  ;;  %v4581_v2 = vmul.f32 %v4415_v25, %v4415_v25  ;;  %v4418_v13 = vadd.f32 %v5819_v50, %v3964_v26  ;;  %v3963_v54 = vadd.f32 %v3892_v24, %v3509_v52  ;;  %v5822_v56 = vpop.f32.mrf.mxu0  ;;  %v3060_v12 = vadd.f32 %v7626_v9, %v7625_v23 }
 0x1f1   : > { %v4542_v49 = vadd.f32 %v4541_v35, %v4415_v25  ;;  %v4611_v4 = vadd.f32 %v4610_v62, %v4580_v29  ;;  %v5772_v28 = vpop.f32.mrf.mxu1  ;;  %v3516_v22 = vadd.f32 %v7627_v27, %v3061_v5  ;;  %v3063_v50 = vadd.f32 %v7233_v37, %v7628_v32  ;;  %v7630_v29 = vld [vmem:[#allocation7_spill] sm:$0xff] }
 0x1f2   : > { %4514 = vst [vmem:[%s7254_s18 + $0xb8] sm:$0xff] %v4418_v13  ;;  %v4417_v17 = vadd.f32 %v4346_v21, %v3963_v54  ;;  %v3966_v6 = vadd.f32 %v5772_v28, %v3512_v46  ;;  %v4356_v30 = vpop.f32.mrf.mxu0  ;;  %v4584_v36 = vmul.f32 %v4418_v13, %v4418_v13  ;;  %v3515_v46 = vadd.f32 %v7629_v16, %v3060_v12  ;;  %v7631_v62 = vld [vmem:[#allocation43_spill] sm:$0xff] }
 0x1f3   : > { %v4612_v0 = vadd.f32 %v4611_v4, %v4581_v2  ;;  %v4543_v38 = vadd.f32 %v4542_v49, %v4416_v60  ;;  %v3902_v51 = vpop.f32.mrf.mxu1  ;;  %v3062_v35 = vadd.f32 %v7631_v62, %v7630_v29 }
 0x1f4   : > { %4513 = vst [vmem:[%s7254_s18 + $0xb0] sm:$0xff] %v4417_v17  ;;  %v4583_v59 = vmul.f32 %v4417_v17, %v4417_v17  ;;  %v4420_v7 = vadd.f32 %v5822_v56, %v3966_v6  ;;  %v3965_v15 = vadd.f32 %v3902_v51, %v3511_v40  ;;  %v5825_v63 = vpop.f32.mrf.mxu0 }
 0x1f5   : > { %v4544_v47 = vadd.f32 %v4543_v38, %v4417_v17  ;;  %v4613_v10 = vadd.f32 %v4612_v0, %v4582_v58  ;;  %v5775_v48 = vpop.f32.mrf.mxu1  ;;  %v3517_v43 = vadd.f32 %v7633_v44, %v3062_v35 }
 0x1f6   : > { %4516 = vst [vmem:[%s7254_s18 + $0xc8] sm:$0xff] %v4420_v7  ;;  %v4419_v33 = vadd.f32 %v4356_v30, %v3965_v15  ;;  %v3968_v31 = vadd.f32 %v5775_v48, %v3514_v34  ;;  %v4366_v61 = vpop.f32.mrf.mxu0  ;;  %v4586_v14 = vmul.f32 %v4420_v7, %v4420_v7 }
 0x1f7   : > { %v4614_v60 = vadd.f32 %v4613_v10, %v4583_v59  ;;  %v4545_v42 = vadd.f32 %v4544_v47, %v4418_v13  ;;  %v3912_v1 = vpop.f32.mrf.mxu1  ;;  %v7632_v13 = vld [vmem:[#allocation42_spill] sm:$0xff] }
 0x1f8   : > { %4515 = vst [vmem:[%s7254_s18 + $0xc0] sm:$0xff] %v4419_v33  ;;  %v4585_v41 = vmul.f32 %v4419_v33, %v4419_v33  ;;  %v4422_v52 = vadd.f32 %v5825_v63, %v3968_v31  ;;  %v3967_v53 = vadd.f32 %v3912_v1, %v3513_v20  ;;  %v5828_v26 = vpop.f32.mrf.mxu0  ;;  %v3518_v54 = vadd.f32 %v7632_v13, %v3063_v50 }
 0x1f9   : > { %v4546_v11 = vadd.f32 %v4545_v42, %v4419_v33  ;;  %v4615_v3 = vadd.f32 %v4614_v60, %v4584_v36  ;;  %v5778_v25 = vpop.f32.mrf.mxu1 }
 0x1fa   : > { %4518 = vst [vmem:[%s7254_s18 + $0xd8] sm:$0xff] %v4422_v52  ;;  %v4421_v24 = vadd.f32 %v4366_v61, %v3967_v53  ;;  %v3970_v21 = vadd.f32 %v5778_v25, %v3516_v22  ;;  %v4376_v2 = vpop.f32.mrf.mxu0  ;;  %v4588_v8 = vmul.f32 %v4422_v52, %v4422_v52 }
 0x1fb   : > { %v4616_v37 = vadd.f32 %v4615_v3, %v4585_v41  ;;  %v4547_v55 = vadd.f32 %v4546_v11, %v4420_v7  ;;  %v3922_v39 = vpop.f32.mrf.mxu1 }
 0x1fc   : > { %4517 = vst [vmem:[%s7254_s18 + $0xd0] sm:$0xff] %v4421_v24  ;;  %v4587_v49 = vmul.f32 %v4421_v24, %v4421_v24  ;;  %v4424_v4 = vadd.f32 %v5828_v26, %v3970_v21  ;;  %v3969_v28 = vadd.f32 %v3922_v39, %v3515_v46  ;;  %v5831_v45 = vpop.f32.mrf.mxu0 }
 0x1fd   : > { %v4548_v56 = vadd.f32 %v4547_v55, %v4421_v24  ;;  %v4617_v57 = vadd.f32 %v4616_v37, %v4586_v14  ;;  %v5781_v40 = vpop.f32.mrf.mxu1 }
 0x1fe   : > { %4520 = vst [vmem:[%s7254_s18 + $0xe8] sm:$0xff] %v4424_v4  ;;  %v4423_v17 = vadd.f32 %v4376_v2, %v3969_v28  ;;  %v3972_v6 = vadd.f32 %v5781_v40, %v3518_v54  ;;  %v4386_v59 = vpop.f32.mrf.mxu0  ;;  %v4590_v15 = vmul.f32 %v4424_v4, %v4424_v4 }
 0x1ff   : > { %v4618_v5 = vadd.f32 %v4617_v57, %v4587_v49  ;;  %v4549_v58 = vadd.f32 %v4548_v56, %v4422_v52  ;;  %v3932_v0 = vpop.f32.mrf.mxu1 }
 0x200   : > { %4519 = vst [vmem:[%s7254_s18 + $0xe0] sm:$0xff] %v4423_v17  ;;  %v4589_v38 = vmul.f32 %v4423_v17, %v4423_v17  ;;  %v4426_v51 = vadd.f32 %v5831_v45, %v3972_v6  ;;  %v3971_v30 = vadd.f32 %v3932_v0, %v3517_v43 }
 0x201   : > { %v4550_v19 = vadd.f32 %v4549_v58, %v4423_v17  ;;  %v4619_v34 = vadd.f32 %v4618_v5, %v4588_v8 }
 0x202   : > { %4522 = vst [vmem:[%s7254_s18 + $0xf8] sm:$0xff] %v4426_v51  ;;  %v4425_v7 = vadd.f32 %v4386_v59, %v3971_v30  ;;  %v4592_v20 = vmul.f32 %v4426_v51, %v4426_v51 }
 0x203   : > { %v4620_v47 = vadd.f32 %v4619_v34, %v4589_v38  ;;  %v4551_v10 = vadd.f32 %v4550_v19, %v4424_v4 }
 0x204   : > { %4521 = vst [vmem:[%s7254_s18 + $0xf0] sm:$0xff] %v4425_v7  ;;  %v4591_v48 = vmul.f32 %v4425_v7, %v4425_v7 }
 0x205   : > { %v4552_v63 = vadd.f32 %v4551_v10, %v4425_v7  ;;  %v4621_v18 = vadd.f32 %v4620_v47, %v4590_v15 }
 0x207   : > { %v4553_v23 = vadd.f32 %v4552_v63, %v4426_v51  ;;  %v4622_v9 = vadd.f32 %v4621_v18, %v4591_v48 }
 0x209   : > { %v4554_v12 = vrot.slane %v4553_v23, 4  ;;  %v4623_v33 = vadd.f32 %v4622_v9, %v4592_v20 }
 0x20b   : > { %v4555_v31 = vadd.f32 %v4554_v12, %v4553_v23  ;;  %v4624_v27 = vrot.slane %v4623_v33, 4 }
 0x20d   : > { %v4556_v22 = vrot.slane %v4555_v31, 2  ;;  %v4625_v36 = vadd.f32 %v4624_v27, %v4623_v33 }
 0x20f   : > { %v4557_v60 = vadd.f32 %v4556_v22, %v4555_v31  ;;  %v4626_v42 = vrot.slane %v4625_v36, 2 }
 0x211   : > { %v4558_v1 = vrot.slane %v4557_v60, 1  ;;  %v4627_v61 = vadd.f32 %v4626_v42, %v4625_v36 }
 0x213   : > { %v4559_v32 = vadd.f32 %v4558_v1, %v4557_v60  ;;  %v4628_v50 = vrot.slane %v4627_v61, 1 }
 0x215   : > { %4560 = vst [vmem:[%s228_s22] sm:$0x1] %v4559_v32  ;;  %v4629_v41 = vadd.f32 %v4628_v50, %v4627_v61 }
 0x217   : > { %4630 = vst [vmem:[%s228_s22 + $0x1] sm:$0x1] %v4629_v41 }
 0x218 PF: > { %s14_s14 = sadd.s32 1, %s5881_s14   ;;  %s7634_s12 = smov %s5877_s13 }
 0x219   : > { %p11_p5 = scmp.ge.s32.totalorder %s14_s14, 4   ;;  %s7635_s13 = smov %s7637_s15 }
 0x21b   :  { %13 = sbr.rel (!%p11_p5) target bundleno = 2 (0x2), region = 80 }

// kernel: encoder_block_forward.4
= control target key start
LH: loop header
LB: loop body
LE: loop exit
PB: predicated region body
PF: predicated region fallthrough
CT: control target
= control target key end

     0   :  { %s6024_s18 = smov 0   ;;  %s6026_s19 = smov 0   ;;  %s7823_s0 = inlined_call_operand.vmem [shape: f32[2,1,18,18,128], index: 0, kind: input, shape index: {}]   ;;  %s7824_s1 = inlined_call_operand.vmem [shape: f32[9,128,128], index: 1, kind: input, shape index: {}]   ;;  %s7825_s2 = inlined_call_operand.vmem [shape: f32[1,128], index: 2, kind: input, shape index: {}]   ;;  %s7826_s3 = inlined_call_operand.vmem [shape: f32[1,128], index: 3, kind: input, shape index: {}]   ;;  %s7827_s4 = inlined_call_operand.vmem [shape: f32[2,16,16,128], index: 4, kind: output, shape index: {0}]   ;;  %s7828_s5 = inlined_call_operand.vmem [shape: f32[2,1,2,128], index: 5, kind: output, shape index: {1}]  }
   0x1   :  { %s6028_s20 = smov 0  }
   0x2 LB: > { %s28_s21 = sadd.s32 1, %s5987_s19  ;;  %p4596_p0 = scmp.ge.s32.totalorder %s5991_s20, 1  ;;  %s5991_s20 = sphi %s6028_s20, %s16_s20   ;;  %s5987_s19 = sphi %s6026_s19, %s7943_s19   ;;  %s5983_s18 = sphi %s6024_s18, %s7942_s18  }
   0x3   : > { %p30_p1 = scmp.ge.s32.totalorder %s28_s21, 2  ;;  %p212_p2 = scmp.lt.s32.totalorder %s5991_s20, 3 }
   0x5   : > { %s7945_s21 = smov (%p30_p1, %s28_s21), 0  ;;  %p213_p3 = pnand %p4596_p0, %p212_p2 }
   0x7   : > { %216 = sbr.rel (%p213_p3) target bundleno = 566 (0x236), region = 36 }
   0xc   : > { %v1031_v0 = vld [vmem:[%s7824_s1 + $0x78] sm:$0xff]  ;;  %v1030_v1 = vld [vmem:[%s7824_s1 + $0x70] sm:$0xff]  ;;  %p256_p4 = scmp.lt.s32.totalorder %s5983_s18, 1  ;;  %v5993_v2 = vmov 0.0   ;;  %v1029_v3 = vld [vmem:[%s7824_s1 + $0x68] sm:$0xff]  ;;  %v532_v4 = vlaneseq }
   0xd   : > { %5886 = vmatprep.subr.mxu1 %v1031_v0  ;;  %5166 = vmatprep.subr.mxu0 %v1031_v0  ;;  %866 = vst [vmem:[#allocation2] sm:$0xff] %v5993_v2  ;;  %867 = vst [vmem:[#allocation2 + $0x8] sm:$0xff] %v5993_v2  ;;  %v1028_v5 = vld [vmem:[%s7824_s1 + $0x60] sm:$0xff]  ;;  %v1027_v7 = vld [vmem:[%s7824_s1 + $0x58] sm:$0xff] }
   0xe   : > { %868 = vst [vmem:[#allocation2 + $0x10] sm:$0x3] %v5993_v2  ;;  %917 = vst [vmem:[#allocation2 + $0x198] sm:$0xff] %v5993_v2  ;;  %5902 = vmatpush3.msra.mxu1 %v1031_v0  ;;  %5167 = vmatpush3.msra.mxu0 %v1031_v0  ;;  %s7947_s18 = smov (!%p256_p4, %s5983_s18), 1  ;;  %v6066_v6 = vld [vmem:[%s7825_s2] ss:$0 sm:$0xff] }
   0xf   : > { %918 = vst [vmem:[#allocation2 + $0x1a0] sm:$0xff] %v5993_v2  ;;  %919 = vst [vmem:[#allocation2 + $0x1a8] sm:$0x3] %v5993_v2  ;;  %5887 = vmatprep.subr.mxu1 %v1030_v1  ;;  %5168 = vmatprep.subr.mxu0 %v1030_v1  ;;  %s5918_s30 = smul.u32 432, %s7947_s18  ;;  %v6079_v8 = vld [vmem:[%s7826_s3] ss:$0 sm:$0xff] }
  0x10   : > { %5903 = vmatpush3.msra.mxu1 %v1030_v1  ;;  %5169 = vmatpush3.msra.mxu0 %v1030_v1  ;;  %v6082_v10 = vshrl.u32 %v532_v4, 7  ;;  %v1026_v13 = vld [vmem:[%s7824_s1 + $0x50] sm:$0xff]  ;;  %v1025_v22 = vld [vmem:[%s7824_s1 + $0x48] sm:$0xff]  ;;  %v1024_v32 = vld [vmem:[%s7824_s1 + $0x40] sm:$0xff]  ;;  %s4733_s28 = sshll.u32 %s7947_s18, 8  ;;  %s4600_s6 = sshll.u32 %s7947_s18, 1 }
  0x11   : > { %5888 = vmatprep.subr.mxu1 %v1029_v3  ;;  %5170 = vmatprep.subr.mxu0 %v1029_v3  ;;  %s6074_s12 = scalar_lea.vmem %s7823_s0, %s5918_s30  ;;  %v1023_v44 = vld [vmem:[%s7824_s1 + $0x38] sm:$0xff]  ;;  %v1022_v55 = vld [vmem:[%s7824_s1 + $0x30] sm:$0xff]  ;;  %s282_s9 = scalar_lea.vmem %s7828_s5, %s4600_s6 }
  0x12   : > { %5904 = vmatpush3.msra.mxu1 %v1029_v3  ;;  %5171 = vmatpush3.msra.mxu0 %v1029_v3  ;;  %v307_v9 = vld [vmem:[%s6074_s12 + $0xc0] sm:$0xff]  ;;  %v308_v11 = vld [vmem:[%s6074_s12 + $0xc8] sm:$0xff]  ;;  %v310_v12 = vld [vmem:[%s6074_s12 + $0xd8] sm:$0xff]  ;;  %vm590_vm0 = vcmp.ge.s32.totalorder %v6082_v10, 1 }
  0x13   : > { %5889 = vmatprep.subr.mxu1 %v1028_v5  ;;  %5172 = vmatprep.subr.mxu0 %v1028_v5  ;;  %v368_v14 = vmul.f32 %v6066_v6, %v307_v9  ;;  %v369_v15 = vmul.f32 %v6066_v6, %v308_v11  ;;  %v371_v16 = vmul.f32 %v6066_v6, %v310_v12  ;;  %v286_v17 = vld [vmem:[%s6074_s12 + $0x18] sm:$0xff]  ;;  %v311_v18 = vld [vmem:[%s6074_s12 + $0xe0] sm:$0xff]  ;;  %v313_v26 = vld [vmem:[%s6074_s12 + $0xf0] sm:$0xff] }
  0x14   : > { %5905 = vmatpush3.msra.mxu1 %v1028_v5  ;;  %5173 = vmatpush3.msra.mxu0 %v1028_v5  ;;  %v347_v19 = vmul.f32 %v6066_v6, %v286_v17  ;;  %v372_v20 = vmul.f32 %v6066_v6, %v311_v18  ;;  %v287_v21 = vld [vmem:[%s6074_s12 + $0x20] sm:$0xff]  ;;  %v289_v30 = vld [vmem:[%s6074_s12 + $0x30] sm:$0xff]  ;;  %v314_v31 = vld [vmem:[%s6074_s12 + $0xf8] sm:$0xff]  ;;  %v374_v36 = vmul.f32 %v6066_v6, %v313_v26 }
  0x15   : > { %5890 = vmatprep.subr.mxu1 %v1027_v7  ;;  %5174 = vmatprep.subr.mxu0 %v1027_v7  ;;  %v6101_v23 = vadd.f32 %v6079_v8, %v368_v14  ;;  %v6104_v24 = vadd.f32 %v6079_v8, %v369_v15  ;;  %v6107_v25 = vadd.f32 %v6079_v8, %v371_v16  ;;  %v290_v37 = vld [vmem:[%s6074_s12 + $0x38] sm:$0xff]  ;;  %v316_v42 = vld [vmem:[%s6074_s12 + $0x108] sm:$0xff]  ;;  %v317_v49 = vld [vmem:[%s6074_s12 + $0x110] sm:$0xff] }
  0x16   : > { %5906 = vmatpush3.msra.mxu1 %v1027_v7  ;;  %5175 = vmatpush3.msra.mxu0 %v1027_v7  ;;  %v6112_v27 = vadd.f32 %v6079_v8, %v347_v19  ;;  %v6115_v28 = vadd.f32 %v6079_v8, %v372_v20  ;;  %v348_v29 = vmul.f32 %v6066_v6, %v287_v21  ;;  %v292_v43 = vld [vmem:[%s6074_s12 + $0x48] sm:$0xff]  ;;  %v293_v50 = vld [vmem:[%s6074_s12 + $0x50] sm:$0xff]  ;;  %v319_v0 = vld [vmem:[%s6074_s12 + $0x120] sm:$0xff] }
  0x17   : > { %5891 = vmatprep.subr.mxu1 %v1026_v13  ;;  %5176 = vmatprep.subr.mxu0 %v1026_v13  ;;  %v483_v33 = vmax.f32 %v6101_v23, 0.0  ;;  %v484_v34 = vmax.f32 %v6104_v24, 0.0  ;;  %v486_v35 = vmax.f32 %v6107_v25, 0.0  ;;  %v350_v41 = vmul.f32 %v6066_v6, %v289_v30  ;;  %v295_v1 = vld [vmem:[%s6074_s12 + $0x60] sm:$0xff]  ;;  %v1021_v3 = vld [vmem:[%s7824_s1 + $0x28] sm:$0xff]  ;;  %v4634_v23 = vld [vmem:[%s7824_s1 + $0x178] sm:$0xff] }
  0x18   : > { %5907 = vmatpush3.msra.mxu1 %v1026_v13  ;;  %5177 = vmatpush3.msra.mxu0 %v1026_v13  ;;  %v462_v38 = vmax.f32 %v6112_v27, 0.0  ;;  %v487_v39 = vmax.f32 %v6115_v28, 0.0  ;;  %v6131_v40 = vadd.f32 %v6079_v8, %v348_v29  ;;  %v6150_v47 = vadd.f32 %v6079_v8, %v374_v36  ;;  %v320_v11 = vld [vmem:[%s6074_s12 + $0x128] sm:$0xff]  ;;  %v1020_v17 = vld [vmem:[%s7824_s1 + $0x20] sm:$0xff] }
  0x19   : > { %5892 = vmatprep.subr.mxu1 %v1025_v22  ;;  %5178 = vmatprep.subr.mxu0 %v1025_v22  ;;  %v836_v45 = vsel %vm590_vm0, %v483_v33, 0.0  ;;  %891 = vst [vmem:[#allocation2 + $0xc8] sm:$0xff] %v484_v34  ;;  %v839_v46 = vsel %vm590_vm0, %v486_v35, 0.0  ;;  %v375_v48 = vmul.f32 %v6066_v6, %v314_v31  ;;  %v6163_v53 = vadd.f32 %v6079_v8, %v350_v41  ;;  %v296_v12 = vld [vmem:[%s6074_s12 + $0x68] sm:$0xff]  ;;  %v323_v36 = vld [vmem:[%s6074_s12 + $0x140] sm:$0xff] }
  0x1a   : > { %5908 = vmatpush3.msra.mxu1 %v1025_v22  ;;  %5179 = vmatpush3.msra.mxu0 %v1025_v22  ;;  %890 = vst [vmem:[#allocation2 + $0xc0] sm:$0xff] %v836_v45  ;;  %893 = vst [vmem:[#allocation2 + $0xd8] sm:$0xff] %v839_v46  ;;  %v815_v51 = vsel %vm590_vm0, %v462_v38, 0.0  ;;  %v463_v52 = vmax.f32 %v6131_v40, 0.0  ;;  %v351_v54 = vmul.f32 %v6066_v6, %v290_v37  ;;  %v489_v56 = vmax.f32 %v6150_v47, 0.0  ;;  %v322_v22 = vld [vmem:[%s6074_s12 + $0x138] sm:$0xff] }
  0x1b   : > { %5893 = vmatprep.subr.mxu1 %v1024_v32  ;;  %5180 = vmatprep.subr.mxu0 %v1024_v32  ;;  %894 = vst [vmem:[#allocation2 + $0xe0] sm:$0xff] %v487_v39  ;;  %869 = vst [vmem:[#allocation2 + $0x18] sm:$0xff] %v815_v51  ;;  %v6171_v57 = vadd.f32 %v6079_v8, %v375_v48  ;;  %v377_v58 = vmul.f32 %v6066_v6, %v316_v42  ;;  %v465_v60 = vmax.f32 %v6163_v53, 0.0  ;;  %v1019_v37 = vld [vmem:[%s7824_s1 + $0x18] sm:$0xff]  ;;  %v299_v45 = vld [vmem:[%s6074_s12 + $0x80] sm:$0xff] }
  0x1c   : > { %5909 = vmatpush3.msra.mxu1 %v1024_v32  ;;  %5181 = vmatpush3.msra.mxu0 %v1024_v32  ;;  %v353_v59 = vmul.f32 %v6066_v6, %v292_v43  ;;  %870 = vst [vmem:[#allocation2 + $0x20] sm:$0xff] %v463_v52  ;;  %v6179_v61 = vadd.f32 %v6079_v8, %v351_v54  ;;  %v842_v4 = vsel %vm590_vm0, %v489_v56, 0.0  ;;  %v298_v32 = vld [vmem:[%s6074_s12 + $0x78] sm:$0xff]  ;;  %v1018_v51 = vld [vmem:[%s7824_s1 + $0x10] sm:$0xff] }
  0x1d   : > { %5894 = vmatprep.subr.mxu1 %v1023_v44  ;;  %5182 = vmatprep.subr.mxu0 %v1023_v44  ;;  %v378_v62 = vmul.f32 %v6066_v6, %v317_v49  ;;  %v354_v63 = vmul.f32 %v6066_v6, %v293_v50  ;;  %v490_v5 = vmax.f32 %v6171_v57, 0.0  ;;  %v6194_v7 = vadd.f32 %v6079_v8, %v377_v58 }
  0x1e   : > { %5910 = vmatpush3.msra.mxu1 %v1023_v44  ;;  %5183 = vmatpush3.msra.mxu0 %v1023_v44  ;;  %v6197_v9 = vadd.f32 %v6079_v8, %v353_v59  ;;  %896 = vst [vmem:[#allocation2 + $0xf0] sm:$0xff] %v842_v4  ;;  %v818_v13 = vsel %vm590_vm0, %v465_v60, 0.0  ;;  %v466_v14 = vmax.f32 %v6179_v61, 0.0  ;;  %v380_v20 = vmul.f32 %v6066_v6, %v319_v0  ;;  %v4612_v61 = vld [vmem:[%s7824_s1 + $0xc8] sm:$0xff] }
  0x1f   : > { %5895 = vmatprep.subr.mxu1 %v1022_v55  ;;  %5184 = vmatprep.subr.mxu0 %v1022_v55  ;;  %v6207_v15 = vadd.f32 %v6079_v8, %v378_v62  ;;  %v6210_v16 = vadd.f32 %v6079_v8, %v354_v63  ;;  %872 = vst [vmem:[#allocation2 + $0x30] sm:$0xff] %v818_v13  ;;  %897 = vst [vmem:[#allocation2 + $0xf8] sm:$0xff] %v490_v5  ;;  %v492_v18 = vmax.f32 %v6194_v7, 0.0  ;;  %v325_v62 = vld [vmem:[%s6074_s12 + $0x150] sm:$0xff]  ;;  %v1017_v13 = vld [vmem:[%s7824_s1 + $0x8] sm:$0xff] }
  0x20   : > { %5911 = vmatpush3.msra.mxu1 %v1022_v55  ;;  %5185 = vmatpush3.msra.mxu0 %v1022_v55  ;;  %v468_v19 = vmax.f32 %v6197_v9, 0.0  ;;  %v356_v21 = vmul.f32 %v6066_v6, %v295_v1  ;;  %873 = vst [vmem:[#allocation2 + $0x38] sm:$0xff] %v466_v14  ;;  %v381_v30 = vmul.f32 %v6066_v6, %v320_v11  ;;  %v6260_v50 = vadd.s32 16, %v6082_v10  ;;  %v301_v63 = vld [vmem:[%s6074_s12 + $0x90] sm:$0xff]  ;;  %v326_v11 = vld [vmem:[%s6074_s12 + $0x158] sm:$0xff] }
  0x21   : > { %5896 = vmatprep.subr.mxu1 %v1021_v3  ;;  %5186 = vmatprep.subr.mxu0 %v1021_v3  ;;  %v493_v26 = vmax.f32 %v6207_v15, 0.0  ;;  %v469_v29 = vmax.f32 %v6210_v16, 0.0  ;;  %v357_v31 = vmul.f32 %v6066_v6, %v296_v12  ;;  %v845_v41 = vsel %vm590_vm0, %v492_v18, 0.0  ;;  %v302_v12 = vld [vmem:[%s6074_s12 + $0x98] sm:$0xff]  ;;  %v4627_v15 = vld [vmem:[%s7824_s1 + $0x140] sm:$0xff] }
  0x22   : > { %5912 = vmatpush3.msra.mxu1 %v1021_v3  ;;  %5187 = vmatpush3.msra.mxu0 %v1021_v3  ;;  %v821_v42 = vsel %vm590_vm0, %v468_v19, 0.0  ;;  %v6242_v43 = vadd.f32 %v6079_v8, %v380_v20  ;;  %v6245_v44 = vadd.f32 %v6079_v8, %v356_v21  ;;  %899 = vst [vmem:[#allocation2 + $0x108] sm:$0xff] %v845_v41  ;;  %v1016_v41 = vld [vmem:[%s7824_s1] sm:$0xff]  ;;  %vm649_vm1 = vcmp.le.s32.totalorder %v6260_v50, 16  ;;  %v4610_v16 = vld [vmem:[%s7824_s1 + $0xb8] sm:$0xff] }
  0x23   : > { %5897 = vmatprep.subr.mxu1 %v1020_v17  ;;  %5188 = vmatprep.subr.mxu0 %v1020_v17  ;;  %875 = vst [vmem:[#allocation2 + $0x48] sm:$0xff] %v821_v42  ;;  %900 = vst [vmem:[#allocation2 + $0x110] sm:$0xff] %v493_v26  ;;  %v6253_v46 = vadd.f32 %v6079_v8, %v381_v30  ;;  %v6256_v48 = vadd.f32 %v6079_v8, %v357_v31  ;;  %v4663_v50 = vld [vmem:[%s7824_s1 + $0x260] sm:$0xff]  ;;  %v4714_v10 = vld [vmem:[%s7824_s1 + $0x3f8] sm:$0xff] }
  0x24   : > { %876 = vst [vmem:[#allocation2 + $0x50] sm:$0xff] %v469_v29  ;;  %v383_v49 = vmul.f32 %v6066_v6, %v322_v22  ;;  %5913 = vmatpush3.msra.mxu1 %v1020_v17  ;;  %5189 = vmatpush3.msra.mxu0 %v1020_v17  ;;  %v495_v54 = vmax.f32 %v6242_v43, 0.0  ;;  %v471_v55 = vmax.f32 %v6245_v44, 0.0  ;;  %v359_v58 = vmul.f32 %v6066_v6, %v298_v32 }
  0x25   : > { %v384_v59 = vmul.f32 %v6066_v6, %v323_v36  ;;  %5898 = vmatprep.subr.mxu1 %v1019_v37  ;;  %5190 = vmatprep.subr.mxu0 %v1019_v37  ;;  %v7834_v0 = vmax.f32 %v6253_v46, 0.0  ;;  %v7833_v1 = vmax.f32 %v6256_v48, 0.0  ;;  %v360_v4 = vmul.f32 %v6066_v6, %v299_v45 }
  0x26   : > { %v6274_v3 = vadd.f32 %v6079_v8, %v383_v49  ;;  %5914 = vmatpush3.msra.mxu1 %v1019_v37  ;;  %5191 = vmatpush3.msra.mxu0 %v1019_v37  ;;  %v848_v17 = vsel %vm590_vm0, %v495_v54, 0.0  ;;  %v824_v20 = vsel %vm590_vm0, %v471_v55, 0.0  ;;  %v6291_v21 = vadd.f32 %v6079_v8, %v359_v58  ;;  %v328_v37 = vld [vmem:[%s6074_s12 + $0x168] sm:$0xff] }
  0x27   : > { %v6294_v22 = vadd.f32 %v6079_v8, %v384_v59  ;;  %5899 = vmatprep.subr.mxu1 %v1018_v51  ;;  %5192 = vmatprep.subr.mxu0 %v1018_v51  ;;  %902 = vst [vmem:[#allocation2 + $0x120] sm:$0xff] %v848_v17  ;;  %878 = vst [vmem:[#allocation2 + $0x60] sm:$0xff] %v824_v20  ;;  %v6302_v31 = vadd.f32 %v6079_v8, %v360_v4  ;;  %v304_v59 = vld [vmem:[%s6074_s12 + $0xa8] sm:$0xff]  ;;  %v7844_v43 = vmax.f32 %v6253_v46, 0.0  ;;  %v4625_v46 = vld [vmem:[%s7824_s1 + $0x130] sm:$0xff] }
  0x28   : > { %903 = vst [vmem:[#allocation2 + $0x128] sm:$0xff] %v7834_v0  ;;  %879 = vst [vmem:[#allocation2 + $0x68] sm:$0xff] %v7833_v1  ;;  %v7831_v30 = vmax.f32 %v6274_v3, 0.0  ;;  %v386_v32 = vmul.f32 %v6066_v6, %v325_v62  ;;  %v362_v36 = vmul.f32 %v6066_v6, %v301_v63  ;;  %5915 = vmatpush3.msra.mxu1 %v1018_v51  ;;  %5193 = vmatpush3.msra.mxu0 %v1018_v51  ;;  %v329_v62 = vld [vmem:[%s6074_s12 + $0x170] sm:$0xff]  ;;  %v294_v1 = vld [vmem:[%s6074_s12 + $0x58] sm:$0x3] }
  0x29   : > { %v7829_v42 = vmax.f32 %v6291_v21, 0.0  ;;  %v7830_v45 = vmax.f32 %v6294_v22, 0.0  ;;  %v387_v49 = vmul.f32 %v6066_v6, %v326_v11  ;;  %v363_v58 = vmul.f32 %v6066_v6, %v302_v12  ;;  %5900 = vmatprep.subr.mxu1 %v1017_v13  ;;  %5194 = vmatprep.subr.mxu0 %v1017_v13  ;;  %v305_v11 = vld [vmem:[%s6074_s12 + $0xb0] sm:$0xff]  ;;  %v4618_v12 = vld [vmem:[%s7824_s1 + $0xf8] sm:$0xff] }
  0x2a   : > { %v851_v51 = vsel %vm590_vm0, %v7831_v30, 0.0  ;;  %v7832_v63 = vmax.f32 %v6302_v31, 0.0  ;;  %v6322_v4 = vadd.f32 %v6079_v8, %v386_v32  ;;  %v6325_v17 = vadd.f32 %v6079_v8, %v362_v36  ;;  %5916 = vmatpush3.msra.mxu1 %v1017_v13  ;;  %5195 = vmatpush3.msra.mxu0 %v1017_v13  ;;  %v288_v30 = vld [vmem:[%s6074_s12 + $0x28] sm:$0x3]  ;;  %v297_v0 = vld [vmem:[%s6074_s12 + $0x70] sm:$0x3] }
  0x2b   : > { %905 = vst [vmem:[#allocation2 + $0x138] sm:$0xff] %v851_v51  ;;  %v827_v20 = vsel %vm590_vm0, %v7829_v42, 0.0  ;;  %906 = vst [vmem:[#allocation2 + $0x140] sm:$0xff] %v7830_v45  ;;  %v6339_v32 = vadd.f32 %v6079_v8, %v387_v49  ;;  %v6342_v13 = vadd.f32 %v6079_v8, %v363_v58  ;;  %v389_v36 = vmul.f32 %v6066_v6, %v328_v37  ;;  %v291_v58 = vld [vmem:[%s6074_s12 + $0x40] sm:$0x3] }
  0x2c   : > { %5901 = vmatprep.subr.mxu1 %v1016_v41  ;;  %5196 = vmatprep.subr.mxu0 %v1016_v41  ;;  %881 = vst [vmem:[#allocation2 + $0x78] sm:$0xff] %v827_v20  ;;  %882 = vst [vmem:[#allocation2 + $0x80] sm:$0xff] %v7832_v63  ;;  %v501_v51 = vmax.f32 %v6322_v4, 0.0  ;;  %v7835_v42 = vmax.f32 %v6325_v17, 0.0  ;;  %v365_v45 = vmul.f32 %v6066_v6, %v304_v59  ;;  %v7845_v44 = vmax.f32 %v6256_v48, 0.0  ;;  %v4608_v48 = vld [vmem:[%s7824_s1 + $0xa8] sm:$0xff] }
  0x2d   : > { %v390_v49 = vmul.f32 %v6066_v6, %v329_v62  ;;  %5917 = vmatpush3.msra.mxu1 %v1016_v41  ;;  %5952 = vmatprep.mubr.msk.f32.mxu1 %vm590_vm0, %v483_v33  ;;  %v7837_v37 = vmax.f32 %v6339_v32, 0.0  ;;  %v7836_v20 = vmax.f32 %v6342_v13, 0.0  ;;  %v6360_v63 = vadd.f32 %v6079_v8, %v389_v36  ;;  %v4617_v33 = vld [vmem:[%s7824_s1 + $0xf0] sm:$0xff]  ;;  %v4622_v4 = vld [vmem:[%s7824_s1 + $0x118] sm:$0xff] }
  0x2e   : > { %v366_v59 = vmul.f32 %v6066_v6, %v305_v11  ;;  %5197 = vmatpush3.msra.mxu0 %v1016_v41  ;;  %5198 = vmatprep.mubr.f32.mxu0 %v5993_v2  ;;  %v854_v62 = vsel %vm590_vm0, %v501_v51, 0.0  ;;  %v830_v41 = vsel %vm590_vm0, %v7835_v42, 0.0  ;;  %v426_v11 = vadd.f32 %v6079_v8, %v365_v45 }
  0x2f   : > { %v6381_v36 = vadd.f32 %v6079_v8, %v390_v49  ;;  %5223 = vmatmul.mubr.f32.vlgmr.msra.gmra.mxu1 %v484_v34  ;;  %5246 = vmatprep.subr.mxu1 %v4618_v12  ;;  %908 = vst [vmem:[#allocation2 + $0x150] sm:$0xff] %v854_v62  ;;  %884 = vst [vmem:[#allocation2 + $0x90] sm:$0xff] %v830_v41  ;;  %v7838_v42 = vmax.f32 %v6360_v63, 0.0  ;;  %v349_v49 = vmul.f32 %v6066_v6, %v288_v30  ;;  %v4633_v34 = vld [vmem:[%s7824_s1 + $0x170] sm:$0xff] }
  0x30   : > { %909 = vst [vmem:[#allocation2 + $0x158] sm:$0xff] %v7837_v37  ;;  %885 = vst [vmem:[#allocation2 + $0x98] sm:$0xff] %v7836_v20  ;;  %v427_v45 = vadd.f32 %v6079_v8, %v366_v59  ;;  %v352_v24 = vmul.f32 %v6066_v6, %v291_v58  ;;  %5199 = vmatmul.mubr.f32.vlgmr.msra.gmra.mxu0 %v5993_v2  ;;  %5247 = vmatpush3.msra.mxu1 %v4618_v12  ;;  %v6398_v62 = vmax.f32 %v426_v11, 0.0  ;;  %v300_v37 = vld [vmem:[%s6074_s12 + $0x88] sm:$0x3] }
  0x31   : > { %v505_v41 = vmax.f32 %v6381_v36, 0.0  ;;  %v355_v20 = vmul.f32 %v6066_v6, %v294_v1  ;;  %v358_v59 = vmul.f32 %v6066_v6, %v297_v0  ;;  %5326 = vmatprep.subr.mxu0 %v4634_v23  ;;  %5248 = vmatprep.subr.mxu1 %v4617_v33  ;;  %v857_v2 = vsel %vm590_vm0, %v7838_v42, 0.0  ;;  %v303_v11 = vld [vmem:[%s6074_s12 + $0xa0] sm:$0x3]  ;;  %v4616_v0 = vld [vmem:[%s7824_s1 + $0xe8] sm:$0xff] }
  0x32   : > { %v6408_v30 = vmax.f32 %v427_v45, 0.0  ;;  %v410_v12 = vadd.f32 %v6079_v8, %v349_v49  ;;  %v413_v58 = vadd.f32 %v6079_v8, %v352_v24  ;;  %5327 = vmatpush3.msra.mxu0 %v4634_v23  ;;  %5953 = vmatprep.mubr.msk.f32.mxu1 %vm590_vm0, %v486_v35  ;;  %911 = vst [vmem:[#allocation2 + $0x168] sm:$0xff] %v857_v2  ;;  %v833_v1 = vsel %vm590_vm0, %v6398_v62, 0.0  ;;  %v306_v49 = vld [vmem:[%s6074_s12 + $0xb8] sm:$0x3]  ;;  %v4619_v36 = vld [vmem:[%s7824_s1 + $0x100] sm:$0xff] }
  0x33   : > { %912 = vst [vmem:[#allocation2 + $0x170] sm:$0xff] %v505_v41  ;;  %v416_v45 = vadd.f32 %v6079_v8, %v355_v20  ;;  %v419_v23 = vadd.f32 %v6079_v8, %v358_v59  ;;  %v361_v25 = vmul.f32 %v6066_v6, %v300_v37  ;;  %5249 = vmatpush3.msra.mxu1 %v4617_v33  ;;  %887 = vst [vmem:[#allocation2 + $0xa8] sm:$0xff] %v833_v1  ;;  %v4632_v37 = vld [vmem:[%s7824_s1 + $0x168] sm:$0xff]  ;;  %v4615_v20 = vld [vmem:[%s7824_s1 + $0xe0] sm:$0xff] }
  0x34   : > { %5328 = vmatprep.subr.mxu0 %v4633_v34  ;;  %888 = vst [vmem:[#allocation2 + $0xb0] sm:$0xff] %v6408_v30  ;;  %v464_v35 = vmax.f32 %v410_v12, 0.0  ;;  %v467_v24 = vmax.f32 %v413_v58, 0.0  ;;  %v364_v2 = vmul.f32 %v6066_v6, %v303_v11  ;;  %v367_v42 = vmul.f32 %v6066_v6, %v306_v49  ;;  %5954 = vmatprep.mubr.msk.f32.mxu0 %vm590_vm0, %v462_v38  ;;  %v309_v58 = vld [vmem:[%s6074_s12 + $0xd0] sm:$0x3]  ;;  %v4631_v11 = vld [vmem:[%s7824_s1 + $0x160] sm:$0xff] }
  0x35   : > { %5226 = vmatmul.mubr.f32.gmra.mxu1 %v487_v39  ;;  %v470_v33 = vmax.f32 %v416_v45, 0.0  ;;  %v473_v59 = vmax.f32 %v419_v23, 0.0  ;;  %v422_v12 = vadd.f32 %v6079_v8, %v361_v25  ;;  %5250 = vmatprep.subr.mxu1 %v4616_v0  ;;  %v4614_v23 = vld [vmem:[%s7824_s1 + $0xd8] sm:$0xff] }
  0x36   : > { %5329 = vmatpush3.msra.mxu0 %v4633_v34  ;;  %v817_v27 = vsel %vm649_vm1, %v464_v35, 0.0  ;;  %v820_v28 = vsel %vm649_vm1, %v467_v24, 0.0  ;;  %v425_v38 = vadd.f32 %v6079_v8, %v364_v2  ;;  %v428_v39 = vadd.f32 %v6079_v8, %v367_v42  ;;  %5251 = vmatpush3.msra.mxu1 %v4616_v0  ;;  %v312_v0 = vld [vmem:[%s6074_s12 + $0xe8] sm:$0x3]  ;;  %v315_v24 = vld [vmem:[%s6074_s12 + $0x100] sm:$0x3] }
  0x37   : > { %5202 = vmatmul.mubr.f32.gmra.mxu0 %v463_v52  ;;  %871 = vst [vmem:[#allocation2 + $0x28] sm:$0x3] %v817_v27  ;;  %874 = vst [vmem:[#allocation2 + $0x40] sm:$0x3] %v820_v28  ;;  %v823_v34 = vsel %vm649_vm1, %v470_v33, 0.0  ;;  %v826_v1 = vsel %vm649_vm1, %v473_v59, 0.0  ;;  %v370_v42 = vmul.f32 %v6066_v6, %v309_v58  ;;  %5330 = vmatprep.subr.mxu0 %v4632_v37 }
  0x38   : > { %v476_v45 = vmax.f32 %v422_v12, 0.0  ;;  %5252 = vmatprep.subr.mxu1 %v4615_v20  ;;  %877 = vst [vmem:[#allocation2 + $0x58] sm:$0x3] %v823_v34  ;;  %880 = vst [vmem:[#allocation2 + $0x70] sm:$0x3] %v826_v1  ;;  %v479_v40 = vmax.f32 %v425_v38, 0.0  ;;  %5331 = vmatpush3.msra.mxu0 %v4632_v37  ;;  %v373_v35 = vmul.f32 %v6066_v6, %v312_v0 }
  0x39   : > { %v482_v52 = vmax.f32 %v428_v39, 0.0  ;;  %5955 = vmatprep.mubr.msk.f32.mxu1 %vm590_vm0, %v489_v56  ;;  %v431_v49 = vadd.f32 %v6079_v8, %v370_v42  ;;  %5253 = vmatpush3.msra.mxu1 %v4615_v20  ;;  %v376_v2 = vmul.f32 %v6066_v6, %v315_v24  ;;  %v4630_v37 = vld [vmem:[%s7824_s1 + $0x158] sm:$0xff]  ;;  %v4613_v20 = vld [vmem:[%s7824_s1 + $0xd0] sm:$0xff]  ;;  %v4611_v1 = vld [vmem:[%s7824_s1 + $0xc0] sm:$0xff]  ;;  %v7846_v24 = vmax.f32 %v6274_v3, 0.0 }
  0x3a   : > { %v829_v25 = vsel %vm649_vm1, %v476_v45, 0.0  ;;  %5332 = vmatprep.subr.mxu0 %v4631_v11  ;;  %v832_v47 = vsel %vm649_vm1, %v479_v40, 0.0  ;;  %5956 = vmatprep.mubr.msk.f32.mxu0 %vm590_vm0, %v465_v60  ;;  %v434_v53 = vadd.f32 %v6079_v8, %v373_v35  ;;  %v318_v59 = vld [vmem:[%s6074_s12 + $0x118] sm:$0x3]  ;;  %v321_v27 = vld [vmem:[%s6074_s12 + $0x130] sm:$0x3] }
  0x3b   : > { %883 = vst [vmem:[#allocation2 + $0x88] sm:$0x3] %v829_v25  ;;  %v835_v56 = vsel %vm649_vm1, %v482_v52, 0.0  ;;  %5229 = vmatmul.mubr.f32.gmra.mxu1 %v490_v5  ;;  %886 = vst [vmem:[#allocation2 + $0xa0] sm:$0x3] %v832_v47  ;;  %v485_v33 = vmax.f32 %v431_v49, 0.0  ;;  %5254 = vmatprep.subr.mxu1 %v4614_v23  ;;  %v437_v57 = vadd.f32 %v6079_v8, %v376_v2 }
  0x3c   : > { %889 = vst [vmem:[#allocation2 + $0xb8] sm:$0x3] %v835_v56  ;;  %5333 = vmatpush3.msra.mxu0 %v4631_v11  ;;  %v379_v60 = vmul.f32 %v6066_v6, %v318_v59  ;;  %5255 = vmatpush3.msra.mxu1 %v4614_v23  ;;  %v4629_v5 = vld [vmem:[%s7824_s1 + $0x150] sm:$0xff]  ;;  %v488_v58 = vmax.f32 %v434_v53, 0.0  ;;  %v382_v39 = vmul.f32 %v6066_v6, %v321_v27  ;;  %v327_v40 = vld [vmem:[%s6074_s12 + $0x160] sm:$0x3] }
  0x3d   : > { %5205 = vmatmul.mubr.f32.gmra.mxu0 %v466_v14  ;;  %v838_v12 = vsel %vm649_vm1, %v485_v33, 0.0  ;;  %5334 = vmatprep.subr.mxu0 %v4630_v37  ;;  %v491_v28 = vmax.f32 %v437_v57, 0.0  ;;  %v4609_v52 = vld [vmem:[%s7824_s1 + $0xb0] sm:$0xff]  ;;  %v388_v0 = vmul.f32 %v6066_v6, %v327_v40  ;;  %v330_v25 = vld [vmem:[%s6074_s12 + $0x178] sm:$0x3]  ;;  %v7847_v2 = vmax.f32 %v6291_v21, 0.0 }
  0x3e   : > { %5256 = vmatprep.subr.mxu1 %v4613_v20  ;;  %892 = vst [vmem:[#allocation2 + $0xd0] sm:$0x3] %v838_v12  ;;  %v440_v38 = vadd.f32 %v6079_v8, %v379_v60  ;;  %5335 = vmatpush3.msra.mxu0 %v4630_v37  ;;  %v841_v14 = vsel %vm649_vm1, %v488_v58, 0.0  ;;  %v443_v7 = vadd.f32 %v6079_v8, %v382_v39  ;;  %v7848_v3 = vmax.f32 %v6294_v22, 0.0  ;;  %v4624_v37 = vld [vmem:[%s7824_s1 + $0x128] sm:$0xff]  ;;  %v4623_v22 = vld [vmem:[%s7824_s1 + $0x120] sm:$0xff] }
  0x3f   : > { %5957 = vmatprep.mubr.msk.f32.mxu1 %vm590_vm0, %v492_v18  ;;  %5257 = vmatpush3.msra.mxu1 %v4613_v20  ;;  %895 = vst [vmem:[#allocation2 + $0xe8] sm:$0x3] %v841_v14  ;;  %v844_v11 = vsel %vm649_vm1, %v491_v28, 0.0  ;;  %v4628_v18 = vld [vmem:[%s7824_s1 + $0x148] sm:$0xff]  ;;  %v391_v35 = vmul.f32 %v6066_v6, %v330_v25  ;;  %v4607_v20 = vld [vmem:[%s7824_s1 + $0xa0] sm:$0xff]  ;;  %v7849_v53 = vmax.f32 %v6302_v31, 0.0 }
  0x40   : > { %5336 = vmatprep.subr.mxu0 %v4629_v5  ;;  %v494_v34 = vmax.f32 %v440_v38, 0.0  ;;  %5958 = vmatprep.mubr.msk.f32.mxu0 %vm590_vm0, %v468_v19  ;;  %898 = vst [vmem:[#allocation2 + $0x100] sm:$0x3] %v844_v11  ;;  %v497_v45 = vmax.f32 %v443_v7, 0.0  ;;  %v324_v19 = vld [vmem:[%s6074_s12 + $0x148] sm:$0x3] }
  0x41   : > { %5232 = vmatmul.mubr.f32.gmra.mxu1 %v493_v26  ;;  %5258 = vmatprep.subr.mxu1 %v4612_v61  ;;  %v385_v42 = vmul.f32 %v6066_v6, %v324_v19  ;;  %v452_v56 = vadd.f32 %v6079_v8, %v391_v35  ;;  %v4606_v31 = vld [vmem:[%s7824_s1 + $0x98] sm:$0xff]  ;;  %v7850_v57 = vmax.f32 %v6325_v17, 0.0  ;;  %v7851_v60 = vmax.f32 %v6339_v32, 0.0  ;;  %v4621_v17 = vld [vmem:[%s7824_s1 + $0x110] sm:$0xff]  ;;  %v4604_v12 = vld [vmem:[%s7824_s1 + $0x88] sm:$0xff] }
  0x42   : > { %5337 = vmatpush3.msra.mxu0 %v4629_v5  ;;  %v847_v9 = vsel %vm649_vm1, %v494_v34, 0.0  ;;  %5259 = vmatpush3.msra.mxu1 %v4612_v61  ;;  %v850_v26 = vsel %vm649_vm1, %v497_v45, 0.0  ;;  %v7852_v5 = vmax.f32 %v6342_v13, 0.0  ;;  %v7853_v32 = vmax.f32 %v6360_v63, 0.0  ;;  %v4620_v63 = vld [vmem:[%s7824_s1 + $0x108] sm:$0xff]  ;;  %v4603_v13 = vld [vmem:[%s7824_s1 + $0x80] sm:$0xff] }
  0x43   : > { %5208 = vmatmul.mubr.f32.gmra.mxu0 %v469_v29  ;;  %901 = vst [vmem:[#allocation2 + $0x118] sm:$0x3] %v847_v9  ;;  %5338 = vmatprep.subr.mxu0 %v4628_v18  ;;  %904 = vst [vmem:[#allocation2 + $0x130] sm:$0x3] %v850_v26  ;;  %v446_v29 = vadd.f32 %v6079_v8, %v385_v42  ;;  %v506_v21 = vmax.f32 %v452_v56, 0.0  ;;  %v1321_v58 = vld [vmem:[#allocation2 + $0x1] sm:$0xff] }
  0x44   : > { %5260 = vmatprep.subr.mxu1 %v4611_v1  ;;  %5339 = vmatpush3.msra.mxu0 %v4628_v18  ;;  %v1691_v27 = vld [vmem:[#allocation2 + $0x2] sm:$0xff]  ;;  %v4650_v28 = vld [vmem:[%s7824_s1 + $0x1f8] sm:$0xff]  ;;  %v1692_v38 = vld [vmem:[#allocation2 + $0xa] sm:$0xff] }
  0x45   : > { %5959 = vmatprep.mubr.msk.f32.mxu1 %vm590_vm0, %v495_v54  ;;  %5261 = vmatpush3.msra.mxu1 %v4611_v1  ;;  %v4626_v54 = vld [vmem:[%s7824_s1 + $0x138] sm:$0xff]  ;;  %v500_v23 = vmax.f32 %v446_v29, 0.0  ;;  %v859_v59 = vsel %vm649_vm1, %v506_v21, 0.0  ;;  %v331_v14 = vld [vmem:[%s6074_s12 + $0x180] sm:$0xff]  ;;  %v332_v11 = vld [vmem:[%s6074_s12 + $0x188] sm:$0xff] }
  0x46   : > { %5340 = vmatprep.subr.mxu0 %v4627_v15  ;;  %5960 = vmatprep.mubr.msk.f32.mxu0 %vm590_vm0, %v471_v55  ;;  %v449_v55 = vadd.f32 %v6079_v8, %v388_v0  ;;  %913 = vst [vmem:[#allocation2 + $0x178] sm:$0x3] %v859_v59  ;;  %v4666_v39 = vld [vmem:[%s7824_s1 + $0x278] sm:$0xff]  ;;  %v6658_v34 = vld [vmem:[#allocation2 + $0x21] sm:$0xff]  ;;  %v392_v7 = vmul.f32 %v6066_v6, %v331_v14  ;;  %v333_v1 = vld [vmem:[%s6074_s12 + $0x190] sm:$0x3]  ;;  %s7692_s12 = scalar_lea.vmem %s7827_s4, %s4733_s28 }
  0x47   : > { %5235 = vmatmul.mubr.f32.gmra.mxu1 %v7844_v43  ;;  %5262 = vmatprep.subr.mxu1 %v4610_v16  ;;  %v853_v49 = vsel %vm649_vm1, %v500_v23, 0.0  ;;  %v6654_v61 = vld [vmem:[#allocation2 + $0x19] sm:$0xff]  ;;  %v393_v18 = vmul.f32 %v6066_v6, %v332_v11  ;;  %v4649_v45 = vld [vmem:[%s7824_s1 + $0x1f0] sm:$0xff]  ;;  %v1694_v19 = vld [vmem:[#allocation2 + $0x22] sm:$0xff] }
  0x48   : > { %5341 = vmatpush3.msra.mxu0 %v4627_v15  ;;  %5263 = vmatpush3.msra.mxu1 %v4610_v16  ;;  %907 = vst [vmem:[#allocation2 + $0x148] sm:$0x3] %v853_v49  ;;  %v503_v47 = vmax.f32 %v449_v55, 0.0  ;;  %v1693_v9 = vld [vmem:[#allocation2 + $0x1a] sm:$0xff]  ;;  %v394_v15 = vmul.f32 %v6066_v6, %v333_v1  ;;  %v6669_v26 = vadd.f32 %v6079_v8, %v392_v7  ;;  %v4665_v16 = vld [vmem:[%s7824_s1 + $0x270] sm:$0xff]  ;;  %v4648_v0 = vld [vmem:[%s7824_s1 + $0x1e8] sm:$0xff] }
  0x49   : > { %5211 = vmatmul.mubr.f32.gmra.mxu0 %v7845_v44  ;;  %5342 = vmatprep.subr.mxu0 %v4626_v54  ;;  %v6672_v42 = vadd.f32 %v6079_v8, %v393_v18  ;;  %v6678_v29 = vld [vmem:[#allocation2 + $0x31] sm:$0xff]  ;;  %v6681_v40 = vld [vmem:[#allocation2 + $0x39] sm:$0xff]  ;;  %v6699_v55 = vld [vmem:[#allocation2 + $0x49] sm:$0xff] }
  0x4a   : > { %5264 = vmatprep.subr.mxu1 %v4609_v52  ;;  %5343 = vmatpush3.msra.mxu0 %v4626_v54  ;;  %v856_v33 = vsel %vm649_vm1, %v503_v47, 0.0  ;;  %v455_v6 = vadd.f32 %v6079_v8, %v394_v15  ;;  %v7840_v43 = vmax.f32 %v6669_v26, 0.0  ;;  %v1696_v8 = vld [vmem:[#allocation2 + $0x3a] sm:$0xff]  ;;  %v6703_v49 = vld [vmem:[#allocation2 + $0x51] sm:$0xff]  ;;  %v6715_v56 = vld [vmem:[#allocation2 + $0x69] sm:$0xff] }
  0x4b   : > { %5961 = vmatprep.mubr.msk.f32.mxu1 %vm590_vm0, %v7846_v24  ;;  %5265 = vmatpush3.msra.mxu1 %v4609_v52  ;;  %910 = vst [vmem:[#allocation2 + $0x160] sm:$0x3] %v856_v33  ;;  %v7839_v54 = vmax.f32 %v6672_v42, 0.0  ;;  %v1695_v52 = vld [vmem:[#allocation2 + $0x32] sm:$0xff]  ;;  %v1697_v35 = vld [vmem:[#allocation2 + $0x4a] sm:$0xff]  ;;  %v4647_v24 = vld [vmem:[%s7824_s1 + $0x1e0] sm:$0xff] }
  0x4c   : > { %5344 = vmatprep.subr.mxu0 %v4625_v46  ;;  %5962 = vmatprep.mubr.msk.f32.mxu0 %vm590_vm0, %v7847_v2  ;;  %v509_v23 = vmax.f32 %v455_v6, 0.0  ;;  %v860_v44 = vsel %vm590_vm0, %v7840_v43, 0.0  ;;  %v6713_v47 = vld [vmem:[#allocation2 + $0x61] sm:$0xff]  ;;  %v6729_v33 = vld [vmem:[#allocation2 + $0x79] sm:$0xff]  ;;  %v4641_v1 = vld [vmem:[%s7824_s1 + $0x1b0] sm:$0xff] }
  0x4d   : > { %5238 = vmatmul.mubr.f32.gmra.mxu1 %v7848_v3  ;;  %5266 = vmatprep.subr.mxu1 %v4608_v48  ;;  %915 = vst [vmem:[#allocation2 + $0x188] sm:$0xff] %v7839_v54  ;;  %914 = vst [vmem:[#allocation2 + $0x180] sm:$0xff] %v860_v44  ;;  %v6717_v2 = vld [vmem:[#allocation2 + $0x62] sm:$0xff]  ;;  %v4646_v3 = vld [vmem:[%s7824_s1 + $0x1d8] sm:$0xff] }
  0x4e   : > { %5345 = vmatpush3.msra.mxu0 %v4625_v46  ;;  %5267 = vmatpush3.msra.mxu1 %v4608_v48  ;;  %v4664_v46 = vld [vmem:[%s7824_s1 + $0x268] sm:$0xff]  ;;  %v862_v25 = vsel %vm649_vm1, %v509_v23, 0.0  ;;  %v1698_v48 = vld [vmem:[#allocation2 + $0x52] sm:$0xff]  ;;  %v6807_v18 = vld [vmem:[#allocation2 + $0xda] sm:$0xff] }
  0x4f   : > { %5214 = vmatmul.mubr.f32.gmra.mxu0 %v7849_v53  ;;  %5346 = vmatprep.subr.mxu0 %v4624_v37  ;;  %916 = vst [vmem:[#allocation2 + $0x190] sm:$0x3] %v862_v25  ;;  %v6732_v21 = vld [vmem:[#allocation2 + $0x81] sm:$0xff]  ;;  %v4658_v14 = vld [vmem:[%s7824_s1 + $0x238] sm:$0xff]  ;;  %v6837_v23 = vld [vmem:[#allocation2 + $0x109] sm:$0xff] }
  0x50   : > { %5268 = vmatprep.subr.mxu1 %v4607_v20  ;;  %5347 = vmatpush3.msra.mxu0 %v4624_v37  ;;  %v6723_v37 = vld [vmem:[#allocation2 + $0x6a] sm:$0xff]  ;;  %v6735_v53 = vld [vmem:[#allocation2 + $0x7a] sm:$0xff]  ;;  %v6741_v59 = vld [vmem:[#allocation2 + $0x82] sm:$0xff] }
  0x51   : > { %5963 = vmatprep.mubr.msk.f32.mxu1 %vm590_vm0, %v501_v51  ;;  %5269 = vmatpush3.msra.mxu1 %v4607_v20  ;;  %v4605_v51 = vld [vmem:[%s7824_s1 + $0x90] sm:$0xff]  ;;  %v4662_v20 = vld [vmem:[%s7824_s1 + $0x258] sm:$0xff]  ;;  %v6804_v7 = vld [vmem:[#allocation2 + $0xe1] sm:$0xff] }
  0x52   : > { %5348 = vmatprep.subr.mxu0 %v4623_v22  ;;  %5964 = vmatprep.mubr.msk.f32.mxu0 %vm590_vm0, %v7850_v57  ;;  %v6747_v57 = vld [vmem:[#allocation2 + $0x91] sm:$0xff]  ;;  %v6801_v11 = vld [vmem:[#allocation2 + $0xd9] sm:$0xff]  ;;  %v4640_v6 = vld [vmem:[%s7824_s1 + $0x1a8] sm:$0xff] }
  0x53   : > { %5241 = vmatmul.mubr.f32.gmra.mxu1 %v7851_v60  ;;  %5270 = vmatprep.subr.mxu1 %v4606_v31  ;;  %v6750_v60 = vld [vmem:[#allocation2 + $0x99] sm:$0xff]  ;;  %v6819_v15 = vld [vmem:[#allocation2 + $0xf1] sm:$0xff] }
  0x54   : > { %5349 = vmatpush3.msra.mxu0 %v4623_v22  ;;  %5271 = vmatpush3.msra.mxu1 %v4606_v31  ;;  %v4645_v22 = vld [vmem:[%s7824_s1 + $0x1d0] sm:$0xff]  ;;  %v4651_v54 = vld [vmem:[%s7824_s1 + $0x200] sm:$0xff]  ;;  %v2062_v43 = vld [vmem:[#allocation2 + $0x18] sm:$0xff] }
  0x55   : > { %5217 = vmatmul.mubr.f32.gmra.mxu0 %v7852_v5  ;;  %5350 = vmatprep.subr.mxu0 %v4622_v4  ;;  %v4661_v31 = vld [vmem:[%s7824_s1 + $0x250] sm:$0xff]  ;;  %v6759_v5 = vld [vmem:[#allocation2 + $0x9a] sm:$0xff] }
  0x56   : > { %5272 = vmatprep.subr.mxu1 %v4605_v51  ;;  %5351 = vmatpush3.msra.mxu0 %v4622_v4  ;;  %v6753_v4 = vld [vmem:[#allocation2 + $0x92] sm:$0xff]  ;;  %v6843_v44 = vld [vmem:[#allocation2 + $0x10a] sm:$0xff] }
  0x57   : > { %5965 = vmatprep.mubr.msk.f32.mxu1 %vm590_vm0, %v7853_v32  ;;  %5273 = vmatpush3.msra.mxu1 %v4605_v51  ;;  %v4644_v51 = vld [vmem:[%s7824_s1 + $0x1c8] sm:$0xff]  ;;  %v6849_v25 = vld [vmem:[#allocation2 + $0x112] sm:$0xff] }
  0x58   : > { %5352 = vmatprep.subr.mxu0 %v4621_v17  ;;  %5966 = vmatprep.mubr.msk.f32.mxu0 %vm590_vm0, %v6398_v62  ;;  %v6765_v32 = vld [vmem:[#allocation2 + $0xa9] sm:$0xff] }
  0x59   : > { %5244 = vmatmul.mubr.f32.gmra.mxu1 %v505_v41  ;;  %5274 = vmatprep.subr.mxu1 %v4604_v12  ;;  %v1322_v41 = vld [vmem:[#allocation2 + $0x9] sm:$0xff] }
  0x5a   : > { %5353 = vmatpush3.msra.mxu0 %v4621_v17  ;;  %5275 = vmatpush3.msra.mxu1 %v4604_v12  ;;  %v4660_v17 = vld [vmem:[%s7824_s1 + $0x248] sm:$0xff]  ;;  %v6768_v12 = vld [vmem:[#allocation2 + $0xb1] sm:$0xff] }
  0x5b   : > { %5220 = vmatmul.mubr.f32.gmra.mxu0 %v6408_v30  ;;  %5354 = vmatprep.subr.mxu0 %v4620_v63 }
  0x5c   : > { %5276 = vmatprep.subr.mxu1 %v4603_v13  ;;  %5355 = vmatpush3.msra.mxu0 %v4620_v63  ;;  %v6771_v63 = vld [vmem:[#allocation2 + $0xaa] sm:$0xff] }
  0x5d   : > { %5277 = vmatpush3.msra.mxu1 %v4603_v13  ;;  %5278 = vmatprep.mubr.f32.mxu1 %v1321_v58  ;;  %v4643_v13 = vld [vmem:[%s7824_s1 + $0x1c0] sm:$0xff]  ;;  %v6777_v58 = vld [vmem:[#allocation2 + $0xb2] sm:$0xff] }
  0x5e   : > { %5356 = vmatprep.subr.mxu0 %v4619_v36  ;;  %5279 = vmatmul.mubr.f32.vlgmr.msra.gmra.mxu1 %v1322_v41  ;;  %v6783_v41 = vld [vmem:[#allocation2 + $0xc1] sm:$0xff] }
  0x5f   : > { %5357 = vmatpush3.msra.mxu0 %v4619_v36  ;;  %5358 = vmatprep.mubr.f32.mxu0 %v1691_v27  ;;  %v4659_v36 = vld [vmem:[%s7824_s1 + $0x240] sm:$0xff]  ;;  %v6786_v27 = vld [vmem:[#allocation2 + $0xc9] sm:$0xff] }
  0x60   : > { %5406 = vmatprep.subr.mxu1 %v4650_v28  ;;  %5359 = vmatmul.mubr.f32.vlgmr.msra.gmra.mxu0 %v1692_v38  ;;  %v4642_v38 = vld [vmem:[%s7824_s1 + $0x1b8] sm:$0xff] }
  0x61   : > { %5407 = vmatpush3.msra.mxu1 %v4650_v28  ;;  %5486 = vmatprep.subr.mxu0 %v4666_v39  ;;  %v6789_v28 = vld [vmem:[#allocation2 + $0xc2] sm:$0xff] }
  0x62   : > { %5281 = vmatprep.mubr.f32.mxu1 %v6654_v61  ;;  %5487 = vmatpush3.msra.mxu0 %v4666_v39  ;;  %v6795_v39 = vld [vmem:[#allocation2 + $0xca] sm:$0xff] }
  0x63   : > { %5282 = vmatmul.mubr.f32.gmra.mxu1 %v6658_v34  ;;  %5361 = vmatprep.mubr.f32.mxu0 %v1693_v9  ;;  %v6813_v9 = vld [vmem:[#allocation2 + $0xe2] sm:$0xff] }
  0x64   : > { %5408 = vmatprep.subr.mxu1 %v4649_v45  ;;  %5362 = vmatmul.mubr.f32.gmra.mxu0 %v1694_v19  ;;  %v6822_v19 = vld [vmem:[#allocation2 + $0xf9] sm:$0xff] }
  0x65   : > { %5409 = vmatpush3.msra.mxu1 %v4649_v45  ;;  %5488 = vmatprep.subr.mxu0 %v4665_v16  ;;  %v4657_v45 = vld [vmem:[%s7824_s1 + $0x230] sm:$0xff] }
  0x66   : > { %5284 = vmatprep.mubr.f32.mxu1 %v6678_v29  ;;  %5489 = vmatpush3.msra.mxu0 %v4665_v16  ;;  %v6825_v16 = vld [vmem:[#allocation2 + $0xf2] sm:$0xff] }
  0x67   : > { %5285 = vmatmul.mubr.f32.gmra.mxu1 %v6681_v40  ;;  %5364 = vmatprep.mubr.f32.mxu0 %v1695_v52  ;;  %v6831_v52 = vld [vmem:[#allocation2 + $0xfa] sm:$0xff] }
  0x68   : > { %5410 = vmatprep.subr.mxu1 %v4648_v0  ;;  %5365 = vmatmul.mubr.f32.gmra.mxu0 %v1696_v8  ;;  %v6840_v8 = vld [vmem:[#allocation2 + $0x111] sm:$0xff] }
  0x69   : > { %5411 = vmatpush3.msra.mxu1 %v4648_v0  ;;  %5490 = vmatprep.subr.mxu0 %v4664_v46  ;;  %v4656_v0 = vld [vmem:[%s7824_s1 + $0x228] sm:$0xff] }
  0x6a   : > { %5287 = vmatprep.mubr.f32.mxu1 %v6699_v55  ;;  %5491 = vmatpush3.msra.mxu0 %v4664_v46  ;;  %v4639_v46 = vld [vmem:[%s7824_s1 + $0x1a0] sm:$0xff] }
  0x6b   : > { %5288 = vmatmul.mubr.f32.gmra.mxu1 %v6703_v49  ;;  %5367 = vmatprep.mubr.f32.mxu0 %v1697_v35  ;;  %v4655_v35 = vld [vmem:[%s7824_s1 + $0x220] sm:$0xff] }
  0x6c   : > { %5412 = vmatprep.subr.mxu1 %v4647_v24  ;;  %5368 = vmatmul.mubr.f32.gmra.mxu0 %v1698_v48  ;;  %v6858_v48 = vld [vmem:[#allocation2 + $0x129] sm:$0xff] }
  0x6d   : > { %5413 = vmatpush3.msra.mxu1 %v4647_v24  ;;  %5492 = vmatprep.subr.mxu0 %v4663_v50  ;;  %v6855_v24 = vld [vmem:[#allocation2 + $0x121] sm:$0xff] }
  0x6e   : > { %5290 = vmatprep.mubr.f32.mxu1 %v6713_v47  ;;  %5493 = vmatpush3.msra.mxu0 %v4663_v50  ;;  %v6861_v50 = vld [vmem:[#allocation2 + $0x122] sm:$0xff] }
  0x6f   : > { %5291 = vmatmul.mubr.f32.gmra.mxu1 %v6715_v56  ;;  %5370 = vmatprep.mubr.f32.mxu0 %v6717_v2 }
  0x70   : > { %5414 = vmatprep.subr.mxu1 %v4646_v3  ;;  %5371 = vmatmul.mubr.f32.gmra.mxu0 %v6723_v37 }
  0x71   : > { %5415 = vmatpush3.msra.mxu1 %v4646_v3  ;;  %5494 = vmatprep.subr.mxu0 %v4662_v20  ;;  %v4638_v3 = vld [vmem:[%s7824_s1 + $0x198] sm:$0xff] }
  0x72   : > { %5293 = vmatprep.mubr.f32.mxu1 %v6729_v33  ;;  %5495 = vmatpush3.msra.mxu0 %v4662_v20  ;;  %v6867_v20 = vld [vmem:[#allocation2 + $0x12a] sm:$0xff] }
  0x73   : > { %5294 = vmatmul.mubr.f32.gmra.mxu1 %v6732_v21  ;;  %5373 = vmatprep.mubr.f32.mxu0 %v6735_v53 }
  0x74   : > { %5416 = vmatprep.subr.mxu1 %v4645_v22  ;;  %5374 = vmatmul.mubr.f32.gmra.mxu0 %v6741_v59 }
  0x75   : > { %5417 = vmatpush3.msra.mxu1 %v4645_v22  ;;  %5496 = vmatprep.subr.mxu0 %v4661_v31  ;;  %v4654_v22 = vld [vmem:[%s7824_s1 + $0x218] sm:$0xff] }
  0x76   : > { %5296 = vmatprep.mubr.f32.mxu1 %v6747_v57  ;;  %5497 = vmatpush3.msra.mxu0 %v4661_v31  ;;  %v6873_v31 = vld [vmem:[#allocation2 + $0x139] sm:$0xff] }
  0x77   : > { %5297 = vmatmul.mubr.f32.gmra.mxu1 %v6750_v60  ;;  %5376 = vmatprep.mubr.f32.mxu0 %v6753_v4 }
  0x78   : > { %5418 = vmatprep.subr.mxu1 %v4644_v51  ;;  %5377 = vmatmul.mubr.f32.gmra.mxu0 %v6759_v5 }
  0x79   : > { %5419 = vmatpush3.msra.mxu1 %v4644_v51  ;;  %5498 = vmatprep.subr.mxu0 %v4660_v17  ;;  %v6876_v51 = vld [vmem:[#allocation2 + $0x141] sm:$0xff] }
  0x7a   : > { %5299 = vmatprep.mubr.f32.mxu1 %v6765_v32  ;;  %5499 = vmatpush3.msra.mxu0 %v4660_v17  ;;  %v6879_v17 = vld [vmem:[#allocation2 + $0x13a] sm:$0xff] }
  0x7b   : > { %5300 = vmatmul.mubr.f32.gmra.mxu1 %v6768_v12  ;;  %5379 = vmatprep.mubr.f32.mxu0 %v6771_v63 }
  0x7c   : > { %5420 = vmatprep.subr.mxu1 %v4643_v13  ;;  %5380 = vmatmul.mubr.f32.gmra.mxu0 %v6777_v58 }
  0x7d   : > { %5421 = vmatpush3.msra.mxu1 %v4643_v13  ;;  %5500 = vmatprep.subr.mxu0 %v4659_v36  ;;  %v4637_v13 = vld [vmem:[%s7824_s1 + $0x190] sm:$0xff] }
  0x7e   : > { %5302 = vmatprep.mubr.f32.mxu1 %v6783_v41  ;;  %5501 = vmatpush3.msra.mxu0 %v4659_v36  ;;  %v6885_v36 = vld [vmem:[#allocation2 + $0x142] sm:$0xff] }
  0x7f   : > { %5303 = vmatmul.mubr.f32.gmra.mxu1 %v6786_v27  ;;  %5382 = vmatprep.mubr.f32.mxu0 %v6789_v28 }
  0x80   : > { %5422 = vmatprep.subr.mxu1 %v4642_v38  ;;  %5383 = vmatmul.mubr.f32.gmra.mxu0 %v6795_v39 }
  0x81   : > { %5423 = vmatpush3.msra.mxu1 %v4642_v38  ;;  %5502 = vmatprep.subr.mxu0 %v4658_v14  ;;  %v4653_v38 = vld [vmem:[%s7824_s1 + $0x210] sm:$0xff] }
  0x82   : > { %5305 = vmatprep.mubr.f32.mxu1 %v6801_v11  ;;  %5503 = vmatpush3.msra.mxu0 %v4658_v14  ;;  %v6891_v14 = vld [vmem:[#allocation2 + $0x151] sm:$0xff] }
  0x83   : > { %5306 = vmatmul.mubr.f32.gmra.mxu1 %v6804_v7  ;;  %5385 = vmatprep.mubr.f32.mxu0 %v6807_v18 }
  0x84   : > { %5424 = vmatprep.subr.mxu1 %v4641_v1  ;;  %5386 = vmatmul.mubr.f32.gmra.mxu0 %v6813_v9 }
  0x85   : > { %5425 = vmatpush3.msra.mxu1 %v4641_v1  ;;  %5504 = vmatprep.subr.mxu0 %v4657_v45  ;;  %v6894_v1 = vld [vmem:[#allocation2 + $0x159] sm:$0xff] }
  0x86   : > { %5308 = vmatprep.mubr.f32.mxu1 %v6819_v15  ;;  %5505 = vmatpush3.msra.mxu0 %v4657_v45  ;;  %v6897_v45 = vld [vmem:[#allocation2 + $0x152] sm:$0xff] }
  0x87   : > { %5309 = vmatmul.mubr.f32.gmra.mxu1 %v6822_v19  ;;  %5388 = vmatprep.mubr.f32.mxu0 %v6825_v16  ;;  %7854 = vst [vmem:[#allocation4_spill] sm:$0xff] %v6897_v45 }
  0x88   : > { %5426 = vmatprep.subr.mxu1 %v4640_v6  ;;  %5389 = vmatmul.mubr.f32.gmra.mxu0 %v6831_v52 }
  0x89   : > { %5427 = vmatpush3.msra.mxu1 %v4640_v6  ;;  %5506 = vmatprep.subr.mxu0 %v4656_v0  ;;  %v4636_v6 = vld [vmem:[%s7824_s1 + $0x188] sm:$0xff] }
  0x8a   : > { %5311 = vmatprep.mubr.f32.mxu1 %v6837_v23  ;;  %5507 = vmatpush3.msra.mxu0 %v4656_v0  ;;  %v6903_v0 = vld [vmem:[#allocation2 + $0x15a] sm:$0xff] }
  0x8b   : > { %5312 = vmatmul.mubr.f32.gmra.mxu1 %v6840_v8  ;;  %5391 = vmatprep.mubr.f32.mxu0 %v6843_v44  ;;  %7855 = vst [vmem:[#allocation5_spill] sm:$0xff] %v6903_v0 }
  0x8c   : > { %5428 = vmatprep.subr.mxu1 %v4639_v46  ;;  %5392 = vmatmul.mubr.f32.gmra.mxu0 %v6849_v25 }
  0x8d   : > { %5429 = vmatpush3.msra.mxu1 %v4639_v46  ;;  %5508 = vmatprep.subr.mxu0 %v4655_v35  ;;  %v4652_v46 = vld [vmem:[%s7824_s1 + $0x208] sm:$0xff] }
  0x8e   : > { %5314 = vmatprep.mubr.f32.mxu1 %v6855_v24  ;;  %5509 = vmatpush3.msra.mxu0 %v4655_v35  ;;  %v6909_v35 = vld [vmem:[#allocation2 + $0x169] sm:$0xff] }
  0x8f   : > { %5315 = vmatmul.mubr.f32.gmra.mxu1 %v6858_v48  ;;  %5394 = vmatprep.mubr.f32.mxu0 %v6861_v50 }
  0x90   : > { %5430 = vmatprep.subr.mxu1 %v4638_v3  ;;  %5395 = vmatmul.mubr.f32.gmra.mxu0 %v6867_v20 }
  0x91   : > { %5431 = vmatpush3.msra.mxu1 %v4638_v3  ;;  %5510 = vmatprep.subr.mxu0 %v4654_v22  ;;  %v6912_v3 = vld [vmem:[#allocation2 + $0x171] sm:$0xff] }
  0x92   : > { %5317 = vmatprep.mubr.f32.mxu1 %v6873_v31  ;;  %5511 = vmatpush3.msra.mxu0 %v4654_v22  ;;  %v6915_v22 = vld [vmem:[#allocation2 + $0x16a] sm:$0xff] }
  0x93   : > { %5318 = vmatmul.mubr.f32.gmra.mxu1 %v6876_v51  ;;  %5397 = vmatprep.mubr.f32.mxu0 %v6879_v17  ;;  %7856 = vst [vmem:[#allocation6_spill] sm:$0xff] %v6915_v22 }
  0x94   : > { %5432 = vmatprep.subr.mxu1 %v4637_v13  ;;  %5398 = vmatmul.mubr.f32.gmra.mxu0 %v6885_v36 }
  0x95   : > { %5433 = vmatpush3.msra.mxu1 %v4637_v13  ;;  %5512 = vmatprep.subr.mxu0 %v4653_v38  ;;  %v4635_v13 = vld [vmem:[%s7824_s1 + $0x180] sm:$0xff] }
  0x96   : > { %5320 = vmatprep.mubr.f32.mxu1 %v6891_v14  ;;  %5513 = vmatpush3.msra.mxu0 %v4653_v38  ;;  %v6921_v38 = vld [vmem:[#allocation2 + $0x172] sm:$0xff] }
  0x97   : > { %5321 = vmatmul.mubr.f32.gmra.mxu1 %v6894_v1  ;;  %5400 = vmatprep.mubr.f32.mxu0 %v6897_v45  ;;  %v6935_v45 = vld [vmem:[#allocation2 + $0x30] sm:$0xff] }
  0x98   : > { %5434 = vmatprep.subr.mxu1 %v4636_v6  ;;  %5401 = vmatmul.mubr.f32.gmra.mxu0 %v6903_v0  ;;  %v4682_v0 = vld [vmem:[%s7824_s1 + $0x2f8] sm:$0xff] }
  0x99   : > { %5435 = vmatpush3.msra.mxu1 %v4636_v6  ;;  %5514 = vmatprep.subr.mxu0 %v4652_v46  ;;  %v2063_v6 = vld [vmem:[#allocation2 + $0x20] sm:$0xff] }
  0x9a   : > { %5323 = vmatprep.mubr.f32.mxu1 %v6909_v35  ;;  %5515 = vmatpush3.msra.mxu0 %v4652_v46  ;;  %v4698_v46 = vld [vmem:[%s7824_s1 + $0x378] sm:$0xff] }
  0x9b   : > { %5324 = vmatmul.mubr.f32.gmra.mxu1 %v6912_v3  ;;  %5403 = vmatprep.mubr.f32.mxu0 %v6915_v22  ;;  %v6938_v22 = vld [vmem:[#allocation2 + $0x38] sm:$0xff] }
  0x9c   : > { %5436 = vmatprep.subr.mxu1 %v4635_v13  ;;  %5404 = vmatmul.mubr.f32.gmra.mxu0 %v6921_v38 }
  0x9d   : > { %5437 = vmatpush3.msra.mxu1 %v4635_v13  ;;  %5516 = vmatprep.subr.mxu0 %v4651_v54  ;;  %v6963_v13 = vld [vmem:[#allocation2 + $0x60] sm:$0xff] }
  0x9e   : > { %5438 = vmatprep.mubr.f32.mxu1 %v2062_v43  ;;  %5517 = vmatpush3.msra.mxu0 %v4651_v54  ;;  %v4681_v43 = vld [vmem:[%s7824_s1 + $0x2f0] sm:$0xff]  ;;  %v6949_v54 = vld [vmem:[#allocation2 + $0x48] sm:$0xff] }
  0x9f   : > { %5439 = vmatmul.mubr.f32.vlgmr.msra.gmra.mxu1 %v2063_v6  ;;  %5518 = vmatprep.mubr.f32.mxu0 %v6654_v61  ;;  %v4697_v61 = vld [vmem:[%s7824_s1 + $0x370] sm:$0xff]  ;;  %v5944_v6 = vld [vmem:[#allocation2 + $0x68] sm:$0xff] }
  0xa0   : > { %5566 = vmatprep.subr.mxu1 %v4682_v0  ;;  %5519 = vmatmul.mubr.f32.vlgmr.msra.gmra.mxu0 %v6658_v34  ;;  %v6952_v34 = vld [vmem:[#allocation2 + $0x50] sm:$0xff] }
  0xa1   : > { %5567 = vmatpush3.msra.mxu1 %v4682_v0  ;;  %5646 = vmatprep.subr.mxu0 %v4698_v46  ;;  %v4680_v0 = vld [vmem:[%s7824_s1 + $0x2e8] sm:$0xff] }
  0xa2   : > { %5441 = vmatprep.mubr.f32.mxu1 %v6935_v45  ;;  %5647 = vmatpush3.msra.mxu0 %v4698_v46  ;;  %v4695_v46 = vld [vmem:[%s7824_s1 + $0x360] sm:$0xff] }
  0xa3   : > { %5442 = vmatmul.mubr.f32.gmra.mxu1 %v6938_v22  ;;  %5521 = vmatprep.mubr.f32.mxu0 %v6678_v29  ;;  %v4696_v29 = vld [vmem:[%s7824_s1 + $0x368] sm:$0xff] }
  0xa4   : > { %5568 = vmatprep.subr.mxu1 %v4681_v43  ;;  %5522 = vmatmul.mubr.f32.gmra.mxu0 %v6681_v40  ;;  %v4679_v40 = vld [vmem:[%s7824_s1 + $0x2e0] sm:$0xff] }
  0xa5   : > { %5569 = vmatpush3.msra.mxu1 %v4681_v43  ;;  %5648 = vmatprep.subr.mxu0 %v4697_v61  ;;  %v5946_v43 = vld [vmem:[#allocation2 + $0x80] sm:$0xff] }
  0xa6   : > { %5444 = vmatprep.mubr.f32.mxu1 %v6949_v54  ;;  %5649 = vmatpush3.msra.mxu0 %v4697_v61  ;;  %v4694_v61 = vld [vmem:[%s7824_s1 + $0x358] sm:$0xff] }
  0xa7   : > { %5445 = vmatmul.mubr.f32.gmra.mxu1 %v6952_v34  ;;  %5524 = vmatprep.mubr.f32.mxu0 %v6699_v55  ;;  %v4678_v55 = vld [vmem:[%s7824_s1 + $0x2d8] sm:$0xff] }
  0xa8   : > { %5570 = vmatprep.subr.mxu1 %v4680_v0  ;;  %5525 = vmatmul.mubr.f32.gmra.mxu0 %v6703_v49  ;;  %v5945_v49 = vld [vmem:[#allocation2 + $0x78] sm:$0xff] }
  0xa9   : > { %5571 = vmatpush3.msra.mxu1 %v4680_v0  ;;  %5650 = vmatprep.subr.mxu0 %v4696_v29  ;;  %v5948_v0 = vld [vmem:[#allocation2 + $0x98] sm:$0xff] }
  0xaa   : > { %5447 = vmatprep.mubr.f32.mxu1 %v6963_v13  ;;  %5651 = vmatpush3.msra.mxu0 %v4696_v29  ;;  %v4693_v29 = vld [vmem:[%s7824_s1 + $0x350] sm:$0xff] }
  0xab   : > { %5448 = vmatmul.mubr.f32.gmra.mxu1 %v5944_v6  ;;  %5527 = vmatprep.mubr.f32.mxu0 %v6713_v47  ;;  %v4677_v47 = vld [vmem:[%s7824_s1 + $0x2d0] sm:$0xff] }
  0xac   : > { %5572 = vmatprep.subr.mxu1 %v4679_v40  ;;  %5528 = vmatmul.mubr.f32.gmra.mxu0 %v6715_v56  ;;  %v5947_v56 = vld [vmem:[#allocation2 + $0x90] sm:$0xff] }
  0xad   : > { %5573 = vmatpush3.msra.mxu1 %v4679_v40  ;;  %5652 = vmatprep.subr.mxu0 %v4695_v46  ;;  %v4674_v40 = vld [vmem:[%s7824_s1 + $0x2b8] sm:$0xff]  ;;  %v7030_v6 = vld [vmem:[#allocation2 + $0xf0] sm:$0xff] }
  0xae   : > { %5450 = vmatprep.mubr.f32.mxu1 %v5945_v49  ;;  %5653 = vmatpush3.msra.mxu0 %v4695_v46  ;;  %v4673_v46 = vld [vmem:[%s7824_s1 + $0x2b0] sm:$0xff]  ;;  %v4672_v49 = vld [vmem:[%s7824_s1 + $0x2a8] sm:$0xff] }
  0xaf   : > { %5451 = vmatmul.mubr.f32.gmra.mxu1 %v5946_v43  ;;  %5530 = vmatprep.mubr.f32.mxu0 %v6729_v33  ;;  %v4676_v33 = vld [vmem:[%s7824_s1 + $0x2c8] sm:$0xff]  ;;  %v7058_v43 = vld [vmem:[#allocation2 + $0x120] sm:$0xff] }
  0xb0   : > { %5574 = vmatprep.subr.mxu1 %v4678_v55  ;;  %5531 = vmatmul.mubr.f32.gmra.mxu0 %v6732_v21  ;;  %v4692_v21 = vld [vmem:[%s7824_s1 + $0x348] sm:$0xff] }
  0xb1   : > { %5575 = vmatpush3.msra.mxu1 %v4678_v55  ;;  %5654 = vmatprep.subr.mxu0 %v4694_v61  ;;  %v7044_v55 = vld [vmem:[#allocation2 + $0x108] sm:$0xff] }
  0xb2   : > { %5453 = vmatprep.mubr.f32.mxu1 %v5947_v56  ;;  %5655 = vmatpush3.msra.mxu0 %v4694_v61  ;;  %v4671_v61 = vld [vmem:[%s7824_s1 + $0x2a0] sm:$0xff]  ;;  %v4670_v56 = vld [vmem:[%s7824_s1 + $0x298] sm:$0xff] }
  0xb3   : > { %5454 = vmatmul.mubr.f32.gmra.mxu1 %v5948_v0  ;;  %5533 = vmatprep.mubr.f32.mxu0 %v6747_v57  ;;  %v7002_v57 = vld [vmem:[#allocation2 + $0xc0] sm:$0xff]  ;;  %v7086_v0 = vld [vmem:[#allocation2 + $0x150] sm:$0xff] }
  0xb4   : > { %5576 = vmatprep.subr.mxu1 %v4677_v47  ;;  %5534 = vmatmul.mubr.f32.gmra.mxu0 %v6750_v60  ;;  %v7005_v60 = vld [vmem:[#allocation2 + $0xc8] sm:$0xff] }
  0xb5   : > { %5577 = vmatpush3.msra.mxu1 %v4677_v47  ;;  %5656 = vmatprep.subr.mxu0 %v4693_v29  ;;  %v7072_v47 = vld [vmem:[#allocation2 + $0x138] sm:$0xff] }
  0xb6   : > { %5967 = vmatprep.mubr.msk.f32.mxu1 %vm590_vm0, %v6398_v62  ;;  %5657 = vmatpush3.msra.mxu0 %v4693_v29  ;;  %v4675_v62 = vld [vmem:[%s7824_s1 + $0x2c0] sm:$0xff]  ;;  %v4669_v29 = vld [vmem:[%s7824_s1 + $0x290] sm:$0xff] }
  0xb7   : > { %5457 = vmatmul.mubr.f32.gmra.mxu1 %v6408_v30  ;;  %5536 = vmatprep.mubr.f32.mxu0 %v6765_v32  ;;  %v4691_v30 = vld [vmem:[%s7824_s1 + $0x340] sm:$0xff]  ;;  %v7016_v32 = vld [vmem:[#allocation2 + $0xd8] sm:$0xff] }
  0xb8   : > { %5578 = vmatprep.subr.mxu1 %v4676_v33  ;;  %5537 = vmatmul.mubr.f32.gmra.mxu0 %v6768_v12  ;;  %v7019_v12 = vld [vmem:[#allocation2 + $0xe0] sm:$0xff] }
  0xb9   : > { %5579 = vmatpush3.msra.mxu1 %v4676_v33  ;;  %5658 = vmatprep.subr.mxu0 %v4692_v21  ;;  %v7100_v33 = vld [vmem:[#allocation2 + $0x168] sm:$0xff] }
  0xba   : > { %5459 = vmatprep.mubr.f32.mxu1 %v7002_v57  ;;  %5659 = vmatpush3.msra.mxu0 %v4692_v21  ;;  %v4668_v21 = vld [vmem:[%s7824_s1 + $0x288] sm:$0xff] }
  0xbb   : > { %5460 = vmatmul.mubr.f32.gmra.mxu1 %v7005_v60  ;;  %5539 = vmatprep.mubr.f32.mxu0 %v6783_v41  ;;  %v4690_v41 = vld [vmem:[%s7824_s1 + $0x338] sm:$0xff] }
  0xbc   : > { %5580 = vmatprep.subr.mxu1 %v4675_v62  ;;  %5540 = vmatmul.mubr.f32.gmra.mxu0 %v6786_v27  ;;  %v7033_v27 = vld [vmem:[#allocation2 + $0xf8] sm:$0xff] }
  0xbd   : > { %5581 = vmatpush3.msra.mxu1 %v4675_v62  ;;  %5660 = vmatprep.subr.mxu0 %v4691_v30  ;;  %v4667_v62 = vld [vmem:[%s7824_s1 + $0x280] sm:$0xff] }
  0xbe   : > { %5462 = vmatprep.mubr.f32.mxu1 %v7016_v32  ;;  %5661 = vmatpush3.msra.mxu0 %v4691_v30  ;;  %v7857_v30 = vmax.f32 %v6669_v26, 0.0  ;;  %v4730_v26 = vld [vmem:[%s7824_s1 + $0x478] sm:$0xff] }
  0xbf   : > { %5463 = vmatmul.mubr.f32.gmra.mxu1 %v7019_v12  ;;  %5542 = vmatprep.mubr.f32.mxu0 %v6801_v11  ;;  %v4689_v11 = vld [vmem:[%s7824_s1 + $0x330] sm:$0xff] }
  0xc0   : > { %5582 = vmatprep.subr.mxu1 %v4674_v40  ;;  %5543 = vmatmul.mubr.f32.gmra.mxu0 %v6804_v7  ;;  %v7047_v7 = vld [vmem:[#allocation2 + $0x110] sm:$0xff] }
  0xc1   : > { %5583 = vmatpush3.msra.mxu1 %v4674_v40  ;;  %5662 = vmatprep.subr.mxu0 %v4690_v41  ;;  %v7125_v40 = vld [vmem:[#allocation2 + $0x189] sm:$0xff] }
  0xc2   : > { %5465 = vmatprep.mubr.f32.mxu1 %v7030_v6  ;;  %5663 = vmatpush3.msra.mxu0 %v4690_v41  ;;  %v2802_v41 = vld [vmem:[#allocation2 + $0x1a] sm:$0xff] }
  0xc3   : > { %5466 = vmatmul.mubr.f32.gmra.mxu1 %v7033_v27  ;;  %5545 = vmatprep.mubr.f32.mxu0 %v6819_v15  ;;  %v4688_v15 = vld [vmem:[%s7824_s1 + $0x328] sm:$0xff] }
  0xc4   : > { %5584 = vmatprep.subr.mxu1 %v4673_v46  ;;  %5546 = vmatmul.mubr.f32.gmra.mxu0 %v6822_v19  ;;  %v7061_v19 = vld [vmem:[#allocation2 + $0x128] sm:$0xff] }
  0xc5   : > { %5585 = vmatpush3.msra.mxu1 %v4673_v46  ;;  %5664 = vmatprep.subr.mxu0 %v4689_v11  ;;  %v2803_v46 = vld [vmem:[#allocation2 + $0x22] sm:$0xff] }
  0xc6   : > { %5468 = vmatprep.mubr.f32.mxu1 %v7044_v55  ;;  %5665 = vmatpush3.msra.mxu0 %v4689_v11  ;;  %v7143_v11 = vld [vmem:[#allocation2 + $0x3a] sm:$0xff] }
  0xc7   : > { %5469 = vmatmul.mubr.f32.gmra.mxu1 %v7047_v7  ;;  %5548 = vmatprep.mubr.f32.mxu0 %v6837_v23  ;;  %v4687_v23 = vld [vmem:[%s7824_s1 + $0x320] sm:$0xff] }
  0xc8   : > { %5586 = vmatprep.subr.mxu1 %v4672_v49  ;;  %5549 = vmatmul.mubr.f32.gmra.mxu0 %v6840_v8  ;;  %v7075_v8 = vld [vmem:[#allocation2 + $0x140] sm:$0xff] }
  0xc9   : > { %5587 = vmatpush3.msra.mxu1 %v4672_v49  ;;  %5666 = vmatprep.subr.mxu0 %v4688_v15  ;;  %v4713_v49 = vld [vmem:[%s7824_s1 + $0x3f0] sm:$0xff] }
  0xca   : > { %5471 = vmatprep.mubr.f32.mxu1 %v7058_v43  ;;  %5667 = vmatpush3.msra.mxu0 %v4688_v15  ;;  %v7154_v15 = vld [vmem:[#allocation2 + $0x4a] sm:$0xff] }
  0xcb   : > { %5472 = vmatmul.mubr.f32.gmra.mxu1 %v7061_v19  ;;  %5551 = vmatprep.mubr.f32.mxu0 %v6855_v24  ;;  %v4686_v24 = vld [vmem:[%s7824_s1 + $0x318] sm:$0xff] }
  0xcc   : > { %5588 = vmatprep.subr.mxu1 %v4671_v61  ;;  %5552 = vmatmul.mubr.f32.gmra.mxu0 %v6858_v48  ;;  %v7089_v48 = vld [vmem:[#allocation2 + $0x158] sm:$0xff] }
  0xcd   : > { %5589 = vmatpush3.msra.mxu1 %v4671_v61  ;;  %5668 = vmatprep.subr.mxu0 %v4687_v23  ;;  %v4712_v61 = vld [vmem:[%s7824_s1 + $0x3e8] sm:$0xff] }
  0xce   : > { %5474 = vmatprep.mubr.f32.mxu1 %v7072_v47  ;;  %5669 = vmatpush3.msra.mxu0 %v4687_v23  ;;  %v3178_v23 = vld [vmem:[#allocation2 + $0x68] sm:$0xff] }
  0xcf   : > { %5475 = vmatmul.mubr.f32.gmra.mxu1 %v7075_v8  ;;  %5554 = vmatprep.mubr.f32.mxu0 %v6873_v31  ;;  %v4685_v31 = vld [vmem:[%s7824_s1 + $0x310] sm:$0xff] }
  0xd0   : > { %5590 = vmatprep.subr.mxu1 %v4670_v56  ;;  %5555 = vmatmul.mubr.f32.gmra.mxu0 %v6876_v51  ;;  %v7103_v51 = vld [vmem:[#allocation2 + $0x170] sm:$0xff] }
  0xd1   : > { %5591 = vmatpush3.msra.mxu1 %v4670_v56  ;;  %5670 = vmatprep.subr.mxu0 %v4686_v24  ;;  %v4711_v56 = vld [vmem:[%s7824_s1 + $0x3e0] sm:$0xff] }
  0xd2   : > { %5477 = vmatprep.mubr.f32.mxu1 %v7086_v0  ;;  %5671 = vmatpush3.msra.mxu0 %v4686_v24  ;;  %v3180_v24 = vld [vmem:[#allocation2 + $0x80] sm:$0xff] }
  0xd3   : > { %5478 = vmatmul.mubr.f32.gmra.mxu1 %v7089_v48  ;;  %5557 = vmatprep.mubr.f32.mxu0 %v6891_v14  ;;  %v4684_v14 = vld [vmem:[%s7824_s1 + $0x308] sm:$0xff] }
  0xd4   : > { %5592 = vmatprep.subr.mxu1 %v4669_v29  ;;  %5558 = vmatmul.mubr.f32.gmra.mxu0 %v6894_v1  ;;  %v7116_v1 = vld [vmem:[#allocation2 + $0x181] sm:$0xff] }
  0xd5   : > { %5593 = vmatpush3.msra.mxu1 %v4669_v29  ;;  %5672 = vmatprep.subr.mxu0 %v4685_v31  ;;  %v4727_v29 = vld [vmem:[%s7824_s1 + $0x460] sm:$0xff] }
  0xd6   : > { %5480 = vmatprep.mubr.f32.mxu1 %v7100_v33  ;;  %5673 = vmatpush3.msra.mxu0 %v4685_v31  ;;  %v4710_v31 = vld [vmem:[%s7824_s1 + $0x3d8] sm:$0xff] }
  0xd7   : > { %5481 = vmatmul.mubr.f32.gmra.mxu1 %v7103_v51  ;;  %5560 = vmatprep.mubr.f32.mxu0 %v6909_v35  ;;  %v7858_v35 = vmax.f32 %v6672_v42, 0.0  ;;  %v7140_v42 = vld [vmem:[#allocation2 + $0x32] sm:$0xff] }
  0xd8   : > { %5594 = vmatprep.subr.mxu1 %v4668_v21  ;;  %5561 = vmatmul.mubr.f32.gmra.mxu0 %v6912_v3  ;;  %v4683_v3 = vld [vmem:[%s7824_s1 + $0x300] sm:$0xff] }
  0xd9   : > { %5595 = vmatpush3.msra.mxu1 %v4668_v21  ;;  %5674 = vmatprep.subr.mxu0 %v4684_v14 }
  0xda   : > { %5968 = vmatprep.mubr.msk.f32.mxu1 %vm590_vm0, %v7857_v30  ;;  %5675 = vmatpush3.msra.mxu0 %v4684_v14  ;;  %v3183_v14 = vld [vmem:[#allocation2 + $0xa8] sm:$0xff] }
  0xdb   : > { %5484 = vmatmul.mubr.f32.gmra.mxu1 %v7858_v35  ;;  %5563 = vmatprep.mubr.f32.mxu0 %v7116_v1  ;;  %v4725_v35 = vld [vmem:[%s7824_s1 + $0x450] sm:$0xff] }
  0xdc   : > { %5596 = vmatprep.subr.mxu1 %v4667_v62  ;;  %5564 = vmatmul.mubr.f32.gmra.mxu0 %v7125_v40 }
  0xdd   : > { %5597 = vmatpush3.msra.mxu1 %v4667_v62  ;;  %5676 = vmatprep.subr.mxu0 %v4683_v3  ;;  %v4709_v62 = vld [vmem:[%s7824_s1 + $0x3d0] sm:$0xff] }
  0xde   : > { %5598 = vmatprep.mubr.f32.mxu1 %v2802_v41  ;;  %5677 = vmatpush3.msra.mxu0 %v4683_v3 }
  0xdf   : > { %5599 = vmatmul.mubr.f32.vlgmr.msra.gmra.mxu1 %v2803_v46  ;;  %5678 = vmatprep.mubr.f32.mxu0 %v6935_v45  ;;  %v4729_v45 = vld [vmem:[%s7824_s1 + $0x470] sm:$0xff] }
  0xe0   : > { %5726 = vmatprep.subr.mxu1 %v4714_v10  ;;  %5679 = vmatmul.mubr.f32.vlgmr.msra.gmra.mxu0 %v6938_v22  ;;  %v7157_v22 = vld [vmem:[#allocation2 + $0x52] sm:$0xff] }
  0xe1   : > { %5727 = vmatpush3.msra.mxu1 %v4714_v10  ;;  %5806 = vmatprep.subr.mxu0 %v4730_v26 }
  0xe2   : > { %5601 = vmatprep.mubr.f32.mxu1 %v7140_v42  ;;  %5807 = vmatpush3.msra.mxu0 %v4730_v26 }
  0xe3   : > { %5602 = vmatmul.mubr.f32.gmra.mxu1 %v7143_v11  ;;  %5681 = vmatprep.mubr.f32.mxu0 %v6949_v54  ;;  %v4728_v54 = vld [vmem:[%s7824_s1 + $0x468] sm:$0xff] }
  0xe4   : > { %5728 = vmatprep.subr.mxu1 %v4713_v49  ;;  %5682 = vmatmul.mubr.f32.gmra.mxu0 %v6952_v34  ;;  %v3179_v34 = vld [vmem:[#allocation2 + $0x78] sm:$0xff] }
  0xe5   : > { %5729 = vmatpush3.msra.mxu1 %v4713_v49  ;;  %5808 = vmatprep.subr.mxu0 %v4729_v45 }
  0xe6   : > { %5604 = vmatprep.mubr.f32.mxu1 %v7154_v15  ;;  %5809 = vmatpush3.msra.mxu0 %v4729_v45 }
  0xe7   : > { %5605 = vmatmul.mubr.f32.gmra.mxu1 %v7157_v22  ;;  %5684 = vmatprep.mubr.f32.mxu0 %v6963_v13  ;;  %v3181_v13 = vld [vmem:[#allocation2 + $0x90] sm:$0xff] }
  0xe8   : > { %5730 = vmatprep.subr.mxu1 %v4712_v61  ;;  %5685 = vmatmul.mubr.f32.gmra.mxu0 %v3178_v23 }
  0xe9   : > { %5731 = vmatpush3.msra.mxu1 %v4712_v61  ;;  %5810 = vmatprep.subr.mxu0 %v4728_v54 }
  0xea   : > { %5607 = vmatprep.mubr.f32.mxu1 %v6717_v2  ;;  %5811 = vmatpush3.msra.mxu0 %v4728_v54  ;;  %v3182_v2 = vld [vmem:[#allocation2 + $0x98] sm:$0xff] }
  0xeb   : > { %5608 = vmatmul.mubr.f32.gmra.mxu1 %v6723_v37  ;;  %5687 = vmatprep.mubr.f32.mxu0 %v3179_v34  ;;  %v4726_v37 = vld [vmem:[%s7824_s1 + $0x458] sm:$0xff] }
  0xec   : > { %5732 = vmatprep.subr.mxu1 %v4711_v56  ;;  %5688 = vmatmul.mubr.f32.gmra.mxu0 %v3180_v24  ;;  %v7860_v54 = vld [vmem:[#allocation5_spill] sm:$0xff] }
  0xed   : > { %5733 = vmatpush3.msra.mxu1 %v4711_v56  ;;  %5812 = vmatprep.subr.mxu0 %v4727_v29 }
  0xee   : > { %5610 = vmatprep.mubr.f32.mxu1 %v6735_v53  ;;  %5813 = vmatpush3.msra.mxu0 %v4727_v29  ;;  %v7861_v29 = vld [vmem:[#allocation6_spill] sm:$0xff] }
  0xef   : > { %5611 = vmatmul.mubr.f32.gmra.mxu1 %v6741_v59  ;;  %5690 = vmatprep.mubr.f32.mxu0 %v3181_v13  ;;  %v7185_v21 = vpop.f32.mrf.mxu1  ;;  %v3184_v59 = vld [vmem:[#allocation2 + $0xb0] sm:$0xff]  ;;  %v7337_v13 = vld [vmem:[#allocation2 + $0x182] sm:$0xff] }
  0xf0   : > { %5734 = vmatprep.subr.mxu1 %v4710_v31  ;;  %5691 = vmatmul.mubr.f32.gmra.mxu0 %v3182_v2  ;;  %v7190_v53 = vpop.f32.mrf.mxu0  ;;  %v7339_v2 = vld [vmem:[#allocation2 + $0x18a] sm:$0xff] }
  0xf1   : > { %5735 = vmatpush3.msra.mxu1 %v4710_v31  ;;  %5814 = vmatprep.subr.mxu0 %v4726_v37  ;;  %v7193_v30 = vpop.f32.mrf.mxu1  ;;  %v5949_v31 = vld [vmem:[#allocation2 + $0x180] sm:$0xff] }
  0xf2   : > { %5613 = vmatprep.mubr.f32.mxu1 %v6753_v4  ;;  %5815 = vmatpush3.msra.mxu0 %v4726_v37  ;;  %v7199_v3 = vpop.f32.mrf.mxu0  ;;  %v4708_v4 = vld [vmem:[%s7824_s1 + $0x3c8] sm:$0xff] }
  0xf3   : > { %5614 = vmatmul.mubr.f32.gmra.mxu1 %v6759_v5  ;;  %5693 = vmatprep.mubr.f32.mxu0 %v3183_v14  ;;  %v4724_v5 = vld [vmem:[%s7824_s1 + $0x448] sm:$0xff] }
  0xf4   : > { %5736 = vmatprep.subr.mxu1 %v4709_v62  ;;  %5694 = vmatmul.mubr.f32.gmra.mxu0 %v3184_v59  ;;  %v5950_v37 = vld [vmem:[#allocation2 + $0x188] sm:$0xff] }
  0xf5   : > { %5737 = vmatpush3.msra.mxu1 %v4709_v62  ;;  %v7204_v41 = vpop.f32.mrf.mxu1  ;;  %5816 = vmatprep.subr.mxu0 %v4725_v35 }
  0xf6   : > { %5616 = vmatprep.mubr.f32.mxu1 %v6771_v63  ;;  %5817 = vmatpush3.msra.mxu0 %v4725_v35  ;;  %v4707_v63 = vld [vmem:[%s7824_s1 + $0x3c0] sm:$0xff] }
  0xf7   : > { %5617 = vmatmul.mubr.f32.gmra.mxu1 %v6777_v58  ;;  %v7211_v46 = vpop.f32.mrf.mxu0  ;;  %v7213_v10 = vpop.f32.mrf.mxu1  ;;  %5696 = vmatprep.mubr.f32.mxu0 %v7002_v57  ;;  %v4723_v58 = vld [vmem:[%s7824_s1 + $0x440] sm:$0xff] }
  0xf8   : > { %5738 = vmatprep.subr.mxu1 %v4708_v4  ;;  %5697 = vmatmul.mubr.f32.gmra.mxu0 %v7005_v60  ;;  %v4706_v60 = vld [vmem:[%s7824_s1 + $0x3b8] sm:$0xff]  ;;  %v4715_v35 = vld [vmem:[%s7824_s1 + $0x400] sm:$0xff] }
  0xf9   : > { %5739 = vmatpush3.msra.mxu1 %v4708_v4  ;;  %v7220_v26 = vpop.f32.mrf.mxu0  ;;  %5818 = vmatprep.subr.mxu0 %v4724_v5  ;;  %v3543_v4 = vld [vmem:[#allocation2 + $0x31] sm:$0xff] }
  0xfa   : > { %5619 = vmatprep.mubr.f32.mxu1 %v6789_v28  ;;  %5819 = vmatpush3.msra.mxu0 %v4724_v5  ;;  %v5951_v5 = vld [vmem:[#allocation2] sm:$0xff] }
  0xfb   : > { %5620 = vmatmul.mubr.f32.gmra.mxu1 %v6795_v39  ;;  %v7227_v57 = vpop.f32.mrf.mxu1  ;;  %5699 = vmatprep.mubr.f32.mxu0 %v7016_v32  ;;  %v4722_v39 = vld [vmem:[%s7824_s1 + $0x438] sm:$0xff] }
  0xfc   : > { %5740 = vmatprep.subr.mxu1 %v4707_v63  ;;  %5700 = vmatmul.mubr.f32.gmra.mxu0 %v7019_v12  ;;  %v4705_v12 = vld [vmem:[%s7824_s1 + $0x3b0] sm:$0xff] }
  0xfd   : > { %5741 = vmatpush3.msra.mxu1 %v4707_v63  ;;  %v7234_v28 = vpop.f32.mrf.mxu0  ;;  %v7236_v49 = vpop.f32.mrf.mxu1  ;;  %5820 = vmatprep.subr.mxu0 %v4723_v58  ;;  %v3544_v63 = vld [vmem:[#allocation2 + $0x39] sm:$0xff] }
  0xfe   : > { %5622 = vmatprep.mubr.f32.mxu1 %v6807_v18  ;;  %5821 = vmatpush3.msra.mxu0 %v4723_v58 }
  0xff   : > { %5623 = vmatmul.mubr.f32.gmra.mxu1 %v6813_v9  ;;  %v7243_v32 = vpop.f32.mrf.mxu0  ;;  %5702 = vmatprep.mubr.f32.mxu0 %v7030_v6  ;;  %v4721_v9 = vld [vmem:[%s7824_s1 + $0x430] sm:$0xff] }
 0x100   : > { %5742 = vmatprep.subr.mxu1 %v4706_v60  ;;  %5703 = vmatmul.mubr.f32.gmra.mxu0 %v7033_v27 }
 0x101   : > { %5743 = vmatpush3.msra.mxu1 %v4706_v60  ;;  %v7250_v18 = vpop.f32.mrf.mxu1  ;;  %5822 = vmatprep.subr.mxu0 %v4722_v39  ;;  %v3545_v60 = vld [vmem:[#allocation2 + $0x49] sm:$0xff] }
 0x102   : > { %5625 = vmatprep.mubr.f32.mxu1 %v6825_v16  ;;  %5823 = vmatpush3.msra.mxu0 %v4722_v39  ;;  %v4704_v16 = vld [vmem:[%s7824_s1 + $0x3a8] sm:$0xff] }
 0x103   : > { %5626 = vmatmul.mubr.f32.gmra.mxu1 %v6831_v52  ;;  %v7257_v6 = vpop.f32.mrf.mxu0  ;;  %v7259_v27 = vpop.f32.mrf.mxu1  ;;  %5705 = vmatprep.mubr.f32.mxu0 %v7044_v55  ;;  %v4720_v52 = vld [vmem:[%s7824_s1 + $0x428] sm:$0xff] }
 0x104   : > { %5744 = vmatprep.subr.mxu1 %v4705_v12  ;;  %5706 = vmatmul.mubr.f32.gmra.mxu0 %v7047_v7  ;;  %v4703_v7 = vld [vmem:[%s7824_s1 + $0x3a0] sm:$0xff] }
 0x105   : > { %5745 = vmatpush3.msra.mxu1 %v4705_v12  ;;  %v7266_v45 = vpop.f32.mrf.mxu0  ;;  %5824 = vmatprep.subr.mxu0 %v4721_v9 }
 0x106   : > { %5628 = vmatprep.mubr.f32.mxu1 %v6843_v44  ;;  %5825 = vmatpush3.msra.mxu0 %v4721_v9  ;;  %v3546_v9 = vld [vmem:[#allocation2 + $0x51] sm:$0xff] }
 0x107   : > { %5629 = vmatmul.mubr.f32.gmra.mxu1 %v6849_v25  ;;  %v7273_v55 = vpop.f32.mrf.mxu1  ;;  %5708 = vmatprep.mubr.f32.mxu0 %v7058_v43  ;;  %v4719_v25 = vld [vmem:[%s7824_s1 + $0x420] sm:$0xff] }
 0x108   : > { %5746 = vmatprep.subr.mxu1 %v4704_v16  ;;  %5709 = vmatmul.mubr.f32.gmra.mxu0 %v7061_v19  ;;  %v4702_v19 = vld [vmem:[%s7824_s1 + $0x398] sm:$0xff] }
 0x109   : > { %5747 = vmatpush3.msra.mxu1 %v4704_v16  ;;  %v7280_v44 = vpop.f32.mrf.mxu0  ;;  %v7282_v61 = vpop.f32.mrf.mxu1  ;;  %5826 = vmatprep.subr.mxu0 %v4720_v52 }
 0x10a   : > { %5631 = vmatprep.mubr.f32.mxu1 %v6861_v50  ;;  %5827 = vmatpush3.msra.mxu0 %v4720_v52 }
 0x10b   : > { %5632 = vmatmul.mubr.f32.gmra.mxu1 %v6867_v20  ;;  %v7289_v43 = vpop.f32.mrf.mxu0  ;;  %5711 = vmatprep.mubr.f32.mxu0 %v7072_v47  ;;  %v4718_v20 = vld [vmem:[%s7824_s1 + $0x418] sm:$0xff] }
 0x10c   : > { %5748 = vmatprep.subr.mxu1 %v4703_v7  ;;  %5712 = vmatmul.mubr.f32.gmra.mxu0 %v7075_v8 }
 0x10d   : > { %5749 = vmatpush3.msra.mxu1 %v4703_v7  ;;  %v7296_v50 = vpop.f32.mrf.mxu1  ;;  %5828 = vmatprep.subr.mxu0 %v4719_v25  ;;  %v3547_v7 = vld [vmem:[#allocation2 + $0x61] sm:$0xff] }
 0x10e   : > { %5634 = vmatprep.mubr.f32.mxu1 %v6879_v17  ;;  %5829 = vmatpush3.msra.mxu0 %v4719_v25  ;;  %v4701_v17 = vld [vmem:[%s7824_s1 + $0x390] sm:$0xff] }
 0x10f   : > { %5635 = vmatmul.mubr.f32.gmra.mxu1 %v6885_v36  ;;  %v7303_v47 = vpop.f32.mrf.mxu0  ;;  %v7305_v8 = vpop.f32.mrf.mxu1  ;;  %5714 = vmatprep.mubr.f32.mxu0 %v7086_v0  ;;  %v7859_v36 = vld [vmem:[#allocation4_spill] sm:$0xff] }
 0x110   : > { %5750 = vmatprep.subr.mxu1 %v4702_v19  ;;  %5715 = vmatmul.mubr.f32.gmra.mxu0 %v7089_v48  ;;  %v4717_v0 = vld [vmem:[%s7824_s1 + $0x410] sm:$0xff]  ;;  %v4700_v48 = vld [vmem:[%s7824_s1 + $0x388] sm:$0xff] }
 0x111   : > { %5751 = vmatpush3.msra.mxu1 %v4702_v19  ;;  %v7312_v23 = vpop.f32.mrf.mxu0  ;;  %5830 = vmatprep.subr.mxu0 %v4718_v20 }
 0x112   : > { %5637 = vmatprep.mubr.f32.mxu1 %v7859_v36  ;;  %5831 = vmatpush3.msra.mxu0 %v4718_v20  ;;  %v3917_v36 = vld [vmem:[#allocation2 + $0x62] sm:$0xff] }
 0x113   : > { %5638 = vmatmul.mubr.f32.gmra.mxu1 %v7860_v54  ;;  %v7319_v34 = vpop.f32.mrf.mxu1  ;;  %5717 = vmatprep.mubr.f32.mxu0 %v7100_v33  ;;  %v4716_v33 = vld [vmem:[%s7824_s1 + $0x408] sm:$0xff] }
 0x114   : > { %5752 = vmatprep.subr.mxu1 %v4701_v17  ;;  %5718 = vmatmul.mubr.f32.gmra.mxu0 %v7103_v51  ;;  %v3548_v54 = vld [vmem:[#allocation2 + $0x69] sm:$0xff] }
 0x115   : > { %5753 = vmatpush3.msra.mxu1 %v4701_v17  ;;  %v7326_v56 = vpop.f32.mrf.mxu0  ;;  %v7328_v24 = vpop.f32.mrf.mxu1  ;;  %5832 = vmatprep.subr.mxu0 %v4717_v0 }
 0x116   : > { %5640 = vmatprep.mubr.f32.mxu1 %v7861_v29  ;;  %5833 = vmatpush3.msra.mxu0 %v4717_v0 }
 0x117   : > { %5641 = vmatmul.mubr.f32.gmra.mxu1 %v6921_v38  ;;  %v7335_v51 = vpop.f32.mrf.mxu0  ;;  %5720 = vmatprep.mubr.f32.mxu0 %v5949_v31  ;;  %v4699_v38 = vld [vmem:[%s7824_s1 + $0x380] sm:$0xff] }
 0x118   : > { %5754 = vmatprep.subr.mxu1 %v4700_v48  ;;  %5721 = vmatmul.mubr.f32.gmra.mxu0 %v5950_v37  ;;  %v3919_v37 = vld [vmem:[#allocation2 + $0x7a] sm:$0xff] }
 0x119   : > { %5755 = vmatpush3.msra.mxu1 %v4700_v48  ;;  %v7341_v14 = vpop.f32.mrf.mxu1  ;;  %5834 = vmatprep.subr.mxu0 %v4716_v33  ;;  %v3549_v48 = vld [vmem:[#allocation2 + $0x79] sm:$0xff] }
 0x11a   : > { %5643 = vmatprep.mubr.f32.mxu1 %v7337_v13  ;;  %5835 = vmatpush3.msra.mxu0 %v4716_v33 }
 0x11b   : > { %5644 = vmatmul.mubr.f32.gmra.mxu1 %v7339_v2  ;;  %v7348_v62 = vpop.f32.mrf.mxu0  ;;  %v7350_v59 = vpop.f32.mrf.mxu1  ;;  %5723 = vmatprep.mubr.f32.mxu0 %v5951_v5 }
 0x11c   : > { %5756 = vmatprep.subr.mxu1 %v4699_v38  ;;  %5724 = vmatmul.mubr.f32.gmra.mxu0 %v5951_v5  ;;  %v3551_v5 = vld [vmem:[#allocation2 + $0x91] sm:$0xff] }
 0x11d   : > { %5757 = vmatpush3.msra.mxu1 %v4699_v38  ;;  %v7355_v58 = vpop.f32.mrf.mxu0  ;;  %5836 = vmatprep.subr.mxu0 %v4715_v35 }
 0x11e   : > { %5758 = vmatprep.mubr.f32.mxu1 %v3543_v4  ;;  %5837 = vmatpush3.msra.mxu0 %v4715_v35  ;;  %v5280_v39 = vpop.f32.mrf.mxu1  ;;  %v3550_v35 = vld [vmem:[#allocation2 + $0x81] sm:$0xff] }
 0x11f   : > { %5759 = vmatmul.mubr.f32.vlgmr.msra.gmra.mxu1 %v3544_v63  ;;  %v1628_v12 = vadd.f32 %v5280_v39, %v7190_v53  ;;  %5838 = vmatprep.mubr.f32.mxu0 %v7140_v42 }
 0x120   : > { %5761 = vmatprep.mubr.f32.mxu1 %v3545_v60  ;;  %v5360_v16 = vpop.f32.mrf.mxu0  ;;  %5839 = vmatmul.mubr.f32.vlgmr.msra.gmra.mxu0 %v7143_v11  ;;  %v1468_v52 = vpop.f32.mrf.mxu1  ;;  %v3920_v60 = vld [vmem:[#allocation2 + $0x82] sm:$0xff] }
 0x121   : > { %v7360_v25 = vadd.f32 %v5360_v16, %v1628_v12  ;;  %v1627_v19 = vadd.f32 %v1468_v52, %v7199_v3  ;;  %5841 = vmatprep.mubr.f32.mxu0 %v7154_v15  ;;  %v3918_v15 = vld [vmem:[#allocation2 + $0x6a] sm:$0xff]  ;;  %v3552_v52 = vld [vmem:[#allocation2 + $0x99] sm:$0xff] }
 0x122   : > { %v1838_v20 = vpop.f32.mrf.mxu0 }
 0x123   : > { %v5283_v17 = vpop.f32.mrf.mxu1  ;;  %5762 = vmatmul.mubr.f32.gmra.mxu1 %v3546_v9  ;;  %v7364_v53 = vadd.f32 %v1838_v20, %v1627_v19  ;;  %v3921_v9 = vld [vmem:[#allocation2 + $0x92] sm:$0xff]  ;;  %v3553_v20 = vld [vmem:[#allocation2 + $0xa9] sm:$0xff] }
 0x124   : > { %v1630_v42 = vadd.f32 %v5283_v17, %v7211_v46  ;;  %5764 = vmatprep.mubr.f32.mxu1 %v3547_v7  ;;  %v5363_v0 = vpop.f32.mrf.mxu0  ;;  %5842 = vmatmul.mubr.f32.gmra.mxu0 %v7157_v22 }
 0x125   : > { %v1478_v11 = vpop.f32.mrf.mxu1  ;;  %5844 = vmatprep.mubr.f32.mxu0 %v3917_v36  ;;  %v3922_v36 = vld [vmem:[#allocation2 + $0x9a] sm:$0xff] }
 0x126   : > { %v7368_v29 = vadd.f32 %v5363_v0, %v1630_v42  ;;  %v1629_v3 = vadd.f32 %v1478_v11, %v7220_v26  ;;  %v1848_v33 = vpop.f32.mrf.mxu0  ;;  %v3923_v0 = vld [vmem:[#allocation2 + $0xaa] sm:$0xff] }
 0x127   : > { %v5286_v31 = vpop.f32.mrf.mxu1  ;;  %5765 = vmatmul.mubr.f32.gmra.mxu1 %v3548_v54 }
 0x128   : > { %v7371_v38 = vadd.f32 %v1848_v33, %v1629_v3  ;;  %v1632_v46 = vadd.f32 %v5286_v31, %v7234_v28  ;;  %5767 = vmatprep.mubr.f32.mxu1 %v3549_v48  ;;  %v5366_v4 = vpop.f32.mrf.mxu0  ;;  %5845 = vmatmul.mubr.f32.gmra.mxu0 %v3918_v15  ;;  %v3554_v48 = vld [vmem:[#allocation2 + $0xb1] sm:$0xff]  ;;  %v3555_v33 = vld [vmem:[#allocation2 + $0xc1] sm:$0xff] }
 0x129   : > { %v1488_v22 = vpop.f32.mrf.mxu1  ;;  %5847 = vmatprep.mubr.f32.mxu0 %v3919_v37  ;;  %v3924_v37 = vld [vmem:[#allocation2 + $0xb2] sm:$0xff] }
 0x12a   : > { %v7374_v63 = vadd.f32 %v5366_v4, %v1632_v46  ;;  %v1631_v26 = vadd.f32 %v1488_v22, %v7243_v32  ;;  %v1858_v39 = vpop.f32.mrf.mxu0  ;;  %v3925_v4 = vld [vmem:[#allocation2 + $0xc2] sm:$0xff] }
 0x12b   : > { %v5289_v12 = vpop.f32.mrf.mxu1  ;;  %5768 = vmatmul.mubr.f32.gmra.mxu1 %v3550_v35 }
 0x12c   : > { %v7377_v16 = vadd.f32 %v1858_v39, %v1631_v26  ;;  %v1634_v28 = vadd.f32 %v5289_v12, %v7257_v6  ;;  %5770 = vmatprep.mubr.f32.mxu1 %v3551_v5  ;;  %v5369_v7 = vpop.f32.mrf.mxu0  ;;  %5848 = vmatmul.mubr.f32.gmra.mxu0 %v3920_v60  ;;  %v3556_v5 = vld [vmem:[#allocation2 + $0xc9] sm:$0xff]  ;;  %v3557_v39 = vld [vmem:[#allocation2 + $0xd9] sm:$0xff] }
 0x12d   : > { %v1498_v19 = vpop.f32.mrf.mxu1  ;;  %5850 = vmatprep.mubr.f32.mxu0 %v3921_v9  ;;  %v3926_v9 = vld [vmem:[#allocation2 + $0xca] sm:$0xff] }
 0x12e   : > { %v7380_v17 = vadd.f32 %v5369_v7, %v1634_v28  ;;  %v1633_v32 = vadd.f32 %v1498_v19, %v7266_v45  ;;  %v1868_v42 = vpop.f32.mrf.mxu0  ;;  %v3927_v7 = vld [vmem:[#allocation2 + $0xda] sm:$0xff] }
 0x12f   : > { %v5292_v54 = vpop.f32.mrf.mxu1  ;;  %5771 = vmatmul.mubr.f32.gmra.mxu1 %v3552_v52 }
 0x130   : > { %v7383_v11 = vadd.f32 %v1868_v42, %v1633_v32  ;;  %v1636_v6 = vadd.f32 %v5292_v54, %v7280_v44  ;;  %5773 = vmatprep.mubr.f32.mxu1 %v3553_v20  ;;  %v5372_v3 = vpop.f32.mrf.mxu0  ;;  %5851 = vmatmul.mubr.f32.gmra.mxu0 %v3922_v36  ;;  %v3558_v20 = vld [vmem:[#allocation2 + $0xe1] sm:$0xff]  ;;  %v3559_v42 = vld [vmem:[#allocation2 + $0xf1] sm:$0xff] }
 0x131   : > { %v1508_v15 = vpop.f32.mrf.mxu1  ;;  %5853 = vmatprep.mubr.f32.mxu0 %v3923_v0  ;;  %v3928_v0 = vld [vmem:[#allocation2 + $0xe2] sm:$0xff] }
 0x132   : > { %v7386_v31 = vadd.f32 %v5372_v3, %v1636_v6  ;;  %v1635_v45 = vadd.f32 %v1508_v15, %v7289_v43  ;;  %v1878_v46 = vpop.f32.mrf.mxu0  ;;  %v3929_v3 = vld [vmem:[#allocation2 + $0xf2] sm:$0xff] }
 0x133   : > { %v5295_v35 = vpop.f32.mrf.mxu1  ;;  %5774 = vmatmul.mubr.f32.gmra.mxu1 %v3554_v48 }
 0x134   : > { %v7389_v22 = vadd.f32 %v1878_v46, %v1635_v45  ;;  %v1638_v44 = vadd.f32 %v5295_v35, %v7303_v47  ;;  %5776 = vmatprep.mubr.f32.mxu1 %v3555_v33  ;;  %v5375_v26 = vpop.f32.mrf.mxu0  ;;  %5854 = vmatmul.mubr.f32.gmra.mxu0 %v3924_v37  ;;  %v3560_v33 = vld [vmem:[#allocation2 + $0xf9] sm:$0xff]  ;;  %v3561_v46 = vld [vmem:[#allocation2 + $0x109] sm:$0xff] }
 0x135   : > { %v1518_v60 = vpop.f32.mrf.mxu1  ;;  %5856 = vmatprep.mubr.f32.mxu0 %v3925_v4  ;;  %v3930_v4 = vld [vmem:[#allocation2 + $0xfa] sm:$0xff] }
 0x136   : > { %v7392_v12 = vadd.f32 %v5375_v26, %v1638_v44  ;;  %v1637_v43 = vadd.f32 %v1518_v60, %v7312_v23  ;;  %v1888_v28 = vpop.f32.mrf.mxu0  ;;  %v3931_v26 = vld [vmem:[#allocation2 + $0x10a] sm:$0xff] }
 0x137   : > { %v5298_v52 = vpop.f32.mrf.mxu1  ;;  %5777 = vmatmul.mubr.f32.gmra.mxu1 %v3556_v5 }
 0x138   : > { %v7395_v19 = vadd.f32 %v1888_v28, %v1637_v43  ;;  %v1640_v47 = vadd.f32 %v5298_v52, %v7326_v56  ;;  %5779 = vmatprep.mubr.f32.mxu1 %v3557_v39  ;;  %v5378_v32 = vpop.f32.mrf.mxu0  ;;  %5857 = vmatmul.mubr.f32.gmra.mxu0 %v3926_v9  ;;  %v3562_v39 = vld [vmem:[#allocation2 + $0x111] sm:$0xff]  ;;  %v3563_v28 = vld [vmem:[#allocation2 + $0x121] sm:$0xff] }
 0x139   : > { %v1528_v36 = vpop.f32.mrf.mxu1  ;;  %5859 = vmatprep.mubr.f32.mxu0 %v3927_v7  ;;  %v3932_v7 = vld [vmem:[#allocation2 + $0x112] sm:$0xff] }
 0x13a   : > { %v7398_v54 = vadd.f32 %v5378_v32, %v1640_v47  ;;  %v1639_v23 = vadd.f32 %v1528_v36, %v7335_v51  ;;  %v1898_v6 = vpop.f32.mrf.mxu0  ;;  %v3933_v32 = vld [vmem:[#allocation2 + $0x122] sm:$0xff] }
 0x13b   : > { %v5301_v48 = vpop.f32.mrf.mxu1  ;;  %5780 = vmatmul.mubr.f32.gmra.mxu1 %v3558_v20 }
 0x13c   : > { %v7401_v15 = vadd.f32 %v1898_v6, %v1639_v23  ;;  %v1642_v56 = vadd.f32 %v5301_v48, %v7348_v62  ;;  %5782 = vmatprep.mubr.f32.mxu1 %v3559_v42  ;;  %v5381_v45 = vpop.f32.mrf.mxu0  ;;  %5860 = vmatmul.mubr.f32.gmra.mxu0 %v3928_v0  ;;  %v3564_v42 = vld [vmem:[#allocation2 + $0x129] sm:$0xff]  ;;  %v3565_v6 = vld [vmem:[#allocation2 + $0x139] sm:$0xff] }
 0x13d   : > { %v1538_v37 = vpop.f32.mrf.mxu1  ;;  %5862 = vmatprep.mubr.f32.mxu0 %v3929_v3  ;;  %v3934_v3 = vld [vmem:[#allocation2 + $0x12a] sm:$0xff] }
 0x13e   : > { %v7404_v35 = vadd.f32 %v5381_v45, %v1642_v56  ;;  %v1641_v51 = vadd.f32 %v1538_v37, %v7355_v58  ;;  %v1908_v44 = vpop.f32.mrf.mxu0  ;;  %v3935_v45 = vld [vmem:[#allocation2 + $0x13a] sm:$0xff] }
 0x13f   : > { %v5304_v5 = vpop.f32.mrf.mxu1  ;;  %5783 = vmatmul.mubr.f32.gmra.mxu1 %v3560_v33 }
 0x140   : > { %v7407_v60 = vadd.f32 %v1908_v44, %v1641_v51  ;;  %v1644_v62 = vadd.f32 %v5304_v5, %v7185_v21  ;;  %5785 = vmatprep.mubr.f32.mxu1 %v3561_v46  ;;  %v5384_v43 = vpop.f32.mrf.mxu0  ;;  %5863 = vmatmul.mubr.f32.gmra.mxu0 %v3930_v4  ;;  %v3566_v46 = vld [vmem:[#allocation2 + $0x141] sm:$0xff]  ;;  %v3567_v44 = vld [vmem:[#allocation2 + $0x151] sm:$0xff] }
 0x141   : > { %v1548_v9 = vpop.f32.mrf.mxu1  ;;  %5865 = vmatprep.mubr.f32.mxu0 %v3931_v26  ;;  %v3936_v26 = vld [vmem:[#allocation2 + $0x142] sm:$0xff] }
 0x142   : > { %v7410_v52 = vadd.f32 %v5384_v43, %v1644_v62  ;;  %v1643_v58 = vadd.f32 %v1548_v9, %v7193_v30  ;;  %v1918_v47 = vpop.f32.mrf.mxu0  ;;  %v3937_v43 = vld [vmem:[#allocation2 + $0x152] sm:$0xff] }
 0x143   : > { %v5307_v20 = vpop.f32.mrf.mxu1  ;;  %5786 = vmatmul.mubr.f32.gmra.mxu1 %v3562_v39 }
 0x144   : > { %v7413_v36 = vadd.f32 %v1918_v47, %v1643_v58  ;;  %v1646_v21 = vadd.f32 %v5307_v20, %v7204_v41  ;;  %5788 = vmatprep.mubr.f32.mxu1 %v3563_v28  ;;  %v5387_v23 = vpop.f32.mrf.mxu0  ;;  %5866 = vmatmul.mubr.f32.gmra.mxu0 %v3932_v7  ;;  %v3568_v28 = vld [vmem:[#allocation2 + $0x159] sm:$0xff]  ;;  %v3569_v47 = vld [vmem:[#allocation2 + $0x169] sm:$0xff] }
 0x145   : > { %v1558_v0 = vpop.f32.mrf.mxu1  ;;  %5868 = vmatprep.mubr.f32.mxu0 %v3933_v32  ;;  %v3938_v32 = vld [vmem:[#allocation2 + $0x15a] sm:$0xff] }
 0x146   : > { %v7416_v48 = vadd.f32 %v5387_v23, %v1646_v21  ;;  %v1645_v30 = vadd.f32 %v1558_v0, %v7213_v10  ;;  %v1928_v56 = vpop.f32.mrf.mxu0  ;;  %v3939_v23 = vld [vmem:[#allocation2 + $0x16a] sm:$0xff] }
 0x147   : > { %v5310_v33 = vpop.f32.mrf.mxu1  ;;  %5789 = vmatmul.mubr.f32.gmra.mxu1 %v3564_v42 }
 0x148   : > { %v7419_v37 = vadd.f32 %v1928_v56, %v1645_v30  ;;  %v1648_v41 = vadd.f32 %v5310_v33, %v7227_v57  ;;  %5791 = vmatprep.mubr.f32.mxu1 %v3565_v6  ;;  %v5390_v51 = vpop.f32.mrf.mxu0  ;;  %5869 = vmatmul.mubr.f32.gmra.mxu0 %v3934_v3  ;;  %v3570_v6 = vld [vmem:[#allocation2 + $0x171] sm:$0xff] }
 0x149   : > { %v1568_v4 = vpop.f32.mrf.mxu1  ;;  %5871 = vmatprep.mubr.f32.mxu0 %v3935_v45 }
 0x14a   : > { %v7422_v5 = vadd.f32 %v5390_v51, %v1648_v41  ;;  %v1647_v10 = vadd.f32 %v1568_v4, %v7236_v49  ;;  %v1938_v62 = vpop.f32.mrf.mxu0 }
 0x14b   : > { %v5313_v39 = vpop.f32.mrf.mxu1  ;;  %5792 = vmatmul.mubr.f32.gmra.mxu1 %v3566_v46 }
 0x14c   : > { %v7425_v9 = vadd.f32 %v1938_v62, %v1647_v10  ;;  %v1650_v57 = vadd.f32 %v5313_v39, %v7250_v18  ;;  %5794 = vmatprep.mubr.f32.mxu1 %v3567_v44  ;;  %v5393_v58 = vpop.f32.mrf.mxu0  ;;  %5872 = vmatmul.mubr.f32.gmra.mxu0 %v3936_v26  ;;  %v3573_v44 = vld [vmem:[#allocation2 + $0x199] sm:$0xff] }
 0x14d   : > { %v1578_v7 = vpop.f32.mrf.mxu1  ;;  %5874 = vmatprep.mubr.f32.mxu0 %v3937_v43  ;;  %v3943_v39 = vld [vmem:[#allocation2 + $0x19a] sm:$0xff] }
 0x14e   : > { %v7428_v20 = vadd.f32 %v5393_v58, %v1650_v57  ;;  %v1649_v49 = vadd.f32 %v1578_v7, %v7259_v27  ;;  %v1948_v21 = vpop.f32.mrf.mxu0  ;;  %v3940_v27 = vld [vmem:[#allocation2 + $0x172] sm:$0xff] }
 0x14f   : > { %v5316_v42 = vpop.f32.mrf.mxu1  ;;  %5795 = vmatmul.mubr.f32.gmra.mxu1 %v3568_v28 }
 0x150   : > { %v7431_v0 = vadd.f32 %v1948_v21, %v1649_v49  ;;  %v1652_v18 = vadd.f32 %v5316_v42, %v7273_v55  ;;  %5797 = vmatprep.mubr.f32.mxu1 %v3569_v47  ;;  %v5396_v30 = vpop.f32.mrf.mxu0  ;;  %5875 = vmatmul.mubr.f32.gmra.mxu0 %v3938_v32 }
 0x151   : > { %v1588_v3 = vpop.f32.mrf.mxu1  ;;  %5877 = vmatprep.mubr.f32.mxu0 %v3939_v23 }
 0x152   : > { %v7434_v56 = vadd.f32 %v5396_v30, %v1652_v18  ;;  %v1651_v33 = vadd.f32 %v1588_v3, %v7282_v61  ;;  %v1958_v45 = vpop.f32.mrf.mxu0 }
 0x153   : > { %v5319_v41 = vpop.f32.mrf.mxu1  ;;  %5798 = vmatmul.mubr.f32.gmra.mxu1 %v3570_v6 }
 0x154   : > { %v7437_v46 = vadd.f32 %v1958_v45, %v1651_v33  ;;  %v1654_v51 = vadd.f32 %v5319_v41, %v7296_v50  ;;  %5800 = vmatprep.mubr.f32.mxu1 %v7116_v1  ;;  %v5399_v55 = vpop.f32.mrf.mxu0  ;;  %5878 = vmatmul.mubr.f32.gmra.mxu0 %v3940_v27  ;;  %v3574_v1 = vld [vmem:[#allocation2 + $0x1a1] sm:$0xff] }
 0x155   : > { %v1598_v4 = vpop.f32.mrf.mxu1  ;;  %5880 = vmatprep.mubr.f32.mxu0 %v7337_v13  ;;  %v3944_v13 = vld [vmem:[#allocation2 + $0x1a2] sm:$0xff] }
 0x156   : > { %v7441_v10 = vadd.f32 %v5399_v55, %v1654_v51  ;;  %v1653_v26 = vadd.f32 %v1598_v4, %v7305_v8  ;;  %v1968_v61 = vpop.f32.mrf.mxu0 }
 0x157   : > { %v5322_v62 = vpop.f32.mrf.mxu1  ;;  %5801 = vmatmul.mubr.f32.gmra.mxu1 %v7125_v40 }
 0x158   : > { %v7446_v43 = vadd.f32 %v1968_v61, %v1653_v26  ;;  %v1656_v50 = vadd.f32 %v5322_v62, %v7319_v34  ;;  %5803 = vmatprep.mubr.f32.mxu1 %v3573_v44  ;;  %v5402_v57 = vpop.f32.mrf.mxu0  ;;  %5881 = vmatmul.mubr.f32.gmra.mxu0 %v7339_v2 }
 0x159   : > { %v1608_v28 = vpop.f32.mrf.mxu1  ;;  %5883 = vmatprep.mubr.f32.mxu0 %v3943_v39 }
 0x15a   : > { %v7450_v58 = vadd.f32 %v5402_v57, %v1656_v50  ;;  %v1655_v8 = vadd.f32 %v1608_v28, %v7328_v24  ;;  %v1978_v7 = vpop.f32.mrf.mxu0 }
 0x15b   : > { %v5325_v47 = vpop.f32.mrf.mxu1  ;;  %5804 = vmatmul.mubr.f32.gmra.mxu1 %v3574_v1 }
 0x15c   : > { %v7453_v40 = vadd.f32 %v1978_v7, %v1655_v8  ;;  %v1658_v49 = vadd.f32 %v5325_v47, %v7341_v14  ;;  %v5405_v34 = vpop.f32.mrf.mxu0  ;;  %5884 = vmatmul.mubr.f32.gmra.mxu0 %v3944_v13 }
 0x15d   : > { %v1618_v32 = vpop.f32.mrf.mxu1 }
 0x15e   : > { %v7456_v21 = vadd.f32 %v5405_v34, %v1658_v49  ;;  %v1657_v2 = vadd.f32 %v1618_v32, %v7350_v59  ;;  %v1988_v42 = vpop.f32.mrf.mxu0 }
 0x15f   : > { %v5440_v23 = vpop.f32.mrf.mxu1 }
 0x160   : > { %v7459_v18 = vadd.f32 %v1988_v42, %v1657_v2  ;;  %v2369_v24 = vadd.f32 %v5440_v23, %v7360_v25  ;;  %v5520_v6 = vpop.f32.mrf.mxu0 }
 0x161   : > { %v2209_v30 = vpop.f32.mrf.mxu1 }
 0x162   : > { %v7462_v3 = vadd.f32 %v5520_v6, %v2369_v24  ;;  %v2368_v33 = vadd.f32 %v2209_v30, %v7364_v53  ;;  %v2579_v14 = vpop.f32.mrf.mxu0 }
 0x163   : > { %v5443_v27 = vpop.f32.mrf.mxu1 }
 0x164   : > { %v7465_v45 = vadd.f32 %v2579_v14, %v2368_v33  ;;  %v2371_v41 = vadd.f32 %v5443_v27, %v7368_v29  ;;  %v5523_v51 = vpop.f32.mrf.mxu0 }
 0x165   : > { %v2219_v59 = vpop.f32.mrf.mxu1 }
 0x166   : > { %v7468_v55 = vadd.f32 %v5523_v51, %v2371_v41  ;;  %v2370_v4 = vadd.f32 %v2219_v59, %v7371_v38  ;;  %v2589_v44 = vpop.f32.mrf.mxu0 }
 0x167   : > { %v5446_v25 = vpop.f32.mrf.mxu1 }
 0x168   : > { %v7471_v26 = vadd.f32 %v2589_v44, %v2370_v4  ;;  %v2373_v61 = vadd.f32 %v5446_v25, %v7374_v63  ;;  %v5526_v62 = vpop.f32.mrf.mxu0 }
 0x169   : > { %v2229_v53 = vpop.f32.mrf.mxu1 }
 0x16a   : > { %v7474_v39 = vadd.f32 %v5526_v62, %v2373_v61  ;;  %v2372_v50 = vadd.f32 %v2229_v53, %v7377_v16  ;;  %v2599_v1 = vpop.f32.mrf.mxu0 }
 0x16b   : > { %v5449_v29 = vpop.f32.mrf.mxu1 }
 0x16c   : > { %v7477_v57 = vadd.f32 %v2599_v1, %v2372_v50  ;;  %v2375_v28 = vadd.f32 %v5449_v29, %v7380_v17  ;;  %v5529_v8 = vpop.f32.mrf.mxu0 }
 0x16d   : > { %v2239_v38 = vpop.f32.mrf.mxu1 }
 0x16e   : > { %v7480_v13 = vadd.f32 %v5529_v8, %v2375_v28  ;;  %v2374_v7 = vadd.f32 %v2239_v38, %v7383_v11  ;;  %v2609_v47 = vpop.f32.mrf.mxu0 }
 0x16f   : > { %v5452_v63 = vpop.f32.mrf.mxu1 }
 0x170   : > { %v7483_v49 = vadd.f32 %v2609_v47, %v2374_v7  ;;  %v2377_v34 = vadd.f32 %v5452_v63, %v7386_v31  ;;  %v5532_v32 = vpop.f32.mrf.mxu0 }
 0x171   : > { %v2249_v16 = vpop.f32.mrf.mxu1 }
 0x172   : > { %v7486_v2 = vadd.f32 %v5532_v32, %v2377_v34  ;;  %v2376_v42 = vadd.f32 %v2249_v16, %v7389_v22  ;;  %v2619_v23 = vpop.f32.mrf.mxu0 }
 0x173   : > { %v5455_v17 = vpop.f32.mrf.mxu1 }
 0x174   : > { %v7489_v24 = vadd.f32 %v2619_v23, %v2376_v42  ;;  %v2379_v6 = vadd.f32 %v5455_v17, %v7392_v12  ;;  %v5535_v30 = vpop.f32.mrf.mxu0 }
 0x175   : > { %v2259_v11 = vpop.f32.mrf.mxu1 }
 0x176   : > { %v7492_v33 = vadd.f32 %v5535_v30, %v2379_v6  ;;  %v2378_v14 = vadd.f32 %v2259_v11, %v7395_v19  ;;  %v2629_v27 = vpop.f32.mrf.mxu0 }
 0x177   : > { %v5458_v31 = vpop.f32.mrf.mxu1 }
 0x178   : > { %v7495_v41 = vadd.f32 %v2629_v27, %v2378_v14  ;;  %v2381_v51 = vadd.f32 %v5458_v31, %v7398_v54  ;;  %v5538_v59 = vpop.f32.mrf.mxu0 }
 0x179   : > { %v2269_v22 = vpop.f32.mrf.mxu1 }
 0x17a   : > { %v7498_v4 = vadd.f32 %v5538_v59, %v2381_v51  ;;  %v2380_v44 = vadd.f32 %v2269_v22, %v7401_v15  ;;  %v2639_v25 = vpop.f32.mrf.mxu0 }
 0x17b   : > { %v5461_v12 = vpop.f32.mrf.mxu1 }
 0x17c   : > { %v7501_v61 = vadd.f32 %v2639_v25, %v2380_v44  ;;  %v2383_v62 = vadd.f32 %v5461_v12, %v7404_v35  ;;  %v5541_v53 = vpop.f32.mrf.mxu0 }
 0x17d   : > { %v2279_v19 = vpop.f32.mrf.mxu1 }
 0x17e   : > { %v7504_v50 = vadd.f32 %v5541_v53, %v2383_v62  ;;  %v2382_v1 = vadd.f32 %v2279_v19, %v7407_v60  ;;  %v2649_v29 = vpop.f32.mrf.mxu0 }
 0x17f   : > { %v5464_v54 = vpop.f32.mrf.mxu1 }
 0x180   : > { %v7507_v28 = vadd.f32 %v2649_v29, %v2382_v1  ;;  %v2385_v8 = vadd.f32 %v5464_v54, %v7410_v52  ;;  %v5544_v38 = vpop.f32.mrf.mxu0 }
 0x181   : > { %v2289_v15 = vpop.f32.mrf.mxu1 }
 0x182   : > { %v7510_v7 = vadd.f32 %v5544_v38, %v2385_v8  ;;  %v2384_v47 = vadd.f32 %v2289_v15, %v7413_v36  ;;  %v2659_v63 = vpop.f32.mrf.mxu0 }
 0x183   : > { %v5467_v35 = vpop.f32.mrf.mxu1 }
 0x184   : > { %v7513_v34 = vadd.f32 %v2659_v63, %v2384_v47  ;;  %v2387_v32 = vadd.f32 %v5467_v35, %v7416_v48  ;;  %v5547_v16 = vpop.f32.mrf.mxu0 }
 0x185   : > { %v2299_v60 = vpop.f32.mrf.mxu1 }
 0x186   : > { %v7516_v42 = vadd.f32 %v5547_v16, %v2387_v32  ;;  %v2386_v23 = vadd.f32 %v2299_v60, %v7419_v37  ;;  %v2669_v17 = vpop.f32.mrf.mxu0 }
 0x187   : > { %v5470_v52 = vpop.f32.mrf.mxu1 }
 0x188   : > { %7862 = vst [vmem:[#allocation4_spill] sm:$0xff] %v7516_v42  ;;  %v7519_v6 = vadd.f32 %v2669_v17, %v2386_v23  ;;  %v2389_v30 = vadd.f32 %v5470_v52, %v7422_v5  ;;  %v5550_v11 = vpop.f32.mrf.mxu0 }
 0x189   : > { %v2309_v36 = vpop.f32.mrf.mxu1 }
 0x18a   : > { %7863 = vst [vmem:[#allocation5_spill] sm:$0xff] %v7519_v6  ;;  %v7522_v14 = vadd.f32 %v5550_v11, %v2389_v30  ;;  %v2388_v27 = vadd.f32 %v2309_v36, %v7425_v9  ;;  %v2679_v31 = vpop.f32.mrf.mxu0 }
 0x18b   : > { %v5473_v48 = vpop.f32.mrf.mxu1 }
 0x18c   : > { %7864 = vst [vmem:[#allocation6_spill] sm:$0xff] %v7522_v14  ;;  %v7525_v51 = vadd.f32 %v2679_v31, %v2388_v27  ;;  %v2391_v59 = vadd.f32 %v5473_v48, %v7428_v20  ;;  %v5553_v22 = vpop.f32.mrf.mxu0 }
 0x18d   : > { %v2319_v37 = vpop.f32.mrf.mxu1 }
 0x18e   : > { %7865 = vst [vmem:[#allocation7_spill] sm:$0xff] %v7525_v51  ;;  %v7528_v44 = vadd.f32 %v5553_v22, %v2391_v59  ;;  %v2390_v25 = vadd.f32 %v2319_v37, %v7431_v0  ;;  %v2689_v12 = vpop.f32.mrf.mxu0 }
 0x18f   : > { %v5476_v5 = vpop.f32.mrf.mxu1 }
 0x190   : > { %7866 = vst [vmem:[#allocation8_spill] sm:$0xff] %v7528_v44  ;;  %v7531_v62 = vadd.f32 %v2689_v12, %v2390_v25  ;;  %v2393_v53 = vadd.f32 %v5476_v5, %v7434_v56  ;;  %v5556_v19 = vpop.f32.mrf.mxu0 }
 0x191   : > { %v2329_v9 = vpop.f32.mrf.mxu1 }
 0x192   : > { %7867 = vst [vmem:[#allocation9_spill] sm:$0xff] %v7531_v62  ;;  %v7534_v1 = vadd.f32 %v5556_v19, %v2393_v53  ;;  %v2392_v29 = vadd.f32 %v2329_v9, %v7437_v46  ;;  %v2699_v54 = vpop.f32.mrf.mxu0 }
 0x193   : > { %v5479_v20 = vpop.f32.mrf.mxu1 }
 0x194   : > { %7868 = vst [vmem:[#allocation10_spill] sm:$0xff] %v7534_v1  ;;  %v7537_v8 = vadd.f32 %v2699_v54, %v2392_v29  ;;  %v2395_v38 = vadd.f32 %v5479_v20, %v7441_v10  ;;  %v5559_v15 = vpop.f32.mrf.mxu0 }
 0x195   : > { %v2339_v0 = vpop.f32.mrf.mxu1 }
 0x196   : > { %7869 = vst [vmem:[#allocation11_spill] sm:$0xff] %v7537_v8  ;;  %v7540_v47 = vadd.f32 %v5559_v15, %v2395_v38  ;;  %v2394_v63 = vadd.f32 %v2339_v0, %v7446_v43  ;;  %v2709_v35 = vpop.f32.mrf.mxu0 }
 0x197   : > { %v5482_v56 = vpop.f32.mrf.mxu1 }
 0x198   : > { %7870 = vst [vmem:[#allocation12_spill] sm:$0xff] %v7540_v47  ;;  %v7543_v32 = vadd.f32 %v2709_v35, %v2394_v63  ;;  %v2397_v16 = vadd.f32 %v5482_v56, %v7450_v58  ;;  %v5562_v60 = vpop.f32.mrf.mxu0 }
 0x199   : > { %v2349_v46 = vpop.f32.mrf.mxu1 }
 0x19a   : > { %7871 = vst [vmem:[#allocation13_spill] sm:$0xff] %v7543_v32  ;;  %v7546_v23 = vadd.f32 %v5562_v60, %v2397_v16  ;;  %v2396_v17 = vadd.f32 %v2349_v46, %v7453_v40  ;;  %v2719_v52 = vpop.f32.mrf.mxu0 }
 0x19b   : > { %v5485_v10 = vpop.f32.mrf.mxu1 }
 0x19c   : > { %7872 = vst [vmem:[#allocation14_spill] sm:$0xff] %v7546_v23  ;;  %v7549_v30 = vadd.f32 %v2719_v52, %v2396_v17  ;;  %v2399_v11 = vadd.f32 %v5485_v10, %v7456_v21  ;;  %v5565_v36 = vpop.f32.mrf.mxu0 }
 0x19d   : > { %v2359_v43 = vpop.f32.mrf.mxu1 }
 0x19e   : > { %7873 = vst [vmem:[#allocation15_spill] sm:$0xff] %v7549_v30  ;;  %v7552_v27 = vadd.f32 %v5565_v36, %v2399_v11  ;;  %v2398_v31 = vadd.f32 %v2359_v43, %v7459_v18  ;;  %v2729_v48 = vpop.f32.mrf.mxu0 }
 0x19f   : > { %v5600_v58 = vpop.f32.mrf.mxu1 }
 0x1a0   : > { %7874 = vst [vmem:[#allocation16_spill] sm:$0xff] %v7552_v27  ;;  %v7555_v59 = vadd.f32 %v2729_v48, %v2398_v31  ;;  %v7557_v22 = vpop.f32.mrf.mxu0 }
 0x1a1   : > { %v2949_v37 = vpop.f32.mrf.mxu1 }
 0x1a2   : > { %7875 = vst [vmem:[#allocation17_spill] sm:$0xff] %v7555_v59  ;;  %v7559_v40 = vpop.f32.mrf.mxu0 }
 0x1a3   : > { %v5603_v25 = vpop.f32.mrf.mxu1 }
 0x1a4   : > { %v7561_v12 = vpop.f32.mrf.mxu0 }
 0x1a5   : > { %v7563_v5 = vpop.f32.mrf.mxu1 }
 0x1a6   : > { %v7565_v21 = vpop.f32.mrf.mxu0 }
 0x1a7   : > { %v7567_v53 = vpop.f32.mrf.mxu1 }
 0x1a8   : > { %v7569_v19 = vpop.f32.mrf.mxu0 }
 0x1a9   : > { %v7571_v18 = vpop.f32.mrf.mxu1 }
 0x1aa   : > { %v7573_v9 = vpop.f32.mrf.mxu0 }
 0x1ab   : > { %v7575_v29 = vpop.f32.mrf.mxu1 }
 0x1ac   : > { %v7577_v54 = vpop.f32.mrf.mxu0 }
 0x1ad   : > { %v7579_v20 = vpop.f32.mrf.mxu1 }
 0x1ae   : > { %v7581_v38 = vpop.f32.mrf.mxu0 }
 0x1af   : > { %v7583_v15 = vpop.f32.mrf.mxu1 }
 0x1b0   : > { %v7585_v0 = vpop.f32.mrf.mxu0 }
 0x1b1   : > { %v7587_v63 = vpop.f32.mrf.mxu1 }
 0x1b2   : > { %v7589_v35 = vpop.f32.mrf.mxu0 }
 0x1b3   : > { %v7591_v56 = vpop.f32.mrf.mxu1 }
 0x1b4   : > { %v7593_v16 = vpop.f32.mrf.mxu0 }
 0x1b5   : > { %v7595_v60 = vpop.f32.mrf.mxu1 }
 0x1b6   : > { %v7597_v46 = vpop.f32.mrf.mxu0 }
 0x1b7   : > { %v7599_v17 = vpop.f32.mrf.mxu1 }
 0x1b8   : > { %v7601_v52 = vpop.f32.mrf.mxu0 }
 0x1b9   : > { %v7603_v10 = vpop.f32.mrf.mxu1 }
 0x1ba   : > { %v7605_v11 = vpop.f32.mrf.mxu0 }
 0x1bb   : > { %v7607_v36 = vpop.f32.mrf.mxu1 }
 0x1bc   : > { %v7609_v43 = vpop.f32.mrf.mxu0 }
 0x1bd   : > { %v7611_v31 = vpop.f32.mrf.mxu1 }
 0x1be   : > { %v7613_v48 = vpop.f32.mrf.mxu0 }
 0x1bf   : > { %v7615_v59 = vpop.f32.mrf.mxu1 }
 0x1c0   : > { %v7617_v27 = vpop.f32.mrf.mxu0 }
 0x1c1   : > { %v7619_v30 = vpop.f32.mrf.mxu1 }
 0x1c2   : > { %v7621_v23 = vpop.f32.mrf.mxu0 }
 0x1c3   : > { %7876 = vst [vmem:[#allocation18_spill] sm:$0xff] %v7621_v23  ;;  %v7623_v32 = vpop.f32.mrf.mxu1 }
 0x1c4   : > { %7877 = vst [vmem:[#allocation19_spill] sm:$0xff] %v7623_v32  ;;  %v7625_v47 = vpop.f32.mrf.mxu0 }
 0x1c5   : > { %7878 = vst [vmem:[#allocation20_spill] sm:$0xff] %v7625_v47  ;;  %v7627_v8 = vpop.f32.mrf.mxu1 }
 0x1c6   : > { %7879 = vst [vmem:[#allocation21_spill] sm:$0xff] %v7627_v8  ;;  %v7629_v1 = vpop.f32.mrf.mxu0 }
 0x1c7   : > { %7880 = vst [vmem:[#allocation22_spill] sm:$0xff] %v7629_v1  ;;  %v7631_v62 = vpop.f32.mrf.mxu1 }
 0x1c8   : > { %7881 = vst [vmem:[#allocation23_spill] sm:$0xff] %v7631_v62  ;;  %v7633_v44 = vpop.f32.mrf.mxu0 }
 0x1c9   : > { %7882 = vst [vmem:[#allocation24_spill] sm:$0xff] %v7633_v44  ;;  %v7635_v51 = vpop.f32.mrf.mxu1 }
 0x1ca   : > { %7883 = vst [vmem:[#allocation25_spill] sm:$0xff] %v7635_v51  ;;  %v7637_v14 = vpop.f32.mrf.mxu0 }
 0x1cb   : > { %7884 = vst [vmem:[#allocation26_spill] sm:$0xff] %v7637_v14  ;;  %v7639_v6 = vpop.f32.mrf.mxu1 }
 0x1cc   : > { %7885 = vst [vmem:[#allocation27_spill] sm:$0xff] %v7639_v6  ;;  %v7641_v42 = vpop.f32.mrf.mxu0 }
 0x1cd   : > { %7886 = vst [vmem:[#allocation28_spill] sm:$0xff] %v7641_v42  ;;  %v7643_v23 = vpop.f32.mrf.mxu1 }
 0x1ce   : > { %7887 = vst [vmem:[#allocation29_spill] sm:$0xff] %v7643_v23  ;;  %v7645_v32 = vpop.f32.mrf.mxu0 }
 0x1cf   : > { %7888 = vst [vmem:[#allocation30_spill] sm:$0xff] %v7645_v32  ;;  %v7647_v47 = vpop.f32.mrf.mxu1 }
 0x1d0   : > { %7889 = vst [vmem:[#allocation31_spill] sm:$0xff] %v7647_v47  ;;  %v7649_v8 = vpop.f32.mrf.mxu0 }
 0x1d1   : > { %7890 = vst [vmem:[#allocation32_spill] sm:$0xff] %v7649_v8  ;;  %v7651_v1 = vpop.f32.mrf.mxu1  ;;  %v3109_v8 = vadd.f32 %v5600_v58, %v7462_v3  ;;  %v3110_v58 = vadd.f32 %v7563_v5, %v7471_v26 }
 0x1d2   : > { %7891 = vst [vmem:[#allocation33_spill] sm:$0xff] %v7651_v1  ;;  %v7653_v62 = vpop.f32.mrf.mxu0 }
 0x1d3   : > { %7892 = vst [vmem:[#allocation34_spill] sm:$0xff] %v7653_v62  ;;  %v7655_v44 = vpop.f32.mrf.mxu1  ;;  %v3481_v26 = vadd.f32 %v7565_v21, %v3110_v58  ;;  %v3115_v21 = vadd.f32 %v7575_v29, %v7480_v13 }
 0x1d4   : > { %7893 = vst [vmem:[#allocation35_spill] sm:$0xff] %v7655_v44  ;;  %v7657_v14 = vpop.f32.mrf.mxu0  ;;  %v3108_v44 = vadd.f32 %v2949_v37, %v7465_v45  ;;  %v3113_v45 = vadd.f32 %v7567_v53, %v7474_v39  ;;  %v3112_v39 = vadd.f32 %v7571_v18, %v7477_v57  ;;  %v3114_v57 = vadd.f32 %v7579_v20, %v7483_v49 }
 0x1d5   : > { %7894 = vst [vmem:[#allocation36_spill] sm:$0xff] %v7657_v14  ;;  %v7659_v6 = vpop.f32.mrf.mxu1  ;;  %v3486_v49 = vadd.f32 %v7577_v54, %v3115_v21 }
 0x1d6   : > { %v7661_v42 = vpop.f32.mrf.mxu0  ;;  %v3479_v3 = vadd.f32 %v7559_v40, %v3108_v44  ;;  %v3484_v5 = vadd.f32 %v7569_v19, %v3113_v45 }
 0x1d7   : > { %7895 = vst [vmem:[#allocation37_spill] sm:$0xff] %v7661_v42  ;;  %v7663_v23 = vpop.f32.mrf.mxu1  ;;  %v3480_v42 = vadd.f32 %v7557_v22, %v3109_v8 }
 0x1d8   : > { %7896 = vst [vmem:[#allocation38_spill] sm:$0xff] %v7663_v23  ;;  %v7665_v32 = vpop.f32.mrf.mxu0  ;;  %v3111_v23 = vadd.f32 %v5603_v25, %v7468_v55 }
 0x1d9   : > { %7897 = vst [vmem:[#allocation39_spill] sm:$0xff] %v7665_v32  ;;  %v7667_v47 = vpop.f32.mrf.mxu1 }
 0x1da   : > { %7898 = vst [vmem:[#allocation40_spill] sm:$0xff] %v7667_v47  ;;  %v7670_v1 = vpop.f32.mrf.mxu0  ;;  %v3482_v22 = vadd.f32 %v7561_v12, %v3111_v23 }
 0x1db   : > { %7899 = vst [vmem:[#allocation41_spill] sm:$0xff] %v7670_v1  ;;  %v7672_v62 = vpop.f32.mrf.mxu1 }
 0x1dc   : > { %v7675_v51 = vpop.f32.mrf.mxu0 }
 0x1dd   : > { %7900 = vst [vmem:[#allocation42_spill] sm:$0xff] %v7675_v51  ;;  %v7677_v14 = vpop.f32.mrf.mxu1 }
 0x1de   : > { %v7682_v32 = vpop.f32.mrf.mxu0 }
 0x1df   : > { %7901 = vst [vmem:[#allocation43_spill] sm:$0xff] %v7682_v32  ;;  %v5760_v47 = vpop.f32.mrf.mxu1 }
 0x1e0   : > { %v3850_v1 = vadd.f32 %v5760_v47, %v3480_v42  ;;  %v5840_v55 = vpop.f32.mrf.mxu0 }
 0x1e1   : > { %v3690_v8 = vpop.f32.mrf.mxu1 }
 0x1e2   : > { %v4220_v37 = vadd.f32 %v5840_v55, %v3850_v1  ;;  %v3849_v44 = vadd.f32 %v3690_v8, %v3479_v3  ;;  %v4060_v40 = vpop.f32.mrf.mxu0  ;;  %v3483_v55 = vadd.f32 %v7573_v9, %v3112_v39  ;;  %v3485_v9 = vadd.f32 %v7581_v38, %v3114_v57 }
 0x1e3   : > { %v5763_v25 = vpop.f32.mrf.mxu1 }
 0x1e4   : > { %4316 = vst [vmem:[%s7692_s12 + $0x8] sm:$0xff] %v4220_v37  ;;  %v4219_v42 = vadd.f32 %v4060_v40, %v3849_v44  ;;  %v3852_v47 = vadd.f32 %v5763_v25, %v3482_v22  ;;  %v4386_v53 = vmul.f32 %v4220_v37, %v4220_v37  ;;  %v5843_v32 = vpop.f32.mrf.mxu0  ;;  %v3117_v22 = vadd.f32 %v7583_v15, %v7486_v2 }
 0x1e5   : > { %v3700_v51 = vpop.f32.mrf.mxu1  ;;  %v3116_v15 = vadd.f32 %v7587_v63, %v7489_v24 }
 0x1e6   : > { %4315 = vst [vmem:[%s7692_s12] sm:$0xff] %v4219_v42  ;;  %v4347_v23 = vadd.f32 %v4220_v37, %v4219_v42  ;;  %v4385_v1 = vmul.f32 %v4219_v42, %v4219_v42  ;;  %v4222_v12 = vadd.f32 %v5843_v32, %v3852_v47  ;;  %v3851_v3 = vadd.f32 %v3700_v51, %v3481_v26  ;;  %v4070_v18 = vpop.f32.mrf.mxu0 }
 0x1e7   : > { %v5766_v58 = vpop.f32.mrf.mxu1  ;;  %v3488_v2 = vadd.f32 %v7585_v0, %v3117_v22  ;;  %v3119_v47 = vadd.f32 %v7591_v56, %v7492_v33 }
 0x1e8   : > { %v4417_v19 = vadd.f32 %v4386_v53, %v4385_v1  ;;  %4318 = vst [vmem:[%s7692_s12 + $0x18] sm:$0xff] %v4222_v12  ;;  %v4221_v45 = vadd.f32 %v4070_v18, %v3851_v3  ;;  %v3854_v8 = vadd.f32 %v5766_v58, %v3484_v5  ;;  %v5846_v32 = vpop.f32.mrf.mxu0  ;;  %v4388_v25 = vmul.f32 %v4222_v12, %v4222_v12 }
 0x1e9   : > { %v3710_v51 = vpop.f32.mrf.mxu1  ;;  %v3487_v58 = vadd.f32 %v7589_v35, %v3116_v15 }
 0x1ea   : > { %4317 = vst [vmem:[%s7692_s12 + $0x10] sm:$0xff] %v4221_v45  ;;  %v4348_v37 = vadd.f32 %v4347_v23, %v4221_v45  ;;  %v4387_v13 = vmul.f32 %v4221_v45, %v4221_v45  ;;  %v4224_v29 = vadd.f32 %v5846_v32, %v3854_v8  ;;  %v3853_v44 = vadd.f32 %v3710_v51, %v3483_v55  ;;  %v4080_v20 = vpop.f32.mrf.mxu0 }
 0x1eb   : > { %v5769_v40 = vpop.f32.mrf.mxu1  ;;  %v3490_v55 = vadd.f32 %v7593_v16, %v3119_v47 }
 0x1ec   : > { %v4418_v26 = vadd.f32 %v4417_v19, %v4387_v13  ;;  %4320 = vst [vmem:[%s7692_s12 + $0x28] sm:$0xff] %v4224_v29  ;;  %v4223_v39 = vadd.f32 %v4080_v20, %v3853_v44  ;;  %v4349_v42 = vadd.f32 %v4348_v37, %v4222_v12  ;;  %v3856_v5 = vadd.f32 %v5769_v40, %v3486_v49  ;;  %v5849_v53 = vpop.f32.mrf.mxu0 }
 0x1ed   : > { %v3720_v54 = vpop.f32.mrf.mxu1  ;;  %v3118_v12 = vadd.f32 %v7595_v60, %v7495_v41  ;;  %v4390_v0 = vmul.f32 %v4224_v29, %v4224_v29  ;;  %v3121_v19 = vadd.f32 %v7599_v17, %v7498_v4  ;;  %v3120_v37 = vadd.f32 %v7603_v10, %v7501_v61 }
 0x1ee   : > { %4319 = vst [vmem:[%s7692_s12 + $0x20] sm:$0xff] %v4223_v39  ;;  %v4350_v38 = vadd.f32 %v4349_v42, %v4223_v39  ;;  %v4389_v23 = vmul.f32 %v4223_v39, %v4223_v39  ;;  %v4419_v1 = vadd.f32 %v4418_v26, %v4388_v25  ;;  %v3855_v3 = vadd.f32 %v3720_v54, %v3485_v9  ;;  %v4090_v57 = vpop.f32.mrf.mxu0 }
 0x1ef   : > { %v4226_v21 = vadd.f32 %v5849_v53, %v3856_v5  ;;  %v5772_v24 = vpop.f32.mrf.mxu1  ;;  %v3489_v51 = vadd.f32 %v7597_v46, %v3118_v12  ;;  %v3492_v49 = vadd.f32 %v7601_v52, %v3121_v19  ;;  %v3123_v46 = vadd.f32 %v7607_v36, %v7504_v50  ;;  %v7903_v19 = vld [vmem:[#allocation19_spill] sm:$0xff] }
 0x1f0   : > { %v4420_v63 = vadd.f32 %v4419_v1, %v4389_v23  ;;  %v4225_v18 = vadd.f32 %v4090_v57, %v3855_v3  ;;  %v4351_v33 = vadd.f32 %v4350_v38, %v4224_v29  ;;  %v3858_v56 = vadd.f32 %v5772_v24, %v3488_v2  ;;  %v5852_v45 = vpop.f32.mrf.mxu0 }
 0x1f1   : > { %4322 = vst [vmem:[%s7692_s12 + $0x38] sm:$0xff] %v4226_v21  ;;  %v3730_v8 = vpop.f32.mrf.mxu1  ;;  %v4392_v29 = vmul.f32 %v4226_v21, %v4226_v21  ;;  %v3491_v15 = vadd.f32 %v7605_v11, %v3120_v37  ;;  %v3122_v52 = vadd.f32 %v7611_v31, %v7507_v28  ;;  %v3125_v50 = vadd.f32 %v7615_v59, %v7510_v7  ;;  %v7906_v37 = vld [vmem:[#allocation21_spill] sm:$0xff] }
 0x1f2   : > { %4321 = vst [vmem:[%s7692_s12 + $0x30] sm:$0xff] %v4225_v18  ;;  %v4352_v41 = vadd.f32 %v4351_v33, %v4225_v18  ;;  %v4391_v60 = vmul.f32 %v4225_v18, %v4225_v18  ;;  %v4421_v22 = vadd.f32 %v4420_v63, %v4390_v0  ;;  %v4228_v32 = vadd.f32 %v5852_v45, %v3858_v56  ;;  %v4100_v16 = vpop.f32.mrf.mxu0 }
 0x1f3   : > { %v3857_v35 = vadd.f32 %v3730_v8, %v3487_v58  ;;  %v5775_v13 = vpop.f32.mrf.mxu1  ;;  %v3494_v1 = vadd.f32 %v7609_v43, %v3123_v46  ;;  %v3493_v57 = vadd.f32 %v7613_v48, %v3122_v52  ;;  %v3124_v7 = vadd.f32 %v7619_v30, %v7513_v34  ;;  %v7909_v46 = vld [vmem:[#allocation20_spill] sm:$0xff]  ;;  %v7910_v52 = vld [vmem:[#allocation22_spill] sm:$0xff] }
 0x1f4   : > { %v4422_v4 = vadd.f32 %v4421_v22, %v4391_v60  ;;  %4324 = vst [vmem:[%s7692_s12 + $0x48] sm:$0xff] %v4228_v32  ;;  %v4353_v17 = vadd.f32 %v4352_v41, %v4226_v21  ;;  %v3860_v44 = vadd.f32 %v5775_v13, %v3490_v55  ;;  %v5855_v20 = vpop.f32.mrf.mxu0  ;;  %v4394_v36 = vmul.f32 %v4228_v32, %v4228_v32  ;;  %v7902_v55 = vld [vmem:[#allocation4_spill] sm:$0xff] }
 0x1f5   : > { %v4227_v9 = vadd.f32 %v4100_v16, %v3857_v35  ;;  %v3740_v40 = vpop.f32.mrf.mxu1  ;;  %v3496_v63 = vadd.f32 %v7617_v27, %v3125_v50  ;;  %v3127_v45 = vadd.f32 %v7903_v19, %v7902_v55  ;;  %v7912_v50 = vld [vmem:[#allocation25_spill] sm:$0xff] }
 0x1f6   : > { %v4423_v25 = vadd.f32 %v4422_v4, %v4392_v29  ;;  %v4230_v61 = vadd.f32 %v5855_v20, %v3860_v44  ;;  %v3859_v10 = vadd.f32 %v3740_v40, %v3489_v51  ;;  %v4110_v42 = vpop.f32.mrf.mxu0  ;;  %v7905_v51 = vld [vmem:[#allocation5_spill] sm:$0xff]  ;;  %v7907_v29 = vld [vmem:[#allocation6_spill] sm:$0xff]  ;;  %v7908_v4 = vld [vmem:[#allocation23_spill] sm:$0xff] }
 0x1f7   : > { %4323 = vst [vmem:[%s7692_s12 + $0x40] sm:$0xff] %v4227_v9  ;;  %v4354_v26 = vadd.f32 %v4353_v17, %v4227_v9  ;;  %v4393_v39 = vmul.f32 %v4227_v9, %v4227_v9  ;;  %v5778_v2 = vpop.f32.mrf.mxu1  ;;  %v3126_v35 = vadd.f32 %v7906_v37, %v7905_v51  ;;  %v3129_v17 = vadd.f32 %v7908_v4, %v7907_v29  ;;  %v7918_v55 = vld [vmem:[#allocation29_spill] sm:$0xff]  ;;  %v7921_v51 = vld [vmem:[#allocation28_spill] sm:$0xff] }
 0x1f8   : > { %4326 = vst [vmem:[%s7692_s12 + $0x58] sm:$0xff] %v4230_v61  ;;  %v4229_v47 = vadd.f32 %v4110_v42, %v3859_v10  ;;  %v3862_v5 = vadd.f32 %v5778_v2, %v3492_v49  ;;  %v5858_v38 = vpop.f32.mrf.mxu0  ;;  %v4396_v43 = vmul.f32 %v4230_v61, %v4230_v61 }
 0x1f9   : > { %v4424_v53 = vadd.f32 %v4423_v25, %v4393_v39  ;;  %v4355_v54 = vadd.f32 %v4354_v26, %v4228_v32  ;;  %v3750_v23 = vpop.f32.mrf.mxu1  ;;  %v7904_v32 = vld [vmem:[#allocation18_spill] sm:$0xff]  ;;  %v3498_v25 = vadd.f32 %v7909_v46, %v3127_v45 }
 0x1fa   : > { %4325 = vst [vmem:[%s7692_s12 + $0x50] sm:$0xff] %v4229_v47  ;;  %v4395_v3 = vmul.f32 %v4229_v47, %v4229_v47  ;;  %v4232_v11 = vadd.f32 %v5858_v38, %v3862_v5  ;;  %v3861_v12 = vadd.f32 %v3750_v23, %v3491_v15  ;;  %v4120_v31 = vpop.f32.mrf.mxu0  ;;  %v3495_v27 = vadd.f32 %v7904_v32, %v3124_v7  ;;  %v7911_v5 = vld [vmem:[#allocation7_spill] sm:$0xff]  ;;  %v7913_v38 = vld [vmem:[#allocation24_spill] sm:$0xff] }
 0x1fb   : > { %v4356_v0 = vadd.f32 %v4355_v54, %v4229_v47  ;;  %v4425_v28 = vadd.f32 %v4424_v53, %v4394_v36  ;;  %v5781_v21 = vpop.f32.mrf.mxu1  ;;  %v3497_v47 = vadd.f32 %v7910_v52, %v3126_v35  ;;  %v3128_v36 = vadd.f32 %v7912_v50, %v7911_v5  ;;  %v7927_v5 = vld [vmem:[#allocation35_spill] sm:$0xff] }
 0x1fc   : > { %4328 = vst [vmem:[%s7692_s12 + $0x68] sm:$0xff] %v4232_v11  ;;  %v4231_v59 = vadd.f32 %v4120_v31, %v3861_v12  ;;  %v3864_v24 = vadd.f32 %v5781_v21, %v3494_v1  ;;  %v5861_v56 = vpop.f32.mrf.mxu0  ;;  %v4398_v44 = vmul.f32 %v4232_v11, %v4232_v11  ;;  %v3500_v23 = vadd.f32 %v7913_v38, %v3129_v17  ;;  %v7915_v31 = vld [vmem:[#allocation27_spill] sm:$0xff] }
 0x1fd   : > { %v4426_v18 = vadd.f32 %v4425_v28, %v4395_v3  ;;  %v4357_v33 = vadd.f32 %v4356_v0, %v4230_v61  ;;  %v3760_v58 = vpop.f32.mrf.mxu1  ;;  %v7914_v28 = vld [vmem:[#allocation8_spill] sm:$0xff] }
 0x1fe   : > { %4327 = vst [vmem:[%s7692_s12 + $0x60] sm:$0xff] %v4231_v59  ;;  %v4397_v8 = vmul.f32 %v4231_v59, %v4231_v59  ;;  %v4234_v48 = vadd.f32 %v5861_v56, %v3864_v24  ;;  %v3863_v41 = vadd.f32 %v3760_v58, %v3493_v57  ;;  %v4130_v30 = vpop.f32.mrf.mxu0  ;;  %v3131_v21 = vadd.f32 %v7915_v31, %v7914_v28  ;;  %v7917_v58 = vld [vmem:[#allocation9_spill] sm:$0xff] }
 0x1ff   : > { %v4358_v60 = vadd.f32 %v4357_v33, %v4231_v59  ;;  %v4427_v34 = vadd.f32 %v4426_v18, %v4396_v43  ;;  %v5784_v22 = vpop.f32.mrf.mxu1  ;;  %v7916_v33 = vld [vmem:[#allocation26_spill] sm:$0xff]  ;;  %v3130_v19 = vadd.f32 %v7918_v55, %v7917_v58 }
 0x200   : > { %4330 = vst [vmem:[%s7692_s12 + $0x78] sm:$0xff] %v4234_v48  ;;  %v4233_v16 = vadd.f32 %v4130_v30, %v3863_v41  ;;  %v3866_v13 = vadd.f32 %v5784_v22, %v3496_v63  ;;  %v5864_v20 = vpop.f32.mrf.mxu0  ;;  %v4400_v1 = vmul.f32 %v4234_v48, %v4234_v48  ;;  %v3499_v56 = vadd.f32 %v7916_v33, %v3128_v36  ;;  %v7920_v41 = vld [vmem:[#allocation31_spill] sm:$0xff] }
 0x201   : > { %v4428_v49 = vadd.f32 %v4427_v34, %v4397_v8  ;;  %v4359_v9 = vadd.f32 %v4358_v60, %v4232_v11  ;;  %v3770_v40 = vpop.f32.mrf.mxu1  ;;  %v3502_v37 = vadd.f32 %v7921_v51, %v3131_v21 }
 0x202   : > { %4329 = vst [vmem:[%s7692_s12 + $0x70] sm:$0xff] %v4233_v16  ;;  %v4399_v61 = vmul.f32 %v4233_v16, %v4233_v16  ;;  %v4236_v10 = vadd.f32 %v5864_v20, %v3866_v13  ;;  %v3865_v26 = vadd.f32 %v3770_v40, %v3495_v27  ;;  %v4140_v2 = vpop.f32.mrf.mxu0  ;;  %v7923_v20 = vld [vmem:[#allocation11_spill] sm:$0xff]  ;;  %v7924_v40 = vld [vmem:[#allocation33_spill] sm:$0xff] }
 0x203   : > { %v4360_v39 = vadd.f32 %v4359_v9, %v4233_v16  ;;  %v4429_v42 = vadd.f32 %v4428_v49, %v4398_v44  ;;  %v5787_v15 = vpop.f32.mrf.mxu1  ;;  %v7922_v49 = vld [vmem:[#allocation30_spill] sm:$0xff]  ;;  %v3132_v46 = vadd.f32 %v7924_v40, %v7923_v20 }
 0x204   : > { %4332 = vst [vmem:[%s7692_s12 + $0x88] sm:$0xff] %v4236_v10  ;;  %v4235_v53 = vadd.f32 %v4140_v2, %v3865_v26  ;;  %v3868_v54 = vadd.f32 %v5787_v15, %v3498_v25  ;;  %v5867_v12 = vpop.f32.mrf.mxu0  ;;  %v4402_v34 = vmul.f32 %v4236_v10, %v4236_v10  ;;  %v3501_v9 = vadd.f32 %v7922_v49, %v3130_v19 }
 0x205   : > { %v4430_v3 = vadd.f32 %v4429_v42, %v4399_v61  ;;  %v4361_v11 = vadd.f32 %v4360_v39, %v4234_v48  ;;  %v3780_v0 = vpop.f32.mrf.mxu1  ;;  %v7919_v48 = vld [vmem:[#allocation10_spill] sm:$0xff] }
 0x206   : > { %4331 = vst [vmem:[%s7692_s12 + $0x80] sm:$0xff] %v4235_v53  ;;  %v4401_v57 = vmul.f32 %v4235_v53, %v4235_v53  ;;  %v4238_v7 = vadd.f32 %v5867_v12, %v3868_v54  ;;  %v3867_v59 = vadd.f32 %v3780_v0, %v3497_v47  ;;  %v4150_v43 = vpop.f32.mrf.mxu0  ;;  %v3133_v60 = vadd.f32 %v7920_v41, %v7919_v48  ;;  %v7926_v47 = vld [vmem:[#allocation12_spill] sm:$0xff]  ;;  %v7929_v0 = vld [vmem:[#allocation13_spill] sm:$0xff] }
 0x207   : > { %v4362_v24 = vadd.f32 %v4361_v11, %v4235_v53  ;;  %v4431_v63 = vadd.f32 %v4430_v3, %v4400_v1  ;;  %v5790_v18 = vpop.f32.mrf.mxu1  ;;  %v3135_v50 = vadd.f32 %v7927_v5, %v7926_v47  ;;  %v7928_v11 = vld [vmem:[#allocation34_spill] sm:$0xff]  ;;  %v3134_v28 = vadd.f32 %v7659_v6, %v7929_v0  ;;  %v7941_v0 = vld [vmem:[#allocation43_spill] sm:$0xff] }
 0x208   : > { %4334 = vst [vmem:[%s7692_s12 + $0x98] sm:$0xff] %v4238_v7  ;;  %v4237_v45 = vadd.f32 %v4150_v43, %v3867_v59  ;;  %v3870_v8 = vadd.f32 %v5790_v18, %v3500_v23  ;;  %v5870_v32 = vpop.f32.mrf.mxu0  ;;  %v4404_v39 = vmul.f32 %v4238_v7, %v4238_v7  ;;  %v3503_v12 = vadd.f32 %v7928_v11, %v3132_v46 }
 0x209   : > { %v4432_v30 = vadd.f32 %v4431_v63, %v4401_v57  ;;  %v4363_v22 = vadd.f32 %v4362_v24, %v4236_v10  ;;  %v3790_v27 = vpop.f32.mrf.mxu1  ;;  %v7925_v10 = vld [vmem:[#allocation32_spill] sm:$0xff]  ;;  %v7930_v57 = vld [vmem:[#allocation14_spill] sm:$0xff] }
 0x20a   : > { %4333 = vst [vmem:[%s7692_s12 + $0x90] sm:$0xff] %v4237_v45  ;;  %v4403_v35 = vmul.f32 %v4237_v45, %v4237_v45  ;;  %v4240_v16 = vadd.f32 %v5870_v32, %v3870_v8  ;;  %v3869_v13 = vadd.f32 %v3790_v27, %v3499_v56  ;;  %v4160_v17 = vpop.f32.mrf.mxu0  ;;  %v3504_v26 = vadd.f32 %v7925_v10, %v3133_v60  ;;  %v7932_v56 = vld [vmem:[#allocation36_spill] sm:$0xff]  ;;  %v7933_v60 = vld [vmem:[#allocation37_spill] sm:$0xff] }
 0x20b   : > { %v4364_v29 = vadd.f32 %v4363_v22, %v4237_v45  ;;  %v4433_v4 = vadd.f32 %v4432_v30, %v4402_v34  ;;  %v5793_v44 = vpop.f32.mrf.mxu1  ;;  %v3506_v58 = vadd.f32 %v7932_v56, %v3135_v50  ;;  %v3505_v34 = vadd.f32 %v7933_v60, %v3134_v28  ;;  %v7934_v30 = vld [vmem:[#allocation15_spill] sm:$0xff]  ;;  %v7935_v22 = vld [vmem:[#allocation40_spill] sm:$0xff] }
 0x20c   : > { %4336 = vst [vmem:[%s7692_s12 + $0xa8] sm:$0xff] %v4240_v16  ;;  %v4239_v25 = vadd.f32 %v4160_v17, %v3869_v13  ;;  %v3872_v61 = vadd.f32 %v5793_v44, %v3502_v37  ;;  %v5873_v15 = vpop.f32.mrf.mxu0  ;;  %v4406_v24 = vmul.f32 %v4240_v16, %v4240_v16  ;;  %v3136_v32 = vadd.f32 %v7935_v22, %v7934_v30  ;;  %v7936_v37 = vld [vmem:[#allocation39_spill] sm:$0xff]  ;;  %v7937_v44 = vld [vmem:[#allocation16_spill] sm:$0xff] }
 0x20d   : > { %v4434_v42 = vadd.f32 %v4433_v4, %v4403_v35  ;;  %v4365_v2 = vadd.f32 %v4364_v29, %v4238_v7  ;;  %v3800_v52 = vpop.f32.mrf.mxu1  ;;  %v7931_v7 = vld [vmem:[#allocation38_spill] sm:$0xff]  ;;  %v3139_v49 = vadd.f32 %v7672_v62, %v7937_v44 }
 0x20e   : > { %4335 = vst [vmem:[%s7692_s12 + $0xa0] sm:$0xff] %v4239_v25  ;;  %v4405_v36 = vmul.f32 %v4239_v25, %v4239_v25  ;;  %v4242_v53 = vadd.f32 %v5873_v15, %v3872_v61  ;;  %v3871_v54 = vadd.f32 %v3800_v52, %v3501_v9  ;;  %v4170_v1 = vpop.f32.mrf.mxu0  ;;  %v3137_v59 = vadd.f32 %v7931_v7, %v7930_v57 }
 0x20f   : > { %v4366_v38 = vadd.f32 %v4365_v2, %v4239_v25  ;;  %v4435_v23 = vadd.f32 %v4434_v42, %v4404_v39  ;;  %v5796_v3 = vpop.f32.mrf.mxu1  ;;  %v7939_v42 = vld [vmem:[#allocation17_spill] sm:$0xff] }
 0x210   : > { %4338 = vst [vmem:[%s7692_s12 + $0xb8] sm:$0xff] %v4242_v53  ;;  %v4241_v31 = vadd.f32 %v4170_v1, %v3871_v54  ;;  %v3874_v21 = vadd.f32 %v5796_v3, %v3504_v26  ;;  %v5876_v18 = vpop.f32.mrf.mxu0  ;;  %v3508_v35 = vadd.f32 %v7936_v37, %v3137_v59  ;;  %v7938_v26 = vld [vmem:[#allocation41_spill] sm:$0xff]  ;;  %v3138_v2 = vadd.f32 %v7677_v14, %v7939_v42 }
 0x211   : > { %v4436_v63 = vadd.f32 %v4435_v23, %v4405_v36  ;;  %v4367_v43 = vadd.f32 %v4366_v38, %v4240_v16  ;;  %v3810_v33 = vpop.f32.mrf.mxu1  ;;  %v4408_v16 = vmul.f32 %v4242_v53, %v4242_v53  ;;  %v3507_v39 = vadd.f32 %v7938_v26, %v3136_v32 }
 0x212   : > { %4337 = vst [vmem:[%s7692_s12 + $0xb0] sm:$0xff] %v4241_v31  ;;  %v4407_v55 = vmul.f32 %v4241_v31, %v4241_v31  ;;  %v4244_v19 = vadd.f32 %v5876_v18, %v3874_v21  ;;  %v3873_v45 = vadd.f32 %v3810_v33, %v3503_v12  ;;  %v4180_v48 = vpop.f32.mrf.mxu0  ;;  %v3509_v28 = vadd.f32 %v7941_v0, %v3138_v2 }
 0x213   : > { %v4368_v8 = vadd.f32 %v4367_v43, %v4241_v31  ;;  %v4437_v6 = vadd.f32 %v4436_v63, %v4406_v24  ;;  %v5799_v41 = vpop.f32.mrf.mxu1 }
 0x214   : > { %4340 = vst [vmem:[%s7692_s12 + $0xc8] sm:$0xff] %v4244_v19  ;;  %v4243_v27 = vadd.f32 %v4180_v48, %v3873_v45  ;;  %v3876_v51 = vadd.f32 %v5799_v41, %v3506_v58  ;;  %v5879_v4 = vpop.f32.mrf.mxu0  ;;  %v4410_v47 = vmul.f32 %v4244_v19, %v4244_v19 }
 0x215   : > { %v4438_v13 = vadd.f32 %v4437_v6, %v4407_v55  ;;  %v4369_v29 = vadd.f32 %v4368_v8, %v4242_v53  ;;  %v3820_v17 = vpop.f32.mrf.mxu1  ;;  %v7940_v53 = vld [vmem:[#allocation42_spill] sm:$0xff] }
 0x216   : > { %4339 = vst [vmem:[%s7692_s12 + $0xc0] sm:$0xff] %v4243_v27  ;;  %v4409_v9 = vmul.f32 %v4243_v27, %v4243_v27  ;;  %v4246_v20 = vadd.f32 %v5879_v4, %v3876_v51  ;;  %v3875_v40 = vadd.f32 %v3820_v17, %v3505_v34  ;;  %v4190_v61 = vpop.f32.mrf.mxu0  ;;  %v3510_v54 = vadd.f32 %v7940_v53, %v3139_v49 }
 0x217   : > { %v4370_v46 = vadd.f32 %v4369_v29, %v4243_v27  ;;  %v4439_v25 = vadd.f32 %v4438_v13, %v4408_v16  ;;  %v5802_v10 = vpop.f32.mrf.mxu1 }
 0x218   : > { %4342 = vst [vmem:[%s7692_s12 + $0xd8] sm:$0xff] %v4246_v20  ;;  %v4245_v15 = vadd.f32 %v4190_v61, %v3875_v40  ;;  %v3878_v52 = vadd.f32 %v5802_v10, %v3508_v35  ;;  %v5882_v50 = vpop.f32.mrf.mxu0  ;;  %v4412_v57 = vmul.f32 %v4246_v20, %v4246_v20 }
 0x219   : > { %v4440_v62 = vadd.f32 %v4439_v25, %v4409_v9  ;;  %v4371_v5 = vadd.f32 %v4370_v46, %v4244_v19  ;;  %v3830_v36 = vpop.f32.mrf.mxu1 }
 0x21a   : > { %4341 = vst [vmem:[%s7692_s12 + $0xd0] sm:$0xff] %v4245_v15  ;;  %v4411_v38 = vmul.f32 %v4245_v15, %v4245_v15  ;;  %v4248_v23 = vadd.f32 %v5882_v50, %v3878_v52  ;;  %v3877_v1 = vadd.f32 %v3830_v36, %v3507_v39  ;;  %v4200_v12 = vpop.f32.mrf.mxu0 }
 0x21b   : > { %v4372_v3 = vadd.f32 %v4371_v5, %v4245_v15  ;;  %v4441_v11 = vadd.f32 %v4440_v62, %v4410_v47  ;;  %v5805_v14 = vpop.f32.mrf.mxu1 }
 0x21c   : > { %4344 = vst [vmem:[%s7692_s12 + $0xe8] sm:$0xff] %v4248_v23  ;;  %v4247_v31 = vadd.f32 %v4200_v12, %v3877_v1  ;;  %v3880_v21 = vadd.f32 %v5805_v14, %v3510_v54  ;;  %v5885_v24 = vpop.f32.mrf.mxu0  ;;  %v4414_v45 = vmul.f32 %v4248_v23, %v4248_v23 }
 0x21d   : > { %v4442_v7 = vadd.f32 %v4441_v11, %v4411_v38  ;;  %v4373_v59 = vadd.f32 %v4372_v3, %v4246_v20  ;;  %v3840_v63 = vpop.f32.mrf.mxu1 }
 0x21e   : > { %4343 = vst [vmem:[%s7692_s12 + $0xe0] sm:$0xff] %v4247_v31  ;;  %v4413_v43 = vmul.f32 %v4247_v31, %v4247_v31  ;;  %v4250_v18 = vadd.f32 %v5885_v24, %v3880_v21  ;;  %v3879_v33 = vadd.f32 %v3840_v63, %v3509_v28  ;;  %v4210_v55 = vpop.f32.mrf.mxu0 }
 0x21f   : > { %v4374_v56 = vadd.f32 %v4373_v59, %v4247_v31  ;;  %v4443_v58 = vadd.f32 %v4442_v7, %v4412_v57 }
 0x220   : > { %4346 = vst [vmem:[%s7692_s12 + $0xf8] sm:$0xff] %v4250_v18  ;;  %v4249_v19 = vadd.f32 %v4210_v55, %v3879_v33  ;;  %v4416_v34 = vmul.f32 %v4250_v18, %v4250_v18 }
 0x221   : > { %v4444_v8 = vadd.f32 %v4443_v58, %v4413_v43  ;;  %v4375_v6 = vadd.f32 %v4374_v56, %v4248_v23 }
 0x222   : > { %4345 = vst [vmem:[%s7692_s12 + $0xf0] sm:$0xff] %v4249_v19  ;;  %v4415_v48 = vmul.f32 %v4249_v19, %v4249_v19 }
 0x223   : > { %v4376_v41 = vadd.f32 %v4375_v6, %v4249_v19  ;;  %v4445_v60 = vadd.f32 %v4444_v8, %v4414_v45 }
 0x225   : > { %v4377_v30 = vadd.f32 %v4376_v41, %v4250_v18  ;;  %v4446_v22 = vadd.f32 %v4445_v60, %v4415_v48 }
 0x227   : > { %v4378_v32 = vrot.slane %v4377_v30, 4  ;;  %v4447_v27 = vadd.f32 %v4446_v22, %v4416_v34 }
 0x229   : > { %v4379_v51 = vadd.f32 %v4378_v32, %v4377_v30  ;;  %v4448_v37 = vrot.slane %v4447_v27, 4 }
 0x22b   : > { %v4380_v35 = vrot.slane %v4379_v51, 2  ;;  %v4449_v16 = vadd.f32 %v4448_v37, %v4447_v27 }
 0x22d   : > { %v4381_v13 = vadd.f32 %v4380_v35, %v4379_v51  ;;  %v4450_v29 = vrot.slane %v4449_v16, 2 }
 0x22f   : > { %v4382_v4 = vrot.slane %v4381_v13, 1  ;;  %v4451_v17 = vadd.f32 %v4450_v29, %v4449_v16 }
 0x231   : > { %v4383_v44 = vadd.f32 %v4382_v4, %v4381_v13  ;;  %v4452_v49 = vrot.slane %v4451_v17, 1 }
 0x233   : > { %4384 = vst [vmem:[%s282_s9] sm:$0x1] %v4383_v44  ;;  %v4453_v9 = vadd.f32 %v4452_v49, %v4451_v17 }
 0x235   : > { %4454 = vst [vmem:[%s282_s9 + $0x1] sm:$0x1] %v4453_v9 }
 0x236 PF: > { %s16_s20 = sadd.s32 1, %s5991_s20   ;;  %s7942_s18 = smov %s5987_s19 }
 0x237   : > { %p13_p5 = scmp.ge.s32.totalorder %s16_s20, 4   ;;  %s7943_s19 = smov %s7945_s21 }
 0x239   :  { %15 = sbr.rel (!%p13_p5) target bundleno = 2 (0x2), region = 88 }

</bundles_post_ra>
